<compile_context>
chip_gen: v6e
topology: v6e:2x2x1
jax: 0.10.0
libtpu: 0.0.40
codegen_flags: <defaults>
</compile_context>

<pallas_src>
import jax
import jax.numpy as jnp
from jax.experimental import pallas as pl
from jax.experimental.pallas import tpu as pltpu

LEAKY_SLOPE = 0.001  # InPlaceABN activation_param used by BasicBlock.conv1


def _round_up(x, m):
    return (x + m - 1) // m * m


def basic_block_kernel(xpad_ref, xres_ref, w1_ref, s1_ref, o1_ref,
                       w2_ref, s2_ref, o2_ref,
                       wse1_ref, bse1_ref, wse2_ref, bse2_ref,
                       out_ref, col_scr, pad_scr):
    _, H, W, C = out_ref.shape          # C is the lane-padded channel count
    HW = H * W

    # ---- conv1: build bf16 im2col (HW, 9*C) from the halo-padded bf16 input,
    #      then one MXU matmul with f32 accumulation.
    for t in range(9):
        dy, dx = divmod(t, 3)
        col_scr[:, t * C:(t + 1) * C] = (
            xpad_ref[0, dy:dy + H, dx:dx + W, :].reshape(HW, C))
    act1 = jnp.dot(col_scr[...], w1_ref[...], preferred_element_type=jnp.float32)
    act1 = act1 * s1_ref[...] + o1_ref[...]
    act1 = jnp.where(act1 >= 0.0, act1, LEAKY_SLOPE * act1)

    # ---- re-pad act1 (bf16) for conv2's 1-pixel halo.
    # Zero only the halo strips (interior is fully overwritten every step);
    # per-step (not pl.when(pid==0)) so per-core scratch stays valid when the
    # batch axis is split across TensorCores.
    zero_row = jnp.zeros((1, W + 2, C), jnp.bfloat16)
    zero_col = jnp.zeros((H, 1, C), jnp.bfloat16)
    pad_scr[0:1, :, :] = zero_row
    pad_scr[H + 1:H + 2, :, :] = zero_row
    pad_scr[1:H + 1, 0:1, :] = zero_col
    pad_scr[1:H + 1, W + 1:W + 2, :] = zero_col
    pad_scr[1:H + 1, 1:W + 1, :] = act1.astype(jnp.bfloat16).reshape(H, W, C)

    # ---- conv2: same im2col + single matmul, BN (identity activation)
    for t in range(9):
        dy, dx = divmod(t, 3)
        col_scr[:, t * C:(t + 1) * C] = (
            pad_scr[dy:dy + H, dx:dx + W, :].reshape(HW, C))
    act2 = jnp.dot(col_scr[...], w2_ref[...], preferred_element_type=jnp.float32)
    act2 = act2 * s2_ref[...] + o2_ref[...]                      # (HW, C) f32

    # ---- SE: GAP -> fc1 -> ReLU -> fc2 -> sigmoid -> channel scale
    # (tiny f32 matmuls; kept f32 for accuracy — off the critical path)
    pooled = jnp.mean(act2, axis=0, keepdims=True)               # (1, C)
    se = jnp.dot(pooled, wse1_ref[...], preferred_element_type=jnp.float32) + bse1_ref[...]
    se = jnp.maximum(se, 0.0)
    se = jnp.dot(se, wse2_ref[...], preferred_element_type=jnp.float32) + bse2_ref[...]
    se = jax.nn.sigmoid(se)                                      # (1, C)
    # Padded lanes: act2==0 there, so sigmoid(0)=0.5 scale keeps them exactly 0.

    # ---- identity residual (contiguous f32 block) + final ReLU
    res = xres_ref[0].reshape(HW, C)
    out = jnp.maximum(act2 * se + res, 0.0)
    out_ref[...] = out.reshape(1, H, W, C).astype(out_ref.dtype)


def basic_block(x, conv1_w, bn1, conv2_w, bn2,
                se_fc1_w, se_fc1_b, se_fc2_w, se_fc2_b, *, eps=1e-5):
    """TResNet BasicBlock forward (stride=1, downsample=None, use_se=True), NHWC.

    x: (N,H,W,C); conv*_w: (3,3,C,C) HWIO; bn* = (gamma,beta,mean,var) each (C,);
    se_fc1_w: (C,Cr), se_fc1_b: (Cr,); se_fc2_w: (Cr,C), se_fc2_b: (C,).
    """
    N, H, W, C = x.shape
    Cr = se_fc1_w.shape[1]
    Cp = _round_up(C, 128)          # lane-dense channel padding
    Crp = _round_up(Cr, 128)
    # TODO(synk): for C<128 on v6e/v7x, a true K=9*C im2col (pad K only to the
    # next 128 multiple) would cut the 2x K and 2x N padding waste, at the cost
    # of lane-misaligned column blocks; not done here.

    g1, be1, m1, v1 = bn1
    g2, be2, m2, v2 = bn2
    s1 = g1 * jax.lax.rsqrt(v1 + eps)
    o1 = be1 - m1 * s1
    s2 = g2 * jax.lax.rsqrt(v2 + eps)
    o2 = be2 - m2 * s2

    f32, bf16 = jnp.float32, jnp.bfloat16

    def pad_to(a, targets):
        return jnp.pad(a, [(0, t - s) for s, t in zip(a.shape, targets)])

    # Conv weights: pad channels, flatten taps into the contraction dim (tap-major,
    # matching the im2col column order), cast to bf16 (f32 accumulation in-kernel).
    w1 = pad_to(conv1_w.astype(f32), (3, 3, Cp, Cp)).reshape(9 * Cp, Cp).astype(bf16)
    w2 = pad_to(conv2_w.astype(f32), (3, 3, Cp, Cp)).reshape(9 * Cp, Cp).astype(bf16)
    s1p = pad_to(s1.astype(f32), (Cp,)).reshape(1, Cp)
    o1p = pad_to(o1.astype(f32), (Cp,)).reshape(1, Cp)
    s2p = pad_to(s2.astype(f32), (Cp,)).reshape(1, Cp)
    o2p = pad_to(o2.astype(f32), (Cp,)).reshape(1, Cp)
    wse1 = pad_to(se_fc1_w.astype(f32), (Cp, Crp))
    bse1 = pad_to(se_fc1_b.astype(f32), (Crp,)).reshape(1, Crp)
    wse2 = pad_to(se_fc2_w.astype(f32), (Crp, Cp))
    bse2 = pad_to(se_fc2_b.astype(f32), (Cp,)).reshape(1, Cp)

    # Conv path: channel pad + 1-pixel spatial halo, bf16 (MXU input).
    # Residual path: channel-padded original, f32, contiguous block (no strided read).
    xch = pad_to(x.astype(f32), (N, H, W, Cp))
    xpad = jnp.pad(xch.astype(bf16), ((0, 0), (1, 1), (1, 1), (0, 0)))

    flops = int(N * (2 * H * W * (9 * Cp) * Cp * 2 + 2 * Cp * Crp * 2))
    bytes_accessed = int(
        xpad.size * 2 + xch.size * 4 + N * H * W * Cp * 4      # acts in / residual / out
        + (w1.size + w2.size) * 2                               # bf16 conv weights
        + (wse1.size + wse2.size) * 4                           # f32 SE weights
        + (4 * Cp + 2 * Crp) * 4)                               # BN + SE biases
    transcendentals = int(N * Cp)                               # sigmoid

    out = pl.pallas_call(
        basic_block_kernel,
        out_shape=jax.ShapeDtypeStruct((N, H, W, Cp), x.dtype),
        grid=(N,),
        in_specs=[
            pl.BlockSpec((1, H + 2, W + 2, Cp), lambda n: (n, 0, 0, 0)),  # x halo (bf16)
            pl.BlockSpec((1, H, W, Cp), lambda n: (n, 0, 0, 0)),          # x residual (f32)
            pl.BlockSpec((9 * Cp, Cp), lambda n: (0, 0)),                 # conv1 weights
            pl.BlockSpec((1, Cp), lambda n: (0, 0)),                      # bn1 scale
            pl.BlockSpec((1, Cp), lambda n: (0, 0)),                      # bn1 offset
            pl.BlockSpec((9 * Cp, Cp), lambda n: (0, 0)),                 # conv2 weights
            pl.BlockSpec((1, Cp), lambda n: (0, 0)),                      # bn2 scale
            pl.BlockSpec((1, Cp), lambda n: (0, 0)),                      # bn2 offset
            pl.BlockSpec((Cp, Crp), lambda n: (0, 0)),                    # SE fc1 w
            pl.BlockSpec((1, Crp), lambda n: (0, 0)),                     # SE fc1 b
            pl.BlockSpec((Crp, Cp), lambda n: (0, 0)),                    # SE fc2 w
            pl.BlockSpec((1, Cp), lambda n: (0, 0)),                      # SE fc2 b
        ],
        out_specs=pl.BlockSpec((1, H, W, Cp), lambda n: (n, 0, 0, 0)),
        scratch_shapes=[
            pltpu.VMEM((H * W, 9 * Cp), jnp.bfloat16),          # im2col buffer (reused)
            pltpu.VMEM((H + 2, W + 2, Cp), jnp.bfloat16),       # conv2 halo scratch
        ],
        compiler_params=pltpu.CompilerParams(
            dimension_semantics=("parallel",),   # shard batch over TCs where available
            vmem_limit_bytes=32 * 1024 * 1024,   # fits v5e/v6e/v7x at these shapes
        ),
        cost_estimate=pl.CostEstimate(
            flops=flops,
            transcendentals=transcendentals,
            bytes_accessed=bytes_accessed,
        ),
    )(xpad, xch, w1, s1p, o1p, w2, s2p, o2p, wse1, bse1, wse2, bse2)

    # TODO(synk): production path could keep the padded/bf16 layout and fuse this
    # slice into the consumer to avoid the extra post-kernel copy.
    return out[..., :C]


if __name__ == "__main__":
    # Smallest real TResNet BasicBlock config: planes = 64, SE reduce = max(64//4, 64) = 64.
    N, H, W, C = 2, 16, 16, 64
    Cr = max(C // 4, 64)

    key = jax.random.PRNGKey(0)
    ks = jax.random.split(key, 9)
    x = jax.random.normal(ks[0], (N, H, W, C), dtype=jnp.float32)

    fan = 9 * C
    conv1_w = jax.random.normal(ks[1], (3, 3, C, C), jnp.float32) / jnp.sqrt(fan)
    conv2_w = jax.random.normal(ks[2], (3, 3, C, C), jnp.float32) / jnp.sqrt(fan)

    def rand_bn(k):
        kg, kb, km, kv = jax.random.split(k, 4)
        gamma = 1.0 + 0.1 * jax.random.normal(kg, (C,), jnp.float32)
        beta = 0.1 * jax.random.normal(kb, (C,), jnp.float32)
        mean = 0.1 * jax.random.normal(km, (C,), jnp.float32)
        var = jax.random.uniform(kv, (C,), jnp.float32, 0.5, 1.5)
        return gamma, beta, mean, var

    bn1 = rand_bn(ks[3])
    bn2 = rand_bn(ks[4])

    se_fc1_w = jax.random.normal(ks[5], (C, Cr), jnp.float32) / jnp.sqrt(C)
    se_fc1_b = 0.1 * jax.random.normal(ks[6], (Cr,), jnp.float32)
    se_fc2_w = jax.random.normal(ks[7], (Cr, C), jnp.float32) / jnp.sqrt(Cr)
    se_fc2_b = 0.1 * jax.random.normal(ks[8], (C,), jnp.float32)

    out = basic_block(x, conv1_w, bn1, conv2_w, bn2,
                      se_fc1_w, se_fc1_b, se_fc2_w, se_fc2_b)
    out = jax.block_until_ready(out)

    # ---- pure-JAX fp32 reference ----
    eps = 1e-5
    dn = ('NHWC', 'HWIO', 'NHWC')

    def bn_apply(y, p):
        g, b, m, v = p
        return (y - m) * jax.lax.rsqrt(v + eps) * g + b

    y = jax.lax.conv_general_dilated(x, conv1_w, (1, 1), 'SAME',
                                     dimension_numbers=dn,
                                     precision=jax.lax.Precision.HIGHEST)
    y = bn_apply(y, bn1)
    y = jnp.where(y >= 0, y, LEAKY_SLOPE * y)
    y = jax.lax.conv_general_dilated(y, conv2_w, (1, 1), 'SAME',
                                     dimension_numbers=dn,
                                     precision=jax.lax.Precision.HIGHEST)
    y = bn_apply(y, bn2)
    pooled = y.mean(axis=(1, 2))
    se = jax.nn.relu(pooled @ se_fc1_w + se_fc1_b)
    se = jax.nn.sigmoid(se @ se_fc2_w + se_fc2_b)
    y = y * se[:, None, None, :]
    ref = jax.nn.relu(y + x)

    assert out.shape == (N, H, W, C)
    err = float(jnp.max(jnp.abs(out - ref)))
    # Tolerance loosened vs the pure-f32 version because conv matmul inputs are
    # bf16 (f32 accumulation), per the performance review.
    assert jnp.allclose(out, ref, atol=5e-2, rtol=5e-2), err

    # TODO(synk): stride=2 / anti-alias downsample path and non-identity
    # downsample branch of BasicBlock are not implemented (stride=1 case only).
    print("KERNEL_OK")
</pallas_src>

<mosaic_0001>
module attributes {stable_mosaic.version = 11 : i64} {
  func.func @basic_block_kernel(%arg0: i32, %arg1: memref<1x18x18x128xbf16, #tpu.memory_space<vmem>>, %arg2: memref<1x16x16x128xf32, #tpu.memory_space<vmem>>, %arg3: memref<1152x128xbf16, #tpu.memory_space<vmem>>, %arg4: memref<1x128xf32, #tpu.memory_space<vmem>>, %arg5: memref<1x128xf32, #tpu.memory_space<vmem>>, %arg6: memref<1152x128xbf16, #tpu.memory_space<vmem>>, %arg7: memref<1x128xf32, #tpu.memory_space<vmem>>, %arg8: memref<1x128xf32, #tpu.memory_space<vmem>>, %arg9: memref<128x128xf32, #tpu.memory_space<vmem>>, %arg10: memref<1x128xf32, #tpu.memory_space<vmem>>, %arg11: memref<128x128xf32, #tpu.memory_space<vmem>>, %arg12: memref<1x128xf32, #tpu.memory_space<vmem>>, %arg13: memref<1x16x16x128xf32, #tpu.memory_space<vmem>>, %arg14: memref<256x1152xbf16, #tpu.memory_space<vmem>>, %arg15: memref<18x18x128xbf16, #tpu.memory_space<vmem>>) attributes {dimension_semantics = [#tpu.dimension_semantics<parallel>], iteration_bounds = array<i64: 2>, scalar_prefetch = 0 : i64, scratch_operands = 2 : i64, tpu.core_type = #tpu.core_type<tc>, window_params = [{transform_indices = @transform_0, window_bounds = array<i64: 1, 18, 18, 128>}, {transform_indices = @transform_1, window_bounds = array<i64: 1, 16, 16, 128>}, {pipeline_mode = #tpu.pipeline_mode<synchronous>, transform_indices = @transform_2, window_bounds = array<i64: 1152, 128>}, {pipeline_mode = #tpu.pipeline_mode<synchronous>, transform_indices = @transform_3, window_bounds = array<i64: 1, 128>}, {pipeline_mode = #tpu.pipeline_mode<synchronous>, transform_indices = @transform_4, window_bounds = array<i64: 1, 128>}, {pipeline_mode = #tpu.pipeline_mode<synchronous>, transform_indices = @transform_5, window_bounds = array<i64: 1152, 128>}, {pipeline_mode = #tpu.pipeline_mode<synchronous>, transform_indices = @transform_6, window_bounds = array<i64: 1, 128>}, {pipeline_mode = #tpu.pipeline_mode<synchronous>, transform_indices = @transform_7, window_bounds = array<i64: 1, 128>}, {pipeline_mode = #tpu.pipeline_mode<synchronous>, transform_indices = @transform_8, window_bounds = array<i64: 128, 128>}, {pipeline_mode = #tpu.pipeline_mode<synchronous>, transform_indices = @transform_9, window_bounds = array<i64: 1, 128>}, {pipeline_mode = #tpu.pipeline_mode<synchronous>, transform_indices = @transform_10, window_bounds = array<i64: 128, 128>}, {pipeline_mode = #tpu.pipeline_mode<synchronous>, transform_indices = @transform_11, window_bounds = array<i64: 1, 128>}, {transform_indices = @transform_12, window_bounds = array<i64: 1, 16, 16, 128>}]} {
    %c0 = arith.constant 0 : index
    %c0_0 = arith.constant 0 : index
    %c0_1 = arith.constant 0 : index
    %c0_2 = arith.constant 0 : index
    %0 = vector.load %arg1[%c0, %c0_0, %c0_1, %c0_2] : memref<1x18x18x128xbf16, #tpu.memory_space<vmem>>, vector<1x16x16x128xbf16>
    %1 = vector.shape_cast %0 : vector<1x16x16x128xbf16> to vector<16x16x128xbf16>
    %2 = vector.shape_cast %1 : vector<16x16x128xbf16> to vector<256x128xbf16>
    %c0_3 = arith.constant 0 : index
    %c0_4 = arith.constant 0 : index
    %3 = vector.load %arg14[%c0_3, %c0_4] : memref<256x1152xbf16, #tpu.memory_space<vmem>>, vector<256x128xbf16>
    tpu.vector_store %arg14[%c0_3, %c0_4], %2 {strides = array<i32>} : memref<256x1152xbf16, #tpu.memory_space<vmem>>, vector<256x128xbf16>,
    %c0_5 = arith.constant 0 : index
    %c0_6 = arith.constant 0 : index
    %c1 = arith.constant 1 : index
    %c0_7 = arith.constant 0 : index
    %4 = vector.load %arg1[%c0_5, %c0_6, %c1, %c0_7] : memref<1x18x18x128xbf16, #tpu.memory_space<vmem>>, vector<1x16x16x128xbf16>
    %5 = vector.shape_cast %4 : vector<1x16x16x128xbf16> to vector<16x16x128xbf16>
    %6 = vector.shape_cast %5 : vector<16x16x128xbf16> to vector<256x128xbf16>
    %c0_8 = arith.constant 0 : index
    %c128 = arith.constant 128 : index
    %7 = vector.load %arg14[%c0_8, %c128] : memref<256x1152xbf16, #tpu.memory_space<vmem>>, vector<256x128xbf16>
    tpu.vector_store %arg14[%c0_8, %c128], %6 {strides = array<i32>} : memref<256x1152xbf16, #tpu.memory_space<vmem>>, vector<256x128xbf16>,
    %c0_9 = arith.constant 0 : index
    %c0_10 = arith.constant 0 : index
    %c2 = arith.constant 2 : index
    %c0_11 = arith.constant 0 : index
    %8 = vector.load %arg1[%c0_9, %c0_10, %c2, %c0_11] : memref<1x18x18x128xbf16, #tpu.memory_space<vmem>>, vector<1x16x16x128xbf16>
    %9 = vector.shape_cast %8 : vector<1x16x16x128xbf16> to vector<16x16x128xbf16>
    %10 = vector.shape_cast %9 : vector<16x16x128xbf16> to vector<256x128xbf16>
    %c0_12 = arith.constant 0 : index
    %c256 = arith.constant 256 : index
    %11 = vector.load %arg14[%c0_12, %c256] : memref<256x1152xbf16, #tpu.memory_space<vmem>>, vector<256x128xbf16>
    tpu.vector_store %arg14[%c0_12, %c256], %10 {strides = array<i32>} : memref<256x1152xbf16, #tpu.memory_space<vmem>>, vector<256x128xbf16>,
    %c0_13 = arith.constant 0 : index
    %c1_14 = arith.constant 1 : index
    %c0_15 = arith.constant 0 : index
    %c0_16 = arith.constant 0 : index
    %12 = vector.load %arg1[%c0_13, %c1_14, %c0_15, %c0_16] : memref<1x18x18x128xbf16, #tpu.memory_space<vmem>>, vector<1x16x16x128xbf16>
    %13 = vector.shape_cast %12 : vector<1x16x16x128xbf16> to vector<16x16x128xbf16>
    %14 = vector.shape_cast %13 : vector<16x16x128xbf16> to vector<256x128xbf16>
    %c0_17 = arith.constant 0 : index
    %c384 = arith.constant 384 : index
    %15 = vector.load %arg14[%c0_17, %c384] : memref<256x1152xbf16, #tpu.memory_space<vmem>>, vector<256x128xbf16>
    tpu.vector_store %arg14[%c0_17, %c384], %14 {strides = array<i32>} : memref<256x1152xbf16, #tpu.memory_space<vmem>>, vector<256x128xbf16>,
    %c0_18 = arith.constant 0 : index
    %c1_19 = arith.constant 1 : index
    %c1_20 = arith.constant 1 : index
    %c0_21 = arith.constant 0 : index
    %16 = vector.load %arg1[%c0_18, %c1_19, %c1_20, %c0_21] : memref<1x18x18x128xbf16, #tpu.memory_space<vmem>>, vector<1x16x16x128xbf16>
    %17 = vector.shape_cast %16 : vector<1x16x16x128xbf16> to vector<16x16x128xbf16>
    %18 = vector.shape_cast %17 : vector<16x16x128xbf16> to vector<256x128xbf16>
    %c0_22 = arith.constant 0 : index
    %c512 = arith.constant 512 : index
    %19 = vector.load %arg14[%c0_22, %c512] : memref<256x1152xbf16, #tpu.memory_space<vmem>>, vector<256x128xbf16>
    tpu.vector_store %arg14[%c0_22, %c512], %18 {strides = array<i32>} : memref<256x1152xbf16, #tpu.memory_space<vmem>>, vector<256x128xbf16>,
    %c0_23 = arith.constant 0 : index
    %c1_24 = arith.constant 1 : index
    %c2_25 = arith.constant 2 : index
    %c0_26 = arith.constant 0 : index
    %20 = vector.load %arg1[%c0_23, %c1_24, %c2_25, %c0_26] : memref<1x18x18x128xbf16, #tpu.memory_space<vmem>>, vector<1x16x16x128xbf16>
    %21 = vector.shape_cast %20 : vector<1x16x16x128xbf16> to vector<16x16x128xbf16>
    %22 = vector.shape_cast %21 : vector<16x16x128xbf16> to vector<256x128xbf16>
    %c0_27 = arith.constant 0 : index
    %c640 = arith.constant 640 : index
    %23 = vector.load %arg14[%c0_27, %c640] : memref<256x1152xbf16, #tpu.memory_space<vmem>>, vector<256x128xbf16>
    tpu.vector_store %arg14[%c0_27, %c640], %22 {strides = array<i32>} : memref<256x1152xbf16, #tpu.memory_space<vmem>>, vector<256x128xbf16>,
    %c0_28 = arith.constant 0 : index
    %c2_29 = arith.constant 2 : index
    %c0_30 = arith.constant 0 : index
    %c0_31 = arith.constant 0 : index
    %24 = vector.load %arg1[%c0_28, %c2_29, %c0_30, %c0_31] : memref<1x18x18x128xbf16, #tpu.memory_space<vmem>>, vector<1x16x16x128xbf16>
    %25 = vector.shape_cast %24 : vector<1x16x16x128xbf16> to vector<16x16x128xbf16>
    %26 = vector.shape_cast %25 : vector<16x16x128xbf16> to vector<256x128xbf16>
    %c0_32 = arith.constant 0 : index
    %c768 = arith.constant 768 : index
    %27 = vector.load %arg14[%c0_32, %c768] : memref<256x1152xbf16, #tpu.memory_space<vmem>>, vector<256x128xbf16>
    tpu.vector_store %arg14[%c0_32, %c768], %26 {strides = array<i32>} : memref<256x1152xbf16, #tpu.memory_space<vmem>>, vector<256x128xbf16>,
    %c0_33 = arith.constant 0 : index
    %c2_34 = arith.constant 2 : index
    %c1_35 = arith.constant 1 : index
    %c0_36 = arith.constant 0 : index
    %28 = vector.load %arg1[%c0_33, %c2_34, %c1_35, %c0_36] : memref<1x18x18x128xbf16, #tpu.memory_space<vmem>>, vector<1x16x16x128xbf16>
    %29 = vector.shape_cast %28 : vector<1x16x16x128xbf16> to vector<16x16x128xbf16>
    %30 = vector.shape_cast %29 : vector<16x16x128xbf16> to vector<256x128xbf16>
    %c0_37 = arith.constant 0 : index
    %c896 = arith.constant 896 : index
    %31 = vector.load %arg14[%c0_37, %c896] : memref<256x1152xbf16, #tpu.memory_space<vmem>>, vector<256x128xbf16>
    tpu.vector_store %arg14[%c0_37, %c896], %30 {strides = array<i32>} : memref<256x1152xbf16, #tpu.memory_space<vmem>>, vector<256x128xbf16>,
    %c0_38 = arith.constant 0 : index
    %c2_39 = arith.constant 2 : index
    %c2_40 = arith.constant 2 : index
    %c0_41 = arith.constant 0 : index
    %32 = vector.load %arg1[%c0_38, %c2_39, %c2_40, %c0_41] : memref<1x18x18x128xbf16, #tpu.memory_space<vmem>>, vector<1x16x16x128xbf16>
    %33 = vector.shape_cast %32 : vector<1x16x16x128xbf16> to vector<16x16x128xbf16>
    %34 = vector.shape_cast %33 : vector<16x16x128xbf16> to vector<256x128xbf16>
    %c0_42 = arith.constant 0 : index
    %c1024 = arith.constant 1024 : index
    %35 = vector.load %arg14[%c0_42, %c1024] : memref<256x1152xbf16, #tpu.memory_space<vmem>>, vector<256x128xbf16>
    tpu.vector_store %arg14[%c0_42, %c1024], %34 {strides = array<i32>} : memref<256x1152xbf16, #tpu.memory_space<vmem>>, vector<256x128xbf16>,
    %c0_43 = arith.constant 0 : index
    %c0_44 = arith.constant 0 : index
    %36 = vector.load %arg14[%c0_43, %c0_44] : memref<256x1152xbf16, #tpu.memory_space<vmem>>, vector<256x1152xbf16>
    %c0_45 = arith.constant 0 : index
    %c0_46 = arith.constant 0 : index
    %37 = vector.load %arg3[%c0_45, %c0_46] : memref<1152x128xbf16, #tpu.memory_space<vmem>>, vector<1152x128xbf16>
    %cst = arith.constant dense<0.000000e+00> : vector<256x128xf32>
    %38 = tpu.matmul %36, %37, %cst {dimension_numbers = #tpu.dot_dimension_numbers<[1], [0], [0], [1], [0, 0, 1, 1], [], []>} : vector<256x1152xbf16>, vector<1152x128xbf16>, vector<256x128xf32> -> vector<256x128xf32>
    %c0_47 = arith.constant 0 : index
    %c0_48 = arith.constant 0 : index
    %39 = vector.load %arg4[%c0_47, %c0_48] : memref<1x128xf32, #tpu.memory_space<vmem>>, vector<1x128xf32>
    %40 = vector.broadcast %39 : vector<1x128xf32> to vector<256x128xf32>
    %41 = arith.mulf %38, %40 : vector<256x128xf32>
    %c0_49 = arith.constant 0 : index
    %c0_50 = arith.constant 0 : index
    %42 = vector.load %arg5[%c0_49, %c0_50] : memref<1x128xf32, #tpu.memory_space<vmem>>, vector<1x128xf32>
    %43 = vector.broadcast %42 : vector<1x128xf32> to vector<256x128xf32>
    %44 = arith.addf %41, %43 : vector<256x128xf32>
    %cst_51 = arith.constant 0.000000e+00 : f32
    %45 = vector.broadcast %cst_51 : f32 to vector<256x128xf32>
    %46 = arith.cmpf oge, %44, %45 : vector<256x128xf32>
    %cst_52 = arith.constant 1.000000e-03 : f32
    %47 = vector.broadcast %cst_52 : f32 to vector<256x128xf32>
    %48 = arith.mulf %47, %44 : vector<256x128xf32>
    %49 = arith.select %46, %44, %48 : vector<256x128xi1>, vector<256x128xf32>
    %cst_53 = arith.constant 0.000000e+00 : bf16
    %50 = vector.broadcast %cst_53 : bf16 to vector<1x18x128xbf16>
    %cst_54 = arith.constant 0.000000e+00 : bf16
    %51 = vector.broadcast %cst_54 : bf16 to vector<16x1x128xbf16>
    %c0_55 = arith.constant 0 : index
    %c0_56 = arith.constant 0 : index
    %c0_57 = arith.constant 0 : index
    %52 = vector.load %arg15[%c0_55, %c0_56, %c0_57] : memref<18x18x128xbf16, #tpu.memory_space<vmem>>, vector<1x18x128xbf16>
    tpu.vector_store %arg15[%c0_55, %c0_56, %c0_57], %50 {strides = array<i32>} : memref<18x18x128xbf16, #tpu.memory_space<vmem>>, vector<1x18x128xbf16>,
    %c17 = arith.constant 17 : index
    %c0_58 = arith.constant 0 : index
    %c0_59 = arith.constant 0 : index
    %53 = vector.load %arg15[%c17, %c0_58, %c0_59] : memref<18x18x128xbf16, #tpu.memory_space<vmem>>, vector<1x18x128xbf16>
    tpu.vector_store %arg15[%c17, %c0_58, %c0_59], %50 {strides = array<i32>} : memref<18x18x128xbf16, #tpu.memory_space<vmem>>, vector<1x18x128xbf16>,
    %c1_60 = arith.constant 1 : index
    %c0_61 = arith.constant 0 : index
    %c0_62 = arith.constant 0 : index
    %54 = vector.load %arg15[%c1_60, %c0_61, %c0_62] : memref<18x18x128xbf16, #tpu.memory_space<vmem>>, vector<16x1x128xbf16>
    tpu.vector_store %arg15[%c1_60, %c0_61, %c0_62], %51 {strides = array<i32>} : memref<18x18x128xbf16, #tpu.memory_space<vmem>>, vector<16x1x128xbf16>,
    %c1_63 = arith.constant 1 : index
    %c17_64 = arith.constant 17 : index
    %c0_65 = arith.constant 0 : index
    %55 = vector.load %arg15[%c1_63, %c17_64, %c0_65] : memref<18x18x128xbf16, #tpu.memory_space<vmem>>, vector<16x1x128xbf16>
    tpu.vector_store %arg15[%c1_63, %c17_64, %c0_65], %51 {strides = array<i32>} : memref<18x18x128xbf16, #tpu.memory_space<vmem>>, vector<16x1x128xbf16>,
    %56 = arith.truncf %49 : vector<256x128xf32> to vector<256x128xbf16>
    %57 = vector.shape_cast %56 : vector<256x128xbf16> to vector<16x16x128xbf16>
    %c1_66 = arith.constant 1 : index
    %c1_67 = arith.constant 1 : index
    %c0_68 = arith.constant 0 : index
    %58 = vector.load %arg15[%c1_66, %c1_67, %c0_68] : memref<18x18x128xbf16, #tpu.memory_space<vmem>>, vector<16x16x128xbf16>
    tpu.vector_store %arg15[%c1_66, %c1_67, %c0_68], %57 {strides = array<i32>} : memref<18x18x128xbf16, #tpu.memory_space<vmem>>, vector<16x16x128xbf16>,
    %c0_69 = arith.constant 0 : index
    %c0_70 = arith.constant 0 : index
    %c0_71 = arith.constant 0 : index
    %59 = vector.load %arg15[%c0_69, %c0_70, %c0_71] : memref<18x18x128xbf16, #tpu.memory_space<vmem>>, vector<16x16x128xbf16>
    %60 = vector.shape_cast %59 : vector<16x16x128xbf16> to vector<256x128xbf16>
    %c0_72 = arith.constant 0 : index
    %c0_73 = arith.constant 0 : index
    %61 = vector.load %arg14[%c0_72, %c0_73] : memref<256x1152xbf16, #tpu.memory_space<vmem>>, vector<256x128xbf16>
    tpu.vector_store %arg14[%c0_72, %c0_73], %60 {strides = array<i32>} : memref<256x1152xbf16, #tpu.memory_space<vmem>>, vector<256x128xbf16>,
    %c0_74 = arith.constant 0 : index
    %c1_75 = arith.constant 1 : index
    %c0_76 = arith.constant 0 : index
    %62 = vector.load %arg15[%c0_74, %c1_75, %c0_76] : memref<18x18x128xbf16, #tpu.memory_space<vmem>>, vector<16x16x128xbf16>
    %63 = vector.shape_cast %62 : vector<16x16x128xbf16> to vector<256x128xbf16>
    %c0_77 = arith.constant 0 : index
    %c128_78 = arith.constant 128 : index
    %64 = vector.load %arg14[%c0_77, %c128_78] : memref<256x1152xbf16, #tpu.memory_space<vmem>>, vector<256x128xbf16>
    tpu.vector_store %arg14[%c0_77, %c128_78], %63 {strides = array<i32>} : memref<256x1152xbf16, #tpu.memory_space<vmem>>, vector<256x128xbf16>,
    %c0_79 = arith.constant 0 : index
    %c2_80 = arith.constant 2 : index
    %c0_81 = arith.constant 0 : index
    %65 = vector.load %arg15[%c0_79, %c2_80, %c0_81] : memref<18x18x128xbf16, #tpu.memory_space<vmem>>, vector<16x16x128xbf16>
    %66 = vector.shape_cast %65 : vector<16x16x128xbf16> to vector<256x128xbf16>
    %c0_82 = arith.constant 0 : index
    %c256_83 = arith.constant 256 : index
    %67 = vector.load %arg14[%c0_82, %c256_83] : memref<256x1152xbf16, #tpu.memory_space<vmem>>, vector<256x128xbf16>
    tpu.vector_store %arg14[%c0_82, %c256_83], %66 {strides = array<i32>} : memref<256x1152xbf16, #tpu.memory_space<vmem>>, vector<256x128xbf16>,
    %c1_84 = arith.constant 1 : index
    %c0_85 = arith.constant 0 : index
    %c0_86 = arith.constant 0 : index
    %68 = vector.load %arg15[%c1_84, %c0_85, %c0_86] : memref<18x18x128xbf16, #tpu.memory_space<vmem>>, vector<16x16x128xbf16>
    %69 = vector.shape_cast %68 : vector<16x16x128xbf16> to vector<256x128xbf16>
    %c0_87 = arith.constant 0 : index
    %c384_88 = arith.constant 384 : index
    %70 = vector.load %arg14[%c0_87, %c384_88] : memref<256x1152xbf16, #tpu.memory_space<vmem>>, vector<256x128xbf16>
    tpu.vector_store %arg14[%c0_87, %c384_88], %69 {strides = array<i32>} : memref<256x1152xbf16, #tpu.memory_space<vmem>>, vector<256x128xbf16>,
    %c1_89 = arith.constant 1 : index
    %c1_90 = arith.constant 1 : index
    %c0_91 = arith.constant 0 : index
    %71 = vector.load %arg15[%c1_89, %c1_90, %c0_91] : memref<18x18x128xbf16, #tpu.memory_space<vmem>>, vector<16x16x128xbf16>
    %72 = vector.shape_cast %71 : vector<16x16x128xbf16> to vector<256x128xbf16>
    %c0_92 = arith.constant 0 : index
    %c512_93 = arith.constant 512 : index
    %73 = vector.load %arg14[%c0_92, %c512_93] : memref<256x1152xbf16, #tpu.memory_space<vmem>>, vector<256x128xbf16>
    tpu.vector_store %arg14[%c0_92, %c512_93], %72 {strides = array<i32>} : memref<256x1152xbf16, #tpu.memory_space<vmem>>, vector<256x128xbf16>,
    %c1_94 = arith.constant 1 : index
    %c2_95 = arith.constant 2 : index
    %c0_96 = arith.constant 0 : index
    %74 = vector.load %arg15[%c1_94, %c2_95, %c0_96] : memref<18x18x128xbf16, #tpu.memory_space<vmem>>, vector<16x16x128xbf16>
    %75 = vector.shape_cast %74 : vector<16x16x128xbf16> to vector<256x128xbf16>
    %c0_97 = arith.constant 0 : index
    %c640_98 = arith.constant 640 : index
    %76 = vector.load %arg14[%c0_97, %c640_98] : memref<256x1152xbf16, #tpu.memory_space<vmem>>, vector<256x128xbf16>
    tpu.vector_store %arg14[%c0_97, %c640_98], %75 {strides = array<i32>} : memref<256x1152xbf16, #tpu.memory_space<vmem>>, vector<256x128xbf16>,
    %c2_99 = arith.constant 2 : index
    %c0_100 = arith.constant 0 : index
    %c0_101 = arith.constant 0 : index
    %77 = vector.load %arg15[%c2_99, %c0_100, %c0_101] : memref<18x18x128xbf16, #tpu.memory_space<vmem>>, vector<16x16x128xbf16>
    %78 = vector.shape_cast %77 : vector<16x16x128xbf16> to vector<256x128xbf16>
    %c0_102 = arith.constant 0 : index
    %c768_103 = arith.constant 768 : index
    %79 = vector.load %arg14[%c0_102, %c768_103] : memref<256x1152xbf16, #tpu.memory_space<vmem>>, vector<256x128xbf16>
    tpu.vector_store %arg14[%c0_102, %c768_103], %78 {strides = array<i32>} : memref<256x1152xbf16, #tpu.memory_space<vmem>>, vector<256x128xbf16>,
    %c2_104 = arith.constant 2 : index
    %c1_105 = arith.constant 1 : index
    %c0_106 = arith.constant 0 : index
    %80 = vector.load %arg15[%c2_104, %c1_105, %c0_106] : memref<18x18x128xbf16, #tpu.memory_space<vmem>>, vector<16x16x128xbf16>
    %81 = vector.shape_cast %80 : vector<16x16x128xbf16> to vector<256x128xbf16>
    %c0_107 = arith.constant 0 : index
    %c896_108 = arith.constant 896 : index
    %82 = vector.load %arg14[%c0_107, %c896_108] : memref<256x1152xbf16, #tpu.memory_space<vmem>>, vector<256x128xbf16>
    tpu.vector_store %arg14[%c0_107, %c896_108], %81 {strides = array<i32>} : memref<256x1152xbf16, #tpu.memory_space<vmem>>, vector<256x128xbf16>,
    %c2_109 = arith.constant 2 : index
    %c2_110 = arith.constant 2 : index
    %c0_111 = arith.constant 0 : index
    %83 = vector.load %arg15[%c2_109, %c2_110, %c0_111] : memref<18x18x128xbf16, #tpu.memory_space<vmem>>, vector<16x16x128xbf16>
    %84 = vector.shape_cast %83 : vector<16x16x128xbf16> to vector<256x128xbf16>
    %c0_112 = arith.constant 0 : index
    %c1024_113 = arith.constant 1024 : index
    %85 = vector.load %arg14[%c0_112, %c1024_113] : memref<256x1152xbf16, #tpu.memory_space<vmem>>, vector<256x128xbf16>
    tpu.vector_store %arg14[%c0_112, %c1024_113], %84 {strides = array<i32>} : memref<256x1152xbf16, #tpu.memory_space<vmem>>, vector<256x128xbf16>,
    %c0_114 = arith.constant 0 : index
    %c0_115 = arith.constant 0 : index
    %86 = vector.load %arg14[%c0_114, %c0_115] : memref<256x1152xbf16, #tpu.memory_space<vmem>>, vector<256x1152xbf16>
    %c0_116 = arith.constant 0 : index
    %c0_117 = arith.constant 0 : index
    %87 = vector.load %arg6[%c0_116, %c0_117] : memref<1152x128xbf16, #tpu.memory_space<vmem>>, vector<1152x128xbf16>
    %cst_118 = arith.constant dense<0.000000e+00> : vector<256x128xf32>
    %88 = tpu.matmul %86, %87, %cst_118 {dimension_numbers = #tpu.dot_dimension_numbers<[1], [0], [0], [1], [0, 0, 1, 1], [], []>} : vector<256x1152xbf16>, vector<1152x128xbf16>, vector<256x128xf32> -> vector<256x128xf32>
    %c0_119 = arith.constant 0 : index
    %c0_120 = arith.constant 0 : index
    %89 = vector.load %arg7[%c0_119, %c0_120] : memref<1x128xf32, #tpu.memory_space<vmem>>, vector<1x128xf32>
    %90 = vector.broadcast %89 : vector<1x128xf32> to vector<256x128xf32>
    %91 = arith.mulf %88, %90 : vector<256x128xf32>
    %c0_121 = arith.constant 0 : index
    %c0_122 = arith.constant 0 : index
    %92 = vector.load %arg8[%c0_121, %c0_122] : memref<1x128xf32, #tpu.memory_space<vmem>>, vector<1x128xf32>
    %93 = vector.broadcast %92 : vector<1x128xf32> to vector<256x128xf32>
    %94 = arith.addf %91, %93 : vector<256x128xf32>
    %cst_123 = arith.constant dense<0.000000e+00> : vector<128xf32>
    %95 = vector.multi_reduction <add>, %94, %cst_123 [0] : vector<256x128xf32> to vector<128xf32>
    %96 = vector.shape_cast %95 : vector<128xf32> to vector<1x128xf32>
    %cst_124 = arith.constant 2.560000e+02 : f32
    %97 = vector.broadcast %cst_124 : f32 to vector<1x128xf32>
    %98 = arith.divf %96, %97 : vector<1x128xf32>
    %c0_125 = arith.constant 0 : index
    %c0_126 = arith.constant 0 : index
    %99 = vector.load %arg9[%c0_125, %c0_126] : memref<128x128xf32, #tpu.memory_space<vmem>>, vector<128x128xf32>
    %cst_127 = arith.constant dense<0.000000e+00> : vector<1x128xf32>
    %100 = tpu.matmul %98, %99, %cst_127 {dimension_numbers = #tpu.dot_dimension_numbers<[1], [0], [0], [1], [0, 0, 1, 1], [], []>} : vector<1x128xf32>, vector<128x128xf32>, vector<1x128xf32> -> vector<1x128xf32>
    %c0_128 = arith.constant 0 : index
    %c0_129 = arith.constant 0 : index
    %101 = vector.load %arg10[%c0_128, %c0_129] : memref<1x128xf32, #tpu.memory_space<vmem>>, vector<1x128xf32>
    %102 = arith.addf %100, %101 : vector<1x128xf32>
    %cst_130 = arith.constant 0.000000e+00 : f32
    %103 = vector.broadcast %cst_130 : f32 to vector<1x128xf32>
    %104 = arith.maximumf %102, %103 : vector<1x128xf32>
    %c0_131 = arith.constant 0 : index
    %c0_132 = arith.constant 0 : index
    %105 = vector.load %arg11[%c0_131, %c0_132] : memref<128x128xf32, #tpu.memory_space<vmem>>, vector<128x128xf32>
    %cst_133 = arith.constant dense<0.000000e+00> : vector<1x128xf32>
    %106 = tpu.matmul %104, %105, %cst_133 {dimension_numbers = #tpu.dot_dimension_numbers<[1], [0], [0], [1], [0, 0, 1, 1], [], []>} : vector<1x128xf32>, vector<128x128xf32>, vector<1x128xf32> -> vector<1x128xf32>
    %c0_134 = arith.constant 0 : index
    %c0_135 = arith.constant 0 : index
    %107 = vector.load %arg12[%c0_134, %c0_135] : memref<1x128xf32, #tpu.memory_space<vmem>>, vector<1x128xf32>
    %108 = arith.addf %106, %107 : vector<1x128xf32>
    %109 = arith.negf %108 : vector<1x128xf32>
    %110 = math.exp %109 : vector<1x128xf32>
    %cst_136 = arith.constant 1.000000e+00 : f32
    %111 = vector.broadcast %cst_136 : f32 to vector<1x128xf32>
    %112 = arith.addf %111, %110 : vector<1x128xf32>
    %113 = arith.divf %111, %112 : vector<1x128xf32>
    %c0_137 = arith.constant 0 : index
    %c0_138 = arith.constant 0 : index
    %c0_139 = arith.constant 0 : index
    %c0_140 = arith.constant 0 : index
    %114 = vector.load %arg2[%c0_137, %c0_138, %c0_139, %c0_140] : memref<1x16x16x128xf32, #tpu.memory_space<vmem>>, vector<1x16x16x128xf32>
    %115 = vector.shape_cast %114 : vector<1x16x16x128xf32> to vector<16x16x128xf32>
    %116 = vector.shape_cast %115 : vector<16x16x128xf32> to vector<256x128xf32>
    %117 = vector.broadcast %113 : vector<1x128xf32> to vector<256x128xf32>
    %118 = arith.mulf %94, %117 : vector<256x128xf32>
    %119 = arith.addf %118, %116 : vector<256x128xf32>
    %cst_141 = arith.constant 0.000000e+00 : f32
    %120 = vector.broadcast %cst_141 : f32 to vector<256x128xf32>
    %121 = arith.maximumf %119, %120 : vector<256x128xf32>
    %122 = vector.shape_cast %121 : vector<256x128xf32> to vector<1x16x16x128xf32>
    %c0_142 = arith.constant 0 : index
    %c0_143 = arith.constant 0 : index
    %c0_144 = arith.constant 0 : index
    %c0_145 = arith.constant 0 : index
    %123 = vector.load %arg13[%c0_142, %c0_143, %c0_144, %c0_145] : memref<1x16x16x128xf32, #tpu.memory_space<vmem>>, vector<1x16x16x128xf32>
    tpu.vector_store %arg13[%c0_142, %c0_143, %c0_144, %c0_145], %122 {strides = array<i32>} : memref<1x16x16x128xf32, #tpu.memory_space<vmem>>, vector<1x16x16x128xf32>,
    return
  }
  func.func @transform_0(%arg0: i32) -> (i32, i32, i32, i32) {
    %c0_i32 = arith.constant 0 : i32
    %c0_i32_0 = arith.constant 0 : i32
    %c0_i32_1 = arith.constant 0 : i32
    %c0_i32_2 = arith.constant 0 : i32
    return %arg0, %c0_i32, %c0_i32_0, %c0_i32_1 : i32, i32, i32, i32
  }
  func.func @transform_1(%arg0: i32) -> (i32, i32, i32, i32) {
    %c0_i32 = arith.constant 0 : i32
    %c0_i32_0 = arith.constant 0 : i32
    %c0_i32_1 = arith.constant 0 : i32
    %c0_i32_2 = arith.constant 0 : i32
    return %arg0, %c0_i32, %c0_i32_0, %c0_i32_1 : i32, i32, i32, i32
  }
  func.func @transform_2(%arg0: i32) -> (i32, i32) {
    %c0_i32 = arith.constant 0 : i32
    %c0_i32_0 = arith.constant 0 : i32
    %c0_i32_1 = arith.constant 0 : i32
    return %c0_i32, %c0_i32_0 : i32, i32
  }
  func.func @transform_3(%arg0: i32) -> (i32, i32) {
    %c0_i32 = arith.constant 0 : i32
    %c0_i32_0 = arith.constant 0 : i32
    %c0_i32_1 = arith.constant 0 : i32
    return %c0_i32, %c0_i32_0 : i32, i32
  }
  func.func @transform_4(%arg0: i32) -> (i32, i32) {
    %c0_i32 = arith.constant 0 : i32
    %c0_i32_0 = arith.constant 0 : i32
    %c0_i32_1 = arith.constant 0 : i32
    return %c0_i32, %c0_i32_0 : i32, i32
  }
  func.func @transform_5(%arg0: i32) -> (i32, i32) {
    %c0_i32 = arith.constant 0 : i32
    %c0_i32_0 = arith.constant 0 : i32
    %c0_i32_1 = arith.constant 0 : i32
    return %c0_i32, %c0_i32_0 : i32, i32
  }
  func.func @transform_6(%arg0: i32) -> (i32, i32) {
    %c0_i32 = arith.constant 0 : i32
    %c0_i32_0 = arith.constant 0 : i32
    %c0_i32_1 = arith.constant 0 : i32
    return %c0_i32, %c0_i32_0 : i32, i32
  }
  func.func @transform_7(%arg0: i32) -> (i32, i32) {
    %c0_i32 = arith.constant 0 : i32
    %c0_i32_0 = arith.constant 0 : i32
    %c0_i32_1 = arith.constant 0 : i32
    return %c0_i32, %c0_i32_0 : i32, i32
  }
  func.func @transform_8(%arg0: i32) -> (i32, i32) {
    %c0_i32 = arith.constant 0 : i32
    %c0_i32_0 = arith.constant 0 : i32
    %c0_i32_1 = arith.constant 0 : i32
    return %c0_i32, %c0_i32_0 : i32, i32
  }
  func.func @transform_9(%arg0: i32) -> (i32, i32) {
    %c0_i32 = arith.constant 0 : i32
    %c0_i32_0 = arith.constant 0 : i32
    %c0_i32_1 = arith.constant 0 : i32
    return %c0_i32, %c0_i32_0 : i32, i32
  }
  func.func @transform_10(%arg0: i32) -> (i32, i32) {
    %c0_i32 = arith.constant 0 : i32
    %c0_i32_0 = arith.constant 0 : i32
    %c0_i32_1 = arith.constant 0 : i32
    return %c0_i32, %c0_i32_0 : i32, i32
  }
  func.func @transform_11(%arg0: i32) -> (i32, i32) {
    %c0_i32 = arith.constant 0 : i32
    %c0_i32_0 = arith.constant 0 : i32
    %c0_i32_1 = arith.constant 0 : i32
    return %c0_i32, %c0_i32_0 : i32, i32
  }
  func.func @transform_12(%arg0: i32) -> (i32, i32, i32, i32) {
    %c0_i32 = arith.constant 0 : i32
    %c0_i32_0 = arith.constant 0 : i32
    %c0_i32_1 = arith.constant 0 : i32
    %c0_i32_2 = arith.constant 0 : i32
    return %arg0, %c0_i32, %c0_i32_0, %c0_i32_1 : i32, i32, i32, i32
  }
}

</mosaic_0001>

<bundles_post_ra>
// kernel: tpu_custom_call.1
= control target key start
LH: loop header
LB: loop body
LE: loop exit
PB: predicated region body
PF: predicated region fallthrough
CT: control target
= control target key end

     0   :  { %s17856_s0 = inlined_call_operand.vmem [shape: bf16[2,18,18,128], index: 0, kind: input, shape index: {}]   ;;  %s17857_s1 = inlined_call_operand.hbm [shape: f32[2,16,16,128], index: 1, kind: input, shape index: {}]   ;;  %s17858_s2 = inlined_call_operand.vmem [shape: bf16[1152,128], index: 2, kind: input, shape index: {}]   ;;  %s17859_s3 = inlined_call_operand.vmem [shape: f32[1,128], index: 3, kind: input, shape index: {}]   ;;  %s17860_s4 = inlined_call_operand.vmem [shape: f32[1,128], index: 4, kind: input, shape index: {}]   ;;  %s17861_s5 = inlined_call_operand.hbm [shape: bf16[1152,128], index: 5, kind: input, shape index: {}]   ;;  %s17862_s6 = inlined_call_operand.vmem [shape: f32[1,128], index: 6, kind: input, shape index: {}]   ;;  %s17863_s7 = inlined_call_operand.vmem [shape: f32[1,128], index: 7, kind: input, shape index: {}]   ;;  %s17864_s8 = inlined_call_operand.vmem [shape: f32[128,128], index: 8, kind: input, shape index: {}]   ;;  %s17865_s9 = inlined_call_operand.vmem [shape: f32[1,128], index: 9, kind: input, shape index: {}]   ;;  %s17866_s10 = inlined_call_operand.hbm [shape: f32[128,128], index: 10, kind: input, shape index: {}]   ;;  %s17867_s11 = inlined_call_operand.vmem [shape: f32[1,128], index: 11, kind: input, shape index: {}]   ;;  %s17868_s12 = inlined_call_operand.hbm [shape: f32[2,16,16,128], index: 12, kind: output, shape index: {}]  }
   0x1   :  { %17885 = sst [smem:[#allocation59_spill]] %s17861_s5 }
   0x2   :  { %17886 = sst [smem:[#allocation60_spill]] %s17866_s10 }
   0x3   :  { %17 = vsyncpa [#allocation5], 0 }
   0x4   :  { %19 = vsyncpa [#allocation5 + $0x1], 0 }
   0x5   :  { %20 = vsyncpa [#allocation8], 0 }
   0x6   :  { %21 = vsyncpa [#allocation6], 0 }
   0x7   :  { %23 = vsyncpa [#allocation6 + $0x1], 0  ;;  %s14304_s21 = smov 0   ;;  %s14306_s22 = smov 0  }
   0x8   :  { %s14308_s23 = smov 0   ;;  %s14310_s24 = smov 0  }
   0x9 LB: > { %17887 = sst [smem:[#allocation14_spill]] %s14220_s23  ;;  %s14325_s25 = sadd.s32 4294967295, %s14224_s24   ;;  %s14224_s24 = sphi %s14310_s24, %s18065_s24   ;;  %s14220_s23 = sphi %s14308_s23, %s18070_s23   ;;  %s14216_s22 = sphi %s14306_s22, %s18069_s22   ;;  %s14212_s21 = sphi %s14304_s21, %s18068_s21  }
   0xa   : > { %17888 = sst [smem:[#allocation15_spill]] %s14224_s24  ;;  %s11432_s26 = sadd.s32 4294967294, %s14224_s24  }
   0xb   : > { %p75_p0 = scmp.ne.s32.totalorder %s14216_s22, %s14212_s21  ;;  %p17869_p1 = scmp.eq.s32.totalorder %s14325_s25, 0 }
   0xc   : > { %p315_p3 = scmp.eq.s32.totalorder %s11432_s26, 1  ;;  %p11433_p5 = scmp.ge.s32.totalorder %s14224_s24, 1 }
   0xd   : > { %p14334_p4 = por %p17869_p1, %p75_p0  ;;  %p322_p7 = scmp.lt.s32.totalorder %s14224_s24, 3 }
   0xe   : > { %p14339_p6 = por %p315_p3, %p75_p0  ;;  %s14226_s30 = smov [#allocation7]  }
   0xf   : > { %s17889_s27 = scalar_select %p14334_p4, 1, 0 }
  0x10   : > { %s17890_s28 = scalar_select %p14339_p6, 1, 0 }
  0x11   : > { %p14344_p8 = pnand %p11433_p5, %p322_p7  ;;  %s343_s13 = sshll.u32 %s14226_s30, 4  ;;  %s344_s13 = int_to_ptr.vmem [resolvable:$true] %s343_s13 }
  0x12   : > { %s14227_s15 = smov [#allocation9]   ;;  %s14087_s17 = scalar_lea.vmem %s344_s13, 9216 }
  0x13   : > { %s17891_s29 = scalar_select %p14344_p8, 1, 0 }
  0x14   : > { %p13463_p9 = pneg %p14344_p8  ;;  %s368_s16 = sshll.u32 %s14227_s15, 4  ;;  %s369_s16 = int_to_ptr.vmem [resolvable:$true] %s368_s16 }
  0x15   : > { %p14088_p13 = scmp.ne.s32.totalorder %s344_s13, %s14087_s17  ;;  %p14095_p5 = scmp.lt.s32.totalorder %s344_s13, %s344_s13 }
  0x16   : > { %p14353_p11 = pnand %p13463_p9, %p17869_p1  ;;  %p14096_p7 = scmp.lt.s32.totalorder %s14087_s17, %s14087_s17 }
  0x18   : > { %p14078_p12 = pneg %p14353_p11  ;;  %p14097_p10 = por %p14096_p7, %p14095_p5 }
  0x1a   : > { %p14090_p0 = pnand %p14088_p13, %p14078_p12 }
  0x1c   : > { %p14091_p3 = pneg %p14090_p0 }
  0x1e   : > { %p14098_p9 = pnand %p14097_p10, %p14091_p3 }
  0x20   : > { %14101 = shalt.err (!%p14098_p9)
}
  0x21   : > { %s14228_s18 = smov 64   ;;  %s14229_s19 = smov 4  }
  0x22   : > { %s17893_s5 = sld [smem:[#allocation59_spill]]  ;;  %s14113_s30 = scalar_lea.vmem %s369_s16, 2048 }
  0x23   : > { %p14114_p1 = scmp.ne.s32.totalorder %s369_s16, %s14113_s30  ;;  %p14121_p2 = scmp.lt.s32.totalorder %s369_s16, %s369_s16 }
  0x24   : > { %p14122_p6 = scmp.lt.s32.totalorder %s14113_s30, %s14113_s30 }
  0x25   : > { %p14116_p13 = pnand %p14114_p1, %p14078_p12 }
  0x26   : > { %p14123_p5 = por %p14122_p6, %p14121_p2 }
  0x27   : > { %p14117_p0 = pneg %p14116_p13 }
  0x28   : > { %13466 = dma.hbm_to_vmem [thread:$0]  (!%p14353_p11), %s17893_s5, 9216, %s344_s13, [#allocation8], %s14228_s18, %s14228_s18, %s14229_s19  }
  0x29   : > { %p14124_p10 = pnand %p14123_p5, %p14117_p0 }
  0x2b   : > { %14127 = shalt.err (!%p14124_p10)
}
  0x2c   : > { %s17870_s15 = smov 128   ;;  %s17871_s13 = smov 8  }
  0x2d   : > { %s17894_s10 = sld [smem:[#allocation60_spill]]  ;;  %s14379_s19 = sadd.s32 1, %s14224_s24  }
  0x2e   : > { %17895 = sst [smem:[#allocation16_spill]] %s14379_s19  ;;  %s59_s20 = ssub.s32 %s14224_s24, %s14379_s19 }
  0x2f   : > { %p60_p1 = scmp.eq.s32.totalorder %s59_s20, 0  ;;  %s62_s26 = sadd.s32 1, %s14220_s23 }
  0x30   : > { %p69_p2 = scmp.ne.s32.totalorder %s14220_s23, %s14216_s22  ;;  %p70_p6 = scmp.eq.s32.totalorder %s14224_s24, 0 }
  0x31   : > { %s14388_s30 = scalar_select %p60_p1, %s14220_s23, %s62_s26  }
  0x32   : > { %p71_p12 = por %p70_p6, %p69_p2  ;;  %p17897_p3 = scmp.eq.s32.totalorder %s14325_s25, 1 }
  0x33   : > { %13469 = dma.hbm_to_vmem [thread:$0]  (!%p14353_p11), %s17894_s10, 2048, %s369_s16, [#allocation8], %s17870_s15, %s17870_s15, %s17871_s13  }
  0x34   : > { %17896 = sst [smem:[#allocation17_spill]] %s14388_s30  ;;  %p14392_p7 = por %p17897_p3, %p69_p2 }
  0x35   : > { %p13480_p9 = scmp.lt.s32.totalorder %s14224_s24, 2  ;;  %s393_s5 = sand.u32 1, %s14220_s23  }
  0x36   : > { %s17898_s14 = scalar_select %p14392_p7, 1, 0 }
  0x37   : > { %s11437_s17 = sshll.u32 %s393_s5, 8  ;;  %s12272_s16 = sshll.u32 %s14224_s24, 12 }
  0x38   : > { %s14402_s13 = scalar_lea.hbm %s17857_s1, %s12272_s16  ;;  %s397_s20 = scalar_lea.vmem [#allocation4], %s11437_s17 }
  0x39   : > { %s404_s26 = sshll.u32 %s397_s20, 4  ;;  %p14406_p11 = pnand %p13480_p9, %p71_p12  ;;  %s14404_s26 = int_to_ptr.vmem [resolvable:$true] %s404_s26 }
  0x3a   : > { %s14410_s30 = scalar_lea.sflag [#allocation5], %s393_s5  ;;  %s14128_s23 = scalar_lea.hbm %s14402_s13, 4096 }
  0x3b   : > { %p14129_p13 = scmp.ne.s32.totalorder %s14402_s13, %s14128_s23  ;;  %p14130_p0 = pneg %p14406_p11 }
  0x3c   : > { %s14133_s17 = scalar_lea.hbm %s17857_s1, 8192  ;;  %p14134_p1 = scmp.lt.s32.totalorder %s14402_s13, %s17857_s1 }
  0x3d   : > { %p14131_p5 = pnand %p14130_p0, %p14129_p13  ;;  %p14135_p2 = scmp.lt.s32.totalorder %s14133_s17, %s14128_s23 }
  0x3f   : > { %p14132_p10 = pneg %p14131_p5  ;;  %p14136_p6 = por %p14135_p2, %p14134_p1 }
  0x41   : > { %p14137_p12 = pnand %p14136_p6, %p14132_p10 }
  0x43   : > { %14140 = shalt.err (!%p14137_p12)
}
  0x44   : > { %s14141_s5 = scalar_lea.vmem %s14404_s26, 4096  ;;  %s14232_s19 = smov [#allocation4]  }
  0x45   : > { %p14142_p3 = scmp.ne.s32.totalorder %s14404_s26, %s14141_s5  ;;  %s14146_s24 = sshll.u32 %s14232_s19, 4  ;;  %s14147_s24 = int_to_ptr.vmem [resolvable:$false] %s14146_s24 }
  0x46   : > { %s14148_s15 = scalar_lea.vmem %s14147_s24, 8192  ;;  %p14149_p5 = scmp.lt.s32.totalorder %s14404_s26, %s14147_s24 }
  0x47   : > { %p14144_p9 = pnand %p14142_p3, %p14130_p0  ;;  %p14150_p7 = scmp.lt.s32.totalorder %s14148_s15, %s14141_s5 }
  0x49   : > { %p14145_p13 = pneg %p14144_p9  ;;  %p14151_p4 = por %p14150_p7, %p14149_p5 }
  0x4b   : > { %p14152_p8 = pnand %p14151_p4, %p14145_p13 }
  0x4d   : > { %14155 = shalt.err (!%p14152_p8)
}
  0x4e   : > { %s17900_s23 = smov 8   ;;  %s17901_s16 = smov 128  }
  0x4f   : > { %13473 = dma.hbm_to_vmem [thread:$0]  (!%p14406_p11), %s14402_s13, 4096, %s14404_s26, %s14410_s30, %s17901_s16, %s17901_s16, %s17900_s23  }
  0x50   : > { %p17902_p0 = scmp.ne.s32.totalorder %s17891_s29, 0 }
  0x52   : > { %416 = sbr.rel (%p17902_p0) target bundleno = 1923 (0x783), region = 68 }
  0x57   : > { %s14437_s19 = sand.u32 1, %s14216_s22   ;;  %p17903_p4 = scmp.ne.s32.totalorder %s17889_s27, 0 }
  0x58   : > { %s11441_s24 = sshll.u32 %s14437_s19, 8  ;;  %s419_s17 = scalar_lea.sflag [#allocation5], %s14437_s19 }
  0x59   : > { %s14443_s10 = scalar_lea.vmem [#allocation4], %s11441_s24 }
  0x5a   : > { %14199 = dma.done.wait (%p17903_p4), %s419_s17, 4096  }
  0x5b   : > { %14201 = vsyncadd (%p17903_p4), %s419_s17, 4294963200  ;;  %p17904_p8 = scmp.eq.s32.totalorder %s14325_s25, 0 }
  0x5d   : > { %14203 = dma.done.wait (%p17904_p8), [#allocation8], 11264   ;;  %p17905_p7 = pmov %p17904_p8 }
  0x5e   : > { %v14233_v0 = vmov 0   ;;  %v13527_v1 = vld [vmem:[%s17858_s2 + $0x78] sm:$0xff]   ;;  %v13531_v5 = vld [vmem:[%s17858_s2 + $0x70] sm:$0xff]   ;;  %v13535_v9 = vld [vmem:[%s17858_s2 + $0x68] sm:$0xff]   ;;  %p476_p11 = scmp.lt.s32.totalorder %s14325_s25, 1  ;;  %vm1141_vm2 = vcmask 1042432  }
  0x5f   : > { %14205 = vsyncadd (%p17905_p7), [#allocation8], 4294956032  ;;  %5437 = vst [vmem:[#allocation3] sm:$0xf] %v14233_v0  ;;  %v13528_v2 = vld [vmem:[%s17858_s2 + $0xf8] sm:$0xff]   ;;  %12306 = vmatprep.subr.bf16.mxu0 %v13527_v1  ;;  %v13532_v6 = vld [vmem:[%s17858_s2 + $0xf0] sm:$0xff]  }
  0x60   : > { %5438 = vst [vmem:[#allocation3 + $0x4] sm:$0xf] %v14233_v0  ;;  %5439 = vst [vmem:[#allocation3 + $0x8] sm:$0x1] %v14233_v0  ;;  %v13529_v3 = vld [vmem:[%s17858_s2 + $0x38] sm:$0xff]   ;;  %12418 = vmatprep.subr.bf16.mxu1 %v13528_v2  ;;  %v13533_v7 = vld [vmem:[%s17858_s2 + $0x30] sm:$0xff]  }
  0x61   : > { %5441 = vst [vmem:[#allocation3 + $0xcc] sm:$0xf] %v14233_v0  ;;  %5442 = vst [vmem:[#allocation3 + $0xd0] sm:$0xf] %v14233_v0  ;;  %v13530_v4 = vld [vmem:[%s17858_s2 + $0xb8] sm:$0xff]   ;;  %12307 = vmatpush3.bf16.msra.mxu0 %v13529_v3  ;;  %v13534_v8 = vld [vmem:[%s17858_s2 + $0xb0] sm:$0xff]  }
  0x62   : > { %5443 = vst [vmem:[#allocation3 + $0xd4] sm:$0x1] %v14233_v0  ;;  %12419 = vmatpush3.bf16.msra.mxu1 %v13530_v4  ;;  %12308 = vmatprep.subr.bf16.mxu0 %v13531_v5  ;;  %v13536_v10 = vld [vmem:[%s17858_s2 + $0xe8] sm:$0xff]   ;;  %v13539_v13 = vld [vmem:[%s17858_s2 + $0x60] sm:$0xff]   ;;  %v13543_v17 = vld [vmem:[%s17858_s2 + $0x58] sm:$0xff]   ;;  %s477_s15 = scalar_select %p476_p11, %s14325_s25, 1 }
  0x63   : > { %12420 = vmatprep.subr.bf16.mxu1 %v13532_v6  ;;  %v13537_v11 = vld [vmem:[%s17858_s2 + $0x28] sm:$0xff]   ;;  %v13540_v14 = vld [vmem:[%s17858_s2 + $0xe0] sm:$0xff]   ;;  %v13544_v18 = vld [vmem:[%s17858_s2 + $0xd8] sm:$0xff]   ;;  %vm594_vm0 = vsmask.f32 3328  ;;  %vm1142_vm3 = vcmask 1046532  }
  0x64   : > { %v13538_v12 = vld [vmem:[%s17858_s2 + $0xa8] sm:$0xff]   ;;  %v13541_v15 = vld [vmem:[%s17858_s2 + $0x20] sm:$0xff]   ;;  %v13545_v19 = vld [vmem:[%s17858_s2 + $0x18] sm:$0xff]   ;;  %s13450_s18 = smul.u32 216, %s477_s15  ;;  %vm595_vm1 = vsmask.f32 7440 }
  0x65   : > { %12309 = vmatpush3.bf16.msra.mxu0 %v13533_v7  ;;  %v13542_v16 = vld [vmem:[%s17858_s2 + $0xa0] sm:$0xff]   ;;  %v13546_v20 = vld [vmem:[%s17858_s2 + $0x98] sm:$0xff]   ;;  %v13547_v21 = vld [vmem:[%s17858_s2 + $0x50] sm:$0xff]   ;;  %v17906_v57 = vmov 0  ;;  %v17909_v4 = vmov 0  ;;  %vm5445_vm6 = vcmask 1040384  }
  0x66   : > { %12421 = vmatpush3.bf16.msra.mxu1 %v13534_v8  ;;  %12310 = vmatprep.subr.bf16.mxu0 %v13535_v9  ;;  %v13548_v22 = vld [vmem:[%s17858_s2 + $0xd0] sm:$0xff]   ;;  %v13551_v25 = vld [vmem:[%s17858_s2 + $0x48] sm:$0xff]   ;;  %v13555_v29 = vld [vmem:[%s17858_s2 + $0x40] sm:$0xff]   ;;  %s14548_s26 = scalar_lea.vmem %s17856_s0, %s13450_s18  ;;  %vm5446_vm7 = vsmask.f32 256  ;;  %vm5964_vm11 = vcmask 1043456  }
  0x67   : > { %12422 = vmatprep.subr.bf16.mxu1 %v13536_v10  ;;  %v13549_v23 = vld [vmem:[%s17858_s2 + $0x10] sm:$0xff]   ;;  %v13552_v26 = vld [vmem:[%s17858_s2 + $0xc8] sm:$0xff]   ;;  %v13556_v30 = vld [vmem:[%s17858_s2 + $0xc0] sm:$0xff]   ;;  %vm5496_vm9 = vsmask.f32 7938  ;;  %s11315_s15 = scalar_lea.sflag [#allocation6], %s14437_s19 }
  0x68   : > { %v13550_v24 = vld [vmem:[%s17858_s2 + $0x90] sm:$0xff]   ;;  %v13553_v27 = vld [vmem:[%s17858_s2 + $0x8] sm:$0xff]   ;;  %v13557_v31 = vld [vmem:[%s17858_s2] sm:$0xff]   ;;  %vm5642_vm13 = vsmask.f32 4368  ;;  %p18061_p1 = scmp.ne.s32.totalorder %s17898_s14, 0 }
  0x69   : > { %12311 = vmatpush3.bf16.msra.mxu0 %v13537_v11  ;;  %v13554_v28 = vld [vmem:[%s17858_s2 + $0x88] sm:$0xff]   ;;  %v13558_v32 = vld [vmem:[%s17858_s2 + $0x80] sm:$0xff]   ;;  %v13563_v43 = vld [vmem:[%s17858_s2 + $0x178] sm:$0xff]   ;;  %s14236_s20 = smov [#allocation10]  }
  0x6a   : > { %12423 = vmatpush3.bf16.msra.mxu1 %v13538_v12  ;;  %12312 = vmatprep.subr.bf16.mxu0 %v13539_v13  ;;  %v482_v33 = vld [vmem:[%s14548_s26] sm:$0xf]  ;;  %v483_v34 = vld [vmem:[%s14548_s26 + $0x4] sm:$0xf]  ;;  %v548_v37 = vld [vmem:[%s14548_s26 + $0x8] sm:$0x1] }
  0x6b   : > { %12424 = vmatprep.subr.bf16.mxu1 %v13540_v14  ;;  %v546_v35 = vld [vmem:[%s14548_s26] sm:$0xf]  ;;  %514 = vst [vmem:[#allocation2] sm:$0xf] %v482_v33  ;;  %515 = vst [vmem:[#allocation2 + $0x24] sm:$0xf] %v483_v34 }
  0x6c   : > { %v547_v36 = vld [vmem:[%s14548_s26 + $0x4] sm:$0xf]  ;;  %v598_v38 = vshrl.u32 %v546_v35, 16  ;;  %v601_v39 = vshll.u32 %v546_v35, 16  ;;  %v617_v42 = vshll.u32 %v548_v37, 16  ;;  %vm14566_vm4 = vmor %vm594_vm0, %vm595_vm1  ;;  %s14160_s5 = sshll.u32 %s14236_s20, 4  ;;  %s14161_s5 = int_to_ptr.vmem [resolvable:$false] %s14160_s5 }
  0x6d   : > { %12313 = vmatpush3.bf16.msra.mxu0 %v13541_v15  ;;  %v607_v40 = vshll.u32 %v547_v36, 16  ;;  %v611_v41 = vshrl.u32 %v547_v36, 16  ;;  %v6142_v46 = vld [vmem:[#allocation3] sm:$0xf]  ;;  %v6143_v50 = vld [vmem:[#allocation3 + $0x4] sm:$0xf]  ;;  %vm14577_vm5 = vmor %vm1141_vm2, %vm1142_vm3 }
  0x6e   : > { %12425 = vmatpush3.bf16.msra.mxu1 %v13542_v16  ;;  %12314 = vmatprep.subr.bf16.mxu0 %v13543_v17  ;;  %v600_v44 = vrot.slane %v598_v38, 4  ;;  %v603_v45 = vrot.slane %v601_v39, 5  ;;  %v619_v49 = vrot.slane %v617_v42, 5  ;;  %v6191_v51 = vshrl.u32 %v6142_v46, 16  ;;  %v6144_v53 = vld [vmem:[#allocation3 + $0x8] sm:$0x1]  ;;  %vm15812_vm8 = vmand %vm5445_vm6, %vm5446_vm7 }
  0x6f   : > { %12426 = vmatprep.subr.bf16.mxu1 %v13544_v18  ;;  %v609_v47 = vrot.slane %v607_v40, 5  ;;  %v613_v48 = vrot.slane %v611_v41, 4  ;;  %v6194_v54 = vshll.u32 %v6142_v46, 16  ;;  %v6200_v55 = vshll.u32 %v6143_v50, 16  ;;  %v1045_v61 = vld [vmem:[%s14548_s26] sm:$0xe]  ;;  %vm15821_vm10 = vmand %vm5445_vm6, %vm5496_vm9 }
  0x70   : > { %v604_v52 = vor.u32 %v603_v45, %v600_v44  ;;  %v6204_v56 = vshrl.u32 %v6143_v50, 16  ;;  %v17907_v57 = vsel %vm14566_vm4, 4294967295, %v17906_v57  ;;  %v6193_v59 = vrot.slane %v6191_v51, 4  ;;  %v1046_v62 = vld [vmem:[%s14548_s26 + $0x4] sm:$0xf]  ;;  %v13564_v41 = vld [vmem:[%s17858_s2 + $0x138] sm:$0xff]   ;;  %vm16207_vm0 = vmand %vm5964_vm11, %vm5496_vm9 }
  0x71   : > { %12315 = vmatpush3.bf16.msra.mxu0 %v13545_v19  ;;  %17908 = vst [vmem:[#allocation18_spill] sm:$0xff] %v17907_v57  ;;  %v614_v58 = vor.u32 %v613_v48, %v609_v47  ;;  %v6210_v60 = vshll.u32 %v6144_v53, 16  ;;  %v6196_v0 = vrot.slane %v6194_v54, 5  ;;  %v14572_v1 = vrot.slane %v6200_v55, 5  ;;  %v1047_v3 = vld [vmem:[%s14548_s26 + $0x8] sm:$0x1]  ;;  %vm16217_vm3 = vmor %vm5446_vm7, %vm5642_vm13 }
  0x72   : > { %12427 = vmatpush3.bf16.msra.mxu1 %v13546_v20  ;;  %12316 = vmatprep.subr.bf16.mxu0 %v13547_v21  ;;  %v605_v63 = vrot.slane %v604_v52, 4  ;;  %v6206_v2 = vrot.slane %v6204_v56, 4  ;;  %v17910_v4 = vsel %vm14577_vm5, 4294967295, %v17909_v4  ;;  %v11446_v6 = vrot.slane %v1045_v61, 9  ;;  %v11462_v8 = vld [vmem:[%s14548_s26 + $0xc] sm:$0xf] }
  0x73   : > { %12428 = vmatprep.subr.bf16.mxu1 %v13548_v22  ;;  %17911 = vst [vmem:[#allocation19_spill] sm:$0xff] %v17910_v4  ;;  %v615_v5 = vrot.slane %v614_v58, 4  ;;  %v1146_v7 = vrot.slane %v1046_v62, 5  ;;  %v6197_v10 = vor.u32 %v6196_v0, %v6193_v59  ;;  %v1149_v12 = vrot.slane %v1047_v3, 5  ;;  %v11463_v13 = vld [vmem:[%s14548_s26 + $0x10] sm:$0xf] }
  0x74   : > { %v610_v9 = vsel %vm14566_vm4, %v605_v63, %v609_v47  ;;  %v6207_v11 = vor.u32 %v6206_v2, %v14572_v1  ;;  %1353 = vst [vmem:[#allocation2 + $0xc] sm:$0xf] %v11462_v8  ;;  %v6638_v14 = vld [vmem:[#allocation3] sm:$0xe]  ;;  %v6212_v16 = vrot.slane %v6210_v60, 5  ;;  %v13575_v51 = vld [vmem:[%s17858_s2 + $0x170] sm:$0xff]  }
  0x75   : > { %12317 = vmatpush3.bf16.msra.mxu0 %v13549_v23  ;;  %v620_v15 = vsel %vm14566_vm4, %v615_v5, %v619_v49  ;;  %1013 = vst [vmem:[#allocation2 + $0x4] sm:$0xf] %v610_v9  ;;  %v1147_v17 = vsel %vm14577_vm5, %v11446_v6, %v1146_v7  ;;  %v1148_v18 = vrot.slane %v1146_v7, 4  ;;  %1354 = vst [vmem:[#allocation2 + $0x30] sm:$0xf] %v11463_v13  ;;  %v6198_v21 = vrot.slane %v6197_v10, 4 }
  0x76   : > { %12429 = vmatpush3.bf16.msra.mxu1 %v13550_v24  ;;  %12318 = vmatprep.subr.bf16.mxu0 %v13551_v25  ;;  %v6639_v19 = vld [vmem:[#allocation3 + $0x4] sm:$0xf]  ;;  %v6640_v20 = vld [vmem:[#allocation3 + $0x8] sm:$0x1]  ;;  %1014 = vst [vmem:[#allocation2 + $0x28] sm:$0xf] %v620_v15 }
  0x77   : > { %12430 = vmatprep.subr.bf16.mxu1 %v13552_v26  ;;  %v6208_v22 = vrot.slane %v6207_v11, 4  ;;  %1288 = vst [vmem:[#allocation2 + $0x8] sm:$0xf] %v1147_v17  ;;  %v12000_v23 = vrot.slane %v6638_v14, 9  ;;  %v6736_v24 = vrot.slane %v6639_v19, 5  ;;  %v1150_v25 = vsel %vm14577_vm5, %v1148_v18, %v1149_v12  ;;  %v13576_v7 = vld [vmem:[%s17858_s2 + $0x130] sm:$0xff]  }
  0x78   : > { %1289 = vst [vmem:[#allocation2 + $0x2c] sm:$0xf] %v1150_v25  ;;  %v550_v33 = vld [vmem:[%s14548_s26 + $0x10] sm:$0xf]  ;;  %v551_v34 = vld [vmem:[%s14548_s26 + $0x14] sm:$0x1]  ;;  %v6203_v39 = vsel %vm14566_vm4, %v6198_v21, %v14572_v1 }
  0x79   : > { %12319 = vmatpush3.bf16.msra.mxu0 %v13553_v27  ;;  %v6738_v26 = vrot.slane %v6736_v24, 4  ;;  %v6739_v27 = vrot.slane %v6640_v20, 5  ;;  %v631_v37 = vshll.u32 %v550_v33, 16  ;;  %v1048_v38 = vld [vmem:[%s14548_s26 + $0xc] sm:$0xe]  ;;  %v6213_v40 = vsel %vm14566_vm4, %v6208_v22, %v6212_v16  ;;  %s14162_s23 = scalar_lea.vmem %s14161_s5, 8192 }
  0x7a   : > { %12431 = vmatpush3.bf16.msra.mxu1 %v13554_v28  ;;  %12320 = vmatprep.subr.bf16.mxu0 %v13555_v29  ;;  %v484_v28 = vld [vmem:[%s14548_s26 + $0xc] sm:$0xf]  ;;  %v485_v29 = vld [vmem:[%s14548_s26 + $0x10] sm:$0xf]  ;;  %v635_v42 = vshrl.u32 %v550_v33, 16  ;;  %v11447_v50 = vrot.slane %v1048_v38, 9  ;;  %v6737_v55 = vsel %vm14577_vm5, %v12000_v23, %v6736_v24 }
  0x7b   : > { %12432 = vmatprep.subr.bf16.mxu1 %v13556_v30  ;;  %v6078_v30 = vld [vmem:[#allocation3] sm:$0xf]  ;;  %516 = vst [vmem:[#allocation2 + $0x48] sm:$0xf] %v484_v28  ;;  %517 = vst [vmem:[#allocation2 + $0x6c] sm:$0xf] %v485_v29  ;;  %v6740_v56 = vsel %vm14577_vm5, %v6738_v26, %v6739_v27 }
  0x7c   : > { %v1049_v44 = vld [vmem:[%s14548_s26 + $0x10] sm:$0xf]  ;;  %v1050_v45 = vld [vmem:[%s14548_s26 + $0x14] sm:$0x1]  ;;  %v2986_v46 = vld [vmem:[#allocation2] sm:$0xff]  ;;  %v633_v49 = vrot.slane %v631_v37, 5 }
  0x7d   : > { %12321 = vmatpush3.bf16.msra.mxu0 %v13557_v31  ;;  %v6079_v31 = vld [vmem:[#allocation3 + $0x4] sm:$0xf]  ;;  %v637_v58 = vrot.slane %v635_v42, 4  ;;  %6110 = vst [vmem:[#allocation2] sm:$0xf] %v6078_v30  ;;  %v1153_v61 = vrot.slane %v1049_v44, 5 }
  0x7e   : > { %12433 = vmatpush3.bf16.msra.mxu1 %v13558_v32  ;;  %12530 = vmatprep.subr.bf16.mxu0 %v13563_v43  ;;  %v549_v32 = vld [vmem:[%s14548_s26 + $0xc] sm:$0xf]  ;;  %v641_v43 = vshll.u32 %v551_v34, 16  ;;  %v2991_v52 = vld [vmem:[#allocation2 + $0x24] sm:$0xff]  ;;  %v1156_v62 = vrot.slane %v1050_v45, 5 }
  0x7f   : > { %v622_v35 = vshrl.u32 %v549_v32, 16  ;;  %v625_v36 = vshll.u32 %v549_v32, 16  ;;  %v13559_v53 = vld [vmem:[#allocation2 + $0x4] ss:$36 sps:$4 sm:$0xff]   ;;  %6111 = vst [vmem:[#allocation2 + $0x24] sm:$0xf] %v6079_v31  ;;  %v11750_v59 = vcombine.low %v2986_v46, %v2991_v52  ;;  %v638_v3 = vor.u32 %v637_v58, %v633_v49 }
  0x80   : > { %v2987_v54 = vld [vmem:[#allocation2 + $0x8] sm:$0xff]  ;;  %6606 = vst [vmem:[#allocation2 + $0x4] sm:$0xf] %v6203_v39  ;;  %6607 = vst [vmem:[#allocation2 + $0x28] sm:$0xf] %v6213_v40  ;;  %4490 = vmatprep.mubr.bf16.mxu0 %v13559_v53  ;;  %v643_v5 = vrot.slane %v641_v43, 5  ;;  %v1154_v10 = vsel %vm14577_vm5, %v11447_v50, %v1153_v61 }
  0x81   : > { %v624_v47 = vrot.slane %v622_v35, 4  ;;  %v627_v48 = vrot.slane %v625_v36, 5  ;;  %v11464_v63 = vld [vmem:[%s14548_s26 + $0x18] sm:$0xf]  ;;  %v11465_v0 = vld [vmem:[%s14548_s26 + $0x1c] sm:$0xf]  ;;  %4491 = vmatmul.mubr.bf16.vlgmr.msra.gmra.mxu0 %v11750_v59 }
  0x82   : > { %v2992_v1 = vld [vmem:[#allocation2 + $0x2c] sm:$0xff]  ;;  %1355 = vst [vmem:[#allocation2 + $0x54] sm:$0xf] %v11464_v63  ;;  %1356 = vst [vmem:[#allocation2 + $0x78] sm:$0xf] %v11465_v0  ;;  %v1155_v11 = vrot.slane %v1153_v61, 4  ;;  %12531 = vmatpush3.bf16.msra.mxu0 %v13564_v41 }
  0x83   : > { %v628_v60 = vor.u32 %v627_v48, %v624_v47  ;;  %v13561_v2 = vld [vmem:[#allocation2 + $0xc] ss:$36 sps:$4 sm:$0xff]   ;;  %v486_v6 = vld [vmem:[%s14548_s26 + $0x18] sm:$0xf]  ;;  %6878 = vst [vmem:[#allocation2 + $0x8] sm:$0xf] %v6737_v55  ;;  %v11752_v8 = vcombine.low %v2987_v54, %v2992_v1  ;;  %12532 = vmatprep.subr.bf16.mxu0 %v13575_v51 }
  0x84   : > { %6879 = vst [vmem:[#allocation2 + $0x2c] sm:$0xf] %v6740_v56  ;;  %v487_v12 = vld [vmem:[%s14548_s26 + $0x1c] sm:$0xf]  ;;  %518 = vst [vmem:[#allocation2 + $0x90] sm:$0xf] %v486_v6  ;;  %4651 = vmatprep.mubr.bf16.mxu1 %v13561_v2  ;;  %v1157_v20 = vsel %vm14577_vm5, %v1155_v11, %v1156_v62 }
  0x85   : > { %v629_v9 = vrot.slane %v628_v60, 4  ;;  %v552_v13 = vld [vmem:[%s14548_s26 + $0x18] sm:$0xf]  ;;  %v13587_v14 = vld [vmem:[%s17858_s2 + $0x168] sm:$0xff]   ;;  %v639_v15 = vrot.slane %v638_v3, 4  ;;  %4652 = vmatmul.mubr.bf16.vlgmr.msra.gmra.mxu1 %v11752_v8  ;;  %v13599_v39 = vld [vmem:[%s17858_s2 + $0x160] sm:$0xff]  }
  0x86   : > { %1290 = vst [vmem:[#allocation2 + $0x50] sm:$0xf] %v1154_v10  ;;  %519 = vst [vmem:[#allocation2 + $0xb4] sm:$0xf] %v487_v12  ;;  %v553_v16 = vld [vmem:[%s14548_s26 + $0x1c] sm:$0xf]  ;;  %12533 = vmatpush3.bf16.msra.mxu0 %v13576_v7 }
  0x87   : > { %v554_v17 = vld [vmem:[%s14548_s26 + $0x20] sm:$0x1]  ;;  %v646_v18 = vshrl.u32 %v552_v13, 16  ;;  %v634_v19 = vsel %vm14566_vm4, %v629_v9, %v633_v49  ;;  %v649_v21 = vshll.u32 %v552_v13, 16  ;;  %v655_v22 = vshll.u32 %v553_v16, 16  ;;  %v13588_v38 = vld [vmem:[%s17858_s2 + $0x128] sm:$0xff]   ;;  %12534 = vmatprep.subr.bf16.mxu0 %v13587_v14 }
  0x88   : > { %v1051_v23 = vld [vmem:[%s14548_s26 + $0x18] sm:$0xe]  ;;  %v1052_v24 = vld [vmem:[%s14548_s26 + $0x1c] sm:$0xf]  ;;  %v644_v25 = vsel %vm14566_vm4, %v639_v15, %v643_v5  ;;  %1015 = vst [vmem:[#allocation2 + $0x4c] sm:$0xf] %v634_v19 }
  0x89   : > { %1291 = vst [vmem:[#allocation2 + $0x74] sm:$0xf] %v1157_v20  ;;  %v648_v26 = vrot.slane %v646_v18, 4  ;;  %v659_v27 = vshrl.u32 %v553_v16, 16  ;;  %v665_v28 = vshll.u32 %v554_v17, 16  ;;  %v651_v30 = vrot.slane %v649_v21, 5 }
  0x8a   : > { %v1053_v29 = vld [vmem:[%s14548_s26 + $0x20] sm:$0x1]  ;;  %1016 = vst [vmem:[#allocation2 + $0x70] sm:$0xf] %v644_v25  ;;  %v657_v31 = vrot.slane %v655_v22, 5  ;;  %v11448_v32 = vrot.slane %v1051_v23, 9  ;;  %12535 = vmatpush3.bf16.msra.mxu0 %v13588_v38 }
  0x8b   : > { %v1160_v33 = vrot.slane %v1052_v24, 5  ;;  %v11466_v34 = vld [vmem:[%s14548_s26 + $0x24] sm:$0xf]  ;;  %v661_v35 = vrot.slane %v659_v27, 4  ;;  %v1163_v36 = vrot.slane %v1053_v29, 5  ;;  %v652_v40 = vor.u32 %v651_v30, %v648_v26  ;;  %12536 = vmatprep.subr.bf16.mxu0 %v13599_v39  ;;  %v13611_v8 = vld [vmem:[%s17858_s2 + $0x158] sm:$0xff]  }
  0x8c   : > { %v11467_v37 = vld [vmem:[%s14548_s26 + $0x28] sm:$0xf]  ;;  %1357 = vst [vmem:[#allocation2 + $0x9c] sm:$0xf] %v11466_v34  ;;  %v667_v41 = vrot.slane %v665_v28, 5  ;;  %v13600_v54 = vld [vmem:[%s17858_s2 + $0x120] sm:$0xff]  }
  0x8d   : > { %v1161_v42 = vsel %vm14577_vm5, %v11448_v32, %v1160_v33  ;;  %v1162_v43 = vrot.slane %v1160_v33, 4  ;;  %1358 = vst [vmem:[#allocation2 + $0xc0] sm:$0xf] %v11467_v37  ;;  %v662_v44 = vor.u32 %v661_v35, %v657_v31  ;;  %v488_v45 = vld [vmem:[%s14548_s26 + $0x24] sm:$0xf]  ;;  %v653_v46 = vrot.slane %v652_v40, 4 }
  0x8e   : > { %1292 = vst [vmem:[#allocation2 + $0x98] sm:$0xf] %v1161_v42  ;;  %v489_v48 = vld [vmem:[%s14548_s26 + $0x28] sm:$0xf]  ;;  %520 = vst [vmem:[#allocation2 + $0xd8] sm:$0xf] %v488_v45  ;;  %12537 = vmatpush3.bf16.msra.mxu0 %v13600_v54 }
  0x8f   : > { %v1164_v47 = vsel %vm14577_vm5, %v1162_v43, %v1163_v36  ;;  %v555_v49 = vld [vmem:[%s14548_s26 + $0x24] sm:$0xf]  ;;  %v663_v50 = vrot.slane %v662_v44, 4  ;;  %521 = vst [vmem:[#allocation2 + $0xfc] sm:$0xf] %v489_v48  ;;  %v2996_v55 = vld [vmem:[#allocation2 + $0x48] sm:$0xff]  ;;  %v658_v58 = vsel %vm14566_vm4, %v653_v46, %v657_v31  ;;  %12538 = vmatprep.subr.bf16.mxu0 %v13611_v8 }
  0x90   : > { %1293 = vst [vmem:[#allocation2 + $0xbc] sm:$0xf] %v1164_v47  ;;  %v556_v51 = vld [vmem:[%s14548_s26 + $0x28] sm:$0xf]  ;;  %v557_v52 = vld [vmem:[%s14548_s26 + $0x2c] sm:$0x1] }
  0x91   : > { %v670_v53 = vshrl.u32 %v555_v49, 16  ;;  %v13567_v56 = vld [vmem:[#allocation2 + $0x54] ss:$36 sps:$4 sm:$0xff]   ;;  %v673_v59 = vshll.u32 %v555_v49, 16  ;;  %v679_v60 = vshll.u32 %v556_v51, 16  ;;  %v3001_v61 = vld [vmem:[#allocation2 + $0x6c] sm:$0xff]  ;;  %v668_v0 = vsel %vm14566_vm4, %v663_v50, %v667_v41 }
  0x92   : > { %v13565_v62 = vld [vmem:[#allocation2 + $0x4c] ss:$36 sps:$4 sm:$0xff]   ;;  %1017 = vst [vmem:[#allocation2 + $0x94] sm:$0xf] %v658_v58  ;;  %4659 = vmatprep.mubr.bf16.mxu1 %v13567_v56  ;;  %v11759_v2 = vcombine.low %v2996_v55, %v3001_v61  ;;  %1018 = vst [vmem:[#allocation2 + $0xb8] sm:$0xf] %v668_v0 }
  0x93   : > { %v13569_v63 = vld [vmem:[#allocation2 + $0x50] ss:$36 sps:$4 sm:$0xff]   ;;  %v672_v1 = vrot.slane %v670_v53, 4  ;;  %v675_v3 = vrot.slane %v673_v59, 5  ;;  %v681_v5 = vrot.slane %v679_v60, 5  ;;  %v683_v6 = vshrl.u32 %v556_v51, 16  ;;  %4498 = vmatprep.mubr.bf16.mxu0 %v13565_v62 }
  0x94   : > { %v1054_v7 = vld [vmem:[%s14548_s26 + $0x24] sm:$0xe]  ;;  %4660 = vmatmul.mubr.bf16.gmra.mxu1 %v13569_v63  ;;  %v689_v9 = vshll.u32 %v557_v52, 16  ;;  %v1055_v10 = vld [vmem:[%s14548_s26 + $0x28] sm:$0xf]  ;;  %v13612_v13 = vld [vmem:[%s17858_s2 + $0x118] sm:$0xff]   ;;  %4499 = vmatmul.mubr.bf16.gmra.mxu0 %v11759_v2 }
  0x95   : > { %v1056_v11 = vld [vmem:[%s14548_s26 + $0x2c] sm:$0x1]  ;;  %v11449_v12 = vrot.slane %v1054_v7, 9  ;;  %v676_v14 = vor.u32 %v675_v3, %v672_v1  ;;  %v685_v15 = vrot.slane %v683_v6, 4  ;;  %v1167_v16 = vrot.slane %v1055_v10, 5  ;;  %v13623_v22 = vld [vmem:[%s17858_s2 + $0x150] sm:$0xff]   ;;  %12539 = vmatpush3.bf16.msra.mxu0 %v13612_v13 }
  0x96   : > { %v1170_v17 = vrot.slane %v1056_v11, 5  ;;  %v11468_v18 = vld [vmem:[%s14548_s26 + $0x30] sm:$0xf]  ;;  %v691_v19 = vrot.slane %v689_v9, 5  ;;  %v11469_v20 = vld [vmem:[%s14548_s26 + $0x34] sm:$0xf]  ;;  %12540 = vmatprep.subr.bf16.mxu0 %v13623_v22 }
  0x97   : > { %1359 = vst [vmem:[#allocation2 + $0xe4] sm:$0xf] %v11468_v18  ;;  %v490_v21 = vld [vmem:[%s14548_s26 + $0x30] sm:$0xf]  ;;  %v13572_v23 = vld [vmem:[#allocation2 + $0x9c] ss:$36 sps:$4 sm:$0xff]   ;;  %v686_v26 = vor.u32 %v685_v15, %v681_v5  ;;  %v1168_v27 = vsel %vm14577_vm5, %v11449_v12, %v1167_v16 }
  0x98   : > { %v13574_v24 = vld [vmem:[#allocation2 + $0x98] ss:$36 sps:$4 sm:$0xff]   ;;  %v677_v25 = vrot.slane %v676_v14, 4  ;;  %1360 = vst [vmem:[#allocation2 + $0x108] sm:$0xf] %v11469_v20  ;;  %v1169_v28 = vrot.slane %v1167_v16, 4  ;;  %4667 = vmatprep.mubr.bf16.mxu1 %v13572_v23 }
  0x99   : > { %522 = vst [vmem:[#allocation2 + $0x120] sm:$0xf] %v490_v21  ;;  %1294 = vst [vmem:[#allocation2 + $0xe0] sm:$0xf] %v1168_v27  ;;  %v491_v29 = vld [vmem:[%s14548_s26 + $0x34] sm:$0xf] }
  0x9a   : > { %v558_v30 = vld [vmem:[%s14548_s26 + $0x30] sm:$0xf]  ;;  %v682_v33 = vsel %vm14566_vm4, %v677_v25, %v681_v5  ;;  %v687_v34 = vrot.slane %v686_v26, 4  ;;  %523 = vst [vmem:[#allocation2 + $0x144] sm:$0xf] %v491_v29  ;;  %v3011_v37 = vld [vmem:[#allocation2 + $0xb4] sm:$0xff]  ;;  %v1171_v39 = vsel %vm14577_vm5, %v1169_v28, %v1170_v17 }
  0x9b   : > { %v13624_v31 = vld [vmem:[%s17858_s2 + $0x110] sm:$0xff]   ;;  %v560_v36 = vld [vmem:[%s14548_s26 + $0x38] sm:$0x1]  ;;  %1019 = vst [vmem:[#allocation2 + $0xdc] sm:$0xf] %v682_v33  ;;  %v694_v40 = vshrl.u32 %v558_v30, 16 }
  0x9c   : > { %v3006_v32 = vld [vmem:[#allocation2 + $0x90] sm:$0xff]  ;;  %v697_v41 = vshll.u32 %v558_v30, 16  ;;  %v692_v44 = vsel %vm14566_vm4, %v687_v34, %v691_v19  ;;  %1295 = vst [vmem:[#allocation2 + $0x104] sm:$0xf] %v1171_v39  ;;  %v713_v46 = vshll.u32 %v560_v36, 16  ;;  %4668 = vmatmul.mubr.bf16.gmra.mxu1 %v13574_v24  ;;  %12541 = vmatpush3.bf16.msra.mxu0 %v13624_v31  ;;  %v13635_v5 = vld [vmem:[%s17858_s2 + $0x148] sm:$0xff]  }
  0x9d   : > { %v559_v35 = vld [vmem:[%s14548_s26 + $0x34] sm:$0xf]  ;;  %v11768_v43 = vcombine.low %v3006_v32, %v3011_v37  ;;  %v1057_v47 = vld [vmem:[%s14548_s26 + $0x30] sm:$0xe]  ;;  %1020 = vst [vmem:[#allocation2 + $0x100] sm:$0xf] %v692_v44  ;;  %12542 = vmatprep.subr.bf16.mxu0 %v13635_v5 }
  0x9e   : > { %v13570_v38 = vld [vmem:[#allocation2 + $0x94] ss:$36 sps:$4 sm:$0xff]   ;;  %v703_v42 = vshll.u32 %v559_v35, 16  ;;  %v707_v45 = vshrl.u32 %v559_v35, 16  ;;  %v696_v49 = vrot.slane %v694_v40, 4  ;;  %v699_v50 = vrot.slane %v697_v41, 5 }
  0x9f   : > { %v1058_v48 = vld [vmem:[%s14548_s26 + $0x34] sm:$0xf]  ;;  %4506 = vmatprep.mubr.bf16.mxu0 %v13570_v38  ;;  %v1059_v52 = vld [vmem:[%s14548_s26 + $0x38] sm:$0x1]  ;;  %v11450_v53 = vrot.slane %v1057_v47, 9  ;;  %v715_v55 = vrot.slane %v713_v46, 5 }
  0xa0   : > { %v705_v51 = vrot.slane %v703_v42, 5  ;;  %4507 = vmatmul.mubr.bf16.gmra.mxu0 %v11768_v43  ;;  %v709_v54 = vrot.slane %v707_v45, 4  ;;  %v1174_v56 = vrot.slane %v1058_v48, 5  ;;  %v1177_v58 = vrot.slane %v1059_v52, 5  ;;  %v11470_v59 = vld [vmem:[%s14548_s26 + $0x3c] sm:$0xf] }
  0xa1   : > { %v700_v60 = vor.u32 %v699_v50, %v696_v49  ;;  %v11471_v61 = vld [vmem:[%s14548_s26 + $0x40] sm:$0xf]  ;;  %1361 = vst [vmem:[#allocation2 + $0x12c] sm:$0xf] %v11470_v59  ;;  %v492_v2 = vld [vmem:[%s14548_s26 + $0x3c] sm:$0xf] }
  0xa2   : > { %v710_v62 = vor.u32 %v709_v54, %v705_v51  ;;  %v1175_v63 = vsel %vm14577_vm5, %v11450_v53, %v1174_v56  ;;  %v1176_v0 = vrot.slane %v1174_v56, 4  ;;  %1362 = vst [vmem:[#allocation2 + $0x150] sm:$0xf] %v11471_v61  ;;  %v493_v3 = vld [vmem:[%s14548_s26 + $0x40] sm:$0xf]  ;;  %v3016_v6 = vld [vmem:[#allocation2 + $0xd8] sm:$0xff] }
  0xa3   : > { %v701_v1 = vrot.slane %v700_v60, 4  ;;  %1296 = vst [vmem:[#allocation2 + $0x128] sm:$0xf] %v1175_v63  ;;  %524 = vst [vmem:[#allocation2 + $0x168] sm:$0xf] %v492_v2  ;;  %v13636_v25 = vld [vmem:[%s17858_s2 + $0x108] sm:$0xff]  }
  0xa4   : > { %v711_v7 = vrot.slane %v710_v62, 4  ;;  %v1178_v8 = vsel %vm14577_vm5, %v1176_v0, %v1177_v58  ;;  %525 = vst [vmem:[#allocation2 + $0x18c] sm:$0xf] %v493_v3  ;;  %v561_v9 = vld [vmem:[%s14548_s26 + $0x3c] sm:$0xf]  ;;  %12543 = vmatpush3.bf16.msra.mxu0 %v13636_v25 }
  0xa5   : > { %v562_v10 = vld [vmem:[%s14548_s26 + $0x40] sm:$0xf]  ;;  %v13579_v11 = vld [vmem:[#allocation2 + $0xe4] ss:$36 sps:$4 sm:$0xff]   ;;  %v706_v13 = vsel %vm14566_vm4, %v701_v1, %v705_v51  ;;  %1297 = vst [vmem:[#allocation2 + $0x14c] sm:$0xf] %v1178_v8 }
  0xa6   : > { %v13581_v12 = vld [vmem:[#allocation2 + $0xe0] ss:$36 sps:$4 sm:$0xff]   ;;  %v718_v14 = vshrl.u32 %v561_v9, 16  ;;  %v716_v17 = vsel %vm14566_vm4, %v711_v7, %v715_v55  ;;  %1021 = vst [vmem:[#allocation2 + $0x124] sm:$0xf] %v706_v13  ;;  %v721_v19 = vshll.u32 %v561_v9, 16  ;;  %4675 = vmatprep.mubr.bf16.mxu1 %v13579_v11 }
  0xa7   : > { %v3021_v15 = vld [vmem:[#allocation2 + $0xfc] sm:$0xff]  ;;  %v563_v18 = vld [vmem:[%s14548_s26 + $0x44] sm:$0x1]  ;;  %1022 = vst [vmem:[#allocation2 + $0x148] sm:$0xf] %v716_v17  ;;  %v727_v22 = vshll.u32 %v562_v10, 16  ;;  %4676 = vmatmul.mubr.bf16.gmra.mxu1 %v13581_v12 }
  0xa8   : > { %v13577_v16 = vld [vmem:[#allocation2 + $0xdc] ss:$36 sps:$4 sm:$0xff]   ;;  %v11777_v20 = vcombine.low %v3016_v6, %v3021_v15  ;;  %v720_v21 = vrot.slane %v718_v14, 4  ;;  %v731_v23 = vshrl.u32 %v562_v10, 16  ;;  %v723_v26 = vrot.slane %v721_v19, 5 }
  0xa9   : > { %v1060_v24 = vld [vmem:[%s14548_s26 + $0x3c] sm:$0xe]  ;;  %4514 = vmatprep.mubr.bf16.mxu0 %v13577_v16  ;;  %v737_v27 = vshll.u32 %v563_v18, 16  ;;  %v1061_v28 = vld [vmem:[%s14548_s26 + $0x40] sm:$0xf]  ;;  %v729_v30 = vrot.slane %v727_v22, 5 }
  0xaa   : > { %v1062_v29 = vld [vmem:[%s14548_s26 + $0x44] sm:$0x1]  ;;  %4515 = vmatmul.mubr.bf16.gmra.mxu0 %v11777_v20  ;;  %v733_v31 = vrot.slane %v731_v23, 4  ;;  %v11451_v32 = vrot.slane %v1060_v24, 9  ;;  %v1181_v33 = vrot.slane %v1061_v28, 5  ;;  %v724_v35 = vor.u32 %v723_v26, %v720_v21  ;;  %v13637_v39 = vld [vmem:[%s17858_s2 + $0x1f8] sm:$0xff]  }
  0xab   : > { %v11472_v34 = vld [vmem:[%s14548_s26 + $0x48] sm:$0xf]  ;;  %v739_v36 = vrot.slane %v737_v27, 5  ;;  %v1184_v37 = vrot.slane %v1062_v29, 5  ;;  %v11473_v38 = vld [vmem:[%s14548_s26 + $0x4c] sm:$0xf]  ;;  %12642 = vmatprep.subr.bf16.mxu1 %v13637_v39 }
  0xac   : > { %1363 = vst [vmem:[#allocation2 + $0x174] sm:$0xf] %v11472_v34  ;;  %v734_v40 = vor.u32 %v733_v31, %v729_v30  ;;  %v1182_v41 = vsel %vm14577_vm5, %v11451_v32, %v1181_v33  ;;  %v1183_v42 = vrot.slane %v1181_v33, 4  ;;  %1364 = vst [vmem:[#allocation2 + $0x198] sm:$0xf] %v11473_v38  ;;  %v13638_v45 = vld [vmem:[%s17858_s2 + $0x1b8] sm:$0xff]  }
  0xad   : > { %v494_v43 = vld [vmem:[%s14548_s26 + $0x48] sm:$0xf]  ;;  %v495_v44 = vld [vmem:[%s14548_s26 + $0x4c] sm:$0xf]  ;;  %v725_v48 = vrot.slane %v724_v35, 4  ;;  %v3026_v49 = vld [vmem:[#allocation2 + $0x120] sm:$0xff]  ;;  %12643 = vmatpush3.bf16.msra.mxu1 %v13638_v45 }
  0xae   : > { %v13584_v46 = vld [vmem:[#allocation2 + $0x12c] ss:$36 sps:$4 sm:$0xff]   ;;  %1298 = vst [vmem:[#allocation2 + $0x170] sm:$0xf] %v1182_v41  ;;  %526 = vst [vmem:[#allocation2 + $0x1b0] sm:$0xf] %v494_v43  ;;  %v1185_v51 = vsel %vm14577_vm5, %v1183_v42, %v1184_v37 }
  0xaf   : > { %v13586_v47 = vld [vmem:[#allocation2 + $0x128] ss:$36 sps:$4 sm:$0xff]   ;;  %527 = vst [vmem:[#allocation2 + $0x1d4] sm:$0xf] %v495_v44  ;;  %v735_v50 = vrot.slane %v734_v40, 4  ;;  %4683 = vmatprep.mubr.bf16.mxu1 %v13584_v46  ;;  %v730_v56 = vsel %vm14566_vm4, %v725_v48, %v729_v30 }
  0xb0   : > { %v564_v52 = vld [vmem:[%s14548_s26 + $0x48] sm:$0xf]  ;;  %v565_v53 = vld [vmem:[%s14548_s26 + $0x4c] sm:$0xf]  ;;  %1299 = vst [vmem:[#allocation2 + $0x194] sm:$0xf] %v1185_v51  ;;  %4684 = vmatmul.mubr.bf16.gmra.mxu1 %v13586_v47 }
  0xb1   : > { %v3031_v54 = vld [vmem:[#allocation2 + $0x144] sm:$0xff]  ;;  %v566_v58 = vld [vmem:[%s14548_s26 + $0x50] sm:$0x1]  ;;  %v742_v59 = vshrl.u32 %v564_v52, 16  ;;  %v740_v61 = vsel %vm14566_vm4, %v735_v50, %v739_v36  ;;  %1023 = vst [vmem:[#allocation2 + $0x16c] sm:$0xf] %v730_v56 }
  0xb2   : > { %v13582_v55 = vld [vmem:[#allocation2 + $0x124] ss:$36 sps:$4 sm:$0xff]   ;;  %v11786_v60 = vcombine.low %v3026_v49, %v3031_v54  ;;  %v745_v62 = vshll.u32 %v564_v52, 16  ;;  %v751_v63 = vshll.u32 %v565_v53, 16  ;;  %v1064_v1 = vld [vmem:[%s14548_s26 + $0x4c] sm:$0xf] }
  0xb3   : > { %v1063_v0 = vld [vmem:[%s14548_s26 + $0x48] sm:$0xe]  ;;  %4522 = vmatprep.mubr.bf16.mxu0 %v13582_v55  ;;  %1024 = vst [vmem:[#allocation2 + $0x190] sm:$0xf] %v740_v61  ;;  %v744_v2 = vrot.slane %v742_v59, 4  ;;  %v755_v3 = vshrl.u32 %v565_v53, 16 }
  0xb4   : > { %v761_v5 = vshll.u32 %v566_v58, 16  ;;  %v1065_v6 = vld [vmem:[%s14548_s26 + $0x50] sm:$0x1]  ;;  %v11452_v7 = vrot.slane %v1063_v0, 9  ;;  %4523 = vmatmul.mubr.bf16.gmra.mxu0 %v11786_v60  ;;  %v747_v8 = vrot.slane %v745_v62, 5  ;;  %v753_v9 = vrot.slane %v751_v63, 5 }
  0xb5   : > { %v1188_v10 = vrot.slane %v1064_v1, 5  ;;  %v1191_v11 = vrot.slane %v1065_v6, 5  ;;  %v11474_v12 = vld [vmem:[%s14548_s26 + $0x54] sm:$0xf]  ;;  %v757_v13 = vrot.slane %v755_v3, 4  ;;  %v13646_v6 = vld [vmem:[%s17858_s2 + $0x1e8] sm:$0xff]  }
  0xb6   : > { %v763_v14 = vrot.slane %v761_v5, 5  ;;  %v11475_v15 = vld [vmem:[%s14548_s26 + $0x58] sm:$0xf]  ;;  %1365 = vst [vmem:[#allocation2 + $0x1bc] sm:$0xf] %v11474_v12  ;;  %v748_v16 = vor.u32 %v747_v8, %v744_v2  ;;  %v13639_v53 = vld [vmem:[%s17858_s2 + $0x1f0] sm:$0xff]  }
  0xb7   : > { %v1189_v17 = vsel %vm14577_vm5, %v11452_v7, %v1188_v10  ;;  %v1190_v18 = vrot.slane %v1188_v10, 4  ;;  %1366 = vst [vmem:[#allocation2 + $0x1e0] sm:$0xf] %v11475_v15  ;;  %v758_v19 = vor.u32 %v757_v13, %v753_v9  ;;  %v496_v20 = vld [vmem:[%s14548_s26 + $0x54] sm:$0xf]  ;;  %12644 = vmatprep.subr.bf16.mxu1 %v13639_v53 }
  0xb8   : > { %1300 = vst [vmem:[#allocation2 + $0x1b8] sm:$0xf] %v1189_v17  ;;  %v497_v21 = vld [vmem:[%s14548_s26 + $0x58] sm:$0xf]  ;;  %v13593_v23 = vld [vmem:[#allocation2 + $0x170] ss:$36 sps:$4 sm:$0xff]  }
  0xb9   : > { %v13591_v22 = vld [vmem:[#allocation2 + $0x174] ss:$36 sps:$4 sm:$0xff]   ;;  %v749_v24 = vrot.slane %v748_v16, 4  ;;  %v1192_v25 = vsel %vm14577_vm5, %v1190_v18, %v1191_v11  ;;  %528 = vst [vmem:[#allocation2 + $0x1f8] sm:$0xf] %v496_v20  ;;  %v3036_v26 = vld [vmem:[#allocation2 + $0x168] sm:$0xff] }
  0xba   : > { %529 = vst [vmem:[#allocation2 + $0x21c] sm:$0xf] %v497_v21  ;;  %v759_v27 = vrot.slane %v758_v19, 4  ;;  %1301 = vst [vmem:[#allocation2 + $0x1dc] sm:$0xf] %v1192_v25  ;;  %v3041_v30 = vld [vmem:[#allocation2 + $0x18c] sm:$0xff]  ;;  %4691 = vmatprep.mubr.bf16.mxu1 %v13591_v22 }
  0xbb   : > { %v567_v28 = vld [vmem:[%s14548_s26 + $0x54] sm:$0xf]  ;;  %v568_v29 = vld [vmem:[%s14548_s26 + $0x58] sm:$0xf]  ;;  %v13589_v31 = vld [vmem:[#allocation2 + $0x16c] ss:$36 sps:$4 sm:$0xff]   ;;  %v754_v32 = vsel %vm14566_vm4, %v749_v24, %v753_v9  ;;  %v11795_v35 = vcombine.low %v3036_v26, %v3041_v30  ;;  %4692 = vmatmul.mubr.bf16.gmra.mxu1 %v13593_v23 }
  0xbc   : > { %v569_v33 = vld [vmem:[%s14548_s26 + $0x5c] sm:$0x1]  ;;  %v766_v34 = vshrl.u32 %v567_v28, 16  ;;  %v764_v36 = vsel %vm14566_vm4, %v759_v27, %v763_v14  ;;  %1025 = vst [vmem:[#allocation2 + $0x1b4] sm:$0xf] %v754_v32  ;;  %v769_v37 = vshll.u32 %v567_v28, 16  ;;  %4530 = vmatprep.mubr.bf16.mxu0 %v13589_v31 }
  0xbd   : > { %v775_v38 = vshll.u32 %v568_v29, 16  ;;  %v1066_v39 = vld [vmem:[%s14548_s26 + $0x54] sm:$0xe]  ;;  %v1067_v40 = vld [vmem:[%s14548_s26 + $0x58] sm:$0xf]  ;;  %v779_v42 = vshrl.u32 %v568_v29, 16  ;;  %4531 = vmatmul.mubr.bf16.gmra.mxu0 %v11795_v35 }
  0xbe   : > { %1026 = vst [vmem:[#allocation2 + $0x1d8] sm:$0xf] %v764_v36  ;;  %v768_v41 = vrot.slane %v766_v34, 4  ;;  %v785_v43 = vshll.u32 %v569_v33, 16  ;;  %v1068_v44 = vld [vmem:[%s14548_s26 + $0x5c] sm:$0x1] }
  0xbf   : > { %v11453_v45 = vrot.slane %v1066_v39, 9  ;;  %v771_v46 = vrot.slane %v769_v37, 5  ;;  %v777_v47 = vrot.slane %v775_v38, 5  ;;  %v1195_v48 = vrot.slane %v1067_v40, 5  ;;  %v11476_v50 = vld [vmem:[%s14548_s26 + $0x60] sm:$0xf] }
  0xc0   : > { %v1198_v49 = vrot.slane %v1068_v44, 5  ;;  %v781_v51 = vrot.slane %v779_v42, 4  ;;  %v11477_v52 = vld [vmem:[%s14548_s26 + $0x64] sm:$0xf]  ;;  %1367 = vst [vmem:[#allocation2 + $0x204] sm:$0xf] %v11476_v50 }
  0xc1   : > { %v772_v54 = vor.u32 %v771_v46, %v768_v41  ;;  %v1196_v55 = vsel %vm14577_vm5, %v11453_v45, %v1195_v48  ;;  %v1197_v56 = vrot.slane %v1195_v48, 4  ;;  %1368 = vst [vmem:[#allocation2 + $0x228] sm:$0xf] %v11477_v52  ;;  %v498_v58 = vld [vmem:[%s14548_s26 + $0x60] sm:$0xf]  ;;  %v13644_v60 = vld [vmem:[%s17858_s2 + $0x1b0] sm:$0xff]  }
  0xc2   : > { %v499_v59 = vld [vmem:[%s14548_s26 + $0x64] sm:$0xf]  ;;  %v13596_v61 = vld [vmem:[#allocation2 + $0x1bc] ss:$36 sps:$4 sm:$0xff]   ;;  %v782_v63 = vor.u32 %v781_v51, %v777_v47  ;;  %v787_v0 = vrot.slane %v785_v43, 5  ;;  %12645 = vmatpush3.bf16.msra.mxu1 %v13644_v60 }
  0xc3   : > { %v13598_v62 = vld [vmem:[#allocation2 + $0x1b8] ss:$36 sps:$4 sm:$0xff]   ;;  %1302 = vst [vmem:[#allocation2 + $0x200] sm:$0xf] %v1196_v55  ;;  %530 = vst [vmem:[#allocation2 + $0x240] sm:$0xf] %v498_v58  ;;  %v1199_v2 = vsel %vm14577_vm5, %v1197_v56, %v1198_v49  ;;  %4699 = vmatprep.mubr.bf16.mxu1 %v13596_v61  ;;  %12646 = vmatprep.subr.bf16.mxu1 %v13646_v6 }
  0xc4   : > { %531 = vst [vmem:[#allocation2 + $0x264] sm:$0xf] %v499_v59  ;;  %v773_v1 = vrot.slane %v772_v54, 4  ;;  %v570_v3 = vld [vmem:[%s14548_s26 + $0x60] sm:$0xf]  ;;  %v3046_v7 = vld [vmem:[#allocation2 + $0x1b0] sm:$0xff]  ;;  %4700 = vmatmul.mubr.bf16.gmra.mxu1 %v13598_v62 }
  0xc5   : > { %v571_v5 = vld [vmem:[%s14548_s26 + $0x64] sm:$0xf]  ;;  %v783_v8 = vrot.slane %v782_v63, 4  ;;  %1303 = vst [vmem:[#allocation2 + $0x224] sm:$0xf] %v1199_v2  ;;  %v790_v10 = vshrl.u32 %v570_v3, 16 }
  0xc6   : > { %v572_v9 = vld [vmem:[%s14548_s26 + $0x68] sm:$0x1]  ;;  %v793_v11 = vshll.u32 %v570_v3, 16  ;;  %v3051_v12 = vld [vmem:[#allocation2 + $0x1d4] sm:$0xff]  ;;  %v778_v14 = vsel %vm14566_vm4, %v773_v1, %v777_v47  ;;  %v799_v15 = vshll.u32 %v571_v5, 16  ;;  %v803_v16 = vshrl.u32 %v571_v5, 16 }
  0xc7   : > { %v13594_v13 = vld [vmem:[#allocation2 + $0x1b4] ss:$36 sps:$4 sm:$0xff]   ;;  %v809_v17 = vshll.u32 %v572_v9, 16  ;;  %v11804_v18 = vcombine.low %v3046_v7, %v3051_v12  ;;  %v788_v19 = vsel %vm14566_vm4, %v783_v8, %v787_v0  ;;  %1027 = vst [vmem:[#allocation2 + $0x1fc] sm:$0xf] %v778_v14  ;;  %v792_v20 = vrot.slane %v790_v10, 4 }
  0xc8   : > { %v795_v21 = vrot.slane %v793_v11, 5  ;;  %v1069_v22 = vld [vmem:[%s14548_s26 + $0x60] sm:$0xe]  ;;  %v1070_v23 = vld [vmem:[%s14548_s26 + $0x64] sm:$0xf]  ;;  %4538 = vmatprep.mubr.bf16.mxu0 %v13594_v13  ;;  %v801_v24 = vrot.slane %v799_v15, 5 }
  0xc9   : > { %1028 = vst [vmem:[#allocation2 + $0x220] sm:$0xf] %v788_v19  ;;  %v805_v25 = vrot.slane %v803_v16, 4  ;;  %v1071_v26 = vld [vmem:[%s14548_s26 + $0x68] sm:$0x1]  ;;  %v11454_v27 = vrot.slane %v1069_v22, 9  ;;  %4539 = vmatmul.mubr.bf16.gmra.mxu0 %v11804_v18 }
  0xca   : > { %v796_v28 = vor.u32 %v795_v21, %v792_v20  ;;  %v1202_v29 = vrot.slane %v1070_v23, 5  ;;  %v1205_v30 = vrot.slane %v1071_v26, 5  ;;  %v11478_v31 = vld [vmem:[%s14548_s26 + $0x6c] sm:$0xf]  ;;  %v11479_v32 = vld [vmem:[%s14548_s26 + $0x70] sm:$0xf] }
  0xcb   : > { %v806_v33 = vor.u32 %v805_v25, %v801_v24  ;;  %v811_v34 = vrot.slane %v809_v17, 5  ;;  %1369 = vst [vmem:[#allocation2 + $0x24c] sm:$0xf] %v11478_v31  ;;  %1370 = vst [vmem:[#allocation2 + $0x270] sm:$0xf] %v11479_v32  ;;  %v13647_v7 = vld [vmem:[%s17858_s2 + $0x1a8] sm:$0xff]  }
  0xcc   : > { %v797_v35 = vrot.slane %v796_v28, 4  ;;  %v1203_v36 = vsel %vm14577_vm5, %v11454_v27, %v1202_v29  ;;  %v1204_v37 = vrot.slane %v1202_v29, 4  ;;  %v13603_v38 = vld [vmem:[#allocation2 + $0x204] ss:$36 sps:$4 sm:$0xff]   ;;  %v500_v43 = vld [vmem:[%s14548_s26 + $0x6c] sm:$0xf]  ;;  %12647 = vmatpush3.bf16.msra.mxu1 %v13647_v7 }
  0xcd   : > { %v13605_v39 = vld [vmem:[#allocation2 + $0x200] ss:$36 sps:$4 sm:$0xff]   ;;  %v807_v40 = vrot.slane %v806_v33, 4  ;;  %1304 = vst [vmem:[#allocation2 + $0x248] sm:$0xf] %v1203_v36  ;;  %4707 = vmatprep.mubr.bf16.mxu1 %v13603_v38 }
  0xce   : > { %v802_v41 = vsel %vm14566_vm4, %v797_v35, %v801_v24  ;;  %v1206_v42 = vsel %vm14577_vm5, %v1204_v37, %v1205_v30  ;;  %v501_v44 = vld [vmem:[%s14548_s26 + $0x70] sm:$0xf]  ;;  %v573_v45 = vld [vmem:[%s14548_s26 + $0x6c] sm:$0xf]  ;;  %v3056_v46 = vld [vmem:[#allocation2 + $0x1f8] sm:$0xff]  ;;  %4708 = vmatmul.mubr.bf16.gmra.mxu1 %v13605_v39 }
  0xcf   : > { %v812_v47 = vsel %vm14566_vm4, %v807_v40, %v811_v34  ;;  %1029 = vst [vmem:[#allocation2 + $0x244] sm:$0xf] %v802_v41  ;;  %1305 = vst [vmem:[#allocation2 + $0x26c] sm:$0xf] %v1206_v42  ;;  %v574_v48 = vld [vmem:[%s14548_s26 + $0x70] sm:$0xf] }
  0xd0   : > { %532 = vst [vmem:[#allocation2 + $0x288] sm:$0xf] %v500_v43  ;;  %533 = vst [vmem:[#allocation2 + $0x2ac] sm:$0xf] %v501_v44  ;;  %v575_v49 = vld [vmem:[%s14548_s26 + $0x74] sm:$0x1] }
  0xd1   : > { %v814_v50 = vshrl.u32 %v573_v45, 16  ;;  %v3061_v51 = vld [vmem:[#allocation2 + $0x21c] sm:$0xff]  ;;  %1030 = vst [vmem:[#allocation2 + $0x268] sm:$0xf] %v812_v47  ;;  %v817_v53 = vshll.u32 %v573_v45, 16  ;;  %v823_v54 = vshll.u32 %v574_v48, 16 }
  0xd2   : > { %v13601_v52 = vld [vmem:[#allocation2 + $0x1fc] ss:$36 sps:$4 sm:$0xff]   ;;  %v827_v55 = vshrl.u32 %v574_v48, 16  ;;  %v11813_v56 = vcombine.low %v3056_v46, %v3061_v51  ;;  %v833_v59 = vshll.u32 %v575_v49, 16  ;;  %v1072_v60 = vld [vmem:[%s14548_s26 + $0x6c] sm:$0xe] }
  0xd3   : > { %v816_v58 = vrot.slane %v814_v50, 4  ;;  %v1073_v61 = vld [vmem:[%s14548_s26 + $0x70] sm:$0xf]  ;;  %4546 = vmatprep.mubr.bf16.mxu0 %v13601_v52  ;;  %v819_v62 = vrot.slane %v817_v53, 5  ;;  %v825_v63 = vrot.slane %v823_v54, 5  ;;  %v11455_v2 = vrot.slane %v1072_v60, 9 }
  0xd4   : > { %v829_v0 = vrot.slane %v827_v55, 4  ;;  %v1074_v1 = vld [vmem:[%s14548_s26 + $0x74] sm:$0x1]  ;;  %4547 = vmatmul.mubr.bf16.gmra.mxu0 %v11813_v56  ;;  %v1209_v3 = vrot.slane %v1073_v61, 5  ;;  %v11480_v6 = vld [vmem:[%s14548_s26 + $0x78] sm:$0xf] }
  0xd5   : > { %v1212_v5 = vrot.slane %v1074_v1, 5  ;;  %v820_v8 = vor.u32 %v819_v62, %v816_v58  ;;  %v835_v10 = vrot.slane %v833_v59, 5  ;;  %v11481_v11 = vld [vmem:[%s14548_s26 + $0x7c] sm:$0xf]  ;;  %1371 = vst [vmem:[#allocation2 + $0x294] sm:$0xf] %v11480_v6 }
  0xd6   : > { %v830_v9 = vor.u32 %v829_v0, %v825_v63  ;;  %v502_v12 = vld [vmem:[%s14548_s26 + $0x78] sm:$0xf]  ;;  %v1210_v13 = vsel %vm14577_vm5, %v11455_v2, %v1209_v3  ;;  %v1211_v14 = vrot.slane %v1209_v3, 4  ;;  %1372 = vst [vmem:[#allocation2 + $0x2b8] sm:$0xf] %v11481_v11  ;;  %v13648_v17 = vld [vmem:[%s17858_s2 + $0x1e0] sm:$0xff]  }
  0xd7   : > { %v503_v15 = vld [vmem:[%s14548_s26 + $0x7c] sm:$0xf]  ;;  %534 = vst [vmem:[#allocation2 + $0x2d0] sm:$0xf] %v502_v12  ;;  %v576_v16 = vld [vmem:[%s14548_s26 + $0x78] sm:$0xf]  ;;  %12648 = vmatprep.subr.bf16.mxu1 %v13648_v17 }
  0xd8   : > { %v3066_v18 = vld [vmem:[#allocation2 + $0x240] sm:$0xff]  ;;  %v13608_v19 = vld [vmem:[#allocation2 + $0x24c] ss:$36 sps:$4 sm:$0xff]   ;;  %v821_v20 = vrot.slane %v820_v8, 4  ;;  %v831_v21 = vrot.slane %v830_v9, 4  ;;  %v1213_v25 = vsel %vm14577_vm5, %v1211_v14, %v1212_v5  ;;  %v838_v26 = vshrl.u32 %v576_v16, 16 }
  0xd9   : > { %1306 = vst [vmem:[#allocation2 + $0x290] sm:$0xf] %v1210_v13  ;;  %535 = vst [vmem:[#allocation2 + $0x2f4] sm:$0xf] %v503_v15  ;;  %v3071_v22 = vld [vmem:[#allocation2 + $0x264] sm:$0xff]  ;;  %4715 = vmatprep.mubr.bf16.mxu1 %v13608_v19  ;;  %v841_v32 = vshll.u32 %v576_v16, 16 }
  0xda   : > { %v13606_v23 = vld [vmem:[#allocation2 + $0x244] ss:$36 sps:$4 sm:$0xff]   ;;  %v11822_v27 = vcombine.low %v3066_v18, %v3071_v22  ;;  %v826_v28 = vsel %vm14566_vm4, %v821_v20, %v825_v63  ;;  %v836_v29 = vsel %vm14566_vm4, %v831_v21, %v835_v10  ;;  %1307 = vst [vmem:[#allocation2 + $0x2b4] sm:$0xf] %v1213_v25  ;;  %v577_v30 = vld [vmem:[%s14548_s26 + $0x7c] sm:$0xf] }
  0xdb   : > { %v13610_v24 = vld [vmem:[#allocation2 + $0x248] ss:$36 sps:$4 sm:$0xff]   ;;  %v578_v31 = vld [vmem:[%s14548_s26 + $0x80] sm:$0x1]  ;;  %4554 = vmatprep.mubr.bf16.mxu0 %v13606_v23  ;;  %1031 = vst [vmem:[#allocation2 + $0x28c] sm:$0xf] %v826_v28 }
  0xdc   : > { %v13653_v33 = vld [vmem:[%s17858_s2 + $0x1a0] sm:$0xff]   ;;  %4716 = vmatmul.mubr.bf16.gmra.mxu1 %v13610_v24  ;;  %1032 = vst [vmem:[#allocation2 + $0x2b0] sm:$0xf] %v836_v29  ;;  %v840_v34 = vrot.slane %v838_v26, 4  ;;  %v847_v35 = vshll.u32 %v577_v30, 16  ;;  %v851_v36 = vshrl.u32 %v577_v30, 16  ;;  %4555 = vmatmul.mubr.bf16.gmra.mxu0 %v11822_v27 }
  0xdd   : > { %v857_v37 = vshll.u32 %v578_v31, 16  ;;  %v1075_v38 = vld [vmem:[%s14548_s26 + $0x78] sm:$0xe]  ;;  %v843_v39 = vrot.slane %v841_v32, 5  ;;  %v1076_v40 = vld [vmem:[%s14548_s26 + $0x7c] sm:$0xf]  ;;  %12649 = vmatpush3.bf16.msra.mxu1 %v13653_v33 }
  0xde   : > { %v1077_v41 = vld [vmem:[%s14548_s26 + $0x80] sm:$0x1]  ;;  %v11456_v42 = vrot.slane %v1075_v38, 9  ;;  %v849_v43 = vrot.slane %v847_v35, 5  ;;  %v853_v44 = vrot.slane %v851_v36, 4  ;;  %v1216_v46 = vrot.slane %v1076_v40, 5 }
  0xdf   : > { %v859_v45 = vrot.slane %v857_v37, 5  ;;  %v11482_v47 = vld [vmem:[%s14548_s26 + $0x84] sm:$0xf]  ;;  %v844_v48 = vor.u32 %v843_v39, %v840_v34  ;;  %v1219_v49 = vrot.slane %v1077_v41, 5  ;;  %v11483_v50 = vld [vmem:[%s14548_s26 + $0x88] sm:$0xf] }
  0xe0   : > { %1373 = vst [vmem:[#allocation2 + $0x2dc] sm:$0xf] %v11482_v47  ;;  %v13655_v51 = vld [vmem:[%s17858_s2 + $0x140] sm:$0xff]   ;;  %v854_v52 = vor.u32 %v853_v44, %v849_v43  ;;  %v1217_v53 = vsel %vm14577_vm5, %v11456_v42, %v1216_v46  ;;  %v1218_v54 = vrot.slane %v1216_v46, 4  ;;  %1374 = vst [vmem:[#allocation2 + $0x300] sm:$0xf] %v11483_v50 }
  0xe1   : > { %v845_v55 = vrot.slane %v844_v48, 4  ;;  %1308 = vst [vmem:[#allocation2 + $0x2d8] sm:$0xf] %v1217_v53  ;;  %v504_v56 = vld [vmem:[%s14548_s26 + $0x84] sm:$0xf]  ;;  %12544 = vmatprep.subr.bf16.mxu0 %v13655_v51  ;;  %v13657_v17 = vld [vmem:[%s17858_s2 + $0x1d8] sm:$0xff]  }
  0xe2   : > { %v13656_v58 = vld [vmem:[%s17858_s2 + $0x100] sm:$0xff]   ;;  %v13615_v59 = vld [vmem:[#allocation2 + $0x294] ss:$36 sps:$4 sm:$0xff]   ;;  %v855_v61 = vrot.slane %v854_v52, 4  ;;  %v1220_v62 = vsel %vm14577_vm5, %v1218_v54, %v1219_v49  ;;  %536 = vst [vmem:[#allocation2 + $0x318] sm:$0xf] %v504_v56  ;;  %12650 = vmatprep.subr.bf16.mxu1 %v13657_v17 }
  0xe3   : > { %v13617_v60 = vld [vmem:[#allocation2 + $0x290] ss:$36 sps:$4 sm:$0xff]   ;;  %v3076_v63 = vld [vmem:[#allocation2 + $0x288] sm:$0xff]  ;;  %v850_v2 = vsel %vm14566_vm4, %v845_v55, %v849_v43  ;;  %1309 = vst [vmem:[#allocation2 + $0x2fc] sm:$0xf] %v1220_v62  ;;  %12545 = vmatpush3.bf16.msra.mxu0 %v13656_v58  ;;  %4723 = vmatprep.mubr.bf16.mxu1 %v13615_v59  ;;  %v13658_v27 = vld [vmem:[%s17858_s2 + $0x198] sm:$0xff]  }
  0xe4   : > { %v3081_v0 = vld [vmem:[#allocation2 + $0x2ac] sm:$0xff]  ;;  %v860_v5 = vsel %vm14566_vm4, %v855_v61, %v859_v45  ;;  %1033 = vst [vmem:[#allocation2 + $0x2d4] sm:$0xf] %v850_v2  ;;  %v505_v6 = vld [vmem:[%s14548_s26 + $0x88] sm:$0xf]  ;;  %4724 = vmatmul.mubr.bf16.gmra.mxu1 %v13617_v60 }
  0xe5   : > { %v13613_v1 = vld [vmem:[#allocation2 + $0x28c] ss:$36 sps:$4 sm:$0xff]   ;;  %v11831_v3 = vcombine.low %v3076_v63, %v3081_v0  ;;  %v579_v7 = vld [vmem:[%s14548_s26 + $0x84] sm:$0xf]  ;;  %v580_v8 = vld [vmem:[%s14548_s26 + $0x88] sm:$0xf]  ;;  %12651 = vmatpush3.bf16.msra.mxu1 %v13658_v27 }
  0xe6   : > { %4562 = vmatprep.mubr.bf16.mxu0 %v13613_v1  ;;  %1034 = vst [vmem:[#allocation2 + $0x2f8] sm:$0xf] %v860_v5  ;;  %537 = vst [vmem:[#allocation2 + $0x33c] sm:$0xf] %v505_v6  ;;  %v581_v9 = vld [vmem:[%s14548_s26 + $0x8c] sm:$0x1] }
  0xe7   : > { %v862_v10 = vshrl.u32 %v579_v7, 16  ;;  %v865_v11 = vshll.u32 %v579_v7, 16  ;;  %v871_v12 = vshll.u32 %v580_v8, 16  ;;  %v875_v13 = vshrl.u32 %v580_v8, 16  ;;  %4563 = vmatmul.mubr.bf16.gmra.mxu0 %v11831_v3  ;;  %v1078_v15 = vld [vmem:[%s14548_s26 + $0x84] sm:$0xe] }
  0xe8   : > { %v881_v14 = vshll.u32 %v581_v9, 16  ;;  %v1079_v16 = vld [vmem:[%s14548_s26 + $0x88] sm:$0xf]  ;;  %v1080_v22 = vld [vmem:[%s14548_s26 + $0x8c] sm:$0x1]  ;;  %v11457_v24 = vrot.slane %v1078_v15, 9 }
  0xe9   : > { %v864_v18 = vrot.slane %v862_v10, 4  ;;  %v867_v19 = vrot.slane %v865_v11, 5  ;;  %v873_v20 = vrot.slane %v871_v12, 5  ;;  %v877_v21 = vrot.slane %v875_v13, 4  ;;  %v11484_v30 = vld [vmem:[%s14548_s26 + $0x90] sm:$0xf] }
  0xea   : > { %v883_v23 = vrot.slane %v881_v14, 5  ;;  %v1223_v25 = vrot.slane %v1079_v16, 5  ;;  %v1226_v26 = vrot.slane %v1080_v22, 5  ;;  %v11485_v31 = vld [vmem:[%s14548_s26 + $0x94] sm:$0xf]  ;;  %v13666_v12 = vld [vmem:[%s17858_s2 + $0x1c8] sm:$0xff]  }
  0xeb   : > { %v868_v28 = vor.u32 %v867_v19, %v864_v18  ;;  %v878_v29 = vor.u32 %v877_v21, %v873_v20  ;;  %v506_v32 = vld [vmem:[%s14548_s26 + $0x90] sm:$0xf]  ;;  %v13620_v33 = vld [vmem:[#allocation2 + $0x2dc] ss:$36 sps:$4 sm:$0xff]   ;;  %1375 = vst [vmem:[#allocation2 + $0x324] sm:$0xf] %v11484_v30 }
  0xec   : > { %v13622_v34 = vld [vmem:[#allocation2 + $0x2d8] ss:$36 sps:$4 sm:$0xff]   ;;  %v1224_v35 = vsel %vm14577_vm5, %v11457_v24, %v1223_v25  ;;  %v1225_v36 = vrot.slane %v1223_v25, 4  ;;  %1376 = vst [vmem:[#allocation2 + $0x348] sm:$0xf] %v11485_v31  ;;  %v3086_v37 = vld [vmem:[#allocation2 + $0x2d0] sm:$0xff]  ;;  %4731 = vmatprep.mubr.bf16.mxu1 %v13620_v33 }
  0xed   : > { %538 = vst [vmem:[#allocation2 + $0x360] sm:$0xf] %v506_v32  ;;  %v869_v38 = vrot.slane %v868_v28, 4  ;;  %v879_v39 = vrot.slane %v878_v29, 4  ;;  %1310 = vst [vmem:[#allocation2 + $0x320] sm:$0xf] %v1224_v35  ;;  %4732 = vmatmul.mubr.bf16.gmra.mxu1 %v13622_v34 }
  0xee   : > { %v507_v40 = vld [vmem:[%s14548_s26 + $0x94] sm:$0xf]  ;;  %v1227_v44 = vsel %vm14577_vm5, %v1225_v36, %v1226_v26  ;;  %v582_v45 = vld [vmem:[%s14548_s26 + $0x90] sm:$0xf]  ;;  %v584_v50 = vld [vmem:[%s14548_s26 + $0x98] sm:$0x1] }
  0xef   : > { %v13659_v41 = vld [vmem:[%s17858_s2 + $0x1d0] sm:$0xff]   ;;  %539 = vst [vmem:[#allocation2 + $0x384] sm:$0xf] %v507_v40  ;;  %v874_v47 = vsel %vm14566_vm4, %v869_v38, %v873_v20  ;;  %v884_v48 = vsel %vm14566_vm4, %v879_v39, %v883_v23  ;;  %1311 = vst [vmem:[#allocation2 + $0x344] sm:$0xf] %v1227_v44  ;;  %v886_v51 = vshrl.u32 %v582_v45, 16 }
  0xf0   : > { %v3091_v42 = vld [vmem:[#allocation2 + $0x2f4] sm:$0xff]  ;;  %12652 = vmatprep.subr.bf16.mxu1 %v13659_v41  ;;  %1035 = vst [vmem:[#allocation2 + $0x31c] sm:$0xf] %v874_v47  ;;  %1036 = vst [vmem:[#allocation2 + $0x340] sm:$0xf] %v884_v48  ;;  %v889_v53 = vshll.u32 %v582_v45, 16 }
  0xf1   : > { %v13618_v43 = vld [vmem:[#allocation2 + $0x2d4] ss:$36 sps:$4 sm:$0xff]   ;;  %v11840_v46 = vcombine.low %v3086_v37, %v3091_v42  ;;  %v905_v56 = vshll.u32 %v584_v50, 16  ;;  %v1081_v58 = vld [vmem:[%s14548_s26 + $0x90] sm:$0xe]  ;;  %v888_v59 = vrot.slane %v886_v51, 4 }
  0xf2   : > { %v583_v49 = vld [vmem:[%s14548_s26 + $0x94] sm:$0xf]  ;;  %4570 = vmatprep.mubr.bf16.mxu0 %v13618_v43  ;;  %v1083_v61 = vld [vmem:[%s14548_s26 + $0x98] sm:$0x1]  ;;  %v11458_v62 = vrot.slane %v1081_v58, 9  ;;  %v891_v63 = vrot.slane %v889_v53, 5 }
  0xf3   : > { %v13664_v52 = vld [vmem:[%s17858_s2 + $0x190] sm:$0xff]   ;;  %v895_v54 = vshll.u32 %v583_v49, 16  ;;  %v899_v55 = vshrl.u32 %v583_v49, 16  ;;  %4571 = vmatmul.mubr.bf16.gmra.mxu0 %v11840_v46  ;;  %v11486_v2 = vld [vmem:[%s14548_s26 + $0x9c] sm:$0xf]  ;;  %v1233_v5 = vrot.slane %v1083_v61, 5 }
  0xf4   : > { %v1082_v60 = vld [vmem:[%s14548_s26 + $0x94] sm:$0xf]  ;;  %12653 = vmatpush3.bf16.msra.mxu1 %v13664_v52  ;;  %v11487_v6 = vld [vmem:[%s14548_s26 + $0xa0] sm:$0xf]  ;;  %1377 = vst [vmem:[#allocation2 + $0x36c] sm:$0xf] %v11486_v2  ;;  %v892_v7 = vor.u32 %v891_v63, %v888_v59 }
  0xf5   : > { %v897_v0 = vrot.slane %v895_v54, 5  ;;  %v901_v1 = vrot.slane %v899_v55, 4  ;;  %v1230_v3 = vrot.slane %v1082_v60, 5  ;;  %v907_v9 = vrot.slane %v905_v56, 5  ;;  %1378 = vst [vmem:[#allocation2 + $0x390] sm:$0xf] %v11487_v6  ;;  %12654 = vmatprep.subr.bf16.mxu1 %v13666_v12 }
  0xf6   : > { %v13627_v13 = vld [vmem:[#allocation2 + $0x324] ss:$36 sps:$4 sm:$0xff]   ;;  %v893_v15 = vrot.slane %v892_v7, 4  ;;  %v508_v24 = vld [vmem:[%s14548_s26 + $0x9c] sm:$0xf] }
  0xf7   : > { %v902_v8 = vor.u32 %v901_v1, %v897_v0  ;;  %v1231_v10 = vsel %vm14577_vm5, %v11458_v62, %v1230_v3  ;;  %v1232_v11 = vrot.slane %v1230_v3, 4  ;;  %v13629_v14 = vld [vmem:[#allocation2 + $0x320] ss:$36 sps:$4 sm:$0xff]   ;;  %v3096_v16 = vld [vmem:[#allocation2 + $0x318] sm:$0xff]  ;;  %4739 = vmatprep.mubr.bf16.mxu1 %v13627_v13  ;;  %540 = vst [vmem:[#allocation2 + $0x3a8] sm:$0xf] %v508_v24 }
  0xf8   : > { %1312 = vst [vmem:[#allocation2 + $0x368] sm:$0xf] %v1231_v10  ;;  %v3101_v17 = vld [vmem:[#allocation2 + $0x33c] sm:$0xff]  ;;  %v898_v22 = vsel %vm14566_vm4, %v893_v15, %v897_v0  ;;  %4740 = vmatmul.mubr.bf16.gmra.mxu1 %v13629_v14  ;;  %v587_v28 = vld [vmem:[%s14548_s26 + $0xa4] sm:$0x1]  ;;  %v13667_v36 = vld [vmem:[%s17858_s2 + $0x188] sm:$0xff]  }
  0xf9   : > { %v13625_v18 = vld [vmem:[#allocation2 + $0x31c] ss:$36 sps:$4 sm:$0xff]   ;;  %v903_v19 = vrot.slane %v902_v8, 4  ;;  %v1234_v20 = vsel %vm14577_vm5, %v1232_v11, %v1233_v5  ;;  %v11849_v21 = vcombine.low %v3096_v16, %v3101_v17  ;;  %1037 = vst [vmem:[#allocation2 + $0x364] sm:$0xf] %v898_v22  ;;  %v929_v33 = vshll.u32 %v587_v28, 16  ;;  %12655 = vmatpush3.bf16.msra.mxu1 %v13667_v36 }
  0xfa   : > { %1313 = vst [vmem:[#allocation2 + $0x38c] sm:$0xf] %v1234_v20  ;;  %4578 = vmatprep.mubr.bf16.mxu0 %v13625_v18  ;;  %v509_v25 = vld [vmem:[%s14548_s26 + $0xa0] sm:$0xf]  ;;  %v585_v26 = vld [vmem:[%s14548_s26 + $0x9c] sm:$0xf] }
  0xfb   : > { %v908_v23 = vsel %vm14566_vm4, %v903_v19, %v907_v9  ;;  %4579 = vmatmul.mubr.bf16.gmra.mxu0 %v11849_v21  ;;  %v586_v27 = vld [vmem:[%s14548_s26 + $0xa0] sm:$0xf]  ;;  %541 = vst [vmem:[#allocation2 + $0x3cc] sm:$0xf] %v509_v25  ;;  %v910_v29 = vshrl.u32 %v585_v26, 16  ;;  %v913_v30 = vshll.u32 %v585_v26, 16 }
  0xfc   : > { %1038 = vst [vmem:[#allocation2 + $0x388] sm:$0xf] %v908_v23  ;;  %v919_v31 = vshll.u32 %v586_v27, 16  ;;  %v923_v32 = vshrl.u32 %v586_v27, 16  ;;  %v1084_v34 = vld [vmem:[%s14548_s26 + $0x9c] sm:$0xe] }
  0xfd   : > { %v1085_v35 = vld [vmem:[%s14548_s26 + $0xa0] sm:$0xf]  ;;  %v912_v37 = vrot.slane %v910_v29, 4  ;;  %v915_v38 = vrot.slane %v913_v30, 5  ;;  %v931_v42 = vrot.slane %v929_v33, 5  ;;  %v11459_v44 = vrot.slane %v1084_v34, 9 }
  0xfe   : > { %v921_v39 = vrot.slane %v919_v31, 5  ;;  %v925_v40 = vrot.slane %v923_v32, 4  ;;  %v13668_v41 = vld [vmem:[%s17858_s2 + $0x1c0] sm:$0xff]   ;;  %v1237_v45 = vrot.slane %v1085_v35, 5  ;;  %v13632_v47 = vld [vmem:[#allocation2 + $0x36c] ss:$36 sps:$4 sm:$0xff]  }
  0xff   : > { %v1086_v43 = vld [vmem:[%s14548_s26 + $0xa4] sm:$0x1]  ;;  %v916_v49 = vor.u32 %v915_v38, %v912_v37  ;;  %12656 = vmatprep.subr.bf16.mxu1 %v13668_v41  ;;  %v11488_v55 = vld [vmem:[%s14548_s26 + $0xa8] sm:$0xf]  ;;  %v11489_v56 = vld [vmem:[%s14548_s26 + $0xac] sm:$0xf]  ;;  %4747 = vmatprep.mubr.bf16.mxu1 %v13632_v47 }
 0x100   : > { %v13671_v46 = vld [vmem:[%s17858_s2 + $0x180] sm:$0xff]   ;;  %v926_v50 = vor.u32 %v925_v40, %v921_v39  ;;  %v1240_v51 = vrot.slane %v1086_v43, 5  ;;  %v1238_v53 = vsel %vm14577_vm5, %v11459_v44, %v1237_v45  ;;  %v1239_v54 = vrot.slane %v1237_v45, 4  ;;  %1379 = vst [vmem:[#allocation2 + $0x3b4] sm:$0xf] %v11488_v55  ;;  %v14925_v62 = vld [vmem:[%s17858_s2 + $0x238] sm:$0xff]  }
 0x101   : > { %v13634_v48 = vld [vmem:[#allocation2 + $0x368] ss:$36 sps:$4 sm:$0xff]   ;;  %v3106_v52 = vld [vmem:[#allocation2 + $0x360] sm:$0xff]  ;;  %v917_v60 = vrot.slane %v916_v49, 4  ;;  %1314 = vst [vmem:[#allocation2 + $0x3b0] sm:$0xf] %v1238_v53  ;;  %12657 = vmatpush3.bf16.msra.mxu1 %v13671_v46  ;;  %13284 = vmatprep.subr.bf16.mxu0 %v14925_v62 }
 0x102   : > { %v927_v61 = vrot.slane %v926_v50, 4  ;;  %1380 = vst [vmem:[#allocation2 + $0x3d8] sm:$0xf] %v11489_v56  ;;  %4748 = vmatmul.mubr.bf16.gmra.mxu1 %v13634_v48  ;;  %v1241_v0 = vsel %vm14577_vm5, %v1239_v54, %v1240_v51  ;;  %v510_v3 = vld [vmem:[%s14548_s26 + $0xa8] sm:$0xf] }
 0x103   : > { %v3111_v58 = vld [vmem:[#allocation2 + $0x384] sm:$0xff]  ;;  %v922_v1 = vsel %vm14566_vm4, %v917_v60, %v921_v39  ;;  %1315 = vst [vmem:[#allocation2 + $0x3d4] sm:$0xf] %v1241_v0  ;;  %v511_v5 = vld [vmem:[%s14548_s26 + $0xac] sm:$0xf] }
 0x104   : > { %v13630_v59 = vld [vmem:[#allocation2 + $0x364] ss:$36 sps:$4 sm:$0xff]   ;;  %v11858_v63 = vcombine.low %v3106_v52, %v3111_v58  ;;  %v932_v2 = vsel %vm14566_vm4, %v927_v61, %v931_v42  ;;  %1039 = vst [vmem:[#allocation2 + $0x3ac] sm:$0xf] %v922_v1  ;;  %542 = vst [vmem:[#allocation2 + $0x3f0] sm:$0xf] %v510_v3 }
 0x105   : > { %4586 = vmatprep.mubr.bf16.mxu0 %v13630_v59  ;;  %1040 = vst [vmem:[#allocation2 + $0x3d0] sm:$0xf] %v932_v2  ;;  %v588_v6 = vld [vmem:[%s14548_s26 + $0xa8] sm:$0xf]  ;;  %v589_v7 = vld [vmem:[%s14548_s26 + $0xac] sm:$0xf] }
 0x106   : > { %4587 = vmatmul.mubr.bf16.gmra.mxu0 %v11858_v63  ;;  %543 = vst [vmem:[#allocation2 + $0x414] sm:$0xf] %v511_v5  ;;  %v590_v8 = vld [vmem:[%s14548_s26 + $0xb0] sm:$0x1]  ;;  %v934_v9 = vshrl.u32 %v588_v6, 16  ;;  %v937_v10 = vshll.u32 %v588_v6, 16 }
 0x107   : > { %v943_v11 = vshll.u32 %v589_v7, 16  ;;  %v947_v12 = vshrl.u32 %v589_v7, 16  ;;  %v953_v13 = vshll.u32 %v590_v8, 16  ;;  %v1087_v14 = vld [vmem:[%s14548_s26 + $0xa8] sm:$0xe] }
 0x108   : > { %v1088_v15 = vld [vmem:[%s14548_s26 + $0xac] sm:$0xf]  ;;  %v936_v16 = vrot.slane %v934_v9, 4  ;;  %v939_v17 = vrot.slane %v937_v10, 5  ;;  %v1089_v21 = vld [vmem:[%s14548_s26 + $0xb0] sm:$0x1] }
 0x109   : > { %v945_v18 = vrot.slane %v943_v11, 5  ;;  %v949_v19 = vrot.slane %v947_v12, 4  ;;  %v955_v20 = vrot.slane %v953_v13, 5  ;;  %v11460_v22 = vrot.slane %v1087_v14, 9  ;;  %v13642_v24 = vld [vmem:[#allocation2 + $0x3b4] ss:$36 sps:$4 sm:$0xff]  }
 0x10a   : > { %v1244_v23 = vrot.slane %v1088_v15, 5  ;;  %v13645_v25 = vld [vmem:[#allocation2 + $0x3b0] ss:$36 sps:$4 sm:$0xff]   ;;  %v940_v26 = vor.u32 %v939_v17, %v936_v16  ;;  %v1247_v28 = vrot.slane %v1089_v21, 5  ;;  %4755 = vmatprep.mubr.bf16.mxu1 %v13642_v24  ;;  %v11491_v38 = vld [vmem:[%s14548_s26 + $0xb8] sm:$0xf] }
 0x10b   : > { %v950_v27 = vor.u32 %v949_v19, %v945_v18  ;;  %v3116_v29 = vld [vmem:[#allocation2 + $0x3a8] sm:$0xff]  ;;  %v11490_v37 = vld [vmem:[%s14548_s26 + $0xb4] sm:$0xf]  ;;  %4756 = vmatmul.mubr.bf16.gmra.mxu1 %v13645_v25  ;;  %1382 = vst [vmem:[#allocation2 + $0x420] sm:$0xf] %v11491_v38 }
 0x10c   : > { %v3121_v30 = vld [vmem:[#allocation2 + $0x3cc] sm:$0xff]  ;;  %v1245_v32 = vsel %vm14577_vm5, %v11460_v22, %v1244_v23  ;;  %v1246_v33 = vrot.slane %v1244_v23, 4  ;;  %v941_v35 = vrot.slane %v940_v26, 4  ;;  %1381 = vst [vmem:[#allocation2 + $0x3fc] sm:$0xf] %v11490_v37 }
 0x10d   : > { %v13640_v31 = vld [vmem:[#allocation2 + $0x3ac] ss:$36 sps:$4 sm:$0xff]   ;;  %v11867_v34 = vcombine.low %v3116_v29, %v3121_v30  ;;  %v951_v36 = vrot.slane %v950_v27, 4  ;;  %1316 = vst [vmem:[#allocation2 + $0x3f8] sm:$0xf] %v1245_v32 }
 0x10e   : > { %4594 = vmatprep.mubr.bf16.mxu0 %v13640_v31  ;;  %v1248_v39 = vsel %vm14577_vm5, %v1246_v33, %v1247_v28  ;;  %v946_v40 = vsel %vm14566_vm4, %v941_v35, %v945_v18  ;;  %v512_v42 = vld [vmem:[%s14548_s26 + $0xb4] sm:$0xf]  ;;  %v513_v43 = vld [vmem:[%s14548_s26 + $0xb8] sm:$0xf]  ;;  %v593_v46 = vld [vmem:[%s14548_s26 + $0xbc] sm:$0x1] }
 0x10f   : > { %4595 = vmatmul.mubr.bf16.gmra.mxu0 %v11867_v34  ;;  %v956_v41 = vsel %vm14566_vm4, %v951_v36, %v955_v20  ;;  %1317 = vst [vmem:[#allocation2 + $0x41c] sm:$0xf] %v1248_v39  ;;  %1041 = vst [vmem:[#allocation2 + $0x3f4] sm:$0xf] %v946_v40  ;;  %v591_v44 = vld [vmem:[%s14548_s26 + $0xb4] sm:$0xf] }
 0x110   : > { %1042 = vst [vmem:[#allocation2 + $0x418] sm:$0xf] %v956_v41  ;;  %544 = vst [vmem:[#allocation2 + $0x438] sm:$0xf] %v512_v42  ;;  %v592_v45 = vld [vmem:[%s14548_s26 + $0xb8] sm:$0xf] }
 0x111   : > { %545 = vst [vmem:[#allocation2 + $0x45c] sm:$0xf] %v513_v43  ;;  %v958_v47 = vshrl.u32 %v591_v44, 16  ;;  %v961_v48 = vshll.u32 %v591_v44, 16  ;;  %v967_v49 = vshll.u32 %v592_v45, 16  ;;  %v971_v50 = vshrl.u32 %v592_v45, 16 }
 0x112   : > { %v977_v51 = vshll.u32 %v593_v46, 16  ;;  %v1090_v52 = vld [vmem:[%s14548_s26 + $0xb4] sm:$0xe]  ;;  %v1091_v55 = vld [vmem:[%s14548_s26 + $0xb8] sm:$0xf] }
 0x113   : > { %v960_v53 = vrot.slane %v958_v47, 4  ;;  %v963_v54 = vrot.slane %v961_v48, 5  ;;  %v11461_v56 = vrot.slane %v1090_v52, 9  ;;  %v13651_v58 = vld [vmem:[#allocation2 + $0x3fc] ss:$36 sps:$4 sm:$0xff]   ;;  %v969_v60 = vrot.slane %v967_v49, 5 }
 0x114   : > { %v973_v2 = vrot.slane %v971_v50, 4  ;;  %v979_v3 = vrot.slane %v977_v51, 5  ;;  %4763 = vmatprep.mubr.bf16.mxu1 %v13651_v58  ;;  %v1092_v6 = vld [vmem:[%s14548_s26 + $0xbc] sm:$0x1]  ;;  %v1251_v7 = vrot.slane %v1091_v55, 5 }
 0x115   : > { %v964_v1 = vor.u32 %v963_v54, %v960_v53  ;;  %v11492_v8 = vld [vmem:[%s14548_s26 + $0xc0] sm:$0xf]  ;;  %v1254_v11 = vrot.slane %v1092_v6, 5  ;;  %v11493_v12 = vld [vmem:[%s14548_s26 + $0xc4] sm:$0xf] }
 0x116   : > { %v13654_v59 = vld [vmem:[#allocation2 + $0x3f8] ss:$36 sps:$4 sm:$0xff]   ;;  %v3126_v61 = vld [vmem:[#allocation2 + $0x3f0] sm:$0xff]  ;;  %v974_v10 = vor.u32 %v973_v2, %v969_v60  ;;  %1383 = vst [vmem:[#allocation2 + $0x444] sm:$0xf] %v11492_v8  ;;  %v1252_v13 = vsel %vm14577_vm5, %v11461_v56, %v1251_v7  ;;  %v1253_v14 = vrot.slane %v1251_v7, 4 }
 0x117   : > { %v3131_v63 = vld [vmem:[#allocation2 + $0x414] sm:$0xff]  ;;  %4764 = vmatmul.mubr.bf16.gmra.mxu1 %v13654_v59  ;;  %v965_v9 = vrot.slane %v964_v1, 4  ;;  %1384 = vst [vmem:[#allocation2 + $0x468] sm:$0xf] %v11493_v12  ;;  %1318 = vst [vmem:[#allocation2 + $0x440] sm:$0xf] %v1252_v13 }
 0x118   : > { %v13649_v0 = vld [vmem:[#allocation2 + $0x3f4] ss:$36 sps:$4 sm:$0xff]   ;;  %v11876_v5 = vcombine.low %v3126_v61, %v3131_v63  ;;  %v975_v16 = vrot.slane %v974_v10, 4  ;;  %v1255_v17 = vsel %vm14577_vm5, %v1253_v14, %v1254_v11  ;;  %v11494_v19 = vld [vmem:[%s14548_s26 + $0xc] sm:$0xf] }
 0x119   : > { %4602 = vmatprep.mubr.bf16.mxu0 %v13649_v0  ;;  %v970_v15 = vsel %vm14566_vm4, %v965_v9, %v969_v60  ;;  %1319 = vst [vmem:[#allocation2 + $0x464] sm:$0xf] %v1255_v17  ;;  %v11495_v20 = vld [vmem:[%s14548_s26 + $0x10] sm:$0xf]  ;;  %v11496_v21 = vld [vmem:[%s14548_s26 + $0x14] sm:$0x1] }
 0x11a   : > { %4603 = vmatmul.mubr.bf16.gmra.mxu0 %v11876_v5  ;;  %1043 = vst [vmem:[#allocation2 + $0x43c] sm:$0xf] %v970_v15  ;;  %v980_v18 = vsel %vm14566_vm4, %v975_v16, %v979_v3  ;;  %v1434_v22 = vshrl.u32 %v11494_v19, 16  ;;  %v1437_v23 = vshll.u32 %v11494_v19, 16  ;;  %v1443_v24 = vshll.u32 %v11495_v20, 16 }
 0x11b   : > { %1044 = vst [vmem:[#allocation2 + $0x460] sm:$0xf] %v980_v18  ;;  %v1447_v25 = vshrl.u32 %v11495_v20, 16  ;;  %v11542_v26 = vld [vmem:[%s14548_s26 + $0xc] sm:$0xe]  ;;  %v1453_v27 = vshll.u32 %v11496_v21, 16 }
 0x11c   : > { %v11543_v28 = vld [vmem:[%s14548_s26 + $0x10] sm:$0xf]  ;;  %v11544_v29 = vld [vmem:[%s14548_s26 + $0x14] sm:$0x1]  ;;  %v11590_v30 = vrot.slane %v11542_v26, 9  ;;  %v1436_v31 = vrot.slane %v1434_v22, 4 }
 0x11d   : > { %v1439_v32 = vrot.slane %v1437_v23, 5  ;;  %v1445_v33 = vrot.slane %v1443_v24, 5  ;;  %v1449_v34 = vrot.slane %v1447_v25, 4  ;;  %v1979_v35 = vrot.slane %v11543_v28, 5  ;;  %v11606_v43 = vld [vmem:[%s14548_s26 + $0x18] sm:$0xf] }
 0x11e   : > { %v1982_v36 = vrot.slane %v11544_v29, 5  ;;  %v1455_v39 = vrot.slane %v1453_v27, 5  ;;  %v11607_v44 = vld [vmem:[%s14548_s26 + $0x1c] sm:$0xf]  ;;  %v13662_v45 = vld [vmem:[#allocation2 + $0x444] ss:$36 sps:$4 sm:$0xff]  }
 0x11f   : > { %v1440_v37 = vor.u32 %v1439_v32, %v1436_v31  ;;  %v1450_v38 = vor.u32 %v1449_v34, %v1445_v33  ;;  %v1980_v41 = vsel %vm14577_vm5, %v11590_v30, %v1979_v35  ;;  %v1981_v42 = vrot.slane %v1979_v35, 4  ;;  %2186 = vst [vmem:[#allocation2 + $0x18] sm:$0xf] %v11606_v43  ;;  %2187 = vst [vmem:[#allocation2 + $0x3c] sm:$0xf] %v11607_v44 }
 0x120   : > { %v13665_v46 = vld [vmem:[#allocation2 + $0x440] ss:$36 sps:$4 sm:$0xff]   ;;  %2121 = vst [vmem:[#allocation2 + $0x14] sm:$0xf] %v1980_v41  ;;  %v11638_v52 = vld [vmem:[%s14548_s26 + $0x18] sm:$0xf]  ;;  %4771 = vmatprep.mubr.bf16.mxu1 %v13662_v45 }
 0x121   : > { %v3136_v40 = vld [vmem:[#allocation2 + $0x438] sm:$0xff]  ;;  %v1441_v47 = vrot.slane %v1440_v37, 4  ;;  %v1451_v50 = vrot.slane %v1450_v38, 4  ;;  %v1983_v51 = vsel %vm14577_vm5, %v1981_v42, %v1982_v36  ;;  %v11640_v56 = vld [vmem:[%s14548_s26 + $0x20] sm:$0x1]  ;;  %v2267_v58 = vshrl.u32 %v11638_v52, 16  ;;  %4772 = vmatmul.mubr.bf16.gmra.mxu1 %v13665_v46 }
 0x122   : > { %v3141_v48 = vld [vmem:[#allocation2 + $0x45c] sm:$0xff]  ;;  %2122 = vst [vmem:[#allocation2 + $0x38] sm:$0xf] %v1983_v51  ;;  %v2270_v59 = vshll.u32 %v11638_v52, 16  ;;  %v2286_v0 = vshll.u32 %v11640_v56, 16  ;;  %v13686_v37 = vld [vmem:[%s17858_s2 + $0x230] sm:$0xff]  }
 0x123   : > { %v13660_v49 = vld [vmem:[#allocation2 + $0x43c] ss:$36 sps:$4 sm:$0xff]   ;;  %v11885_v53 = vcombine.low %v3136_v40, %v3141_v48  ;;  %v1446_v54 = vsel %vm14566_vm4, %v1441_v47, %v1445_v33  ;;  %v1456_v60 = vsel %vm14566_vm4, %v1451_v50, %v1455_v39  ;;  %v11497_v1 = vld [vmem:[%s14548_s26 + $0x18] sm:$0xf]  ;;  %v2269_v2 = vrot.slane %v2267_v58, 4 }
 0x124   : > { %v11639_v55 = vld [vmem:[%s14548_s26 + $0x1c] sm:$0xf]  ;;  %4610 = vmatprep.mubr.bf16.mxu0 %v13660_v49  ;;  %1849 = vst [vmem:[#allocation2 + $0x10] sm:$0xf] %v1446_v54  ;;  %1850 = vst [vmem:[#allocation2 + $0x34] sm:$0xf] %v1456_v60 }
 0x125   : > { %v2276_v61 = vshll.u32 %v11639_v55, 16  ;;  %v2280_v63 = vshrl.u32 %v11639_v55, 16  ;;  %4611 = vmatmul.mubr.bf16.gmra.mxu0 %v11885_v53  ;;  %v2272_v3 = vrot.slane %v2270_v59, 5  ;;  %v11498_v5 = vld [vmem:[%s14548_s26 + $0x1c] sm:$0xf]  ;;  %v2288_v9 = vrot.slane %v2286_v0, 5 }
 0x126   : > { %v11499_v6 = vld [vmem:[%s14548_s26 + $0x20] sm:$0x1]  ;;  %v1458_v10 = vshrl.u32 %v11497_v1, 16  ;;  %v11545_v11 = vld [vmem:[%s14548_s26 + $0x18] sm:$0xe]  ;;  %v1461_v13 = vshll.u32 %v11497_v1, 16 }
 0x127   : > { %v2278_v7 = vrot.slane %v2276_v61, 5  ;;  %v2282_v8 = vrot.slane %v2280_v63, 4  ;;  %v2273_v12 = vor.u32 %v2272_v3, %v2269_v2  ;;  %v1467_v14 = vshll.u32 %v11498_v5, 16  ;;  %v11546_v16 = vld [vmem:[%s14548_s26 + $0x1c] sm:$0xf] }
 0x128   : > { %v1471_v15 = vshrl.u32 %v11498_v5, 16  ;;  %v1460_v18 = vrot.slane %v1458_v10, 4  ;;  %v1477_v19 = vshll.u32 %v11499_v6, 16  ;;  %v11547_v20 = vld [vmem:[%s14548_s26 + $0x20] sm:$0x1]  ;;  %v11591_v21 = vrot.slane %v11545_v11, 9 }
 0x129   : > { %v2283_v17 = vor.u32 %v2282_v8, %v2278_v7  ;;  %v2274_v22 = vrot.slane %v2273_v12, 4  ;;  %v1463_v23 = vrot.slane %v1461_v13, 5  ;;  %v1469_v24 = vrot.slane %v1467_v14, 5  ;;  %v11608_v26 = vld [vmem:[%s14548_s26 + $0x24] sm:$0xf]  ;;  %v13699_v8 = vld [vmem:[%s17858_s2 + $0x228] sm:$0xff]  }
 0x12a   : > { %v1473_v25 = vrot.slane %v1471_v15, 4  ;;  %v1986_v28 = vrot.slane %v11546_v16, 5  ;;  %v1989_v29 = vrot.slane %v11547_v20, 5  ;;  %v11609_v30 = vld [vmem:[%s14548_s26 + $0x28] sm:$0xf]  ;;  %v1479_v34 = vrot.slane %v1477_v19, 5 }
 0x12b   : > { %v2284_v27 = vrot.slane %v2283_v17, 4  ;;  %2188 = vst [vmem:[#allocation2 + $0x60] sm:$0xf] %v11608_v26  ;;  %v2279_v31 = vsel %vm14566_vm4, %v2274_v22, %v2278_v7  ;;  %v1464_v32 = vor.u32 %v1463_v23, %v1460_v18  ;;  %2189 = vst [vmem:[#allocation2 + $0x84] sm:$0xf] %v11609_v30 }
 0x12c   : > { %v1474_v33 = vor.u32 %v1473_v25, %v1469_v24  ;;  %v11641_v35 = vld [vmem:[%s14548_s26 + $0x24] sm:$0xf]  ;;  %v11642_v36 = vld [vmem:[%s14548_s26 + $0x28] sm:$0xf]  ;;  %v13669_v38 = vld [vmem:[#allocation2 + $0x14] ss:$36 sps:$4 sm:$0xff]   ;;  %v1987_v41 = vsel %vm14577_vm5, %v11591_v21, %v1986_v28 }
 0x12d   : > { %v13672_v39 = vld [vmem:[#allocation2 + $0x10] ss:$36 sps:$4 sm:$0xff]   ;;  %v2289_v40 = vsel %vm14566_vm4, %v2284_v27, %v2288_v9  ;;  %2682 = vst [vmem:[#allocation2 + $0x1c] sm:$0xf] %v2279_v31  ;;  %v1988_v42 = vrot.slane %v1986_v28, 4  ;;  %v1465_v43 = vrot.slane %v1464_v32, 4  ;;  %4812 = vmatprep.mubr.bf16.mxu0 %v13669_v38 }
 0x12e   : > { %2683 = vst [vmem:[#allocation2 + $0x40] sm:$0xf] %v2289_v40  ;;  %v1475_v44 = vrot.slane %v1474_v33, 4  ;;  %2123 = vst [vmem:[#allocation2 + $0x5c] sm:$0xf] %v1987_v41  ;;  %v2291_v46 = vshrl.u32 %v11641_v35, 16  ;;  %4813 = vmatmul.mubr.bf16.vlgmr.msra.gmra.mxu0 %v13672_v39 }
 0x12f   : > { %v11643_v45 = vld [vmem:[%s14548_s26 + $0x2c] sm:$0x1]  ;;  %v2294_v47 = vshll.u32 %v11641_v35, 16  ;;  %v1990_v48 = vsel %vm14577_vm5, %v1988_v42, %v1989_v29  ;;  %v2300_v49 = vshll.u32 %v11642_v36, 16  ;;  %v2304_v50 = vshrl.u32 %v11642_v36, 16  ;;  %13285 = vmatpush3.bf16.msra.mxu0 %v14925_v62 }
 0x130   : > { %v2310_v51 = vshll.u32 %v11643_v45, 16  ;;  %v11500_v52 = vld [vmem:[%s14548_s26 + $0x24] sm:$0xf]  ;;  %v1470_v53 = vsel %vm14566_vm4, %v1465_v43, %v1469_v24  ;;  %v1480_v54 = vsel %vm14566_vm4, %v1475_v44, %v1479_v34  ;;  %2124 = vst [vmem:[#allocation2 + $0x80] sm:$0xf] %v1990_v48  ;;  %v2293_v55 = vrot.slane %v2291_v46, 4  ;;  %13286 = vmatprep.subr.bf16.mxu0 %v13686_v37 }
 0x131   : > { %v2296_v56 = vrot.slane %v2294_v47, 5  ;;  %v11501_v58 = vld [vmem:[%s14548_s26 + $0x28] sm:$0xf]  ;;  %v11502_v59 = vld [vmem:[%s14548_s26 + $0x2c] sm:$0x1]  ;;  %v2302_v60 = vrot.slane %v2300_v49, 5 }
 0x132   : > { %1851 = vst [vmem:[#allocation2 + $0x58] sm:$0xf] %v1470_v53  ;;  %1852 = vst [vmem:[#allocation2 + $0x7c] sm:$0xf] %v1480_v54  ;;  %v2306_v61 = vrot.slane %v2304_v50, 4  ;;  %v2312_v63 = vrot.slane %v2310_v51, 5 }
 0x133   : > { %v1482_v0 = vshrl.u32 %v11500_v52, 16  ;;  %v11548_v1 = vld [vmem:[%s14548_s26 + $0x24] sm:$0xe]  ;;  %v2297_v2 = vor.u32 %v2296_v56, %v2293_v55  ;;  %v1485_v3 = vshll.u32 %v11500_v52, 16  ;;  %v1491_v5 = vshll.u32 %v11501_v58, 16  ;;  %13287 = vmatpush3.bf16.msra.mxu0 %v13686_v37  ;;  %v13725_v37 = vld [vmem:[%s17858_s2 + $0x218] sm:$0xff]  }
 0x134   : > { %v1495_v6 = vshrl.u32 %v11501_v58, 16  ;;  %v11549_v7 = vld [vmem:[%s14548_s26 + $0x28] sm:$0xf]  ;;  %v2307_v9 = vor.u32 %v2306_v61, %v2302_v60  ;;  %v1501_v10 = vshll.u32 %v11502_v59, 16  ;;  %v11550_v11 = vld [vmem:[%s14548_s26 + $0x2c] sm:$0x1]  ;;  %13288 = vmatprep.subr.bf16.mxu0 %v13699_v8 }
 0x135   : > { %v1484_v62 = vrot.slane %v1482_v0, 4  ;;  %v11592_v12 = vrot.slane %v11548_v1, 9  ;;  %v2298_v13 = vrot.slane %v2297_v2, 4  ;;  %v1487_v14 = vrot.slane %v1485_v3, 5  ;;  %v13674_v17 = vld [vmem:[#allocation2 + $0x1c] ss:$36 sps:$4 sm:$0xff]  }
 0x136   : > { %v1493_v15 = vrot.slane %v1491_v5, 5  ;;  %v1497_v16 = vrot.slane %v1495_v6, 4  ;;  %v13676_v18 = vld [vmem:[#allocation2 + $0x18] ss:$36 sps:$4 sm:$0xff]   ;;  %v2308_v19 = vrot.slane %v2307_v9, 4  ;;  %v1503_v23 = vrot.slane %v1501_v10, 5  ;;  %4973 = vmatprep.mubr.bf16.mxu1 %v13674_v17 }
 0x137   : > { %v2303_v20 = vsel %vm14566_vm4, %v2298_v13, %v2302_v60  ;;  %v1488_v21 = vor.u32 %v1487_v14, %v1484_v62  ;;  %v13712_v24 = vld [vmem:[%s17858_s2 + $0x220] sm:$0xff]   ;;  %v1993_v26 = vrot.slane %v11549_v7, 5  ;;  %v1996_v27 = vrot.slane %v11550_v11, 5  ;;  %v11610_v28 = vld [vmem:[%s14548_s26 + $0x30] sm:$0xf]  ;;  %4974 = vmatmul.mubr.bf16.vlgmr.msra.gmra.mxu1 %v13676_v18  ;;  %13289 = vmatpush3.bf16.msra.mxu0 %v13699_v8  ;;  %v15060_v11 = vld [vmem:[%s17858_s2 + $0x208] sm:$0xff]  }
 0x138   : > { %v1498_v22 = vor.u32 %v1497_v16, %v1493_v15  ;;  %v2313_v25 = vsel %vm14566_vm4, %v2308_v19, %v2312_v63  ;;  %2684 = vst [vmem:[#allocation2 + $0x64] sm:$0xf] %v2303_v20  ;;  %v11611_v29 = vld [vmem:[%s14548_s26 + $0x34] sm:$0xf]  ;;  %v13677_v30 = vld [vmem:[#allocation2 + $0x5c] ss:$36 sps:$4 sm:$0xff]   ;;  %13290 = vmatprep.subr.bf16.mxu0 %v13712_v24 }
 0x139   : > { %2685 = vst [vmem:[#allocation2 + $0x88] sm:$0xf] %v2313_v25  ;;  %v1489_v31 = vrot.slane %v1488_v21, 4  ;;  %2190 = vst [vmem:[#allocation2 + $0xa8] sm:$0xf] %v11610_v28  ;;  %v1994_v34 = vsel %vm14577_vm5, %v11592_v12, %v1993_v26  ;;  %v1995_v35 = vrot.slane %v1993_v26, 4  ;;  %4820 = vmatprep.mubr.bf16.mxu0 %v13677_v30 }
 0x13a   : > { %v1499_v32 = vrot.slane %v1498_v22, 4  ;;  %2191 = vst [vmem:[#allocation2 + $0xcc] sm:$0xf] %v11611_v29  ;;  %v13679_v33 = vld [vmem:[#allocation2 + $0x58] ss:$36 sps:$4 sm:$0xff]   ;;  %v13738_v53 = vld [vmem:[%s17858_s2 + $0x210] sm:$0xff]  }
 0x13b   : > { %v11644_v36 = vld [vmem:[%s14548_s26 + $0x30] sm:$0xf]  ;;  %v1494_v38 = vsel %vm14566_vm4, %v1489_v31, %v1493_v15  ;;  %2125 = vst [vmem:[#allocation2 + $0xa4] sm:$0xf] %v1994_v34  ;;  %v11645_v40 = vld [vmem:[%s14548_s26 + $0x34] sm:$0xf]  ;;  %4821 = vmatmul.mubr.bf16.gmra.mxu0 %v13679_v33  ;;  %v1997_v44 = vsel %vm14577_vm5, %v1995_v35, %v1996_v27 }
 0x13c   : > { %v1504_v39 = vsel %vm14566_vm4, %v1499_v32, %v1503_v23  ;;  %v11646_v41 = vld [vmem:[%s14548_s26 + $0x38] sm:$0x1]  ;;  %v2315_v42 = vshrl.u32 %v11644_v36, 16  ;;  %v2318_v43 = vshll.u32 %v11644_v36, 16  ;;  %1853 = vst [vmem:[#allocation2 + $0xa0] sm:$0xf] %v1494_v38  ;;  %13291 = vmatpush3.bf16.msra.mxu0 %v13712_v24 }
 0x13d   : > { %1854 = vst [vmem:[#allocation2 + $0xc4] sm:$0xf] %v1504_v39  ;;  %v2324_v45 = vshll.u32 %v11645_v40, 16  ;;  %v2328_v46 = vshrl.u32 %v11645_v40, 16  ;;  %v2334_v47 = vshll.u32 %v11646_v41, 16  ;;  %13292 = vmatprep.subr.bf16.mxu0 %v13725_v37 }
 0x13e   : > { %v11503_v48 = vld [vmem:[%s14548_s26 + $0x30] sm:$0xf]  ;;  %2126 = vst [vmem:[#allocation2 + $0xc8] sm:$0xf] %v1997_v44  ;;  %v2317_v49 = vrot.slane %v2315_v42, 4  ;;  %v2320_v50 = vrot.slane %v2318_v43, 5 }
 0x13f   : > { %v11504_v51 = vld [vmem:[%s14548_s26 + $0x34] sm:$0xf]  ;;  %v11505_v52 = vld [vmem:[%s14548_s26 + $0x38] sm:$0x1]  ;;  %v2326_v54 = vrot.slane %v2324_v45, 5  ;;  %v2330_v55 = vrot.slane %v2328_v46, 4 }
 0x140   : > { %v2336_v56 = vrot.slane %v2334_v47, 5  ;;  %v1506_v58 = vshrl.u32 %v11503_v48, 16  ;;  %v11551_v59 = vld [vmem:[%s14548_s26 + $0x30] sm:$0xe]  ;;  %v2321_v60 = vor.u32 %v2320_v50, %v2317_v49  ;;  %v1509_v61 = vshll.u32 %v11503_v48, 16  ;;  %13293 = vmatpush3.bf16.msra.mxu0 %v13725_v37 }
 0x141   : > { %v1515_v63 = vshll.u32 %v11504_v51, 16  ;;  %v1519_v0 = vshrl.u32 %v11504_v51, 16  ;;  %v11552_v1 = vld [vmem:[%s14548_s26 + $0x34] sm:$0xf]  ;;  %v13680_v2 = vld [vmem:[#allocation2 + $0x64] ss:$36 sps:$4 sm:$0xff]   ;;  %v2331_v5 = vor.u32 %v2330_v55, %v2326_v54  ;;  %13294 = vmatprep.subr.bf16.mxu0 %v13738_v53 }
 0x142   : > { %v13682_v3 = vld [vmem:[#allocation2 + $0x60] ss:$36 sps:$4 sm:$0xff]   ;;  %v1508_v6 = vrot.slane %v1506_v58, 4  ;;  %v2322_v7 = vrot.slane %v2321_v60, 4  ;;  %v1511_v8 = vrot.slane %v1509_v61, 5  ;;  %4981 = vmatprep.mubr.bf16.mxu1 %v13680_v2  ;;  %v1525_v13 = vshll.u32 %v11505_v52, 16 }
 0x143   : > { %v1517_v9 = vrot.slane %v1515_v63, 5  ;;  %v1521_v62 = vrot.slane %v1519_v0, 4  ;;  %v11553_v10 = vld [vmem:[%s14548_s26 + $0x38] sm:$0x1]  ;;  %v2332_v12 = vrot.slane %v2331_v5, 4  ;;  %v11593_v14 = vrot.slane %v11551_v59, 9  ;;  %4982 = vmatmul.mubr.bf16.gmra.mxu1 %v13682_v3 }
 0x144   : > { %v2000_v15 = vrot.slane %v11552_v1, 5  ;;  %v11612_v16 = vld [vmem:[%s14548_s26 + $0x3c] sm:$0xf]  ;;  %v2327_v17 = vsel %vm14566_vm4, %v2322_v7, %v2326_v54  ;;  %v1512_v18 = vor.u32 %v1511_v8, %v1508_v6  ;;  %v2003_v20 = vrot.slane %v11553_v10, 5  ;;  %v11613_v21 = vld [vmem:[%s14548_s26 + $0x40] sm:$0xf]  ;;  %13295 = vmatpush3.bf16.msra.mxu0 %v13738_v53 }
 0x145   : > { %v1522_v19 = vor.u32 %v1521_v62, %v1517_v9  ;;  %2192 = vst [vmem:[#allocation2 + $0xf0] sm:$0xf] %v11612_v16  ;;  %v11647_v22 = vld [vmem:[%s14548_s26 + $0x3c] sm:$0xf]  ;;  %v13683_v23 = vld [vmem:[#allocation2 + $0xa4] ss:$36 sps:$4 sm:$0xff]   ;;  %v2337_v25 = vsel %vm14566_vm4, %v2332_v12, %v2336_v56  ;;  %13296 = vmatprep.subr.bf16.mxu0 %v15060_v11 }
 0x146   : > { %v13685_v24 = vld [vmem:[#allocation2 + $0xa0] ss:$36 sps:$4 sm:$0xff]   ;;  %2686 = vst [vmem:[#allocation2 + $0xac] sm:$0xf] %v2327_v17  ;;  %v1527_v26 = vrot.slane %v1525_v13, 5  ;;  %v2001_v27 = vsel %vm14577_vm5, %v11593_v14, %v2000_v15  ;;  %v1513_v28 = vrot.slane %v1512_v18, 4  ;;  %4828 = vmatprep.mubr.bf16.mxu0 %v13683_v23 }
 0x147   : > { %2193 = vst [vmem:[#allocation2 + $0x114] sm:$0xf] %v11613_v21  ;;  %2687 = vst [vmem:[#allocation2 + $0xd0] sm:$0xf] %v2337_v25  ;;  %v1523_v29 = vrot.slane %v1522_v19, 4  ;;  %v2002_v30 = vrot.slane %v2000_v15, 4  ;;  %4829 = vmatmul.mubr.bf16.gmra.mxu0 %v13685_v24 }
 0x148   : > { %2127 = vst [vmem:[#allocation2 + $0xec] sm:$0xf] %v2001_v27  ;;  %v11648_v31 = vld [vmem:[%s14548_s26 + $0x40] sm:$0xf]  ;;  %v2339_v32 = vshrl.u32 %v11647_v22, 16  ;;  %v2342_v34 = vshll.u32 %v11647_v22, 16  ;;  %v1518_v37 = vsel %vm14566_vm4, %v1513_v28, %v1517_v9  ;;  %13297 = vmatpush3.bf16.msra.mxu0 %v15060_v11 }
 0x149   : > { %v11649_v33 = vld [vmem:[%s14548_s26 + $0x44] sm:$0x1]  ;;  %v2348_v35 = vshll.u32 %v11648_v31, 16  ;;  %v2352_v36 = vshrl.u32 %v11648_v31, 16  ;;  %v1528_v38 = vsel %vm14566_vm4, %v1523_v29, %v1527_v26  ;;  %v2004_v39 = vsel %vm14577_vm5, %v2002_v30, %v2003_v20  ;;  %v11506_v41 = vld [vmem:[%s14548_s26 + $0x3c] sm:$0xf] }
 0x14a   : > { %v2341_v40 = vrot.slane %v2339_v32, 4  ;;  %v11507_v42 = vld [vmem:[%s14548_s26 + $0x40] sm:$0xf]  ;;  %1855 = vst [vmem:[#allocation2 + $0xe8] sm:$0xf] %v1518_v37  ;;  %v2344_v43 = vrot.slane %v2342_v34, 5 }
 0x14b   : > { %1856 = vst [vmem:[#allocation2 + $0x10c] sm:$0xf] %v1528_v38  ;;  %2128 = vst [vmem:[#allocation2 + $0x110] sm:$0xf] %v2004_v39  ;;  %v2350_v44 = vrot.slane %v2348_v35, 5  ;;  %v2354_v45 = vrot.slane %v2352_v36, 4 }
 0x14c   : > { %v2358_v46 = vshll.u32 %v11649_v33, 16  ;;  %v11508_v47 = vld [vmem:[%s14548_s26 + $0x44] sm:$0x1]  ;;  %v1530_v48 = vshrl.u32 %v11506_v41, 16  ;;  %v1533_v49 = vshll.u32 %v11506_v41, 16  ;;  %v1539_v50 = vshll.u32 %v11507_v42, 16 }
 0x14d   : > { %v1543_v51 = vshrl.u32 %v11507_v42, 16  ;;  %v11554_v52 = vld [vmem:[%s14548_s26 + $0x3c] sm:$0xe]  ;;  %v2345_v53 = vor.u32 %v2344_v43, %v2341_v40  ;;  %v2355_v54 = vor.u32 %v2354_v45, %v2350_v44  ;;  %v1549_v56 = vshll.u32 %v11508_v47, 16  ;;  %v11555_v58 = vld [vmem:[%s14548_s26 + $0x40] sm:$0xf] }
 0x14e   : > { %v2360_v55 = vrot.slane %v2358_v46, 5  ;;  %v11556_v59 = vld [vmem:[%s14548_s26 + $0x44] sm:$0x1]  ;;  %v1532_v60 = vrot.slane %v1530_v48, 4  ;;  %v1535_v61 = vrot.slane %v1533_v49, 5  ;;  %v1541_v63 = vrot.slane %v1539_v50, 5 }
 0x14f   : > { %v1545_v0 = vrot.slane %v1543_v51, 4  ;;  %v13687_v1 = vld [vmem:[#allocation2 + $0xac] ss:$36 sps:$4 sm:$0xff]   ;;  %v2346_v3 = vrot.slane %v2345_v53, 4  ;;  %v2356_v5 = vrot.slane %v2355_v54, 4  ;;  %v1551_v8 = vrot.slane %v1549_v56, 5  ;;  %v12322_v51 = vpop.f32.mrf.mxu0 }
 0x150   : > { %v13689_v2 = vld [vmem:[#allocation2 + $0xa8] ss:$36 sps:$4 sm:$0xff]   ;;  %v1536_v6 = vor.u32 %v1535_v61, %v1532_v60  ;;  %4989 = vmatprep.mubr.bf16.mxu1 %v13687_v1  ;;  %v11594_v62 = vrot.slane %v11554_v52, 9  ;;  %v2007_v10 = vrot.slane %v11555_v58, 5  ;;  %v2010_v11 = vrot.slane %v11556_v59, 5  ;;  %v13764_v13 = vld [vmem:[%s17858_s2 + $0x200] sm:$0xff]  }
 0x151   : > { %v1546_v7 = vor.u32 %v1545_v0, %v1541_v63  ;;  %v2351_v9 = vsel %vm14566_vm4, %v2346_v3, %v2350_v44  ;;  %v11614_v12 = vld [vmem:[%s14548_s26 + $0x48] sm:$0xf]  ;;  %4990 = vmatmul.mubr.bf16.gmra.mxu1 %v13689_v2  ;;  %v2361_v15 = vsel %vm14566_vm4, %v2356_v5, %v2360_v55  ;;  %v11615_v21 = vld [vmem:[%s14548_s26 + $0x4c] sm:$0xf]  ;;  %13298 = vmatprep.subr.bf16.mxu0 %v13764_v13  ;;  %v11652_v26 = vld [vmem:[%s14548_s26 + $0x50] sm:$0x1]  ;;  %v12323_v0 = vpop.f32.mrf.mxu0 }
 0x152   : > { %v13690_v14 = vld [vmem:[#allocation2 + $0xec] ss:$36 sps:$4 sm:$0xff]   ;;  %2688 = vst [vmem:[#allocation2 + $0xf4] sm:$0xf] %v2351_v9  ;;  %v1537_v16 = vrot.slane %v1536_v6, 4  ;;  %v2008_v19 = vsel %vm14577_vm5, %v11594_v62, %v2007_v10  ;;  %v2009_v20 = vrot.slane %v2007_v10, 4  ;;  %13299 = vmatpush3.bf16.msra.mxu0 %v13764_v13 }
 0x153   : > { %v1547_v17 = vrot.slane %v1546_v7, 4  ;;  %2194 = vst [vmem:[#allocation2 + $0x138] sm:$0xf] %v11614_v12  ;;  %v13692_v18 = vld [vmem:[#allocation2 + $0xe8] ss:$36 sps:$4 sm:$0xff]   ;;  %4836 = vmatprep.mubr.bf16.mxu0 %v13690_v14  ;;  %v2382_v33 = vshll.u32 %v11652_v26, 16 }
 0x154   : > { %2689 = vst [vmem:[#allocation2 + $0x118] sm:$0xf] %v2361_v15  ;;  %v1542_v22 = vsel %vm14566_vm4, %v1537_v16, %v1541_v63  ;;  %2129 = vst [vmem:[#allocation2 + $0x134] sm:$0xf] %v2008_v19  ;;  %v11650_v24 = vld [vmem:[%s14548_s26 + $0x48] sm:$0xf]  ;;  %4837 = vmatmul.mubr.bf16.gmra.mxu0 %v13692_v18  ;;  %v2011_v27 = vsel %vm14577_vm5, %v2009_v20, %v2010_v11  ;;  %v15114_v63 = vpop.f32.mrf.mxu1  ;;  %v15119_v11 = vadd.f32 %v12323_v0, %v12322_v51 }
 0x155   : > { %v1552_v23 = vsel %vm14566_vm4, %v1547_v17, %v1551_v8  ;;  %2195 = vst [vmem:[#allocation2 + $0x15c] sm:$0xf] %v11615_v21  ;;  %v11651_v25 = vld [vmem:[%s14548_s26 + $0x4c] sm:$0xf]  ;;  %1857 = vst [vmem:[#allocation2 + $0x130] sm:$0xf] %v1542_v22 }
 0x156   : > { %1858 = vst [vmem:[#allocation2 + $0x154] sm:$0xf] %v1552_v23  ;;  %v2363_v28 = vshrl.u32 %v11650_v24, 16  ;;  %v2366_v29 = vshll.u32 %v11650_v24, 16  ;;  %v2372_v30 = vshll.u32 %v11651_v25, 16  ;;  %v2376_v32 = vshrl.u32 %v11651_v25, 16  ;;  %v12435_v12 = vpop.f32.mrf.mxu1  ;;  %v12325_v24 = vpop.f32.mrf.mxu0 }
 0x157   : > { %v11509_v31 = vld [vmem:[%s14548_s26 + $0x48] sm:$0xf]  ;;  %2130 = vst [vmem:[#allocation2 + $0x158] sm:$0xf] %v2011_v27  ;;  %v11510_v34 = vld [vmem:[%s14548_s26 + $0x4c] sm:$0xf] }
 0x158   : > { %v11511_v35 = vld [vmem:[%s14548_s26 + $0x50] sm:$0x1]  ;;  %v2365_v36 = vrot.slane %v2363_v28, 4  ;;  %v2368_v37 = vrot.slane %v2366_v29, 5  ;;  %v2374_v38 = vrot.slane %v2372_v30, 5  ;;  %v1554_v39 = vshrl.u32 %v11509_v31, 16  ;;  %v12437_v25 = vpop.f32.mrf.mxu1 }
 0x159   : > { %v11557_v40 = vld [vmem:[%s14548_s26 + $0x48] sm:$0xe]  ;;  %v2378_v41 = vrot.slane %v2376_v32, 4  ;;  %v2384_v42 = vrot.slane %v2382_v33, 5  ;;  %v1557_v43 = vshll.u32 %v11509_v31, 16  ;;  %v1563_v44 = vshll.u32 %v11510_v34, 16 }
 0x15a   : > { %v11558_v45 = vld [vmem:[%s14548_s26 + $0x4c] sm:$0xf]  ;;  %v2369_v46 = vor.u32 %v2368_v37, %v2365_v36  ;;  %v1556_v47 = vrot.slane %v1554_v39, 4  ;;  %v1567_v48 = vshrl.u32 %v11510_v34, 16  ;;  %v1573_v49 = vshll.u32 %v11511_v35, 16 }
 0x15b   : > { %v11559_v50 = vld [vmem:[%s14548_s26 + $0x50] sm:$0x1]  ;;  %v13693_v52 = vld [vmem:[#allocation2 + $0xf4] ss:$36 sps:$4 sm:$0xff]   ;;  %v2379_v54 = vor.u32 %v2378_v41, %v2374_v38  ;;  %v1559_v55 = vrot.slane %v1557_v43, 5  ;;  %v1565_v58 = vrot.slane %v1563_v44, 5 }
 0x15c   : > { %v13695_v53 = vld [vmem:[#allocation2 + $0xf0] ss:$36 sps:$4 sm:$0xff]   ;;  %v2370_v56 = vrot.slane %v2369_v46, 4  ;;  %v1569_v59 = vrot.slane %v1567_v48, 4  ;;  %v1575_v60 = vrot.slane %v1573_v49, 5  ;;  %4997 = vmatprep.mubr.bf16.mxu1 %v13693_v52  ;;  %v11595_v3 = vrot.slane %v11557_v40, 9  ;;  %v12326_v48 = vpop.f32.mrf.mxu0 }
 0x15d   : > { %v11616_v61 = vld [vmem:[%s14548_s26 + $0x54] sm:$0xf]  ;;  %v2380_v1 = vrot.slane %v2379_v54, 4  ;;  %v1560_v2 = vor.u32 %v1559_v55, %v1556_v47  ;;  %v2014_v5 = vrot.slane %v11558_v45, 5  ;;  %v11617_v6 = vld [vmem:[%s14548_s26 + $0x58] sm:$0xf]  ;;  %4998 = vmatmul.mubr.bf16.gmra.mxu1 %v13695_v53 }
 0x15e   : > { %2196 = vst [vmem:[#allocation2 + $0x180] sm:$0xf] %v11616_v61  ;;  %v13696_v7 = vld [vmem:[#allocation2 + $0x134] ss:$36 sps:$4 sm:$0xff]   ;;  %v2375_v9 = vsel %vm14566_vm4, %v2370_v56, %v2374_v38  ;;  %v1570_v62 = vor.u32 %v1569_v59, %v1565_v58  ;;  %v2017_v10 = vrot.slane %v11559_v50, 5 }
 0x15f   : > { %v13698_v8 = vld [vmem:[#allocation2 + $0x130] ss:$36 sps:$4 sm:$0xff]   ;;  %2197 = vst [vmem:[#allocation2 + $0x1a4] sm:$0xf] %v11617_v6  ;;  %v2385_v13 = vsel %vm14566_vm4, %v2380_v1, %v2384_v42  ;;  %2690 = vst [vmem:[#allocation2 + $0x13c] sm:$0xf] %v2375_v9  ;;  %v2015_v15 = vsel %vm14577_vm5, %v11595_v3, %v2014_v5  ;;  %4844 = vmatprep.mubr.bf16.mxu0 %v13696_v7  ;;  %v12438_v42 = vpop.f32.mrf.mxu1  ;;  %v12436_v1 = vadd.f32 %v12435_v12, %v15114_v63  ;;  %v12328_v9 = vpop.f32.mrf.mxu0 }
 0x160   : > { %v1561_v14 = vrot.slane %v1560_v2, 4  ;;  %v2016_v16 = vrot.slane %v2014_v5, 4  ;;  %v11653_v17 = vld [vmem:[%s14548_s26 + $0x54] sm:$0xf]  ;;  %v11654_v18 = vld [vmem:[%s14548_s26 + $0x58] sm:$0xf]  ;;  %4845 = vmatmul.mubr.bf16.gmra.mxu0 %v13698_v8  ;;  %v12327_v2 = vadd.f32 %v12326_v48, %v12325_v24  ;;  %v12439_v63 = vadd.f32 %v12438_v42, %v12437_v25 }
 0x161   : > { %2691 = vst [vmem:[#allocation2 + $0x160] sm:$0xf] %v2385_v13  ;;  %v1571_v19 = vrot.slane %v1570_v62, 4  ;;  %2131 = vst [vmem:[#allocation2 + $0x17c] sm:$0xf] %v2015_v15  ;;  %v2387_v21 = vshrl.u32 %v11653_v17, 16  ;;  %v12440_v3 = vpop.f32.mrf.mxu1  ;;  %v15148_v15 = vadd.f32 %v12436_v1, %v15119_v11 }
 0x162   : > { %v11655_v20 = vld [vmem:[%s14548_s26 + $0x5c] sm:$0x1]  ;;  %v2390_v22 = vshll.u32 %v11653_v17, 16  ;;  %v2396_v23 = vshll.u32 %v11654_v18, 16  ;;  %v1566_v26 = vsel %vm14566_vm4, %v1561_v14, %v1565_v58  ;;  %v2018_v27 = vsel %vm14577_vm5, %v2016_v16, %v2017_v10  ;;  %v11512_v30 = vld [vmem:[%s14548_s26 + $0x54] sm:$0xf] }
 0x163   : > { %v2400_v28 = vshrl.u32 %v11654_v18, 16  ;;  %v2406_v29 = vshll.u32 %v11655_v20, 16  ;;  %v11513_v31 = vld [vmem:[%s14548_s26 + $0x58] sm:$0xf]  ;;  %v1576_v32 = vsel %vm14566_vm4, %v1571_v19, %v1575_v60  ;;  %1859 = vst [vmem:[#allocation2 + $0x178] sm:$0xf] %v1566_v26  ;;  %v12441_v12 = vpop.f32.mrf.mxu1  ;;  %v12329_v20 = vpop.f32.mrf.mxu0  ;;  %v15156_v25 = vadd.f32 %v12439_v63, %v12327_v2 }
 0x164   : > { %2132 = vst [vmem:[#allocation2 + $0x1a0] sm:$0xf] %v2018_v27  ;;  %v2389_v33 = vrot.slane %v2387_v21, 4  ;;  %v2392_v34 = vrot.slane %v2390_v22, 5  ;;  %v2398_v35 = vrot.slane %v2396_v23, 5  ;;  %v1578_v39 = vshrl.u32 %v11512_v30, 16 }
 0x165   : > { %v11514_v36 = vld [vmem:[%s14548_s26 + $0x5c] sm:$0x1]  ;;  %1860 = vst [vmem:[#allocation2 + $0x19c] sm:$0xf] %v1576_v32  ;;  %v2402_v37 = vrot.slane %v2400_v28, 4  ;;  %v2408_v38 = vrot.slane %v2406_v29, 5  ;;  %v12442_v21 = vadd.f32 %v12441_v12, %v12440_v3  ;;  %v12330_v26 = vadd.f32 %v12329_v20, %v12328_v9  ;;  %v12443_v27 = vpop.f32.mrf.mxu1 }
 0x166   : > { %v1581_v40 = vshll.u32 %v11512_v30, 16  ;;  %v11560_v41 = vld [vmem:[%s14548_s26 + $0x54] sm:$0xe]  ;;  %v2393_v43 = vor.u32 %v2392_v34, %v2389_v33  ;;  %v1587_v44 = vshll.u32 %v11513_v31, 16  ;;  %v1591_v45 = vshrl.u32 %v11513_v31, 16  ;;  %v12331_v33 = vpop.f32.mrf.mxu0 }
 0x167   : > { %v1597_v46 = vshll.u32 %v11514_v36, 16  ;;  %v11561_v47 = vld [vmem:[%s14548_s26 + $0x58] sm:$0xf]  ;;  %v2403_v49 = vor.u32 %v2402_v37, %v2398_v35  ;;  %v1580_v50 = vrot.slane %v1578_v39, 4  ;;  %v11562_v52 = vld [vmem:[%s14548_s26 + $0x5c] sm:$0x1]  ;;  %v15165_v39 = vadd.f32 %v12442_v21, %v12330_v26 }
 0x168   : > { %v1583_v51 = vrot.slane %v1581_v40, 5  ;;  %v11596_v53 = vrot.slane %v11560_v41, 9  ;;  %v2394_v54 = vrot.slane %v2393_v43, 4  ;;  %v1589_v55 = vrot.slane %v1587_v44, 5  ;;  %v13700_v59 = vld [vmem:[#allocation2 + $0x13c] ss:$36 sps:$4 sm:$0xff]   ;;  %v12444_v40 = vpop.f32.mrf.mxu1 }
 0x169   : > { %v1593_v56 = vrot.slane %v1591_v45, 4  ;;  %v1599_v58 = vrot.slane %v1597_v46, 5  ;;  %v13702_v60 = vld [vmem:[#allocation2 + $0x138] ss:$36 sps:$4 sm:$0xff]   ;;  %v2404_v61 = vrot.slane %v2403_v49, 4  ;;  %v2021_v7 = vrot.slane %v11561_v47, 5  ;;  %5005 = vmatprep.mubr.bf16.mxu1 %v13700_v59  ;;  %v12332_v46 = vpop.f32.mrf.mxu0 }
 0x16a   : > { %v1584_v0 = vor.u32 %v1583_v51, %v1580_v50  ;;  %v2399_v5 = vsel %vm14566_vm4, %v2394_v54, %v2398_v35  ;;  %v2024_v8 = vrot.slane %v11562_v52, 5  ;;  %v11618_v13 = vld [vmem:[%s14548_s26 + $0x60] sm:$0xf]  ;;  %v11619_v14 = vld [vmem:[%s14548_s26 + $0x64] sm:$0xf]  ;;  %5006 = vmatmul.mubr.bf16.gmra.mxu1 %v13702_v60  ;;  %v12446_v52 = vpop.f32.mrf.mxu1  ;;  %v12333_v2 = vadd.f32 %v12332_v46, %v12331_v33 }
 0x16b   : > { %v1594_v6 = vor.u32 %v1593_v56, %v1589_v55  ;;  %v2409_v62 = vsel %vm14566_vm4, %v2404_v61, %v2408_v38  ;;  %2692 = vst [vmem:[#allocation2 + $0x184] sm:$0xf] %v2399_v5  ;;  %v13703_v16 = vld [vmem:[#allocation2 + $0x17c] ss:$36 sps:$4 sm:$0xff]   ;;  %v2022_v19 = vsel %vm14577_vm5, %v11596_v53, %v2021_v7  ;;  %2198 = vst [vmem:[#allocation2 + $0x1c8] sm:$0xf] %v11618_v13  ;;  %v12334_v59 = vpop.f32.mrf.mxu0 }
 0x16c   : > { %v1585_v10 = vrot.slane %v1584_v0, 4  ;;  %v13705_v17 = vld [vmem:[#allocation2 + $0x178] ss:$36 sps:$4 sm:$0xff]   ;;  %2693 = vst [vmem:[#allocation2 + $0x1a8] sm:$0xf] %v2409_v62  ;;  %v2023_v22 = vrot.slane %v2021_v7, 4  ;;  %4852 = vmatprep.mubr.bf16.mxu0 %v13703_v16  ;;  %v12445_v3 = vadd.f32 %v12444_v40, %v12443_v27  ;;  %v12447_v5 = vpop.f32.mrf.mxu1 }
 0x16d   : > { %v1595_v18 = vrot.slane %v1594_v6, 4  ;;  %2199 = vst [vmem:[#allocation2 + $0x1ec] sm:$0xf] %v11619_v14  ;;  %2133 = vst [vmem:[#allocation2 + $0x1c4] sm:$0xf] %v2022_v19  ;;  %4853 = vmatmul.mubr.bf16.gmra.mxu0 %v13705_v17 }
 0x16e   : > { %v1590_v11 = vsel %vm14566_vm4, %v1585_v10, %v1589_v55  ;;  %v11656_v23 = vld [vmem:[%s14548_s26 + $0x60] sm:$0xf]  ;;  %v11657_v24 = vld [vmem:[%s14548_s26 + $0x64] sm:$0xf]  ;;  %v11658_v29 = vld [vmem:[%s14548_s26 + $0x68] sm:$0x1]  ;;  %v2025_v34 = vsel %vm14577_vm5, %v2023_v22, %v2024_v8  ;;  %v12335_v10 = vpop.f32.mrf.mxu0  ;;  %v12449_v17 = vpop.f32.mrf.mxu1  ;;  %v15176_v22 = vadd.f32 %v12445_v3, %v12333_v2 }
 0x16f   : > { %v1600_v28 = vsel %vm14566_vm4, %v1595_v18, %v1599_v58  ;;  %1861 = vst [vmem:[#allocation2 + $0x1c0] sm:$0xf] %v1590_v11  ;;  %v2411_v30 = vshrl.u32 %v11656_v23, 16  ;;  %v2414_v31 = vshll.u32 %v11656_v23, 16  ;;  %v2420_v32 = vshll.u32 %v11657_v24, 16 }
 0x170   : > { %1862 = vst [vmem:[#allocation2 + $0x1e4] sm:$0xf] %v1600_v28  ;;  %v2424_v35 = vshrl.u32 %v11657_v24, 16  ;;  %v2430_v36 = vshll.u32 %v11658_v29, 16  ;;  %v11515_v37 = vld [vmem:[%s14548_s26 + $0x60] sm:$0xf]  ;;  %v15178_v23 = vpop.f32.mrf.mxu0 }
 0x171   : > { %v11516_v38 = vld [vmem:[%s14548_s26 + $0x64] sm:$0xf]  ;;  %2134 = vst [vmem:[#allocation2 + $0x1e8] sm:$0xf] %v2025_v34  ;;  %v2413_v41 = vrot.slane %v2411_v30, 4  ;;  %v2416_v42 = vrot.slane %v2414_v31, 5  ;;  %v12336_v30 = vadd.f32 %v12335_v10, %v12334_v59  ;;  %v12450_v31 = vpop.f32.mrf.mxu1 }
 0x172   : > { %v2422_v43 = vrot.slane %v2420_v32, 5  ;;  %v11517_v44 = vld [vmem:[%s14548_s26 + $0x68] sm:$0x1]  ;;  %v1602_v45 = vshrl.u32 %v11515_v37, 16  ;;  %v2426_v47 = vrot.slane %v2424_v35, 4  ;;  %v2432_v48 = vrot.slane %v2430_v36, 5 }
 0x173   : > { %v1605_v49 = vshll.u32 %v11515_v37, 16  ;;  %v1611_v50 = vshll.u32 %v11516_v38, 16  ;;  %v11563_v51 = vld [vmem:[%s14548_s26 + $0x60] sm:$0xe]  ;;  %v2417_v53 = vor.u32 %v2416_v42, %v2413_v41  ;;  %v1615_v55 = vshrl.u32 %v11516_v38, 16  ;;  %v12338_v37 = vpop.f32.mrf.mxu0 }
 0x174   : > { %v1604_v54 = vrot.slane %v1602_v45, 4  ;;  %v1621_v56 = vshll.u32 %v11517_v44, 16  ;;  %v11564_v58 = vld [vmem:[%s14548_s26 + $0x64] sm:$0xf]  ;;  %v2427_v0 = vor.u32 %v2426_v47, %v2422_v43  ;;  %v11565_v62 = vld [vmem:[%s14548_s26 + $0x68] sm:$0x1]  ;;  %v12448_v36 = vadd.f32 %v12447_v5, %v12446_v52 }
 0x175   : > { %v13706_v60 = vld [vmem:[#allocation2 + $0x184] ss:$36 sps:$4 sm:$0xff]   ;;  %v1607_v1 = vrot.slane %v1605_v49, 5  ;;  %v2418_v6 = vrot.slane %v2417_v53, 4  ;;  %v1613_v7 = vrot.slane %v1611_v50, 5  ;;  %v1617_v8 = vrot.slane %v1615_v55, 4 }
 0x176   : > { %v13708_v61 = vld [vmem:[#allocation2 + $0x180] ss:$36 sps:$4 sm:$0xff]   ;;  %v1623_v9 = vrot.slane %v1621_v56, 5  ;;  %5013 = vmatprep.mubr.bf16.mxu1 %v13706_v60  ;;  %v2428_v13 = vrot.slane %v2427_v0, 4  ;;  %v11597_v63 = vrot.slane %v11563_v51, 9  ;;  %v2028_v12 = vrot.slane %v11564_v58, 5  ;;  %v12452_v51 = vpop.f32.mrf.mxu1  ;;  %v12340_v58 = vpop.f32.mrf.mxu0 }
 0x177   : > { %v1608_v14 = vor.u32 %v1607_v1, %v1604_v54  ;;  %v11620_v16 = vld [vmem:[%s14548_s26 + $0x6c] sm:$0xf]  ;;  %5014 = vmatmul.mubr.bf16.gmra.mxu1 %v13708_v61  ;;  %v2423_v18 = vsel %vm14566_vm4, %v2418_v6, %v2422_v43  ;;  %v1618_v19 = vor.u32 %v1617_v8, %v1613_v7  ;;  %v2031_v20 = vrot.slane %v11565_v62, 5  ;;  %v11621_v21 = vld [vmem:[%s14548_s26 + $0x70] sm:$0xf] }
 0x178   : > { %2200 = vst [vmem:[#allocation2 + $0x210] sm:$0xf] %v11620_v16  ;;  %v11659_v11 = vld [vmem:[%s14548_s26 + $0x6c] sm:$0xf]  ;;  %v13709_v24 = vld [vmem:[#allocation2 + $0x1c4] ss:$36 sps:$4 sm:$0xff]   ;;  %v2433_v27 = vsel %vm14566_vm4, %v2428_v13, %v2432_v48  ;;  %v2029_v29 = vsel %vm14577_vm5, %v11597_v63, %v2028_v12  ;;  %v12451_v38 = vadd.f32 %v12450_v31, %v12449_v17  ;;  %v12453_v2 = vpop.f32.mrf.mxu1 }
 0x179   : > { %v13711_v26 = vld [vmem:[#allocation2 + $0x1c0] ss:$36 sps:$4 sm:$0xff]   ;;  %2694 = vst [vmem:[#allocation2 + $0x1cc] sm:$0xf] %v2423_v18  ;;  %v1609_v28 = vrot.slane %v1608_v14, 4  ;;  %v1619_v32 = vrot.slane %v1618_v19, 4  ;;  %4860 = vmatprep.mubr.bf16.mxu0 %v13709_v24  ;;  %v15198_v18 = vadd.f32 %v12448_v36, %v12336_v30  ;;  %v12339_v19 = vadd.f32 %v12338_v37, %v15178_v23 }
 0x17a   : > { %2201 = vst [vmem:[#allocation2 + $0x234] sm:$0xf] %v11621_v21  ;;  %2695 = vst [vmem:[#allocation2 + $0x1f0] sm:$0xf] %v2433_v27  ;;  %v2030_v33 = vrot.slane %v2028_v12, 4  ;;  %v2435_v41 = vshrl.u32 %v11659_v11, 16  ;;  %4861 = vmatmul.mubr.bf16.gmra.mxu0 %v13711_v26  ;;  %v12455_v63 = vpop.f32.mrf.mxu1 }
 0x17b   : > { %2135 = vst [vmem:[#allocation2 + $0x20c] sm:$0xf] %v2029_v29  ;;  %v11660_v34 = vld [vmem:[%s14548_s26 + $0x70] sm:$0xf]  ;;  %v11661_v35 = vld [vmem:[%s14548_s26 + $0x74] sm:$0x1]  ;;  %v1614_v40 = vsel %vm14566_vm4, %v1609_v28, %v1613_v7  ;;  %v1624_v45 = vsel %vm14566_vm4, %v1619_v32, %v1623_v9  ;;  %v12341_v9 = vpop.f32.mrf.mxu0 }
 0x17c   : > { %v2438_v42 = vshll.u32 %v11659_v11, 16  ;;  %v2444_v43 = vshll.u32 %v11660_v34, 16  ;;  %v11518_v44 = vld [vmem:[%s14548_s26 + $0x6c] sm:$0xf]  ;;  %1863 = vst [vmem:[#allocation2 + $0x208] sm:$0xf] %v1614_v40  ;;  %v2032_v46 = vsel %vm14577_vm5, %v2030_v33, %v2031_v20  ;;  %v12342_v20 = vadd.f32 %v12341_v9, %v12340_v58  ;;  %v12456_v28 = vpop.f32.mrf.mxu1 }
 0x17d   : > { %v2448_v47 = vshrl.u32 %v11660_v34, 16  ;;  %v2454_v48 = vshll.u32 %v11661_v35, 16  ;;  %v11519_v49 = vld [vmem:[%s14548_s26 + $0x70] sm:$0xf]  ;;  %v11520_v50 = vld [vmem:[%s14548_s26 + $0x74] sm:$0x1]  ;;  %v12343_v21 = vpop.f32.mrf.mxu0  ;;  %v15204_v34 = vadd.f32 %v12451_v38, %v12339_v19 }
 0x17e   : > { %1864 = vst [vmem:[#allocation2 + $0x22c] sm:$0xf] %v1624_v45  ;;  %2136 = vst [vmem:[#allocation2 + $0x230] sm:$0xf] %v2032_v46  ;;  %v2437_v52 = vrot.slane %v2435_v41, 4  ;;  %v2440_v53 = vrot.slane %v2438_v42, 5  ;;  %v12454_v41 = vadd.f32 %v12453_v2, %v12452_v51  ;;  %v12458_v42 = vpop.f32.mrf.mxu1 }
 0x17f   : > { %v2446_v54 = vrot.slane %v2444_v43, 5  ;;  %v1626_v55 = vshrl.u32 %v11518_v44, 16  ;;  %v11566_v56 = vld [vmem:[%s14548_s26 + $0x6c] sm:$0xe]  ;;  %v2450_v59 = vrot.slane %v2448_v47, 4  ;;  %v2456_v60 = vrot.slane %v2454_v48, 5  ;;  %v12344_v30 = vpop.f32.mrf.mxu0 }
 0x180   : > { %v1629_v61 = vshll.u32 %v11518_v44, 16  ;;  %v1635_v0 = vshll.u32 %v11519_v49, 16  ;;  %v11567_v1 = vld [vmem:[%s14548_s26 + $0x70] sm:$0xf]  ;;  %v2441_v3 = vor.u32 %v2440_v53, %v2437_v52  ;;  %v1639_v6 = vshrl.u32 %v11519_v49, 16 }
 0x181   : > { %v1628_v5 = vrot.slane %v1626_v55, 4  ;;  %v1645_v7 = vshll.u32 %v11520_v50, 16  ;;  %v11568_v8 = vld [vmem:[%s14548_s26 + $0x74] sm:$0x1]  ;;  %v2451_v62 = vor.u32 %v2450_v59, %v2446_v54  ;;  %v11598_v14 = vrot.slane %v11566_v56, 9  ;;  %v12346_v48 = vpop.f32.mrf.mxu0  ;;  %v12459_v55 = vpop.f32.mrf.mxu1 }
 0x182   : > { %v1631_v10 = vrot.slane %v1629_v61, 5  ;;  %v1637_v13 = vrot.slane %v1635_v0, 5  ;;  %v13713_v12 = vld [vmem:[#allocation2 + $0x1cc] ss:$36 sps:$4 sm:$0xff]   ;;  %v2442_v17 = vrot.slane %v2441_v3, 4  ;;  %v1641_v26 = vrot.slane %v1639_v6, 4 }
 0x183   : > { %v13715_v16 = vld [vmem:[#allocation2 + $0x1c8] ss:$36 sps:$4 sm:$0xff]   ;;  %v2452_v11 = vrot.slane %v2451_v62, 4  ;;  %v1647_v27 = vrot.slane %v1645_v7, 5  ;;  %5021 = vmatprep.mubr.bf16.mxu1 %v13713_v12  ;;  %v2035_v31 = vrot.slane %v11567_v1, 5  ;;  %v2038_v32 = vrot.slane %v11568_v8, 5  ;;  %v12347_v0 = vpop.f32.mrf.mxu0  ;;  %v12461_v8 = vpop.f32.mrf.mxu1 }
 0x184   : > { %v1632_v24 = vor.u32 %v1631_v10, %v1628_v5  ;;  %v2447_v29 = vsel %vm14566_vm4, %v2442_v17, %v2446_v54  ;;  %v11622_v33 = vld [vmem:[%s14548_s26 + $0x78] sm:$0xf]  ;;  %5022 = vmatmul.mubr.bf16.gmra.mxu1 %v13715_v16  ;;  %v1642_v40 = vor.u32 %v1641_v26, %v1637_v13  ;;  %v11623_v44 = vld [vmem:[%s14548_s26 + $0x7c] sm:$0xf]  ;;  %v12345_v46 = vadd.f32 %v12344_v30, %v12343_v21  ;;  %v11664_v52 = vld [vmem:[%s14548_s26 + $0x80] sm:$0x1] }
 0x185   : > { %v13716_v23 = vld [vmem:[#allocation2 + $0x20c] ss:$36 sps:$4 sm:$0xff]   ;;  %v2457_v36 = vsel %vm14566_vm4, %v2452_v11, %v2456_v60  ;;  %2696 = vst [vmem:[#allocation2 + $0x214] sm:$0xf] %v2447_v29  ;;  %2202 = vst [vmem:[#allocation2 + $0x258] sm:$0xf] %v11622_v33  ;;  %v2036_v38 = vsel %vm14577_vm5, %v11598_v14, %v2035_v31  ;;  %v12457_v47 = vadd.f32 %v12456_v28, %v12455_v63  ;;  %v12349_v63 = vpop.f32.mrf.mxu0  ;;  %v12462_v21 = vpop.f32.mrf.mxu1 }
 0x186   : > { %v13718_v35 = vld [vmem:[#allocation2 + $0x208] ss:$36 sps:$4 sm:$0xff]   ;;  %v1633_v37 = vrot.slane %v1632_v24, 4  ;;  %2697 = vst [vmem:[#allocation2 + $0x238] sm:$0xf] %v2457_v36  ;;  %v2037_v43 = vrot.slane %v2035_v31, 4  ;;  %4868 = vmatprep.mubr.bf16.mxu0 %v13716_v23  ;;  %v15216_v54 = vadd.f32 %v12454_v41, %v12342_v20  ;;  %v12348_v30 = vadd.f32 %v12347_v0, %v12346_v48 }
 0x187   : > { %v11662_v45 = vld [vmem:[%s14548_s26 + $0x78] sm:$0xf]  ;;  %v1643_v50 = vrot.slane %v1642_v40, 4  ;;  %2137 = vst [vmem:[#allocation2 + $0x254] sm:$0xf] %v2036_v38  ;;  %4869 = vmatmul.mubr.bf16.gmra.mxu0 %v13718_v35  ;;  %v2478_v3 = vshll.u32 %v11664_v52, 16  ;;  %v15225_v7 = vadd.f32 %v12457_v47, %v12345_v46  ;;  %v12350_v29 = vpop.f32.mrf.mxu0  ;;  %v12460_v23 = vadd.f32 %v12459_v55, %v12458_v42  ;;  %v15232_v36 = vpop.f32.mrf.mxu1 }
 0x188   : > { %v1638_v49 = vsel %vm14566_vm4, %v1633_v37, %v1637_v13  ;;  %2203 = vst [vmem:[#allocation2 + $0x27c] sm:$0xf] %v11623_v44  ;;  %v11663_v51 = vld [vmem:[%s14548_s26 + $0x7c] sm:$0xf]  ;;  %v2459_v53 = vshrl.u32 %v11662_v45, 16  ;;  %v2039_v56 = vsel %vm14577_vm5, %v2037_v43, %v2038_v32  ;;  %v2462_v58 = vshll.u32 %v11662_v45, 16 }
 0x189   : > { %1865 = vst [vmem:[#allocation2 + $0x250] sm:$0xf] %v1638_v49  ;;  %v2468_v59 = vshll.u32 %v11663_v51, 16  ;;  %v2472_v60 = vshrl.u32 %v11663_v51, 16  ;;  %v11521_v61 = vld [vmem:[%s14548_s26 + $0x78] sm:$0xf]  ;;  %v1648_v1 = vsel %vm14566_vm4, %v1643_v50, %v1647_v27  ;;  %v15230_v35 = vadd.f32 %v12350_v29, %v12349_v63  ;;  %v15236_v48 = vpop.f32.mrf.mxu0  ;;  %v15238_v42 = vpop.f32.mrf.mxu1 }
 0x18a   : > { %2138 = vst [vmem:[#allocation2 + $0x278] sm:$0xf] %v2039_v56  ;;  %v2461_v2 = vrot.slane %v2459_v53, 4  ;;  %v11522_v5 = vld [vmem:[%s14548_s26 + $0x7c] sm:$0xf]  ;;  %v2464_v9 = vrot.slane %v2462_v58, 5  ;;  %v15248_v0 = vadd.f32 %v12460_v23, %v12348_v30 }
 0x18b   : > { %v11523_v6 = vld [vmem:[%s14548_s26 + $0x80] sm:$0x1]  ;;  %1866 = vst [vmem:[#allocation2 + $0x274] sm:$0xf] %v1648_v1  ;;  %v2470_v62 = vrot.slane %v2468_v59, 5  ;;  %v2474_v10 = vrot.slane %v2472_v60, 4  ;;  %v12463_v1 = vadd.f32 %v12462_v21, %v12461_v8 }
 0x18c   : > { %v1650_v13 = vshrl.u32 %v11521_v61, 16  ;;  %v11569_v14 = vld [vmem:[%s14548_s26 + $0x78] sm:$0xe]  ;;  %v2480_v12 = vrot.slane %v2478_v3, 5  ;;  %v1653_v16 = vshll.u32 %v11521_v61, 16  ;;  %v1659_v17 = vshll.u32 %v11522_v5, 16  ;;  %v15250_v3 = vpop.f32.mrf.mxu1 }
 0x18d   : > { %v1663_v19 = vshrl.u32 %v11522_v5, 16  ;;  %v11570_v20 = vld [vmem:[%s14548_s26 + $0x7c] sm:$0xf]  ;;  %v2465_v11 = vor.u32 %v2464_v9, %v2461_v2  ;;  %v2475_v24 = vor.u32 %v2474_v10, %v2470_v62  ;;  %v1669_v27 = vshll.u32 %v11523_v6, 16  ;;  %v11571_v28 = vld [vmem:[%s14548_s26 + $0x80] sm:$0x1]  ;;  %v12353_v2 = vpop.f32.mrf.mxu0 }
 0x18e   : > { %v1652_v26 = vrot.slane %v1650_v13, 4  ;;  %v13719_v31 = vld [vmem:[#allocation2 + $0x214] ss:$36 sps:$4 sm:$0xff]   ;;  %v1655_v33 = vrot.slane %v1653_v16, 5  ;;  %v1661_v41 = vrot.slane %v1659_v17, 5  ;;  %v11599_v46 = vrot.slane %v11569_v14, 9  ;;  %v15256_v17 = vpop.f32.mrf.mxu1 }
 0x18f   : > { %v13721_v32 = vld [vmem:[#allocation2 + $0x210] ss:$36 sps:$4 sm:$0xff]   ;;  %v2466_v37 = vrot.slane %v2465_v11, 4  ;;  %v2476_v40 = vrot.slane %v2475_v24, 4  ;;  %v1665_v38 = vrot.slane %v1663_v19, 4  ;;  %5029 = vmatprep.mubr.bf16.mxu1 %v13719_v31  ;;  %v1671_v45 = vrot.slane %v1669_v27, 5  ;;  %v12355_v8 = vpop.f32.mrf.mxu0 }
 0x190   : > { %v11624_v43 = vld [vmem:[%s14548_s26 + $0x84] sm:$0xf]  ;;  %v1656_v44 = vor.u32 %v1655_v33, %v1652_v26  ;;  %v2042_v47 = vrot.slane %v11570_v20, 5  ;;  %v11625_v49 = vld [vmem:[%s14548_s26 + $0x88] sm:$0xf]  ;;  %5030 = vmatmul.mubr.bf16.gmra.mxu1 %v13721_v32  ;;  %v2045_v53 = vrot.slane %v11571_v28, 5  ;;  %v12470_v30 = vpop.f32.mrf.mxu1 }
 0x191   : > { %2204 = vst [vmem:[#allocation2 + $0x2a0] sm:$0xf] %v11624_v43  ;;  %v2471_v50 = vsel %vm14566_vm4, %v2466_v37, %v2470_v62  ;;  %v2481_v51 = vsel %vm14566_vm4, %v2476_v40, %v2480_v12  ;;  %v1666_v52 = vor.u32 %v1665_v38, %v1661_v41  ;;  %2205 = vst [vmem:[#allocation2 + $0x2c4] sm:$0xf] %v11625_v49  ;;  %v11665_v55 = vld [vmem:[%s14548_s26 + $0x84] sm:$0xf]  ;;  %v12356_v33 = vpop.f32.mrf.mxu0 }
 0x192   : > { %v11666_v56 = vld [vmem:[%s14548_s26 + $0x88] sm:$0xf]  ;;  %v13722_v58 = vld [vmem:[#allocation2 + $0x254] ss:$36 sps:$4 sm:$0xff]   ;;  %2698 = vst [vmem:[#allocation2 + $0x25c] sm:$0xf] %v2471_v50  ;;  %v2043_v61 = vsel %vm14577_vm5, %v11599_v46, %v2042_v47  ;;  %v12471_v49 = vpop.f32.mrf.mxu1 }
 0x193   : > { %v13724_v59 = vld [vmem:[#allocation2 + $0x250] ss:$36 sps:$4 sm:$0xff]   ;;  %2699 = vst [vmem:[#allocation2 + $0x280] sm:$0xf] %v2481_v51  ;;  %v1657_v60 = vrot.slane %v1656_v44, 4  ;;  %v1667_v5 = vrot.slane %v1666_v52, 4  ;;  %4876 = vmatprep.mubr.bf16.mxu0 %v13722_v58 }
 0x194   : > { %v2044_v6 = vrot.slane %v2042_v47, 4  ;;  %2139 = vst [vmem:[#allocation2 + $0x29c] sm:$0xf] %v2043_v61  ;;  %v11667_v9 = vld [vmem:[%s14548_s26 + $0x8c] sm:$0x1]  ;;  %v2483_v62 = vshrl.u32 %v11665_v55, 16  ;;  %4877 = vmatmul.mubr.bf16.gmra.mxu0 %v13724_v59 }
 0x195   : > { %v2486_v10 = vshll.u32 %v11665_v55, 16  ;;  %v1662_v13 = vsel %vm14566_vm4, %v1657_v60, %v1661_v41  ;;  %v2492_v14 = vshll.u32 %v11666_v56, 16  ;;  %v2496_v63 = vshrl.u32 %v11666_v56, 16  ;;  %v11524_v16 = vld [vmem:[%s14548_s26 + $0x84] sm:$0xf]  ;;  %v12358_v56 = vpop.f32.mrf.mxu0 }
 0x196   : > { %v2502_v12 = vshll.u32 %v11667_v9, 16  ;;  %v1672_v19 = vsel %vm14566_vm4, %v1667_v5, %v1671_v45  ;;  %1867 = vst [vmem:[#allocation2 + $0x298] sm:$0xf] %v1662_v13  ;;  %v2046_v20 = vsel %vm14577_vm5, %v2044_v6, %v2045_v53  ;;  %v2485_v21 = vrot.slane %v2483_v62, 4  ;;  %v11525_v24 = vld [vmem:[%s14548_s26 + $0x88] sm:$0xf]  ;;  %v15271_v6 = vpop.f32.mrf.mxu1 }
 0x197   : > { %v2488_v11 = vrot.slane %v2486_v10, 5  ;;  %v11526_v26 = vld [vmem:[%s14548_s26 + $0x8c] sm:$0x1]  ;;  %1868 = vst [vmem:[#allocation2 + $0x2bc] sm:$0xf] %v1672_v19  ;;  %v2494_v27 = vrot.slane %v2492_v14, 5  ;;  %v15268_v53 = vadd.f32 %v12463_v1, %v15230_v35  ;;  %v12354_v55 = vadd.f32 %v12353_v2, %v15236_v48  ;;  %v12359_v1 = vpop.f32.mrf.mxu0 }
 0x198   : > { %2140 = vst [vmem:[#allocation2 + $0x2c0] sm:$0xf] %v2046_v20  ;;  %v2498_v28 = vrot.slane %v2496_v63, 4  ;;  %v2504_v29 = vrot.slane %v2502_v12, 5  ;;  %v1674_v31 = vshrl.u32 %v11524_v16, 16  ;;  %v1677_v37 = vshll.u32 %v11524_v16, 16  ;;  %v15281_v16 = vpop.f32.mrf.mxu1 }
 0x199   : > { %v11572_v32 = vld [vmem:[%s14548_s26 + $0x84] sm:$0xe]  ;;  %v2489_v23 = vor.u32 %v2488_v11, %v2485_v21  ;;  %v1683_v40 = vshll.u32 %v11525_v24, 16  ;;  %v1687_v41 = vshrl.u32 %v11525_v24, 16  ;;  %v11573_v38 = vld [vmem:[%s14548_s26 + $0x88] sm:$0xf]  ;;  %v12466_v63 = vadd.f32 %v15238_v42, %v15232_v36  ;;  %v15287_v36 = vpop.f32.mrf.mxu0 }
 0x19a   : > { %v2499_v43 = vor.u32 %v2498_v28, %v2494_v27  ;;  %v1676_v44 = vrot.slane %v1674_v31, 4  ;;  %v1693_v45 = vshll.u32 %v11526_v26, 16  ;;  %v11574_v46 = vld [vmem:[%s14548_s26 + $0x8c] sm:$0x1]  ;;  %v11600_v47 = vrot.slane %v11572_v32, 9 }
 0x19b   : > { %v13726_v50 = vld [vmem:[#allocation2 + $0x25c] ss:$36 sps:$4 sm:$0xff]   ;;  %v2490_v51 = vrot.slane %v2489_v23, 4  ;;  %v1679_v52 = vrot.slane %v1677_v37, 5  ;;  %v1685_v60 = vrot.slane %v1683_v40, 5  ;;  %v1689_v61 = vrot.slane %v1687_v41, 4  ;;  %v12362_v37 = vpop.f32.mrf.mxu0  ;;  %v15296_v40 = vpop.f32.mrf.mxu1 }
 0x19c   : > { %v13728_v58 = vld [vmem:[#allocation2 + $0x258] ss:$36 sps:$4 sm:$0xff]   ;;  %v2500_v59 = vrot.slane %v2499_v43, 4  ;;  %v1695_v5 = vrot.slane %v1693_v45, 5  ;;  %5037 = vmatprep.mubr.bf16.mxu1 %v13726_v50  ;;  %v2049_v10 = vrot.slane %v11573_v38, 5  ;;  %v2052_v35 = vrot.slane %v11574_v46, 5 }
 0x19d   : > { %v2495_v9 = vsel %vm14566_vm4, %v2490_v51, %v2494_v27  ;;  %v1680_v62 = vor.u32 %v1679_v52, %v1676_v44  ;;  %5038 = vmatmul.mubr.bf16.gmra.mxu1 %v13728_v58  ;;  %v1690_v2 = vor.u32 %v1689_v61, %v1685_v60  ;;  %v11626_v13 = vld [vmem:[%s14548_s26 + $0x90] sm:$0xf]  ;;  %v11627_v14 = vld [vmem:[%s14548_s26 + $0x94] sm:$0xf]  ;;  %v12357_v12 = vadd.f32 %v12356_v33, %v12355_v8  ;;  %v11670_v33 = vld [vmem:[%s14548_s26 + $0x98] sm:$0x1]  ;;  %v12477_v52 = vpop.f32.mrf.mxu1  ;;  %v12364_v61 = vpop.f32.mrf.mxu0 }
 0x19e   : > { %v2505_v48 = vsel %vm14566_vm4, %v2500_v59, %v2504_v29  ;;  %2700 = vst [vmem:[#allocation2 + $0x2a4] sm:$0xf] %v2495_v9  ;;  %v13731_v20 = vld [vmem:[#allocation2 + $0x298] ss:$36 sps:$4 sm:$0xff]   ;;  %v2050_v11 = vsel %vm14577_vm5, %v11600_v47, %v2049_v10  ;;  %2206 = vst [vmem:[#allocation2 + $0x2e8] sm:$0xf] %v11626_v13  ;;  %v12469_v24 = vadd.f32 %v15256_v17, %v15250_v3 }
 0x19f   : > { %v13729_v19 = vld [vmem:[#allocation2 + $0x29c] ss:$36 sps:$4 sm:$0xff]   ;;  %2701 = vst [vmem:[#allocation2 + $0x2c8] sm:$0xf] %v2505_v48  ;;  %v1681_v21 = vrot.slane %v1680_v62, 4  ;;  %v12360_v26 = vadd.f32 %v12359_v1, %v12358_v56  ;;  %v1691_v42 = vrot.slane %v1690_v2, 4  ;;  %v15291_v29 = vadd.f32 %v12466_v63, %v12354_v55  ;;  %v15307_v1 = vpop.f32.mrf.mxu1 }
 0x1a0   : > { %2207 = vst [vmem:[#allocation2 + $0x30c] sm:$0xf] %v11627_v14  ;;  %v2051_v8 = vrot.slane %v2049_v10, 4  ;;  %2141 = vst [vmem:[#allocation2 + $0x2e4] sm:$0xf] %v2050_v11  ;;  %v12472_v31 = vadd.f32 %v12471_v49, %v12470_v30  ;;  %4884 = vmatprep.mubr.bf16.mxu0 %v13729_v19  ;;  %v2526_v43 = vshll.u32 %v11670_v33, 16  ;;  %v15309_v63 = vadd.f32 %v12469_v24, %v12357_v12 }
 0x1a1   : > { %v11668_v27 = vld [vmem:[%s14548_s26 + $0x90] sm:$0xf]  ;;  %v11669_v28 = vld [vmem:[%s14548_s26 + $0x94] sm:$0xf]  ;;  %v1686_v32 = vsel %vm14566_vm4, %v1681_v21, %v1685_v60  ;;  %4885 = vmatmul.mubr.bf16.gmra.mxu0 %v13731_v20  ;;  %v1696_v41 = vsel %vm14566_vm4, %v1691_v42, %v1695_v5  ;;  %v11529_v50 = vld [vmem:[%s14548_s26 + $0x98] sm:$0x1]  ;;  %v12365_v20 = vpop.f32.mrf.mxu0 }
 0x1a2   : > { %v2507_v23 = vshrl.u32 %v11668_v27, 16  ;;  %v2510_v3 = vshll.u32 %v11668_v27, 16  ;;  %v2516_v17 = vshll.u32 %v11669_v28, 16  ;;  %1869 = vst [vmem:[#allocation2 + $0x2e0] sm:$0xf] %v1686_v32  ;;  %v2053_v30 = vsel %vm14577_vm5, %v2051_v8, %v2052_v35 }
 0x1a3   : > { %v2520_v38 = vshrl.u32 %v11669_v28, 16  ;;  %v11527_v44 = vld [vmem:[%s14548_s26 + $0x90] sm:$0xf]  ;;  %v11528_v45 = vld [vmem:[%s14548_s26 + $0x94] sm:$0xf]  ;;  %v2528_v56 = vrot.slane %v2526_v43, 5  ;;  %v15311_v19 = vadd.f32 %v12472_v31, %v12360_v26  ;;  %v15314_v28 = vpop.f32.mrf.mxu1  ;;  %v15317_v12 = vpop.f32.mrf.mxu0 }
 0x1a4   : > { %1870 = vst [vmem:[#allocation2 + $0x304] sm:$0xf] %v1696_v41  ;;  %2142 = vst [vmem:[#allocation2 + $0x308] sm:$0xf] %v2053_v30  ;;  %v2509_v46 = vrot.slane %v2507_v23, 4  ;;  %v2512_v47 = vrot.slane %v2510_v3, 5 }
 0x1a5   : > { %v2518_v49 = vrot.slane %v2516_v17, 5  ;;  %v1698_v51 = vshrl.u32 %v11527_v44, 16  ;;  %v2522_v55 = vrot.slane %v2520_v38, 4  ;;  %v1701_v58 = vshll.u32 %v11527_v44, 16  ;;  %v11575_v60 = vld [vmem:[%s14548_s26 + $0x90] sm:$0xe] }
 0x1a6   : > { %v1707_v59 = vshll.u32 %v11528_v45, 16  ;;  %v2513_v5 = vor.u32 %v2512_v47, %v2509_v46  ;;  %v1711_v62 = vshrl.u32 %v11528_v45, 16  ;;  %v1717_v10 = vshll.u32 %v11529_v50, 16  ;;  %v11576_v35 = vld [vmem:[%s14548_s26 + $0x94] sm:$0xf]  ;;  %v12368_v50 = vpop.f32.mrf.mxu0 }
 0x1a7   : > { %v1700_v9 = vrot.slane %v1698_v51, 4  ;;  %v13732_v48 = vld [vmem:[#allocation2 + $0x2a4] ss:$36 sps:$4 sm:$0xff]   ;;  %v2523_v13 = vor.u32 %v2522_v55, %v2518_v49  ;;  %v1703_v14 = vrot.slane %v1701_v58, 5  ;;  %v11577_v27 = vld [vmem:[%s14548_s26 + $0x98] sm:$0x1]  ;;  %v15324_v38 = vadd.f32 %v12362_v37, %v15287_v36  ;;  %v15332_v51 = vpop.f32.mrf.mxu1 }
 0x1a8   : > { %v13734_v2 = vld [vmem:[#allocation2 + $0x2a0] ss:$36 sps:$4 sm:$0xff]   ;;  %v2514_v21 = vrot.slane %v2513_v5, 4  ;;  %v1709_v11 = vrot.slane %v1707_v59, 5  ;;  %v1713_v42 = vrot.slane %v1711_v62, 4  ;;  %v1719_v8 = vrot.slane %v1717_v10, 5  ;;  %5045 = vmatprep.mubr.bf16.mxu1 %v13732_v48  ;;  %v12370_v62 = vpop.f32.mrf.mxu0 }
 0x1a9   : > { %v2524_v32 = vrot.slane %v2523_v13, 4  ;;  %v1704_v33 = vor.u32 %v1703_v14, %v1700_v9  ;;  %v11601_v23 = vrot.slane %v11575_v60, 9  ;;  %v2056_v3 = vrot.slane %v11576_v35, 5  ;;  %v11628_v17 = vld [vmem:[%s14548_s26 + $0x9c] sm:$0xf]  ;;  %5046 = vmatmul.mubr.bf16.gmra.mxu1 %v13734_v2  ;;  %v15340_v10 = vpop.f32.mrf.mxu1 }
 0x1aa   : > { %v2519_v24 = vsel %vm14566_vm4, %v2514_v21, %v2518_v49  ;;  %v1714_v26 = vor.u32 %v1713_v42, %v1709_v11  ;;  %v2059_v31 = vrot.slane %v11577_v27, 5  ;;  %v11629_v41 = vld [vmem:[%s14548_s26 + $0xa0] sm:$0xf]  ;;  %2208 = vst [vmem:[#allocation2 + $0x330] sm:$0xf] %v11628_v17  ;;  %v12475_v49 = vadd.f32 %v15281_v16, %v15271_v6  ;;  %v12371_v42 = vpop.f32.mrf.mxu0 }
 0x1ab   : > { %v11671_v30 = vld [vmem:[%s14548_s26 + $0x9c] sm:$0xf]  ;;  %v13735_v43 = vld [vmem:[#allocation2 + $0x2e4] ss:$36 sps:$4 sm:$0xff]   ;;  %v2529_v45 = vsel %vm14566_vm4, %v2524_v32, %v2528_v56  ;;  %2702 = vst [vmem:[#allocation2 + $0x2ec] sm:$0xf] %v2519_v24  ;;  %v2057_v47 = vsel %vm14577_vm5, %v11601_v23, %v2056_v3  ;;  %v12366_v56 = vadd.f32 %v12365_v20, %v12364_v61  ;;  %v12478_v59 = vadd.f32 %v12477_v52, %v15296_v40  ;;  %v15349_v27 = vpop.f32.mrf.mxu1 }
 0x1ac   : > { %v13737_v44 = vld [vmem:[#allocation2 + $0x2e0] ss:$36 sps:$4 sm:$0xff]   ;;  %v1705_v46 = vrot.slane %v1704_v33, 4  ;;  %2209 = vst [vmem:[#allocation2 + $0x354] sm:$0xf] %v11629_v41  ;;  %v1715_v36 = vrot.slane %v1714_v26, 4  ;;  %4892 = vmatprep.mubr.bf16.mxu0 %v13735_v43 }
 0x1ad   : > { %2703 = vst [vmem:[#allocation2 + $0x310] sm:$0xf] %v2529_v45  ;;  %v2058_v37 = vrot.slane %v2056_v3, 4  ;;  %2143 = vst [vmem:[#allocation2 + $0x32c] sm:$0xf] %v2057_v47  ;;  %v2531_v6 = vshrl.u32 %v11671_v30, 16  ;;  %4893 = vmatmul.mubr.bf16.gmra.mxu0 %v13737_v44  ;;  %v15353_v43 = vpop.f32.mrf.mxu1 }
 0x1ae   : > { %v11672_v55 = vld [vmem:[%s14548_s26 + $0xa0] sm:$0xf]  ;;  %v11673_v58 = vld [vmem:[%s14548_s26 + $0xa4] sm:$0x1]  ;;  %v1710_v60 = vsel %vm14566_vm4, %v1705_v46, %v1709_v11  ;;  %v2534_v16 = vshll.u32 %v11671_v30, 16  ;;  %v1720_v61 = vsel %vm14566_vm4, %v1715_v36, %v1719_v8  ;;  %v12373_v30 = vpop.f32.mrf.mxu0 }
 0x1af   : > { %v2540_v5 = vshll.u32 %v11672_v55, 16  ;;  %v11530_v9 = vld [vmem:[%s14548_s26 + $0x9c] sm:$0xf]  ;;  %1871 = vst [vmem:[#allocation2 + $0x328] sm:$0xf] %v1710_v60  ;;  %v2060_v40 = vsel %vm14577_vm5, %v2058_v37, %v2059_v31  ;;  %v2544_v52 = vshrl.u32 %v11672_v55, 16  ;;  %v15358_v60 = vadd.f32 %v12478_v59, %v12366_v56 }
 0x1b0   : > { %v2550_v35 = vshll.u32 %v11673_v58, 16  ;;  %v11531_v48 = vld [vmem:[%s14548_s26 + $0xa0] sm:$0xf]  ;;  %v11532_v2 = vld [vmem:[%s14548_s26 + $0xa4] sm:$0x1]  ;;  %v2533_v13 = vrot.slane %v2531_v6, 4  ;;  %v15356_v58 = vadd.f32 %v12475_v49, %v15324_v38  ;;  %v12369_v6 = vadd.f32 %v12368_v50, %v15317_v12 }
 0x1b1   : > { %1872 = vst [vmem:[#allocation2 + $0x34c] sm:$0xf] %v1720_v61  ;;  %2144 = vst [vmem:[#allocation2 + $0x350] sm:$0xf] %v2060_v40  ;;  %v2536_v14 = vrot.slane %v2534_v16, 5  ;;  %v2542_v20 = vrot.slane %v2540_v5, 5  ;;  %v12374_v16 = vpop.f32.mrf.mxu0  ;;  %v12481_v38 = vadd.f32 %v15314_v28, %v15307_v1 }
 0x1b2   : > { %v1722_v21 = vshrl.u32 %v11530_v9, 16  ;;  %v11578_v11 = vld [vmem:[%s14548_s26 + $0x9c] sm:$0xe]  ;;  %v2546_v8 = vrot.slane %v2544_v52, 4  ;;  %v2552_v32 = vrot.slane %v2550_v35, 5  ;;  %v1725_v33 = vshll.u32 %v11530_v9, 16  ;;  %v15361_v52 = vpop.f32.mrf.mxu1 }
 0x1b3   : > { %v1731_v23 = vshll.u32 %v11531_v48, 16  ;;  %v11579_v3 = vld [vmem:[%s14548_s26 + $0xa0] sm:$0xf]  ;;  %v2537_v17 = vor.u32 %v2536_v14, %v2533_v13  ;;  %v1735_v26 = vshrl.u32 %v11531_v48, 16  ;;  %v1741_v31 = vshll.u32 %v11532_v2, 16  ;;  %v15368_v12 = vpop.f32.mrf.mxu0 }
 0x1b4   : > { %v1724_v24 = vrot.slane %v1722_v21, 4  ;;  %v11580_v41 = vld [vmem:[%s14548_s26 + $0xa4] sm:$0x1]  ;;  %v2547_v44 = vor.u32 %v2546_v8, %v2542_v20  ;;  %v1727_v45 = vrot.slane %v1725_v33, 5  ;;  %v11602_v47 = vrot.slane %v11578_v11, 9  ;;  %v12489_v21 = vpop.f32.mrf.mxu1 }
 0x1b5   : > { %v1733_v46 = vrot.slane %v1731_v23, 5  ;;  %v13739_v36 = vld [vmem:[#allocation2 + $0x2ec] ss:$36 sps:$4 sm:$0xff]   ;;  %v2538_v55 = vrot.slane %v2537_v17, 4  ;;  %v1737_v61 = vrot.slane %v1735_v26, 4  ;;  %v1743_v40 = vrot.slane %v1741_v31, 5  ;;  %v12377_v23 = vpop.f32.mrf.mxu0 }
 0x1b6   : > { %v13741_v37 = vld [vmem:[#allocation2 + $0x2e8] ss:$36 sps:$4 sm:$0xff]   ;;  %v2548_v5 = vrot.slane %v2547_v44, 4  ;;  %v1728_v9 = vor.u32 %v1727_v45, %v1724_v24  ;;  %5053 = vmatprep.mubr.bf16.mxu1 %v13739_v36  ;;  %v2063_v48 = vrot.slane %v11579_v3, 5  ;;  %v2066_v2 = vrot.slane %v11580_v41, 5  ;;  %v15386_v31 = vpop.f32.mrf.mxu1 }
 0x1b7   : > { %v2543_v35 = vsel %vm14566_vm4, %v2538_v55, %v2542_v20  ;;  %v11630_v13 = vld [vmem:[%s14548_s26 + $0xa8] sm:$0xf]  ;;  %5054 = vmatmul.mubr.bf16.gmra.mxu1 %v13741_v37  ;;  %v1738_v14 = vor.u32 %v1737_v61, %v1733_v46  ;;  %v12372_v20 = vadd.f32 %v12371_v42, %v12370_v62  ;;  %v11631_v11 = vld [vmem:[%s14548_s26 + $0xac] sm:$0xf]  ;;  %v15376_v33 = vadd.f32 %v12481_v38, %v12369_v6  ;;  %v11676_v17 = vld [vmem:[%s14548_s26 + $0xb0] sm:$0x1] }
 0x1b8   : > { %v13742_v49 = vld [vmem:[#allocation2 + $0x32c] ss:$36 sps:$4 sm:$0xff]   ;;  %v2553_v56 = vsel %vm14566_vm4, %v2548_v5, %v2552_v32  ;;  %2704 = vst [vmem:[#allocation2 + $0x334] sm:$0xf] %v2543_v35  ;;  %v1729_v59 = vrot.slane %v1728_v9, 4  ;;  %v2064_v1 = vsel %vm14577_vm5, %v11602_v47, %v2063_v48  ;;  %v2065_v28 = vrot.slane %v2063_v48, 4 }
 0x1b9   : > { %v13744_v50 = vld [vmem:[#allocation2 + $0x328] ss:$36 sps:$4 sm:$0xff]   ;;  %2210 = vst [vmem:[#allocation2 + $0x378] sm:$0xf] %v11630_v13  ;;  %2705 = vst [vmem:[#allocation2 + $0x358] sm:$0xf] %v2553_v56  ;;  %v12484_v32 = vadd.f32 %v15340_v10, %v15332_v51  ;;  %4900 = vmatprep.mubr.bf16.mxu0 %v13742_v49  ;;  %v15384_v26 = vadd.f32 %v12374_v16, %v12373_v30  ;;  %v15399_v16 = vpop.f32.mrf.mxu1 }
 0x1ba   : > { %v11674_v8 = vld [vmem:[%s14548_s26 + $0xa8] sm:$0xf]  ;;  %v1734_v62 = vsel %vm14566_vm4, %v1729_v59, %v1733_v46  ;;  %v1739_v42 = vrot.slane %v1738_v14, 4  ;;  %2145 = vst [vmem:[#allocation2 + $0x374] sm:$0xf] %v2064_v1  ;;  %4901 = vmatmul.mubr.bf16.gmra.mxu0 %v13744_v50  ;;  %v2067_v51 = vsel %vm14577_vm5, %v2065_v28, %v2066_v2  ;;  %v15391_v46 = vpop.f32.mrf.mxu0  ;;  %v2574_v36 = vshll.u32 %v11676_v17, 16 }
 0x1bb   : > { %2211 = vst [vmem:[#allocation2 + $0x39c] sm:$0xf] %v11631_v11  ;;  %v11675_v3 = vld [vmem:[%s14548_s26 + $0xac] sm:$0xf]  ;;  %v2555_v24 = vshrl.u32 %v11674_v8, 16  ;;  %v2558_v10 = vshll.u32 %v11674_v8, 16  ;;  %v15397_v6 = vadd.f32 %v12484_v32, %v12372_v20  ;;  %v15405_v56 = vpop.f32.mrf.mxu1 }
 0x1bc   : > { %1873 = vst [vmem:[#allocation2 + $0x370] sm:$0xf] %v1734_v62  ;;  %v2564_v41 = vshll.u32 %v11675_v3, 16  ;;  %v2568_v44 = vshrl.u32 %v11675_v3, 16  ;;  %v11533_v45 = vld [vmem:[%s14548_s26 + $0xa8] sm:$0xf]  ;;  %v1744_v47 = vsel %vm14566_vm4, %v1739_v42, %v1743_v40  ;;  %v15402_v2 = vpop.f32.mrf.mxu0  ;;  %v12487_v62 = vadd.f32 %v15353_v43, %v15349_v27 }
 0x1bd   : > { %2146 = vst [vmem:[#allocation2 + $0x398] sm:$0xf] %v2067_v51  ;;  %v2557_v30 = vrot.slane %v2555_v24, 4  ;;  %v11534_v37 = vld [vmem:[%s14548_s26 + $0xac] sm:$0xf]  ;;  %v2560_v5 = vrot.slane %v2558_v10, 5  ;;  %v12378_v42 = vadd.f32 %v12377_v23, %v15368_v12  ;;  %v12490_v3 = vadd.f32 %v12489_v21, %v15361_v52  ;;  %v15414_v24 = vpop.f32.mrf.mxu1 }
 0x1be   : > { %v11535_v55 = vld [vmem:[%s14548_s26 + $0xb0] sm:$0x1]  ;;  %1874 = vst [vmem:[#allocation2 + $0x394] sm:$0xf] %v1744_v47  ;;  %v2566_v9 = vrot.slane %v2564_v41, 5  ;;  %v2570_v61 = vrot.slane %v2568_v44, 4  ;;  %v15412_v17 = vpop.f32.mrf.mxu0 }
 0x1bf   : > { %v1746_v35 = vshrl.u32 %v11533_v45, 16  ;;  %v11581_v48 = vld [vmem:[%s14548_s26 + $0xa8] sm:$0xe]  ;;  %v2576_v40 = vrot.slane %v2574_v36, 5  ;;  %v1749_v13 = vshll.u32 %v11533_v45, 16  ;;  %v1755_v38 = vshll.u32 %v11534_v37, 16  ;;  %v15420_v52 = vpop.f32.mrf.mxu1 }
 0x1c0   : > { %v1759_v49 = vshrl.u32 %v11534_v37, 16  ;;  %v11582_v50 = vld [vmem:[%s14548_s26 + $0xac] sm:$0xf]  ;;  %v2561_v59 = vor.u32 %v2560_v5, %v2557_v30  ;;  %v2571_v14 = vor.u32 %v2570_v61, %v2566_v9  ;;  %v1765_v1 = vshll.u32 %v11535_v55, 16  ;;  %v11583_v28 = vld [vmem:[%s14548_s26 + $0xb0] sm:$0x1]  ;;  %v15418_v12 = vpop.f32.mrf.mxu0 }
 0x1c1   : > { %v1748_v20 = vrot.slane %v1746_v35, 4  ;;  %v13745_v11 = vld [vmem:[#allocation2 + $0x334] ss:$36 sps:$4 sm:$0xff]   ;;  %v1751_v32 = vrot.slane %v1749_v13, 5  ;;  %v1757_v41 = vrot.slane %v1755_v38, 5  ;;  %v11603_v36 = vrot.slane %v11581_v48, 9 }
 0x1c2   : > { %v13747_v8 = vld [vmem:[#allocation2 + $0x330] ss:$36 sps:$4 sm:$0xff]   ;;  %v2562_v51 = vrot.slane %v2561_v59, 4  ;;  %v2572_v10 = vrot.slane %v2571_v14, 4  ;;  %v1761_v44 = vrot.slane %v1759_v49, 4  ;;  %5061 = vmatprep.mubr.bf16.mxu1 %v13745_v11  ;;  %v1767_v30 = vrot.slane %v1765_v1, 5  ;;  %v15437_v59 = vpop.f32.mrf.mxu1 }
 0x1c3   : > { %v11632_v45 = vld [vmem:[%s14548_s26 + $0xb4] sm:$0xf]  ;;  %v1752_v47 = vor.u32 %v1751_v32, %v1748_v20  ;;  %v2070_v27 = vrot.slane %v11582_v50, 5  ;;  %v11633_v43 = vld [vmem:[%s14548_s26 + $0xb8] sm:$0xf]  ;;  %5062 = vmatmul.mubr.bf16.gmra.mxu1 %v13747_v8  ;;  %v2073_v55 = vrot.slane %v11583_v28, 5  ;;  %v15435_v50 = vpop.f32.mrf.mxu0 }
 0x1c4   : > { %2212 = vst [vmem:[#allocation2 + $0x3c0] sm:$0xf] %v11632_v45  ;;  %v2567_v21 = vsel %vm14566_vm4, %v2562_v51, %v2566_v9  ;;  %v2577_v23 = vsel %vm14566_vm4, %v2572_v10, %v2576_v40  ;;  %v1762_v37 = vor.u32 %v1761_v44, %v1757_v41  ;;  %2213 = vst [vmem:[#allocation2 + $0x3e4] sm:$0xf] %v11633_v43  ;;  %v11677_v5 = vld [vmem:[%s14548_s26 + $0xb4] sm:$0xf] }
 0x1c5   : > { %v11678_v61 = vld [vmem:[%s14548_s26 + $0xb8] sm:$0xf]  ;;  %v13789_v35 = vld [vmem:[#allocation7 + $0x78] sm:$0xff]   ;;  %2706 = vst [vmem:[#allocation2 + $0x37c] sm:$0xf] %v2567_v21  ;;  %v1753_v38 = vrot.slane %v1752_v47, 4  ;;  %v2071_v49 = vsel %vm14577_vm5, %v11603_v36, %v2070_v27  ;;  %v15431_v9 = vadd.f32 %v12487_v62, %v15384_v26  ;;  %v15433_v40 = vadd.f32 %v12490_v3, %v12378_v42  ;;  %v15443_v3 = vpop.f32.mrf.mxu0 }
 0x1c6   : > { %v13748_v48 = vld [vmem:[#allocation2 + $0x374] ss:$36 sps:$4 sm:$0xff]   ;;  %2707 = vst [vmem:[#allocation2 + $0x3a0] sm:$0xf] %v2577_v23  ;;  %v1763_v14 = vrot.slane %v1762_v37, 4  ;;  %v2072_v20 = vrot.slane %v2070_v27, 4  ;;  %12778 = vmatprep.subr.bf16.mxu1 %v13789_v35 }
 0x1c7   : > { %v13750_v13 = vld [vmem:[#allocation2 + $0x370] ss:$36 sps:$4 sm:$0xff]   ;;  %2147 = vst [vmem:[#allocation2 + $0x3bc] sm:$0xf] %v2071_v49  ;;  %v11679_v1 = vld [vmem:[%s14548_s26 + $0xbc] sm:$0x1]  ;;  %4908 = vmatprep.mubr.bf16.mxu0 %v13748_v48  ;;  %v1758_v26 = vsel %vm14566_vm4, %v1753_v38, %v1757_v41 }
 0x1c8   : > { %v2579_v28 = vshrl.u32 %v11677_v5, 16  ;;  %v2582_v11 = vshll.u32 %v11677_v5, 16  ;;  %v2588_v8 = vshll.u32 %v11678_v61, 16  ;;  %v2592_v32 = vshrl.u32 %v11678_v61, 16  ;;  %v11536_v42 = vld [vmem:[%s14548_s26 + $0xb4] sm:$0xf]  ;;  %4909 = vmatmul.mubr.bf16.gmra.mxu0 %v13750_v13  ;;  %v15452_v5 = vpop.f32.mrf.mxu1  ;;  %v12388_v13 = vpop.f32.mrf.mxu0 }
 0x1c9   : > { %v2598_v62 = vshll.u32 %v11679_v1, 16  ;;  %v13790_v51 = vld [vmem:[#allocation7 + $0x38] sm:$0xff]   ;;  %v1768_v10 = vsel %vm14566_vm4, %v1763_v14, %v1767_v30  ;;  %1875 = vst [vmem:[#allocation2 + $0x3b8] sm:$0xf] %v1758_v26  ;;  %v2074_v44 = vsel %vm14577_vm5, %v2072_v20, %v2073_v55  ;;  %v11537_v41 = vld [vmem:[%s14548_s26 + $0xb8] sm:$0xf] }
 0x1ca   : > { %v2581_v45 = vrot.slane %v2579_v28, 4  ;;  %v2584_v47 = vrot.slane %v2582_v11, 5  ;;  %v11538_v36 = vld [vmem:[%s14548_s26 + $0xbc] sm:$0x1]  ;;  %1876 = vst [vmem:[#allocation2 + $0x3dc] sm:$0xf] %v1768_v10  ;;  %12779 = vmatpush3.bf16.msra.mxu1 %v13790_v51  ;;  %v15456_v28 = vpop.f32.mrf.mxu1 }
 0x1cb   : > { %2148 = vst [vmem:[#allocation2 + $0x3e0] sm:$0xf] %v2074_v44  ;;  %v2590_v27 = vrot.slane %v2588_v8, 5  ;;  %v2594_v43 = vrot.slane %v2592_v32, 4  ;;  %v2600_v21 = vrot.slane %v2598_v62, 5  ;;  %v1770_v23 = vshrl.u32 %v11536_v42, 16 }
 0x1cc   : > { %v11584_v37 = vld [vmem:[%s14548_s26 + $0xb4] sm:$0xe]  ;;  %v2585_v30 = vor.u32 %v2584_v47, %v2581_v45  ;;  %v1773_v61 = vshll.u32 %v11536_v42, 16  ;;  %v1779_v35 = vshll.u32 %v11537_v41, 16  ;;  %v1783_v55 = vshrl.u32 %v11537_v41, 16  ;;  %v12389_v42 = vpop.f32.mrf.mxu0  ;;  %v15462_v41 = vpop.f32.mrf.mxu1 }
 0x1cd   : > { %v11585_v48 = vld [vmem:[%s14548_s26 + $0xb8] sm:$0xf]  ;;  %v2595_v38 = vor.u32 %v2594_v43, %v2590_v27  ;;  %v1772_v49 = vrot.slane %v1770_v23, 4  ;;  %v1789_v14 = vshll.u32 %v11538_v36, 16  ;;  %v11586_v20 = vld [vmem:[%s14548_s26 + $0xbc] sm:$0x1]  ;;  %v12381_v32 = vadd.f32 %v15402_v2, %v15391_v46 }
 0x1ce   : > { %v11604_v1 = vrot.slane %v11584_v37, 9  ;;  %v13752_v11 = vld [vmem:[#allocation2 + $0x37c] ss:$36 sps:$4 sm:$0xff]   ;;  %v2586_v26 = vrot.slane %v2585_v30, 4  ;;  %v1775_v8 = vrot.slane %v1773_v61, 5  ;;  %v12493_v62 = vadd.f32 %v15399_v16, %v15386_v31  ;;  %v15466_v2 = vpop.f32.mrf.mxu0 }
 0x1cf   : > { %v13754_v51 = vld [vmem:[#allocation2 + $0x378] ss:$36 sps:$4 sm:$0xff]   ;;  %v2596_v10 = vrot.slane %v2595_v38, 4  ;;  %v1781_v44 = vrot.slane %v1779_v35, 5  ;;  %v1785_v45 = vrot.slane %v1783_v55, 4  ;;  %v1791_v47 = vrot.slane %v1789_v14, 5  ;;  %5069 = vmatprep.mubr.bf16.mxu1 %v13752_v11 }
 0x1d0   : > { %v2591_v36 = vsel %vm14566_vm4, %v2586_v26, %v2590_v27  ;;  %v1776_v43 = vor.u32 %v1775_v8, %v1772_v49  ;;  %v2077_v23 = vrot.slane %v11585_v48, 5  ;;  %v2080_v46 = vrot.slane %v11586_v20, 5  ;;  %5070 = vmatmul.mubr.bf16.gmra.mxu1 %v13754_v51  ;;  %v11634_v37 = vld [vmem:[%s14548_s26 + $0xc0] sm:$0xf]  ;;  %v11635_v30 = vld [vmem:[%s14548_s26 + $0xc4] sm:$0xf]  ;;  %v15476_v27 = vpop.f32.mrf.mxu1 }
 0x1d1   : > { %v2601_v31 = vsel %vm14566_vm4, %v2596_v10, %v2600_v21  ;;  %2708 = vst [vmem:[#allocation2 + $0x3c4] sm:$0xf] %v2591_v36  ;;  %v1786_v16 = vor.u32 %v1785_v45, %v1781_v44  ;;  %v15472_v61 = vadd.f32 %v12493_v62, %v12381_v32  ;;  %v12384_v35 = vadd.f32 %v15418_v12, %v15412_v17  ;;  %v13757_v48 = vld [vmem:[#allocation2 + $0x3b8] ss:$36 sps:$4 sm:$0xff]   ;;  %v15484_v17 = vpop.f32.mrf.mxu0  ;;  %v11680_v11 = vld [vmem:[%s14548_s26 + $0xc0] sm:$0xf] }
 0x1d2   : > { %v13755_v55 = vld [vmem:[#allocation2 + $0x3bc] ss:$36 sps:$4 sm:$0xff]   ;;  %2709 = vst [vmem:[#allocation2 + $0x3e8] sm:$0xf] %v2601_v31  ;;  %v1777_v38 = vrot.slane %v1776_v43, 4  ;;  %v2078_v21 = vsel %vm14577_vm5, %v11604_v1, %v2077_v23  ;;  %v12496_v49 = vadd.f32 %v15414_v24, %v15405_v56  ;;  %v12387_v14 = vadd.f32 %v15443_v3, %v15435_v50  ;;  %v15495_v62 = vpop.f32.mrf.mxu1 }
 0x1d3   : > { %17912 = vst [vmem:[#allocation20_spill] sm:$0xff] %v15472_v61  ;;  %2214 = vst [vmem:[#allocation2 + $0x408] sm:$0xf] %v11634_v37  ;;  %v1787_v12 = vrot.slane %v1786_v16, 4  ;;  %v2079_v20 = vrot.slane %v2077_v23, 4  ;;  %v12499_v8 = vadd.f32 %v15437_v59, %v15420_v52  ;;  %v15490_v1 = vadd.f32 %v12389_v42, %v12388_v13  ;;  %4916 = vmatprep.mubr.bf16.mxu0 %v13755_v55  ;;  %v15504_v31 = vpop.f32.mrf.mxu0 }
 0x1d4   : > { %2215 = vst [vmem:[#allocation2 + $0x42c] sm:$0xf] %v11635_v30  ;;  %2149 = vst [vmem:[#allocation2 + $0x404] sm:$0xf] %v2078_v21  ;;  %v11681_v26 = vld [vmem:[%s14548_s26 + $0xc4] sm:$0xf]  ;;  %v1782_v56 = vsel %vm14566_vm4, %v1777_v38, %v1781_v44  ;;  %4917 = vmatmul.mubr.bf16.gmra.mxu0 %v13757_v48 }
 0x1d5   : > { %v11682_v24 = vld [vmem:[%s14548_s26 + $0xc8] sm:$0x1]  ;;  %v2603_v50 = vshrl.u32 %v11680_v11, 16  ;;  %v2606_v3 = vshll.u32 %v11680_v11, 16  ;;  %v2612_v32 = vshll.u32 %v11681_v26, 16  ;;  %v1792_v51 = vsel %vm14566_vm4, %v1787_v12, %v1791_v47  ;;  %v15506_v47 = vpop.f32.mrf.mxu1  ;;  %v15510_v11 = vpop.f32.mrf.mxu0 }
 0x1d6   : > { %1877 = vst [vmem:[#allocation2 + $0x400] sm:$0xf] %v1782_v56  ;;  %v2081_v52 = vsel %vm14577_vm5, %v2079_v20, %v2080_v46  ;;  %v2616_v59 = vshrl.u32 %v11681_v26, 16  ;;  %v2622_v13 = vshll.u32 %v11682_v24, 16  ;;  %v11539_v42 = vld [vmem:[%s14548_s26 + $0xc0] sm:$0xf] }
 0x1d7   : > { %v11540_v10 = vld [vmem:[%s14548_s26 + $0xc4] sm:$0xf]  ;;  %1878 = vst [vmem:[#allocation2 + $0x424] sm:$0xf] %v1792_v51  ;;  %2150 = vst [vmem:[#allocation2 + $0x428] sm:$0xf] %v2081_v52  ;;  %v15512_v26 = vpop.f32.mrf.mxu1  ;;  %v15516_v51 = vadd.f32 %v12499_v8, %v12387_v14 }
 0x1d8   : > { %v2605_v44 = vrot.slane %v2603_v50, 4  ;;  %v2608_v45 = vrot.slane %v2606_v3, 5  ;;  %v2614_v36 = vrot.slane %v2612_v32, 5  ;;  %v11541_v43 = vld [vmem:[%s14548_s26 + $0xc8] sm:$0x1]  ;;  %v1794_v23 = vshrl.u32 %v11539_v42, 16 }
 0x1d9   : > { %v2618_v16 = vrot.slane %v2616_v59, 4  ;;  %v2624_v37 = vrot.slane %v2622_v13, 5  ;;  %v1797_v46 = vshll.u32 %v11539_v42, 16  ;;  %v1803_v30 = vshll.u32 %v11540_v10, 16  ;;  %v11587_v55 = vld [vmem:[%s14548_s26 + $0xc0] sm:$0xe] }
 0x1da   : > { %v2609_v48 = vor.u32 %v2608_v45, %v2605_v44  ;;  %v1796_v38 = vrot.slane %v1794_v23, 4  ;;  %v1807_v21 = vshrl.u32 %v11540_v10, 16  ;;  %v1813_v12 = vshll.u32 %v11541_v43, 16  ;;  %v11588_v20 = vld [vmem:[%s14548_s26 + $0xc4] sm:$0xf]  ;;  %v15519_v44 = vpop.f32.mrf.mxu0 }
 0x1db   : > { %v13758_v56 = vld [vmem:[#allocation2 + $0x3c4] ss:$36 sps:$4 sm:$0xff]   ;;  %v2619_v50 = vor.u32 %v2618_v16, %v2614_v36  ;;  %v1799_v3 = vrot.slane %v1797_v46, 5  ;;  %v15514_v32 = vadd.f32 %v12496_v49, %v12384_v35  ;;  %v1805_v59 = vrot.slane %v1803_v30, 5  ;;  %v11636_v16 = vld [vmem:[%s14548_s26 + $0xcc] sm:$0xf]  ;;  %v15522_v46 = vpop.f32.mrf.mxu1 }
 0x1dc   : > { %v13760_v24 = vld [vmem:[#allocation2 + $0x3c0] ss:$36 sps:$4 sm:$0xff]   ;;  %v2610_v52 = vrot.slane %v2609_v48, 4  ;;  %v1809_v13 = vrot.slane %v1807_v21, 4  ;;  %v1815_v42 = vrot.slane %v1813_v12, 5  ;;  %5077 = vmatprep.mubr.bf16.mxu1 %v13758_v56  ;;  %v11605_v23 = vrot.slane %v11587_v55, 9 }
 0x1dd   : > { %v11589_v10 = vld [vmem:[%s14548_s26 + $0xc8] sm:$0x1]  ;;  %v2620_v45 = vrot.slane %v2619_v50, 4  ;;  %v1800_v43 = vor.u32 %v1799_v3, %v1796_v38  ;;  %v2084_v61 = vrot.slane %v11588_v20, 5  ;;  %5078 = vmatmul.mubr.bf16.gmra.mxu1 %v13760_v24  ;;  %v11637_v8 = vld [vmem:[%s14548_s26 + $0xd0] sm:$0xf]  ;;  %v12502_v48 = vadd.f32 %v15456_v28, %v15452_v5  ;;  %v15530_v38 = vpop.f32.mrf.mxu0 }
 0x1de   : > { %v2615_v35 = vsel %vm14566_vm4, %v2610_v52, %v2614_v36  ;;  %v1810_v49 = vor.u32 %v1809_v13, %v1805_v59  ;;  %v2087_v14 = vrot.slane %v11589_v10, 5  ;;  %2216 = vst [vmem:[#allocation2 + $0x450] sm:$0xf] %v11636_v16  ;;  %v11683_v30 = vld [vmem:[%s14548_s26 + $0xcc] sm:$0xf]  ;;  %v12393_v56 = vadd.f32 %v15484_v17, %v15466_v2  ;;  %v15547_v2 = vpop.f32.mrf.mxu1 }
 0x1df   : > { %v13761_v55 = vld [vmem:[#allocation2 + $0x404] ss:$36 sps:$4 sm:$0xff]   ;;  %v2625_v12 = vsel %vm14566_vm4, %v2620_v45, %v2624_v37  ;;  %2710 = vst [vmem:[#allocation2 + $0x40c] sm:$0xf] %v2615_v35  ;;  %v1801_v20 = vrot.slane %v1800_v43, 4  ;;  %v2085_v36 = vsel %vm14577_vm5, %v11605_v23, %v2084_v61  ;;  %v2086_v50 = vrot.slane %v2084_v61, 4  ;;  %v15553_v23 = vpop.f32.mrf.mxu0 }
 0x1e0   : > { %v13763_v21 = vld [vmem:[#allocation2 + $0x400] ss:$36 sps:$4 sm:$0xff]   ;;  %2217 = vst [vmem:[#allocation2 + $0x474] sm:$0xf] %v11637_v8  ;;  %2711 = vst [vmem:[#allocation2 + $0x430] sm:$0xf] %v2625_v12  ;;  %v15541_v3 = vadd.f32 %v12502_v48, %v15490_v1  ;;  %v12505_v37 = vadd.f32 %v15476_v27, %v15462_v41  ;;  %4924 = vmatprep.mubr.bf16.mxu0 %v13761_v55 }
 0x1e1   : > { %v1811_v24 = vrot.slane %v1810_v49, 4  ;;  %2151 = vst [vmem:[#allocation2 + $0x44c] sm:$0xf] %v2085_v36  ;;  %v11684_v5 = vld [vmem:[%s14548_s26 + $0xd0] sm:$0xf]  ;;  %v1806_v52 = vsel %vm14566_vm4, %v1801_v20, %v1805_v59  ;;  %v2627_v13 = vshrl.u32 %v11683_v30, 16  ;;  %4925 = vmatmul.mubr.bf16.gmra.mxu0 %v13763_v21  ;;  %v2088_v1 = vsel %vm14577_vm5, %v2086_v50, %v2087_v14  ;;  %v15557_v12 = vpop.f32.mrf.mxu0 }
 0x1e2   : > { %v11685_v28 = vld [vmem:[%s14548_s26 + $0xd4] sm:$0x1]  ;;  %v2630_v10 = vshll.u32 %v11683_v30, 16  ;;  %v2636_v45 = vshll.u32 %v11684_v5, 16  ;;  %v13791_v17 = vld [vmem:[#allocation7 + $0x70] sm:$0xff]   ;;  %v2640_v43 = vshrl.u32 %v11684_v5, 16  ;;  %v15555_v30 = vpop.f32.mrf.mxu1 }
 0x1e3   : > { %v1816_v61 = vsel %vm14566_vm4, %v1811_v24, %v1815_v42  ;;  %1879 = vst [vmem:[#allocation2 + $0x448] sm:$0xf] %v1806_v52  ;;  %v2646_v41 = vshll.u32 %v11685_v28, 16  ;;  %v7852_v27 = vld [vmem:[#allocation3 + $0xcc] sm:$0xf]  ;;  %v2629_v59 = vrot.slane %v2627_v13, 4  ;;  %12780 = vmatprep.subr.bf16.mxu1 %v13791_v17 }
 0x1e4   : > { %1880 = vst [vmem:[#allocation2 + $0x46c] sm:$0xf] %v1816_v61  ;;  %2152 = vst [vmem:[#allocation2 + $0x470] sm:$0xf] %v2088_v1  ;;  %v2632_v16 = vrot.slane %v2630_v10, 5  ;;  %v2638_v35 = vrot.slane %v2636_v45, 5  ;;  %v15560_v28 = vpop.f32.mrf.mxu1  ;;  %v15565_v1 = vpop.f32.mrf.mxu0 }
 0x1e5   : > { %v7853_v49 = vld [vmem:[#allocation3 + $0xd0] sm:$0xf]  ;;  %v8216_v8 = vshrl.u32 %v7852_v27, 16  ;;  %v2642_v42 = vrot.slane %v2640_v43, 4  ;;  %v2648_v48 = vrot.slane %v2646_v41, 5  ;;  %v8219_v55 = vshll.u32 %v7852_v27, 16 }
 0x1e6   : > { %v7854_v14 = vld [vmem:[#allocation3 + $0xd4] sm:$0x1]  ;;  %v8225_v21 = vshll.u32 %v7853_v49, 16  ;;  %v2633_v20 = vor.u32 %v2632_v16, %v2629_v59  ;;  %v8229_v24 = vshrl.u32 %v7853_v49, 16  ;;  %v11686_v5 = vld [vmem:[%s14548_s26 + $0x18] sm:$0xe]  ;;  %v15567_v59 = vadd.f32 %v12505_v37, %v12393_v56 }
 0x1e7   : > { %v8218_v36 = vrot.slane %v8216_v8, 4  ;;  %v8235_v50 = vshll.u32 %v7854_v14, 16  ;;  %v13792_v52 = vld [vmem:[#allocation7 + $0x30] sm:$0xff]   ;;  %v2643_v13 = vor.u32 %v2642_v42, %v2638_v35  ;;  %v8221_v10 = vrot.slane %v8219_v55, 5  ;;  %v11687_v17 = vld [vmem:[%s14548_s26 + $0x1c] sm:$0xf] }
 0x1e8   : > { %v15562_v45 = vrot.slane %v8225_v21, 5  ;;  %v11734_v61 = vrot.slane %v11686_v5, 9  ;;  %v13765_v43 = vld [vmem:[#allocation2 + $0x40c] ss:$36 sps:$4 sm:$0xff]   ;;  %v2634_v27 = vrot.slane %v2633_v20, 4  ;;  %v12396_v16 = vadd.f32 %v15510_v11, %v15504_v31  ;;  %12781 = vmatpush3.bf16.msra.mxu1 %v13792_v52  ;;  %v15576_v5 = vpop.f32.mrf.mxu1 }
 0x1e9   : > { %v13767_v41 = vld [vmem:[#allocation2 + $0x408] ss:$36 sps:$4 sm:$0xff]   ;;  %v12508_v49 = vadd.f32 %v15506_v47, %v15495_v62  ;;  %v2644_v8 = vrot.slane %v2643_v13, 4  ;;  %v8222_v42 = vor.u32 %v8221_v10, %v8218_v36  ;;  %v8231_v14 = vrot.slane %v8229_v24, 4  ;;  %v11688_v21 = vld [vmem:[%s14548_s26 + $0x20] sm:$0x1]  ;;  %5085 = vmatprep.mubr.bf16.mxu1 %v13765_v43  ;;  %v15583_v62 = vpop.f32.mrf.mxu0 }
 0x1ea   : > { %v15573_v55 = vrot.slane %v8235_v50, 5  ;;  %v2639_v56 = vsel %vm14566_vm4, %v2634_v27, %v2638_v35  ;;  %v2812_v37 = vrot.slane %v11687_v17, 5  ;;  %v2815_v20 = vrot.slane %v11688_v21, 5  ;;  %v11689_v31 = vld [vmem:[%s14548_s26 + $0x24] sm:$0xe]  ;;  %5086 = vmatmul.mubr.bf16.gmra.mxu1 %v13767_v41 }
 0x1eb   : > { %v15581_v11 = vadd.f32 %v12508_v49, %v12396_v16  ;;  %v13768_v47 = vld [vmem:[#allocation2 + $0x44c] ss:$36 sps:$4 sm:$0xff]   ;;  %v2649_v24 = vsel %vm14566_vm4, %v2644_v8, %v2648_v48  ;;  %2712 = vst [vmem:[#allocation2 + $0x454] sm:$0xf] %v2639_v56  ;;  %v15587_v50 = vrot.slane %v8222_v42, 4  ;;  %v8232_v35 = vor.u32 %v8231_v14, %v15562_v45  ;;  %v15603_v49 = vpop.f32.mrf.mxu1  ;;  %v12406_v21 = vpop.f32.mrf.mxu0 }
 0x1ec   : > { %v13770_v36 = vld [vmem:[#allocation2 + $0x448] ss:$36 sps:$4 sm:$0xff]   ;;  %v12399_v52 = vadd.f32 %v15530_v38, %v15519_v44  ;;  %2713 = vst [vmem:[#allocation2 + $0x478] sm:$0xf] %v2649_v24  ;;  %v2813_v13 = vsel %vm14577_vm5, %v11734_v61, %v2812_v37  ;;  %v2814_v10 = vrot.slane %v2812_v37, 4  ;;  %v11735_v41 = vrot.slane %v11689_v31, 9  ;;  %4932 = vmatprep.mubr.bf16.mxu0 %v13768_v47 }
 0x1ed   : > { %v11690_v17 = vld [vmem:[%s14548_s26 + $0x28] sm:$0xf]  ;;  %v11691_v43 = vld [vmem:[%s14548_s26 + $0x2c] sm:$0x1]  ;;  %v12511_v48 = vadd.f32 %v15522_v46, %v15512_v26  ;;  %v8228_v27 = vsel %vm14566_vm4, %v15587_v50, %v15562_v45  ;;  %v8233_v44 = vrot.slane %v8232_v35, 4  ;;  %4933 = vmatmul.mubr.bf16.gmra.mxu0 %v13770_v36  ;;  %v12402_v45 = vadd.f32 %v15557_v12, %v15553_v23  ;;  %v12519_v35 = vpop.f32.mrf.mxu1 }
 0x1ee   : > { %2954 = vst [vmem:[#allocation2 + $0x20] sm:$0xf] %v2813_v13  ;;  %v2819_v38 = vrot.slane %v11690_v17, 5  ;;  %v2822_v16 = vrot.slane %v11691_v43, 5  ;;  %v11692_v61 = vld [vmem:[%s14548_s26 + $0x30] sm:$0xe]  ;;  %v2816_v8 = vsel %vm14577_vm5, %v2814_v10, %v2815_v20  ;;  %v12407_v10 = vpop.f32.mrf.mxu0 }
 0x1ef   : > { %v11693_v26 = vld [vmem:[%s14548_s26 + $0x34] sm:$0xf]  ;;  %v11694_v46 = vld [vmem:[%s14548_s26 + $0x38] sm:$0x1]  ;;  %v11736_v42 = vrot.slane %v11692_v61, 9  ;;  %v15609_v14 = vadd.f32 %v12511_v48, %v12399_v52  ;;  %v8238_v31 = vsel %vm14566_vm4, %v8233_v44, %v15573_v55  ;;  %v12514_v55 = vadd.f32 %v15555_v30, %v15547_v2  ;;  %v12521_v61 = vpop.f32.mrf.mxu1 }
 0x1f0   : > { %v7773_v56 = vld [vmem:[#allocation3 + $0xcc] sm:$0xf]  ;;  %v7774_v37 = vld [vmem:[#allocation3 + $0xd0] sm:$0xf]  ;;  %2955 = vst [vmem:[#allocation2 + $0x44] sm:$0xf] %v2816_v8  ;;  %v2820_v20 = vsel %vm14577_vm5, %v11735_v41, %v2819_v38 }
 0x1f1   : > { %v2821_v47 = vrot.slane %v2819_v38, 4  ;;  %v2826_v36 = vrot.slane %v11693_v26, 5  ;;  %v11695_v24 = vld [vmem:[%s14548_s26 + $0x3c] sm:$0xe]  ;;  %v11696_v50 = vld [vmem:[%s14548_s26 + $0x40] sm:$0xf] }
 0x1f2   : > { %2956 = vst [vmem:[#allocation2 + $0x68] sm:$0xf] %v2820_v20  ;;  %v2829_v23 = vrot.slane %v11694_v46, 5  ;;  %v11697_v12 = vld [vmem:[%s14548_s26 + $0x44] sm:$0x1]  ;;  %v11737_v52 = vrot.slane %v11695_v24, 9 }
 0x1f3   : > { %v2833_v13 = vrot.slane %v11696_v50, 5  ;;  %v2823_v17 = vsel %vm14577_vm5, %v2821_v47, %v2822_v16  ;;  %v2827_v43 = vsel %vm14577_vm5, %v11736_v42, %v2826_v36  ;;  %v2828_v41 = vrot.slane %v2826_v36, 4  ;;  %v11698_v44 = vld [vmem:[%s14548_s26 + $0x48] sm:$0xe]  ;;  %v11699_v38 = vld [vmem:[%s14548_s26 + $0x4c] sm:$0xf]  ;;  %v12409_v16 = vpop.f32.mrf.mxu0 }
 0x1f4   : > { %v2836_v48 = vrot.slane %v11697_v12, 5  ;;  %v3139_v8 = vld [vmem:[#allocation2 + $0x450] sm:$0xff]  ;;  %2957 = vst [vmem:[#allocation2 + $0x8c] sm:$0xf] %v2823_v17  ;;  %2958 = vst [vmem:[#allocation2 + $0xb0] sm:$0xf] %v2827_v43  ;;  %v15635_v12 = vadd.f32 %v12514_v55, %v12402_v45 }
 0x1f5   : > { %v2834_v26 = vsel %vm14577_vm5, %v11737_v52, %v2833_v13  ;;  %v2835_v2 = vrot.slane %v2833_v13, 4  ;;  %v11700_v30 = vld [vmem:[%s14548_s26 + $0x50] sm:$0x1]  ;;  %v11738_v46 = vrot.slane %v11698_v44, 9  ;;  %v2840_v20 = vrot.slane %v11699_v38, 5  ;;  %v3144_v47 = vld [vmem:[#allocation2 + $0x474] sm:$0xff]  ;;  %v12410_v55 = vpop.f32.mrf.mxu0 }
 0x1f6   : > { %v13771_v24 = vld [vmem:[#allocation2 + $0x454] ss:$36 sps:$4 sm:$0xff]   ;;  %v2830_v42 = vsel %vm14577_vm5, %v2828_v41, %v2829_v23  ;;  %2960 = vst [vmem:[#allocation2 + $0xf8] sm:$0xf] %v2834_v26  ;;  %v2843_v36 = vrot.slane %v11700_v30, 5  ;;  %v12405_v52 = vadd.f32 %v15583_v62, %v15565_v1  ;;  %v11891_v13 = vcombine.low %v3139_v8, %v3144_v47  ;;  %v12522_v41 = vpop.f32.mrf.mxu1 }
 0x1f7   : > { %v11701_v50 = vld [vmem:[%s14548_s26 + $0x54] sm:$0xe]  ;;  %7805 = vst [vmem:[#allocation2 + $0x450] sm:$0xf] %v7773_v56  ;;  %7806 = vst [vmem:[#allocation2 + $0x474] sm:$0xf] %v7774_v37  ;;  %v2837_v17 = vsel %vm14577_vm5, %v2835_v2, %v2836_v48  ;;  %v2841_v23 = vsel %vm14577_vm5, %v11738_v46, %v2840_v20  ;;  %5093 = vmatprep.mubr.bf16.mxu1 %v13771_v24  ;;  %v12517_v37 = vadd.f32 %v15576_v5, %v15560_v28 }
 0x1f8   : > { %8301 = vst [vmem:[#allocation2 + $0x454] sm:$0xf] %v8228_v27  ;;  %8302 = vst [vmem:[#allocation2 + $0x478] sm:$0xf] %v8238_v31  ;;  %v2842_v43 = vrot.slane %v2840_v20, 4  ;;  %v11739_v62 = vrot.slane %v11701_v50, 9  ;;  %v12408_v31 = vadd.f32 %v12407_v10, %v12406_v21  ;;  %5094 = vmatmul.mubr.bf16.gmra.mxu1 %v11891_v13  ;;  %v12520_v26 = vadd.f32 %v12519_v35, %v15603_v49 }
 0x1f9   : > { %2959 = vst [vmem:[#allocation2 + $0xd4] sm:$0xf] %v2830_v42  ;;  %v11702_v45 = vld [vmem:[%s14548_s26 + $0x58] sm:$0xf]  ;;  %2961 = vst [vmem:[#allocation2 + $0x11c] sm:$0xf] %v2837_v17  ;;  %v15654_v28 = vadd.f32 %v12517_v37, %v12405_v52  ;;  %v12411_v5 = vadd.f32 %v12410_v55, %v12409_v16  ;;  %v12523_v49 = vadd.f32 %v12522_v41, %v12521_v61  ;;  %v12412_v55 = vpop.f32.mrf.mxu0 }
 0x1fa   : > { %2962 = vst [vmem:[#allocation2 + $0x140] sm:$0xf] %v2841_v23  ;;  %v11703_v1 = vld [vmem:[%s14548_s26 + $0x5c] sm:$0x1]  ;;  %v2847_v56 = vrot.slane %v11702_v45, 5  ;;  %v2844_v44 = vsel %vm14577_vm5, %v2842_v43, %v2843_v36  ;;  %v13793_v21 = vld [vmem:[#allocation7 + $0x68] sm:$0xff]   ;;  %v15658_v24 = vadd.f32 %v12520_v26, %v12408_v31  ;;  %v12524_v43 = vpop.f32.mrf.mxu1 }
 0x1fb   : > { %v11704_v27 = vld [vmem:[%s14548_s26 + $0x60] sm:$0xe]  ;;  %v2850_v38 = vrot.slane %v11703_v1, 5  ;;  %2963 = vst [vmem:[#allocation2 + $0x164] sm:$0xf] %v2844_v44  ;;  %12782 = vmatprep.subr.bf16.mxu1 %v13793_v21  ;;  %v15665_v17 = vadd.f32 %v12523_v49, %v12411_v5  ;;  %v12413_v44 = vpop.f32.mrf.mxu0 }
 0x1fc   : > { %v13773_v48 = vld [vmem:[#allocation2 + $0x20] ss:$36 sps:$4 sm:$0xff]   ;;  %v11740_v8 = vrot.slane %v11704_v27, 9  ;;  %v2848_v2 = vsel %vm14577_vm5, %v11739_v62, %v2847_v56  ;;  %v2849_v30 = vrot.slane %v2847_v56, 4  ;;  %v11706_v10 = vld [vmem:[%s14548_s26 + $0x68] sm:$0x1]  ;;  %v12525_v31 = vpop.f32.mrf.mxu1 }
 0x1fd   : > { %v11705_v46 = vld [vmem:[%s14548_s26 + $0x64] sm:$0xf]  ;;  %13300 = vmatprep.mubr.bf16.mxu0 %v13773_v48  ;;  %2964 = vst [vmem:[#allocation2 + $0x188] sm:$0xf] %v2848_v2  ;;  %v11707_v47 = vld [vmem:[%s14548_s26 + $0x6c] sm:$0xe]  ;;  %v12415_v49 = vpop.f32.mrf.mxu0 }
 0x1fe   : > { %v2854_v20 = vrot.slane %v11705_v46, 5  ;;  %v13794_v35 = vld [vmem:[#allocation7 + $0x28] sm:$0xff]   ;;  %v13774_v42 = vld [vmem:[#allocation2 + $0x68] ss:$36 sps:$4 sm:$0xff]   ;;  %v2851_v36 = vsel %vm14577_vm5, %v2849_v30, %v2850_v38  ;;  %v2857_v52 = vrot.slane %v11706_v10, 5  ;;  %v11741_v62 = vrot.slane %v11707_v47, 9  ;;  %v12527_v5 = vpop.f32.mrf.mxu1 }
 0x1ff   : > { %2965 = vst [vmem:[#allocation2 + $0x1ac] sm:$0xf] %v2851_v36  ;;  %v11708_v13 = vld [vmem:[%s14548_s26 + $0x70] sm:$0xf]  ;;  %12783 = vmatpush3.bf16.msra.mxu1 %v13794_v35  ;;  %13301 = vmatmul.mubr.bf16.vlgmr.msra.gmra.mxu0 %v13774_v42  ;;  %v11709_v23 = vld [vmem:[%s14548_s26 + $0x74] sm:$0x1]  ;;  %v12526_v38 = vadd.f32 %v12525_v31, %v12524_v43  ;;  %v12414_v46 = vadd.f32 %v12413_v44, %v12412_v55 }
 0x200   : > { %v2855_v16 = vsel %vm14577_vm5, %v11740_v8, %v2854_v20  ;;  %v2856_v50 = vrot.slane %v2854_v20, 4  ;;  %v13775_v61 = vld [vmem:[#allocation2 + $0xb0] ss:$36 sps:$4 sm:$0xff]   ;;  %v13776_v1 = vld [vmem:[#allocation2 + $0xf8] ss:$36 sps:$4 sm:$0xff]   ;;  %v2861_v56 = vrot.slane %v11708_v13, 5 }
 0x201   : > { %2966 = vst [vmem:[#allocation2 + $0x1d0] sm:$0xf] %v2855_v16  ;;  %13304 = vmatprep.mubr.bf16.mxu0 %v13775_v61  ;;  %v2864_v27 = vrot.slane %v11709_v23, 5  ;;  %v11710_v37 = vld [vmem:[%s14548_s26 + $0x78] sm:$0xe]  ;;  %v15680_v36 = vadd.f32 %v12526_v38, %v12414_v46  ;;  %v12528_v16 = vpop.f32.mrf.mxu1  ;;  %v12416_v23 = vpop.f32.mrf.mxu0 }
 0x202   : > { %v2858_v45 = vsel %vm14577_vm5, %v2856_v50, %v2857_v52  ;;  %v13777_v41 = vld [vmem:[#allocation2 + $0x140] ss:$36 sps:$4 sm:$0xff]   ;;  %v11711_v48 = vld [vmem:[%s14548_s26 + $0x7c] sm:$0xf]  ;;  %v2862_v8 = vsel %vm14577_vm5, %v11741_v62, %v2861_v56  ;;  %v2863_v26 = vrot.slane %v2861_v56, 4  ;;  %v11742_v30 = vrot.slane %v11710_v37, 9 }
 0x203   : > { %2967 = vst [vmem:[#allocation2 + $0x1f4] sm:$0xf] %v2858_v45  ;;  %v11712_v2 = vld [vmem:[%s14548_s26 + $0x80] sm:$0x1]  ;;  %2968 = vst [vmem:[#allocation2 + $0x218] sm:$0xf] %v2862_v8  ;;  %v12417_v62 = vadd.f32 %v12416_v23, %v12415_v49  ;;  %v12529_v56 = vadd.f32 %v12528_v16, %v12527_v5 }
 0x204   : > { %v2868_v21 = vrot.slane %v11711_v48, 5  ;;  %v2871_v10 = vrot.slane %v11712_v2, 5  ;;  %v11713_v20 = vld [vmem:[%s14548_s26 + $0x84] sm:$0xe]  ;;  %v11714_v47 = vld [vmem:[%s14548_s26 + $0x88] sm:$0xf]  ;;  %v2865_v35 = vsel %vm14577_vm5, %v2863_v26, %v2864_v27 }
 0x205   : > { %v11715_v42 = vld [vmem:[%s14548_s26 + $0x8c] sm:$0x1]  ;;  %2969 = vst [vmem:[#allocation2 + $0x23c] sm:$0xf] %v2865_v35  ;;  %v11743_v13 = vrot.slane %v11713_v20, 9  ;;  %v2875_v61 = vrot.slane %v11714_v47, 5  ;;  %v15692_v26 = vadd.f32 %v12529_v56, %v12417_v62 }
 0x206   : > { %v2869_v50 = vsel %vm14577_vm5, %v11742_v30, %v2868_v21  ;;  %v2870_v52 = vrot.slane %v2868_v21, 4  ;;  %v2878_v43 = vrot.slane %v11715_v42, 5  ;;  %v11716_v45 = vld [vmem:[%s14548_s26 + $0x90] sm:$0xe]  ;;  %v11717_v55 = vld [vmem:[%s14548_s26 + $0x94] sm:$0xf] }
 0x207   : > { %13305 = vmatmul.mubr.bf16.gmra.mxu0 %v13776_v1  ;;  %2970 = vst [vmem:[#allocation2 + $0x260] sm:$0xf] %v2869_v50  ;;  %v2876_v37 = vsel %vm14577_vm5, %v11743_v13, %v2875_v61  ;;  %v2877_v31 = vrot.slane %v2875_v61, 4  ;;  %v11744_v48 = vrot.slane %v11716_v45, 9  ;;  %v13778_v44 = vld [vmem:[#allocation2 + $0x188] ss:$36 sps:$4 sm:$0xff]  }
 0x208   : > { %13308 = vmatprep.mubr.bf16.mxu0 %v13777_v41  ;;  %v2872_v27 = vsel %vm14577_vm5, %v2870_v52, %v2871_v10  ;;  %2972 = vst [vmem:[#allocation2 + $0x2a8] sm:$0xf] %v2876_v37  ;;  %v11718_v1 = vld [vmem:[%s14548_s26 + $0x98] sm:$0x1]  ;;  %v2882_v38 = vrot.slane %v11717_v55, 5  ;;  %17913 = vst [vmem:[#allocation21_spill] sm:$0xff] %v15692_v26  ;;  %v12546_v10 = vpop.f32.mrf.mxu0 }
 0x209   : > { %2971 = vst [vmem:[#allocation2 + $0x284] sm:$0xf] %v2872_v27  ;;  %v11719_v8 = vld [vmem:[%s14548_s26 + $0x9c] sm:$0xe]  ;;  %v2879_v2 = vsel %vm14577_vm5, %v2877_v31, %v2878_v43  ;;  %v2885_v30 = vrot.slane %v11718_v1, 5 }
 0x20a   : > { %v13779_v41 = vld [vmem:[#allocation2 + $0x1d0] ss:$36 sps:$4 sm:$0xff]   ;;  %v11720_v46 = vld [vmem:[%s14548_s26 + $0xa0] sm:$0xf]  ;;  %v11721_v5 = vld [vmem:[%s14548_s26 + $0xa4] sm:$0x1]  ;;  %v2883_v20 = vsel %vm14577_vm5, %v11744_v48, %v2882_v38  ;;  %v12547_v52 = vpop.f32.mrf.mxu0 }
 0x20b   : > { %v11745_v21 = vrot.slane %v11719_v8, 9  ;;  %2973 = vst [vmem:[#allocation2 + $0x2cc] sm:$0xf] %v2879_v2  ;;  %v2884_v47 = vrot.slane %v2882_v38, 4  ;;  %v2889_v49 = vrot.slane %v11720_v46, 5  ;;  %v2892_v35 = vrot.slane %v11721_v5, 5 }
 0x20c   : > { %2974 = vst [vmem:[#allocation2 + $0x2f0] sm:$0xf] %v2883_v20  ;;  %v11722_v42 = vld [vmem:[%s14548_s26 + $0xa8] sm:$0xe]  ;;  %v11723_v16 = vld [vmem:[%s14548_s26 + $0xac] sm:$0xf]  ;;  %v12548_v62 = vadd.f32 %v12547_v52, %v12546_v10  ;;  %v12549_v56 = vpop.f32.mrf.mxu0 }
 0x20d   : > { %v11724_v50 = vld [vmem:[%s14548_s26 + $0xb0] sm:$0x1]  ;;  %v2886_v13 = vsel %vm14577_vm5, %v2884_v47, %v2885_v30  ;;  %v2890_v61 = vsel %vm14577_vm5, %v11745_v21, %v2889_v49  ;;  %v2891_v23 = vrot.slane %v2889_v49, 4  ;;  %v11746_v43 = vrot.slane %v11722_v42, 9  ;;  %v11725_v55 = vld [vmem:[%s14548_s26 + $0xb4] sm:$0xe]  ;;  %v15719_v49 = vpop.f32.mrf.mxu1 }
 0x20e   : > { %2975 = vst [vmem:[#allocation2 + $0x314] sm:$0xf] %v2886_v13  ;;  %2976 = vst [vmem:[#allocation2 + $0x338] sm:$0xf] %v2890_v61  ;;  %v2896_v45 = vrot.slane %v11723_v16, 5  ;;  %v2899_v37 = vrot.slane %v11724_v50, 5  ;;  %v15715_v8 = vadd.f32 %v12548_v62, %v15148_v15  ;;  %v12550_v2 = vpop.f32.mrf.mxu0 }
 0x20f   : > { %13309 = vmatmul.mubr.bf16.gmra.mxu0 %v13778_v44  ;;  %v2893_v27 = vsel %vm14577_vm5, %v2891_v23, %v2892_v35  ;;  %v11726_v31 = vld [vmem:[%s14548_s26 + $0xb8] sm:$0xf]  ;;  %v11727_v48 = vld [vmem:[%s14548_s26 + $0xbc] sm:$0x1]  ;;  %v11747_v1 = vrot.slane %v11725_v55, 9  ;;  %v12551_v10 = vadd.f32 %v12550_v2, %v12549_v56 }
 0x210   : > { %13312 = vmatprep.mubr.bf16.mxu0 %v13779_v41  ;;  %2977 = vst [vmem:[#allocation2 + $0x35c] sm:$0xf] %v2893_v27  ;;  %v2897_v38 = vsel %vm14577_vm5, %v11746_v43, %v2896_v45  ;;  %v13780_v44 = vld [vmem:[#allocation2 + $0x218] ss:$36 sps:$4 sm:$0xff]   ;;  %v2898_v30 = vrot.slane %v2896_v45, 4  ;;  %v2903_v46 = vrot.slane %v11726_v31, 5  ;;  %v15728_v43 = vpop.f32.mrf.mxu1  ;;  %v12552_v62 = vpop.f32.mrf.mxu0 }
 0x211   : > { %2978 = vst [vmem:[#allocation2 + $0x380] sm:$0xf] %v2897_v38  ;;  %v2906_v5 = vrot.slane %v11727_v48, 5  ;;  %v11728_v21 = vld [vmem:[%s14548_s26 + $0xc0] sm:$0xe]  ;;  %v13795_v20 = vld [vmem:[#allocation7 + $0x60] sm:$0xff]   ;;  %v15731_v45 = vadd.f32 %v12551_v10, %v15156_v25 }
 0x212   : > { %v13781_v41 = vld [vmem:[#allocation2 + $0x260] ss:$36 sps:$4 sm:$0xff]   ;;  %v2900_v15 = vsel %vm14577_vm5, %v2898_v30, %v2899_v37  ;;  %v2904_v35 = vsel %vm14577_vm5, %v11747_v1, %v2903_v46  ;;  %v2905_v42 = vrot.slane %v2903_v46, 4  ;;  %v11730_v16 = vld [vmem:[%s14548_s26 + $0xc8] sm:$0x1]  ;;  %v11748_v50 = vrot.slane %v11728_v21, 9  ;;  %12784 = vmatprep.subr.bf16.mxu1 %v13795_v20  ;;  %v15738_v1 = vpop.f32.mrf.mxu1  ;;  %v12553_v25 = vpop.f32.mrf.mxu0 }
 0x213   : > { %v11729_v47 = vld [vmem:[%s14548_s26 + $0xc4] sm:$0xf]  ;;  %2979 = vst [vmem:[#allocation2 + $0x3a4] sm:$0xf] %v2900_v15  ;;  %2980 = vst [vmem:[#allocation2 + $0x3c8] sm:$0xf] %v2904_v35  ;;  %v12554_v20 = vadd.f32 %v12553_v25, %v12552_v62 }
 0x214   : > { %v2910_v52 = vrot.slane %v11729_v47, 5  ;;  %v2913_v13 = vrot.slane %v11730_v16, 5  ;;  %v11731_v61 = vld [vmem:[%s14548_s26 + $0xcc] sm:$0xe]  ;;  %v11732_v23 = vld [vmem:[%s14548_s26 + $0xd0] sm:$0xf]  ;;  %v2907_v55 = vsel %vm14577_vm5, %v2905_v42, %v2906_v5  ;;  %v15744_v10 = vpop.f32.mrf.mxu1  ;;  %v12555_v35 = vpop.f32.mrf.mxu0 }
 0x215   : > { %2981 = vst [vmem:[#allocation2 + $0x3ec] sm:$0xf] %v2907_v55  ;;  %v11733_v37 = vld [vmem:[%s14548_s26 + $0xd4] sm:$0x1]  ;;  %v11749_v31 = vrot.slane %v11731_v61, 9  ;;  %v2917_v48 = vrot.slane %v11732_v23, 5 }
 0x216   : > { %v2911_v56 = vsel %vm14577_vm5, %v11748_v50, %v2910_v52  ;;  %v2912_v27 = vrot.slane %v2910_v52, 4  ;;  %v13796_v38 = vld [vmem:[#allocation7 + $0x20] sm:$0xff]   ;;  %v2920_v2 = vrot.slane %v11733_v37, 5  ;;  %v8348_v21 = vld [vmem:[#allocation3 + $0xcc] sm:$0xe]  ;;  %v15749_v50 = vadd.f32 %v12554_v20, %v15165_v39  ;;  %v15751_v55 = vpop.f32.mrf.mxu1 }
 0x217   : > { %13313 = vmatmul.mubr.bf16.gmra.mxu0 %v13780_v44  ;;  %2982 = vst [vmem:[#allocation2 + $0x410] sm:$0xf] %v2911_v56  ;;  %v2918_v46 = vsel %vm14577_vm5, %v11749_v31, %v2917_v48  ;;  %v2919_v5 = vrot.slane %v2917_v48, 4  ;;  %12785 = vmatpush3.bf16.msra.mxu1 %v13796_v38  ;;  %v13782_v47 = vld [vmem:[#allocation2 + $0x2a8] ss:$36 sps:$4 sm:$0xff]   ;;  %v12047_v52 = vrot.slane %v8348_v21, 9 }
 0x218   : > { %13316 = vmatprep.mubr.bf16.mxu0 %v13781_v41  ;;  %v2914_v30 = vsel %vm14577_vm5, %v2912_v27, %v2913_v13  ;;  %2984 = vst [vmem:[#allocation2 + $0x458] sm:$0xf] %v2918_v46  ;;  %v8349_v44 = vld [vmem:[#allocation3 + $0xd0] sm:$0xf]  ;;  %v8350_v15 = vld [vmem:[#allocation3 + $0xd4] sm:$0x1]  ;;  %v12556_v13 = vpop.f32.mrf.mxu0  ;;  %v15753_v56 = vpop.f32.mrf.mxu1 }
 0x219   : > { %2983 = vst [vmem:[#allocation2 + $0x434] sm:$0xf] %v2914_v30  ;;  %v13783_v42 = vld [vmem:[#allocation2 + $0x2f0] ss:$36 sps:$4 sm:$0xff]   ;;  %v2921_v41 = vsel %vm14577_vm5, %v2919_v5, %v2920_v2  ;;  %v8506_v16 = vrot.slane %v8349_v44, 5  ;;  %v8509_v23 = vrot.slane %v8350_v15, 5  ;;  %v12557_v62 = vadd.f32 %v12556_v13, %v12555_v35 }
 0x21a   : > { %2985 = vst [vmem:[#allocation2 + $0x47c] sm:$0xf] %v2921_v41  ;;  %v15762_v31 = vpop.f32.mrf.mxu1  ;;  %v12558_v48 = vpop.f32.mrf.mxu0  ;;  %v13784_v38 = vld [vmem:[#allocation2 + $0x338] ss:$36 sps:$4 sm:$0xff]   ;;  %v13785_v2 = vld [vmem:[#allocation2 + $0x380] ss:$36 sps:$4 sm:$0xff]  }
 0x21b   : > { %v8508_v61 = vrot.slane %v8506_v16, 4  ;;  %v15756_v27 = vadd.f32 %v12557_v62, %v15176_v22  ;;  %v8507_v37 = vsel %vm14577_vm5, %v12047_v52, %v8506_v16  ;;  %v13798_v15 = vld [vmem:[#allocation7 + $0x18] sm:$0xff]  }
 0x21c   : > { %v12559_v30 = vpop.f32.mrf.mxu0  ;;  %v15764_v22 = vpop.f32.mrf.mxu1 }
 0x21d   : > { %17914 = vst [vmem:[#allocation22_spill] sm:$0xff] %v15756_v27  ;;  %v8510_v39 = vsel %vm14577_vm5, %v8508_v61, %v8509_v23  ;;  %v12560_v46 = vadd.f32 %v12559_v30, %v12558_v48 }
 0x21e   : > { %v12561_v5 = vpop.f32.mrf.mxu0  ;;  %v15769_v35 = vpop.f32.mrf.mxu1 }
 0x21f   : > { %13317 = vmatmul.mubr.bf16.gmra.mxu0 %v13782_v47  ;;  %v15767_v21 = vadd.f32 %v12560_v46, %v15198_v18  ;;  %v13797_v47 = vld [vmem:[#allocation7 + $0x58] sm:$0xff]  }
 0x220   : > { %13320 = vmatprep.mubr.bf16.mxu0 %v13783_v42  ;;  %v12562_v20 = vpop.f32.mrf.mxu0  ;;  %12786 = vmatprep.subr.bf16.mxu1 %v13797_v47  ;;  %v13786_v42 = vld [vmem:[#allocation2 + $0x3c8] ss:$36 sps:$4 sm:$0xff]   ;;  %v13787_v16 = vld [vmem:[#allocation2 + $0x410] ss:$36 sps:$4 sm:$0xff]   ;;  %v15774_v52 = vpop.f32.mrf.mxu1 }
 0x221   : > { %v13788_v25 = vld [vmem:[#allocation2 + $0x458] ss:$36 sps:$4 sm:$0xff]   ;;  %17915 = vst [vmem:[#allocation23_spill] sm:$0xff] %v15767_v21  ;;  %v12563_v44 = vadd.f32 %v12562_v20, %v12561_v5  ;;  %12787 = vmatpush3.bf16.msra.mxu1 %v13798_v15 }
 0x222   : > { %8573 = vst [vmem:[#allocation2 + $0x458] sm:$0xf] %v8507_v37  ;;  %8574 = vst [vmem:[#allocation2 + $0x47c] sm:$0xf] %v8510_v39  ;;  %v12564_v13 = vpop.f32.mrf.mxu0  ;;  %v15776_v18 = vpop.f32.mrf.mxu1 }
 0x223   : > { %v15772_v41 = vadd.f32 %v12563_v44, %v15204_v34 }
 0x224   : > { %v12565_v61 = vpop.f32.mrf.mxu0  ;;  %v15778_v62 = vpop.f32.mrf.mxu1 }
 0x225   : > { %17916 = vst [vmem:[#allocation24_spill] sm:$0xff] %v15772_v41  ;;  %v12566_v23 = vadd.f32 %v12565_v61, %v12564_v13  ;;  %v13799_v13 = vld [vmem:[#allocation7 + $0x50] sm:$0xff]  }
 0x226   : > { %v12567_v37 = vpop.f32.mrf.mxu0  ;;  %v13800_v61 = vld [vmem:[#allocation7 + $0x10] sm:$0xff]   ;;  %12788 = vmatprep.subr.bf16.mxu1 %v13799_v13 }
 0x227   : > { %13321 = vmatmul.mubr.bf16.gmra.mxu0 %v13784_v38  ;;  %v15781_v39 = vadd.f32 %v12566_v23, %v15216_v54  ;;  %v15783_v38 = vpop.f32.mrf.mxu1  ;;  %12789 = vmatpush3.bf16.msra.mxu1 %v13800_v61 }
 0x228   : > { %13324 = vmatprep.mubr.bf16.mxu0 %v13785_v2  ;;  %v12568_v48 = vpop.f32.mrf.mxu0 }
 0x229   : > { %17917 = vst [vmem:[#allocation25_spill] sm:$0xff] %v15781_v39  ;;  %v12569_v34 = vadd.f32 %v12568_v48, %v12567_v37  ;;  %v15788_v30 = vpop.f32.mrf.mxu1  ;;  %v5463_v39 = vld [vmem:[#allocation3 + $0x48] sm:$0x1] }
 0x22a   : > { %v12570_v46 = vpop.f32.mrf.mxu0 }
 0x22b   : > { %v15786_v2 = vadd.f32 %v12569_v34, %v15225_v7  ;;  %v15790_v5 = vpop.f32.mrf.mxu1 }
 0x22c   : > { %v12571_v20 = vpop.f32.mrf.mxu0 }
 0x22d   : > { %17918 = vst [vmem:[#allocation26_spill] sm:$0xff] %v15786_v2  ;;  %v12572_v47 = vadd.f32 %v12571_v20, %v12570_v46  ;;  %v15792_v15 = vpop.f32.mrf.mxu1  ;;  %v5457_v2 = vld [vmem:[#allocation3 + $0x30] sm:$0x1] }
 0x22e   : > { %v12573_v44 = vpop.f32.mrf.mxu0 }
 0x22f   : > { %13325 = vmatmul.mubr.bf16.gmra.mxu0 %v13786_v42  ;;  %v15795_v54 = vadd.f32 %v12572_v47, %v15248_v0  ;;  %v15797_v7 = vpop.f32.mrf.mxu1 }
 0x230   : > { %13328 = vmatprep.mubr.bf16.mxu0 %v13787_v16  ;;  %v12574_v42 = vpop.f32.mrf.mxu0 }
 0x231   : > { %17919 = vst [vmem:[#allocation27_spill] sm:$0xff] %v15795_v54  ;;  %v12575_v16 = vadd.f32 %v12574_v42, %v12573_v44  ;;  %v5451_v42 = vld [vmem:[#allocation3 + $0x18] sm:$0x1] }
 0x232   : > { %v12576_v37 = vpop.f32.mrf.mxu0  ;;  %v5452_v61 = vsel %vm15812_vm8, 0, %v5451_v42 }
 0x233   : > { %v15800_v23 = vadd.f32 %v12575_v16, %v15268_v53  ;;  %5453 = vst [vmem:[#allocation3 + $0x18] sm:$0x1] %v5452_v61  ;;  %v5498_v61 = vld [vmem:[#allocation3 + $0x14] sm:$0x1] }
 0x234   : > { %v12577_v34 = vpop.f32.mrf.mxu0 }
 0x235   : > { %17920 = vst [vmem:[#allocation28_spill] sm:$0xff] %v15800_v23  ;;  %v12578_v0 = vadd.f32 %v12577_v34, %v12576_v37  ;;  %v5448_v37 = vld [vmem:[#allocation3 + $0xc] sm:$0x1]  ;;  %v13801_v23 = vld [vmem:[#allocation7 + $0xf8] sm:$0xff]  }
 0x236   : > { %v12579_v20 = vpop.f32.mrf.mxu0  ;;  %v5449_v57 = vsel %vm15812_vm8, 0, %v5448_v37  ;;  %12890 = vmatprep.subr.bf16.mxu0 %v13801_v23 }
 0x237   : > { %13329 = vmatmul.mubr.bf16.gmra.mxu0 %v13788_v25  ;;  %v15802_v25 = vpop.f32.mrf.mxu1  ;;  %v15809_v47 = vadd.f32 %v12578_v0, %v15291_v29  ;;  %5450 = vst [vmem:[#allocation3 + $0xc] sm:$0x1] %v5449_v57 }
 0x238   : > { %v12580_v44 = vpop.f32.mrf.mxu0 }
 0x239   : > { %v15804_v48 = vpop.f32.mrf.mxu1  ;;  %17921 = vst [vmem:[#allocation29_spill] sm:$0xff] %v15809_v47  ;;  %v12581_v13 = vadd.f32 %v12580_v44, %v12579_v20  ;;  %v5501_v20 = vld [vmem:[#allocation3 + $0x20] sm:$0x1] }
 0x23a   : > { %v12582_v42 = vpop.f32.mrf.mxu0  ;;  %v5502_v4 = vsel %vm15821_vm10, 0, %v5501_v20 }
 0x23b   : > { %v15806_v46 = vpop.f32.mrf.mxu1  ;;  %v15828_v0 = vadd.f32 %v12581_v13, %v15309_v63  ;;  %5503 = vst [vmem:[#allocation3 + $0x20] sm:$0x1] %v5502_v4  ;;  %v5499_v63 = vsel %vm15821_vm10, 0, %v5498_v61  ;;  %v13803_v13 = vld [vmem:[#allocation7 + $0xb8] sm:$0xff]   ;;  %v5458_v4 = vsel %vm15812_vm8, 0, %v5457_v2 }
 0x23c   : > { %v12583_v47 = vpop.f32.mrf.mxu0  ;;  %5500 = vst [vmem:[#allocation3 + $0x14] sm:$0x1] %v5499_v63  ;;  %12891 = vmatpush3.bf16.msra.mxu0 %v13803_v13  ;;  %5459 = vst [vmem:[#allocation3 + $0x30] sm:$0x1] %v5458_v4  ;;  %v13806_v13 = vld [vmem:[#allocation7 + $0xb0] sm:$0xff]  }
 0x23d   : > { %v15816_v16 = vpop.f32.mrf.mxu1  ;;  %17926 = vst [vmem:[#allocation30_spill] sm:$0xff] %v15828_v0  ;;  %v12584_v54 = vadd.f32 %v12583_v47, %v12582_v42  ;;  %v5454_v47 = vld [vmem:[#allocation3 + $0x24] sm:$0x1] }
 0x23e   : > { %v12585_v37 = vpop.f32.mrf.mxu0  ;;  %v5455_v61 = vsel %vm15812_vm8, 0, %v5454_v47  ;;  %v13807_v47 = vld [vmem:[#allocation7 + $0xe8] sm:$0xff]  }
 0x23f   : > { %v15825_v34 = vpop.f32.mrf.mxu1  ;;  %v15841_v57 = vadd.f32 %v12584_v54, %v15311_v19  ;;  %5456 = vst [vmem:[#allocation3 + $0x24] sm:$0x1] %v5455_v61  ;;  %v13805_v54 = vld [vmem:[#allocation7 + $0xf0] sm:$0xff]  }
 0x240   : > { %v12586_v20 = vpop.f32.mrf.mxu0  ;;  %12892 = vmatprep.subr.bf16.mxu0 %v13805_v54 }
 0x241   : > { %v15832_v44 = vpop.f32.mrf.mxu1  ;;  %17927 = vst [vmem:[#allocation31_spill] sm:$0xff] %v15841_v57  ;;  %v12587_v26 = vadd.f32 %v12586_v20, %v12585_v37  ;;  %v5507_v37 = vld [vmem:[#allocation3 + $0x38] sm:$0x1]  ;;  %12893 = vmatpush3.bf16.msra.mxu0 %v13806_v13  ;;  %v5504_v13 = vld [vmem:[#allocation3 + $0x2c] sm:$0x1] }
 0x242   : > { %v5508_v4 = vsel %vm15821_vm10, 0, %v5507_v37  ;;  %12894 = vmatprep.subr.bf16.mxu0 %v13807_v47  ;;  %v5460_v47 = vld [vmem:[#allocation3 + $0x3c] sm:$0x1] }
 0x243   : > { %v15838_v0 = vpop.f32.mrf.mxu1  ;;  %v15850_v63 = vadd.f32 %v12587_v26, %v15356_v58  ;;  %5509 = vst [vmem:[#allocation3 + $0x38] sm:$0x1] %v5508_v4  ;;  %v13808_v26 = vld [vmem:[#allocation7 + $0xa8] sm:$0xff]  }
 0x244   : > { %v13802_v4 = vld [vmem:[#allocation7 + $0x48] sm:$0xff]  }
 0x245   : > { %v15845_v42 = vpop.f32.mrf.mxu1  ;;  %17928 = vst [vmem:[#allocation32_spill] sm:$0xff] %v15850_v63  ;;  %12895 = vmatpush3.bf16.msra.mxu0 %v13808_v26  ;;  %12790 = vmatprep.subr.bf16.mxu1 %v13802_v4  ;;  %v5510_v4 = vld [vmem:[#allocation3 + $0x44] sm:$0x1] }
 0x247   : > { %v15852_v19 = vpop.f32.mrf.mxu1  ;;  %v12588_v23 = vpop.f32.mrf.mxu0 }
 0x249   : > { %v15854_v57 = vpop.f32.mrf.mxu1  ;;  %v12589_v2 = vpop.f32.mrf.mxu0 }
 0x24a   : > { %v12590_v20 = vadd.f32 %v12589_v2, %v12588_v23  ;;  %v5505_v2 = vsel %vm15821_vm10, 0, %v5504_v13  ;;  %v13810_v13 = vld [vmem:[#allocation7 + $0xa0] sm:$0xff]  }
 0x24b   : > { %v15858_v41 = vpop.f32.mrf.mxu1  ;;  %v12591_v58 = vpop.f32.mrf.mxu0  ;;  %5506 = vst [vmem:[#allocation3 + $0x2c] sm:$0x1] %v5505_v2 }
 0x24c   : > { %v15861_v61 = vadd.f32 %v12590_v20, %v15358_v60  ;;  %v5464_v60 = vsel %vm15812_vm8, 0, %v5463_v39 }
 0x24d   : > { %v12592_v63 = vpop.f32.mrf.mxu0  ;;  %5465 = vst [vmem:[#allocation3 + $0x48] sm:$0x1] %v5464_v60 }
 0x24e   : > { %17929 = vst [vmem:[#allocation33_spill] sm:$0xff] %v15861_v61  ;;  %v12593_v54 = vadd.f32 %v12592_v63, %v12591_v58  ;;  %v13809_v58 = vld [vmem:[#allocation7 + $0xe0] sm:$0xff]   ;;  %v13804_v61 = vld [vmem:[#allocation7 + $0x8] sm:$0xff]  }
 0x24f   : > { %12896 = vmatprep.subr.bf16.mxu0 %v13809_v58  ;;  %12791 = vmatpush3.bf16.msra.mxu1 %v13804_v61 }
 0x250   : > { %v15863_v21 = vpop.f32.mrf.mxu1  ;;  %v15866_v23 = vadd.f32 %v12593_v54, %v15376_v33  ;;  %v5461_v33 = vsel %vm15812_vm8, 0, %v5460_v47  ;;  %v5513_v54 = vld [vmem:[#allocation3 + $0x50] sm:$0x1]  ;;  %12897 = vmatpush3.bf16.msra.mxu0 %v13810_v13  ;;  %v5511_v47 = vsel %vm15821_vm10, 0, %v5510_v4  ;;  %v13815_v13 = vld [vmem:[#allocation7 + $0xd0] sm:$0xff]  }
 0x251   : > { %5462 = vst [vmem:[#allocation3 + $0x3c] sm:$0x1] %v5461_v33  ;;  %v5514_v39 = vsel %vm15821_vm10, 0, %v5513_v54  ;;  %5512 = vst [vmem:[#allocation3 + $0x44] sm:$0x1] %v5511_v47 }
 0x252   : > { %17930 = vst [vmem:[#allocation34_spill] sm:$0xff] %v15866_v23  ;;  %v15870_v37 = vpop.f32.mrf.mxu1  ;;  %5515 = vst [vmem:[#allocation3 + $0x50] sm:$0x1] %v5514_v39  ;;  %v13816_v39 = vld [vmem:[#allocation7 + $0x90] sm:$0xff]  }
 0x254   : > { %v15874_v20 = vpop.f32.mrf.mxu1  ;;  %v12594_v63 = vpop.f32.mrf.mxu0 }
 0x255   : > { %17931 = vst [vmem:[#allocation35_spill] sm:$0xff] %v15874_v20  ;;  %v13813_v20 = vld [vmem:[#allocation7 + $0x98] sm:$0xff]  }
 0x256   : > { %v12595_v26 = vpop.f32.mrf.mxu0  ;;  %v15878_v23 = vpop.f32.mrf.mxu1 }
 0x257   : > { %17932 = vst [vmem:[#allocation36_spill] sm:$0xff] %v15878_v23  ;;  %v12596_v2 = vadd.f32 %v12595_v26, %v12594_v63  ;;  %v13811_v23 = vld [vmem:[#allocation7 + $0xd8] sm:$0xff]  }
 0x258   : > { %v12597_v27 = vpop.f32.mrf.mxu0  ;;  %12898 = vmatprep.subr.bf16.mxu0 %v13811_v23 }
 0x259   : > { %v15883_v60 = vadd.f32 %v12596_v2, %v15397_v6  ;;  %12899 = vmatpush3.bf16.msra.mxu0 %v13813_v20  ;;  %v5469_v2 = vld [vmem:[#allocation3 + $0x60] sm:$0x1] }
 0x25a   : > { %v12598_v33 = vpop.f32.mrf.mxu0  ;;  %v5470_v47 = vsel %vm15812_vm8, 0, %v5469_v2  ;;  %12900 = vmatprep.subr.bf16.mxu0 %v13815_v13 }
 0x25b   : > { %17933 = vst [vmem:[#allocation37_spill] sm:$0xff] %v15883_v60  ;;  %v12599_v26 = vadd.f32 %v12598_v33, %v12597_v27  ;;  %v13812_v60 = vld [vmem:[#allocation7 + $0x40] sm:$0xff]   ;;  %5471 = vst [vmem:[#allocation3 + $0x60] sm:$0x1] %v5470_v47  ;;  %v5466_v33 = vld [vmem:[#allocation3 + $0x54] sm:$0x1] }
 0x25c   : > { %12792 = vmatprep.subr.bf16.mxu1 %v13812_v60  ;;  %v17940_v47 = vld [vmem:[#allocation20_spill] sm:$0xff] }
 0x25d   : > { %v15887_v63 = vpop.f32.mrf.mxu1  ;;  %v15892_v54 = vadd.f32 %v12599_v26, %v15431_v9  ;;  %v13814_v9 = vld [vmem:[#allocation7] sm:$0xff]   ;;  %12901 = vmatpush3.bf16.msra.mxu0 %v13816_v39  ;;  %v5467_v26 = vsel %vm15812_vm8, 0, %v5466_v33 }
 0x25e   : > { %5468 = vst [vmem:[#allocation3 + $0x54] sm:$0x1] %v5467_v26  ;;  %12793 = vmatpush3.bf16.msra.mxu1 %v13814_v9  ;;  %v5516_v39 = vld [vmem:[#allocation3 + $0x5c] sm:$0x1]  ;;  %v5475_v9 = vld [vmem:[#allocation3 + $0x78] sm:$0x1] }
 0x25f   : > { %v15889_v58 = vpop.f32.mrf.mxu1  ;;  %17934 = vst [vmem:[#allocation38_spill] sm:$0xff] %v15892_v54  ;;  %v13817_v26 = vld [vmem:[#allocation7 + $0xc8] sm:$0xff]  }
 0x260   : > { %12902 = vmatprep.subr.bf16.mxu0 %v13817_v26 }
 0x261   : > { %v15894_v6 = vpop.f32.mrf.mxu1  ;;  %v12600_v61 = vpop.f32.mrf.mxu0 }
 0x262   : > { %17935 = vst [vmem:[#allocation39_spill] sm:$0xff] %v15894_v6  ;;  %v5519_v6 = vld [vmem:[#allocation3 + $0x68] sm:$0x1] }
 0x263   : > { %v12601_v4 = vpop.f32.mrf.mxu0  ;;  %v15898_v27 = vpop.f32.mrf.mxu1 }
 0x264   : > { %17936 = vst [vmem:[#allocation40_spill] sm:$0xff] %v15898_v27  ;;  %v12602_v23 = vadd.f32 %v12601_v4, %v12600_v61  ;;  %v5520_v61 = vsel %vm15821_vm10, 0, %v5519_v6 }
 0x265   : > { %v12603_v20 = vpop.f32.mrf.mxu0  ;;  %5521 = vst [vmem:[#allocation3 + $0x68] sm:$0x1] %v5520_v61 }
 0x266   : > { %v15903_v54 = vadd.f32 %v12602_v23, %v15433_v40  ;;  %v5517_v40 = vsel %vm15821_vm10, 0, %v5516_v39  ;;  %v13819_v39 = vld [vmem:[#allocation2] ss:$36 sps:$4 sm:$0xff]  }
 0x267   : > { %v12604_v2 = vpop.f32.mrf.mxu0  ;;  %5518 = vst [vmem:[#allocation3 + $0x5c] sm:$0x1] %v5517_v40 }
 0x268   : > { %17937 = vst [vmem:[#allocation41_spill] sm:$0xff] %v15903_v54  ;;  %v12605_v27 = vadd.f32 %v12604_v2, %v12603_v20  ;;  %v5476_v20 = vsel %vm15812_vm8, 0, %v5475_v9  ;;  %v13818_v2 = vld [vmem:[#allocation7 + $0x88] sm:$0xff]   ;;  %v13823_v9 = vld [vmem:[#allocation7 + $0x80] sm:$0xff]  }
 0x269   : > { %v15905_v13 = vpop.f32.mrf.mxu1  ;;  %5477 = vst [vmem:[#allocation3 + $0x78] sm:$0x1] %v5476_v20  ;;  %v13821_v54 = vld [vmem:[#allocation2 + $0x4] ss:$36 sps:$4 sm:$0xff]   ;;  %12903 = vmatpush3.bf16.msra.mxu0 %v13818_v2  ;;  %v5525_v2 = vld [vmem:[#allocation3 + $0x80] sm:$0x1] }
 0x26a   : > { %17938 = vst [vmem:[#allocation42_spill] sm:$0xff] %v15905_v13  ;;  %v15912_v33 = vadd.f32 %v12605_v27, %v17940_v47  ;;  %10079 = vmatprep.mubr.bf16.mxu1 %v13821_v54 }
 0x26b   : > { %v15909_v4 = vpop.f32.mrf.mxu1  ;;  %10080 = vmatmul.mubr.bf16.vlgmr.msra.gmra.mxu1 %v13819_v39 }
 0x26c   : > { %17939 = vst [vmem:[#allocation43_spill] sm:$0xff] %v15909_v4  ;;  %17941 = vst [vmem:[#allocation20_spill] sm:$0xff] %v15912_v33  ;;  %v13822_v33 = vld [vmem:[#allocation7 + $0xc0] sm:$0xff]   ;;  %v5472_v4 = vld [vmem:[#allocation3 + $0x6c] sm:$0x1] }
 0x26d   : > { %v15916_v60 = vpop.f32.mrf.mxu1  ;;  %v12606_v23 = vpop.f32.mrf.mxu0  ;;  %12904 = vmatprep.subr.bf16.mxu0 %v13822_v33 }
 0x26e   : > { %17942 = vst [vmem:[#allocation44_spill] sm:$0xff] %v15916_v60  ;;  %12905 = vmatpush3.bf16.msra.mxu0 %v13823_v9  ;;  %v5481_v9 = vld [vmem:[#allocation3 + $0x90] sm:$0x1] }
 0x26f   : > { %v12607_v6 = vpop.f32.mrf.mxu0  ;;  %v15920_v27 = vpop.f32.mrf.mxu1 }
 0x270   : > { %v12608_v61 = vadd.f32 %v12607_v6, %v12606_v23  ;;  %v5473_v23 = vsel %vm15812_vm8, 0, %v5472_v4  ;;  %v5522_v4 = vld [vmem:[#allocation3 + $0x74] sm:$0x1] }
 0x271   : > { %v12609_v47 = vpop.f32.mrf.mxu0  ;;  %5474 = vst [vmem:[#allocation3 + $0x6c] sm:$0x1] %v5473_v23 }
 0x272   : > { %v15923_v40 = vadd.f32 %v12608_v61, %v15514_v32 }
 0x273   : > { %v12610_v60 = vpop.f32.mrf.mxu0 }
 0x274   : > { %17943 = vst [vmem:[#allocation45_spill] sm:$0xff] %v15923_v40  ;;  %v12611_v13 = vadd.f32 %v12610_v60, %v12609_v47  ;;  %v5526_v60 = vsel %vm15821_vm10, 0, %v5525_v2 }
 0x275   : > { %5527 = vst [vmem:[#allocation3 + $0x80] sm:$0x1] %v5526_v60 }
 0x276   : > { %v15930_v26 = vadd.f32 %v12611_v13, %v15516_v51  ;;  %v5523_v51 = vsel %vm15821_vm10, 0, %v5522_v4 }
 0x277   : > { %v15927_v20 = vpop.f32.mrf.mxu1  ;;  %5524 = vst [vmem:[#allocation3 + $0x74] sm:$0x1] %v5523_v51 }
 0x278   : > { %17944 = vst [vmem:[#allocation46_spill] sm:$0xff] %v15930_v26  ;;  %v5482_v26 = vsel %vm15812_vm8, 0, %v5481_v9 }
 0x279   : > { %v15932_v32 = vpop.f32.mrf.mxu1  ;;  %5483 = vst [vmem:[#allocation3 + $0x90] sm:$0x1] %v5482_v26 }
 0x27a   : > { %v12612_v54 = vpop.f32.mrf.mxu0 }
 0x27b   : > { %v15934_v6 = vpop.f32.mrf.mxu1 }
 0x27c   : > { %v12613_v61 = vpop.f32.mrf.mxu0 }
 0x27d   : > { %v12614_v47 = vadd.f32 %v12613_v61, %v12612_v54  ;;  %v15938_v33 = vpop.f32.mrf.mxu1  ;;  %v5478_v54 = vld [vmem:[#allocation3 + $0x84] sm:$0x1] }
 0x27e   : > { %v12615_v39 = vpop.f32.mrf.mxu0  ;;  %v5479_v61 = vsel %vm15812_vm8, 0, %v5478_v54  ;;  %v5528_v54 = vld [vmem:[#allocation3 + $0x8c] sm:$0x1] }
 0x27f   : > { %v15943_v13 = vadd.f32 %v12614_v47, %v15541_v3  ;;  %5480 = vst [vmem:[#allocation3 + $0x84] sm:$0x1] %v5479_v61  ;;  %v5531_v3 = vld [vmem:[#allocation3 + $0x98] sm:$0x1] }
 0x280   : > { %v12616_v23 = vpop.f32.mrf.mxu0  ;;  %v5532_v4 = vsel %vm15821_vm10, 0, %v5531_v3 }
 0x281   : > { %17945 = vst [vmem:[#allocation47_spill] sm:$0xff] %v15943_v13  ;;  %v12617_v40 = vadd.f32 %v12616_v23, %v12615_v39  ;;  %5533 = vst [vmem:[#allocation3 + $0x98] sm:$0x1] %v5532_v4 }
 0x283   : > { %v15947_v2 = vpop.f32.mrf.mxu1  ;;  %v15952_v60 = vadd.f32 %v12617_v40, %v15567_v59  ;;  %v5529_v40 = vsel %vm15821_vm10, 0, %v5528_v54 }
 0x284   : > { %5530 = vst [vmem:[#allocation3 + $0x8c] sm:$0x1] %v5529_v40 }
 0x285   : > { %17946 = vst [vmem:[#allocation48_spill] sm:$0xff] %v15952_v60  ;;  %v15954_v47 = vpop.f32.mrf.mxu1  ;;  %v5487_v60 = vld [vmem:[#allocation3 + $0xa8] sm:$0x1] }
 0x287   : > { %v15958_v51 = vpop.f32.mrf.mxu1 }
 0x288   : > { %17947 = vst [vmem:[#allocation49_spill] sm:$0xff] %v15958_v51  ;;  %v12618_v26 = vpop.f32.mrf.mxu0  ;;  %v5488_v51 = vsel %vm15812_vm8, 0, %v5487_v60 }
 0x289   : > { %v15960_v9 = vpop.f32.mrf.mxu1  ;;  %5489 = vst [vmem:[#allocation3 + $0xa8] sm:$0x1] %v5488_v51 }
 0x28a   : > { %v12619_v39 = vpop.f32.mrf.mxu0  ;;  %17948 = vst [vmem:[#allocation50_spill] sm:$0xff] %v15960_v9 }
 0x28b   : > { %v12620_v23 = vadd.f32 %v12619_v39, %v12618_v26 }
 0x28c   : > { %v12621_v13 = vpop.f32.mrf.mxu0 }
 0x28d   : > { %v15963_v59 = vadd.f32 %v12620_v23, %v15581_v11  ;;  %v13827_v11 = vld [vmem:[#allocation7 + $0x178] sm:$0xff]  }
 0x28e   : > { %v12622_v61 = vpop.f32.mrf.mxu0  ;;  %13002 = vmatprep.subr.bf16.mxu1 %v13827_v11 }
 0x28f   : > { %17949 = vst [vmem:[#allocation51_spill] sm:$0xff] %v15963_v59  ;;  %v12623_v4 = vadd.f32 %v12622_v61, %v12621_v13  ;;  %v13828_v13 = vld [vmem:[#allocation7 + $0x138] sm:$0xff]  }
 0x290   : > { %v15967_v3 = vpop.f32.mrf.mxu1  ;;  %13003 = vmatpush3.bf16.msra.mxu1 %v13828_v13 }
 0x291   : > { %17950 = vst [vmem:[#allocation52_spill] sm:$0xff] %v15967_v3  ;;  %v15974_v26 = vadd.f32 %v12623_v4, %v15609_v14  ;;  %v5484_v4 = vld [vmem:[#allocation3 + $0x9c] sm:$0x1] }
 0x292   : > { %v15971_v9 = vpop.f32.mrf.mxu1 }
 0x293   : > { %17951 = vst [vmem:[#allocation53_spill] sm:$0xff] %v15974_v26  ;;  %v5485_v26 = vsel %vm15812_vm8, 0, %v5484_v4 }
 0x294   : > { %v15976_v39 = vpop.f32.mrf.mxu1  ;;  %v12624_v23 = vpop.f32.mrf.mxu0  ;;  %5486 = vst [vmem:[#allocation3 + $0x9c] sm:$0x1] %v5485_v26 }
 0x295   : > { %17952 = vst [vmem:[#allocation54_spill] sm:$0xff] %v15976_v39 }
 0x296   : > { %v12625_v54 = vpop.f32.mrf.mxu0  ;;  %v15978_v40 = vpop.f32.mrf.mxu1 }
 0x297   : > { %v12626_v59 = vadd.f32 %v12625_v54, %v12624_v23 }
 0x298   : > { %v12627_v3 = vpop.f32.mrf.mxu0 }
 0x299   : > { %v15981_v61 = vadd.f32 %v12626_v59, %v15635_v12 }
 0x29a   : > { %v12628_v60 = vpop.f32.mrf.mxu0 }
 0x29b   : > { %17953 = vst [vmem:[#allocation55_spill] sm:$0xff] %v15981_v61  ;;  %v12629_v14 = vadd.f32 %v12628_v60, %v12627_v3  ;;  %v5537_v61 = vld [vmem:[#allocation3 + $0xb0] sm:$0x1] }
 0x29c   : > { %v5538_v3 = vsel %vm15821_vm10, 0, %v5537_v61 }
 0x29d   : > { %v15983_v51 = vpop.f32.mrf.mxu1  ;;  %v15990_v11 = vadd.f32 %v12629_v14, %v15654_v28  ;;  %5539 = vst [vmem:[#allocation3 + $0xb0] sm:$0x1] %v5538_v3 }
 0x29e   : > { %17954 = vst [vmem:[#allocation56_spill] sm:$0xff] %v15983_v51 }
 0x29f   : > { %v15987_v39 = vpop.f32.mrf.mxu1  ;;  %17955 = vst [vmem:[#allocation57_spill] sm:$0xff] %v15990_v11 }
 0x2a1   : > { %v15992_v23 = vpop.f32.mrf.mxu1  ;;  %v12630_v54 = vpop.f32.mrf.mxu0 }
 0x2a3   : > { %v12631_v12 = vpop.f32.mrf.mxu0  ;;  %v15994_v13 = vpop.f32.mrf.mxu1 }
 0x2a4   : > { %v12632_v59 = vadd.f32 %v12631_v12, %v12630_v54  ;;  %17956 = vst [vmem:[#allocation58_spill] sm:$0xff] %v15994_v13  ;;  %v12660_v54 = vadd.f32 %v15728_v43, %v15719_v49  ;;  %v12663_v12 = vadd.f32 %v15744_v10, %v15738_v1  ;;  %v5534_v13 = vld [vmem:[#allocation3 + $0xa4] sm:$0x1]  ;;  %v12669_v1 = vadd.f32 %v15764_v22, %v15762_v31 }
 0x2a5   : > { %v12633_v51 = vpop.f32.mrf.mxu0  ;;  %v12672_v10 = vadd.f32 %v15774_v52, %v15769_v35  ;;  %v12690_v22 = vadd.f32 %v15825_v34, %v15816_v16  ;;  %v12693_v35 = vadd.f32 %v15838_v0, %v15832_v44  ;;  %v12696_v52 = vadd.f32 %v15852_v19, %v15845_v42  ;;  %v17960_v16 = vld [vmem:[#allocation25_spill] sm:$0xff]  ;;  %v17961_v0 = vld [vmem:[#allocation23_spill] sm:$0xff]  ;;  %v17962_v42 = vld [vmem:[#allocation24_spill] sm:$0xff] }
 0x2a6   : > { %v15999_v60 = vadd.f32 %v12632_v59, %v15658_v24  ;;  %v5535_v24 = vsel %vm15821_vm10, 0, %v5534_v13  ;;  %v16019_v49 = vadd.f32 %v12660_v54, %v15715_v8  ;;  %v16022_v43 = vadd.f32 %v12663_v12, %v15731_v45  ;;  %v17963_v19 = vld [vmem:[#allocation21_spill] sm:$0xff]  ;;  %v17966_v54 = vld [vmem:[#allocation28_spill] sm:$0xff] }
 0x2a7   : > { %v12634_v4 = vpop.f32.mrf.mxu0  ;;  %5536 = vst [vmem:[#allocation3 + $0xa4] sm:$0x1] %v5535_v24  ;;  %v12681_v8 = vadd.f32 %v15792_v15, %v15790_v5  ;;  %v12684_v45 = vadd.f32 %v15802_v25, %v15797_v7  ;;  %v17957_v5 = vld [vmem:[#allocation35_spill] sm:$0xff]  ;;  %v17958_v15 = vld [vmem:[#allocation36_spill] sm:$0xff]  ;;  %v16061_v44 = vadd.f32 %v12672_v10, %v17961_v0 }
 0x2a8   : > { %v12635_v28 = vadd.f32 %v12634_v4, %v12633_v51  ;;  %v12666_v51 = vadd.f32 %v15753_v56, %v15751_v55  ;;  %v12675_v55 = vadd.f32 %v15778_v62, %v15776_v18  ;;  %v12678_v56 = vadd.f32 %v15788_v30, %v15783_v38  ;;  %v17967_v24 = vld [vmem:[#allocation39_spill] sm:$0xff]  ;;  %v17977_v0 = vld [vmem:[#allocation44_spill] sm:$0xff] }
 0x2a9   : > { %v12687_v4 = vadd.f32 %v15806_v46, %v15804_v48  ;;  %v12699_v30 = vadd.f32 %v15858_v41, %v15854_v57  ;;  %v12705_v7 = vadd.f32 %v17958_v15, %v17957_v5  ;;  %v17959_v48 = vld [vmem:[#allocation22_spill] sm:$0xff]  ;;  %v5493_v15 = vld [vmem:[#allocation3 + $0xc0] sm:$0x1] }
 0x2aa   : > { %v16001_v14 = vpop.f32.mrf.mxu1  ;;  %v16004_v26 = vadd.f32 %v12635_v28, %v15665_v17  ;;  %v4984_v38 = vadd.f32 %v12666_v51, %v15749_v50  ;;  %v4987_v46 = vadd.f32 %v12669_v1, %v17959_v48  ;;  %v16058_v34 = vadd.f32 %v12678_v56, %v17960_v16  ;;  %v17964_v57 = vld [vmem:[#allocation26_spill] sm:$0xff]  ;;  %v17968_v51 = vld [vmem:[#allocation40_spill] sm:$0xff]  ;;  %v17969_v1 = vld [vmem:[#allocation29_spill] sm:$0xff] }
 0x2ab   : > { %v16064_v50 = vadd.f32 %v12675_v55, %v17962_v42  ;;  %v16076_v12 = vadd.f32 %v12687_v4, %v17966_v54  ;;  %v16085_v10 = vadd.f32 %v12690_v22, %v17969_v1  ;;  %v17970_v55 = vld [vmem:[#allocation30_spill] sm:$0xff]  ;;  %v17976_v22 = vld [vmem:[#allocation43_spill] sm:$0xff]  ;;  %v5543_v42 = vld [vmem:[#allocation3 + $0xc8] sm:$0x1] }
 0x2ac   : > { %v16010_v11 = vpop.f32.mrf.mxu1  ;;  %v16088_v56 = vadd.f32 %v12693_v35, %v17970_v55  ;;  %v17975_v48 = vld [vmem:[#allocation42_spill] sm:$0xff]  ;;  %v12717_v35 = vadd.f32 %v15920_v27, %v17977_v0  ;;  %v16119_v27 = vld [vmem:[%s17859_s3] ss:$0 sm:$0xff]  ;;  %v17978_v54 = vld [vmem:[#allocation49_spill] sm:$0xff] }
 0x2ad   : > { %v12636_v61 = vpop.f32.mrf.mxu0  ;;  %v12714_v16 = vadd.f32 %v17976_v22, %v17975_v48  ;;  %v17982_v1 = vld [vmem:[#allocation52_spill] sm:$0xff] }
 0x2ae   : > { %v16016_v59 = vpop.f32.mrf.mxu1  ;;  %v12732_v55 = vadd.f32 %v15971_v9, %v17982_v1  ;;  %v17986_v9 = vld [vmem:[#allocation41_spill] sm:$0xff] }
 0x2af   : > { %v12637_v17 = vpop.f32.mrf.mxu0  ;;  %v16147_v22 = vadd.f32 %v12714_v16, %v17986_v9 }
 0x2b0   : > { %v12638_v3 = vadd.f32 %v12637_v17, %v12636_v61  ;;  %v16047_v18 = vpop.f32.mrf.mxu1  ;;  %v12708_v61 = vadd.f32 %v15889_v58, %v15887_v63  ;;  %v12711_v17 = vadd.f32 %v17968_v51, %v17967_v24  ;;  %v17974_v63 = vld [vmem:[#allocation32_spill] sm:$0xff]  ;;  %v17979_v24 = vld [vmem:[#allocation50_spill] sm:$0xff] }
 0x2b1   : > { %v12639_v13 = vpop.f32.mrf.mxu0  ;;  %v16100_v58 = vadd.f32 %v12699_v30, %v17974_v63  ;;  %v12723_v30 = vadd.f32 %v15938_v33, %v15934_v6  ;;  %v17980_v6 = vld [vmem:[#allocation37_spill] sm:$0xff] }
 0x2b2   : > { %v16039_v31 = vadd.f32 %v12638_v3, %v15680_v36  ;;  %v12702_v36 = vadd.f32 %v15870_v37, %v15863_v21  ;;  %v16070_v21 = vadd.f32 %v12681_v8, %v17964_v57  ;;  %v17965_v37 = vld [vmem:[#allocation27_spill] sm:$0xff]  ;;  %v16126_v33 = vadd.f32 %v12708_v61, %v17980_v6 }
 0x2b3   : > { %v12640_v62 = vpop.f32.mrf.mxu0  ;;  %v16073_v28 = vadd.f32 %v12684_v45, %v17965_v37  ;;  %v17972_v45 = vld [vmem:[#allocation31_spill] sm:$0xff]  ;;  %v5544_v37 = vsel %vm15821_vm10, 0, %v5543_v42  ;;  %v17989_v42 = vld [vmem:[#allocation45_spill] sm:$0xff] }
 0x2b4   : > { %v12641_v25 = vadd.f32 %v12640_v62, %v12639_v13  ;;  %v17971_v13 = vld [vmem:[#allocation33_spill] sm:$0xff]  ;;  %v16094_v4 = vadd.f32 %v12696_v52, %v17972_v45  ;;  %v17973_v62 = vld [vmem:[#allocation34_spill] sm:$0xff]  ;;  %5545 = vst [vmem:[#allocation3 + $0xc8] sm:$0x1] %v5544_v37 }
 0x2b5   : > { %v16091_v8 = vadd.f32 %v12702_v36, %v17971_v13  ;;  %v16097_v5 = vadd.f32 %v12705_v7, %v17973_v62  ;;  %v5494_v36 = vsel %vm15812_vm8, 0, %v5493_v15  ;;  %v12720_v7 = vadd.f32 %v15932_v32, %v15927_v20  ;;  %v17983_v13 = vld [vmem:[#allocation54_spill] sm:$0xff]  ;;  %v17984_v62 = vld [vmem:[#allocation56_spill] sm:$0xff] }
 0x2b6   : > { %v16067_v41 = vadd.f32 %v12641_v25, %v17963_v19  ;;  %v5490_v25 = vld [vmem:[#allocation3 + $0xb4] sm:$0x1]  ;;  %v12726_v19 = vadd.f32 %v15954_v47, %v15947_v2  ;;  %5495 = vst [vmem:[#allocation3 + $0xc0] sm:$0x1] %v5494_v36  ;;  %v12729_v20 = vadd.f32 %v17979_v24, %v17978_v54  ;;  %v17981_v2 = vld [vmem:[#allocation38_spill] sm:$0xff]  ;;  %v12735_v45 = vadd.f32 %v15978_v40, %v17983_v13  ;;  %v17987_v40 = vld [vmem:[#allocation20_spill] sm:$0xff] }
 0x2b7   : > { %v5491_v52 = vsel %vm15812_vm8, 0, %v5490_v25  ;;  %v16129_v47 = vadd.f32 %v12711_v17, %v17981_v2  ;;  %v12738_v63 = vadd.f32 %v15987_v39, %v17984_v62  ;;  %v17985_v15 = vld [vmem:[#allocation58_spill] sm:$0xff]  ;;  %v16150_v0 = vadd.f32 %v12717_v35, %v17987_v40  ;;  %v17988_v36 = vld [vmem:[#allocation47_spill] sm:$0xff] }
 0x2b8   : > { %v16082_v3 = vpop.f32.mrf.mxu1  ;;  %5492 = vst [vmem:[#allocation3 + $0xb4] sm:$0x1] %v5491_v52  ;;  %v12741_v25 = vadd.f32 %v17985_v15, %v15992_v23  ;;  %v12744_v39 = vadd.f32 %v16010_v11, %v16001_v14  ;;  %v16155_v52 = vadd.f32 %v12726_v19, %v17988_v36  ;;  %v17990_v37 = vld [vmem:[#allocation46_spill] sm:$0xff]  ;;  %v17992_v14 = vld [vmem:[#allocation55_spill] sm:$0xff]  ;;  %v13844_v15 = vld [vmem:[#allocation7 + $0x170] sm:$0xff]  }
 0x2b9   : > { %v16161_v54 = vadd.f32 %v12723_v30, %v17990_v37  ;;  %v16169_v2 = vadd.f32 %v12738_v63, %v17992_v14  ;;  %v17993_v19 = vld [vmem:[#allocation51_spill] sm:$0xff]  ;;  %v17995_v30 = vld [vmem:[#allocation53_spill] sm:$0xff]  ;;  %v16184_v63 = vadd.f32 %v16047_v18, %v16016_v59  ;;  %13004 = vmatprep.subr.bf16.mxu1 %v13844_v15 }
 0x2ba   : > { %v12749_v32 = vpop.f32.mrf.mxu1  ;;  %v16172_v1 = vadd.f32 %v12732_v55, %v17993_v19  ;;  %v16178_v62 = vadd.f32 %v12735_v45, %v17995_v30 }
 0x2bb   : > { %v16194_v59 = vadd.f32 %v12749_v32, %v16082_v3 }
 0x2bf   : > { %v13302_v57 = vpop.f32.mrf.mxu0 }
 0x2c0   : > { %v5145_v51 = vadd.f32 %v13302_v57, %v4984_v38  ;;  %v16142_v38 = vld [vmem:[%s17860_s4] ss:$0 sm:$0xff]  ;;  %v16158_v57 = vadd.f32 %v12720_v7, %v17989_v42  ;;  %v17994_v7 = vld [vmem:[#allocation57_spill] sm:$0xff] }
 0x2c1   : > { %v5136_v61 = vpop.f32.mrf.mxu0  ;;  %v16175_v13 = vadd.f32 %v12741_v25, %v17994_v7 }
 0x2c2   : > { %v5272_v17 = vmul.f32 %v16119_v27, %v5145_v51  ;;  %v5137_v48 = vadd.f32 %v5136_v61, %v16019_v49  ;;  %v12751_v49 = vpop.f32.mrf.mxu1  ;;  %v17991_v51 = vld [vmem:[#allocation48_spill] sm:$0xff]  ;;  %v5540_v61 = vld [vmem:[#allocation3 + $0xbc] sm:$0x1] }
 0x2c3   : > { %v13303_v23 = vpop.f32.mrf.mxu0  ;;  %v16166_v6 = vadd.f32 %v12729_v20, %v17991_v51  ;;  %v5541_v45 = vsel %vm15821_vm10, 0, %v5540_v61 }
 0x2c4   : > { %v5311_v16 = vadd.f32 %v16142_v38, %v5272_v17  ;;  %v5270_v35 = vmul.f32 %v16119_v27, %v5137_v48  ;;  %v5148_v24 = vadd.f32 %v13303_v23, %v4987_v46  ;;  %v16188_v48 = vadd.f32 %v12744_v39, %v15999_v60  ;;  %v12752_v9 = vpop.f32.mrf.mxu1  ;;  %5542 = vst [vmem:[#allocation3 + $0xbc] sm:$0x1] %v5541_v45 }
 0x2c5   : > { %v5139_v11 = vpop.f32.mrf.mxu0 }
 0x2c6   : > { %vm5343_vm12 = vcmp.ge.f32.partialorder %v5311_v16, 0.0  ;;  %v5375_v46 = vmul.f32 0.001, %v5311_v16  ;;  %v5309_v20 = vadd.f32 %v16142_v38, %v5270_v35  ;;  %v5273_v17 = vmul.f32 %v16119_v27, %v5148_v24 }
 0x2c7   : > { %v5140_v55 = vadd.f32 %v5139_v11, %v16022_v43  ;;  %v13306_v25 = vpop.f32.mrf.mxu0 }
 0x2c8   : > { %v5407_v40 = vsel %vm5343_vm12, %v5311_v16, %v5375_v46  ;;  %vm5341_vm14 = vcmp.ge.f32.partialorder %v5309_v20, 0.0  ;;  %v5373_v23 = vmul.f32 0.001, %v5309_v20  ;;  %v5312_v36 = vadd.f32 %v16142_v38, %v5273_v17 }
 0x2c9   : > { %v12275_v18 = vpack.c.bf16 %v5407_v40, %v5407_v40  ;;  %v5271_v43 = vmul.f32 %v16119_v27, %v5140_v55  ;;  %v5161_v60 = vadd.f32 %v13306_v25, %v16058_v34  ;;  %v5152_v39 = vpop.f32.mrf.mxu0  ;;  %v16199_v16 = vadd.f32 %v12752_v9, %v12751_v49  ;;  %v5973_v49 = vld [vmem:[#allocation3 + $0x18] sm:$0xf]  ;;  %v5966_v9 = vld [vmem:[#allocation3 + $0xc] sm:$0xf] }
 0x2ca   : > { %v5405_v42 = vsel %vm5341_vm14, %v5309_v20, %v5373_v23  ;;  %vm5344_vm15 = vcmp.ge.f32.partialorder %v5312_v36, 0.0  ;;  %v5376_v29 = vmul.f32 0.001, %v5312_v36  ;;  %v5153_v37 = vadd.f32 %v5152_v39, %v16061_v44 }
 0x2cb   : > { %v5662_v35 = vshrl.u32 %v12275_v18, 16  ;;  %v12273_v24 = vpack.c.bf16 %v5405_v42, %v5405_v42  ;;  %v5310_v51 = vadd.f32 %v16142_v38, %v5271_v43  ;;  %v13307_v11 = vpop.f32.mrf.mxu0  ;;  %v5665_v3 = vshll.u32 %v12275_v18, 16  ;;  %v13848_v43 = vld [vmem:[#allocation7 + $0x130] sm:$0xff]  }
 0x2cc   : > { %v5408_v32 = vsel %vm5344_vm15, %v5312_v36, %v5376_v29  ;;  %v5276_v14 = vmul.f32 %v16119_v27, %v5161_v60  ;;  %v5274_v19 = vmul.f32 %v16119_v27, %v5153_v37  ;;  %v5164_v15 = vadd.f32 %v13307_v11, %v16070_v21  ;;  %13005 = vmatpush3.bf16.msra.mxu1 %v13848_v43 }
 0x2cd   : > { %v5664_v34 = vrot.slane %v5662_v35, 7  ;;  %v5645_v7 = vshrl.u32 %v12273_v24, 16  ;;  %v12276_v30 = vpack.c.bf16 %v5408_v32, %v5408_v32  ;;  %v5155_v61 = vpop.f32.mrf.mxu0  ;;  %vm5342_vm1 = vcmp.ge.f32.partialorder %v5310_v51, 0.0 }
 0x2ce   : > { %v5374_v46 = vmul.f32 0.001, %v5310_v51  ;;  %v5315_v20 = vadd.f32 %v16142_v38, %v5276_v14  ;;  %v5313_v17 = vadd.f32 %v16142_v38, %v5274_v19  ;;  %v5648_v45 = vshll.u32 %v12273_v24, 16  ;;  %v5977_v24 = vld [vmem:[#allocation3 + $0x20] sm:$0x1] }
 0x2cf   : > { %v5667_v55 = vor.u32 %v5665_v3, %v5664_v34  ;;  %v5647_v25 = vrot.slane %v5645_v7, 7  ;;  %v5670_v40 = vshrl.u32 %v12276_v30, 16  ;;  %v13310_v21 = vpop.f32.mrf.mxu0  ;;  %v5668_v23 = vrot.slane %v5664_v34, 4 }
 0x2d0   : > { %v5406_v36 = vsel %vm5342_vm1, %v5310_v51, %v5374_v46  ;;  %vm5347_vm2 = vcmp.ge.f32.partialorder %v5315_v20, 0.0  ;;  %v5379_v18 = vmul.f32 0.001, %v5315_v20  ;;  %v5673_v29 = vshll.u32 %v12276_v30, 16 }
 0x2d1   : > { %v5974_v60 = vsel %vm16207_vm0, %v5667_v55, %v5973_v49  ;;  %v5650_v39 = vor.u32 %v5648_v45, %v5647_v25  ;;  %v5672_v42 = vrot.slane %v5670_v40, 7  ;;  %v5168_v37 = vpop.f32.mrf.mxu0  ;;  %v12274_v11 = vpack.c.bf16 %v5406_v36, %v5406_v36 }
 0x2d2   : > { %5975 = vst [vmem:[#allocation3 + $0x18] sm:$0xf] %v5974_v60  ;;  %v5411_v51 = vsel %vm5347_vm2, %v5315_v20, %v5379_v18  ;;  %vm5345_vm6 = vcmp.ge.f32.partialorder %v5313_v17, 0.0  ;;  %v5377_v3 = vmul.f32 0.001, %v5313_v17  ;;  %v5651_v30 = vrot.slane %v5647_v25, 4 }
 0x2d3   : > { %v5967_v32 = vsel %vm16207_vm0, %v5650_v39, %v5966_v9  ;;  %v5675_v14 = vor.u32 %v5673_v29, %v5672_v42  ;;  %v5677_v19 = vrot.slane %v5672_v42, 4  ;;  %v12279_v34 = vpack.c.bf16 %v5411_v51, %v5411_v51  ;;  %v13311_v7 = vpop.f32.mrf.mxu0  ;;  %v5987_v51 = vld [vmem:[#allocation3 + $0x30] sm:$0xf] }
 0x2d4   : > { %5968 = vst [vmem:[#allocation3 + $0xc] sm:$0xf] %v5967_v32  ;;  %v5653_v49 = vshrl.u32 %v12274_v11, 16  ;;  %v5409_v46 = vsel %vm5345_vm6, %v5313_v17, %v5377_v3  ;;  %v5277_v55 = vmul.f32 %v16119_v27, %v5164_v15  ;;  %v5656_v40 = vshll.u32 %v12274_v11, 16  ;;  %v5970_v17 = vld [vmem:[#allocation3 + $0x14] sm:$0x1] }
 0x2d5   : > { %v5676_v45 = vsel %vm16217_vm3, %v5668_v23, %v5675_v14  ;;  %v5978_v20 = vsel %vm15812_vm8, %v5677_v19, %v5977_v24  ;;  %v5696_v36 = vshrl.u32 %v12279_v34, 16  ;;  %v5171_v18 = vpop.f32.mrf.mxu0  ;;  %v12277_v43 = vpack.c.bf16 %v5409_v46, %v5409_v46 }
 0x2d6   : > { %5976 = vst [vmem:[#allocation3 + $0x1c] sm:$0xf] %v5676_v45  ;;  %5979 = vst [vmem:[#allocation3 + $0x20] sm:$0x1] %v5978_v20  ;;  %v5655_v9 = vrot.slane %v5653_v49, 7  ;;  %v5316_v25 = vadd.f32 %v16142_v38, %v5277_v55  ;;  %v5156_v60 = vadd.f32 %v5155_v61, %v16064_v50  ;;  %v5699_v15 = vshll.u32 %v12279_v34, 16 }
 0x2d7   : > { %v16230_v39 = vrot.slane %v5696_v36, 7  ;;  %v5177_v23 = vadd.f32 %v13310_v21, %v16085_v10  ;;  %v5169_v42 = vadd.f32 %v5168_v37, %v16073_v28  ;;  %v16234_v29 = vpop.f32.mrf.mxu0  ;;  %v5679_v3 = vshrl.u32 %v12277_v43, 16  ;;  %v13858_v49 = vld [vmem:[#allocation7 + $0x168] sm:$0xff]  }
 0x2d8   : > { %v5658_v24 = vor.u32 %v5656_v40, %v5655_v9  ;;  %v5660_v11 = vrot.slane %v5655_v9, 4  ;;  %v5180_v32 = vadd.f32 %v13311_v7, %v16088_v56  ;;  %v5682_v19 = vshll.u32 %v12277_v43, 16  ;;  %v5980_v7 = vld [vmem:[#allocation3 + $0x24] sm:$0xf]  ;;  %13006 = vmatprep.subr.bf16.mxu1 %v13858_v49 }
 0x2d9   : > { %v5701_v14 = vor.u32 %v5699_v15, %v16230_v39  ;;  %vm5348_vm7 = vcmp.ge.f32.partialorder %v5316_v25, 0.0  ;;  %v5380_v50 = vmul.f32 0.001, %v5316_v25  ;;  %v6912_v61 = vld [vmem:[#allocation3 + $0x18] sm:$0xf]  ;;  %v16242_v10 = vrot.slane %v5679_v3, 7  ;;  %v5184_v45 = vpop.f32.mrf.mxu0 }
 0x2da   : > { %v5659_v34 = vsel %vm16217_vm3, %v5651_v30, %v5658_v24  ;;  %v5971_v28 = vsel %vm15812_vm8, %v5660_v11, %v5970_v17  ;;  %v5275_v21 = vmul.f32 %v16119_v27, %v5156_v60  ;;  %6944 = vst [vmem:[#allocation2 + $0x54] sm:$0xf] %v6912_v61  ;;  %v6082_v37 = vld [vmem:[#allocation3 + $0x18] sm:$0xf]  ;;  %v5280_v55 = vmul.f32 %v16119_v27, %v5177_v23  ;;  %v13862_v3 = vld [vmem:[#allocation7 + $0x128] sm:$0xff]  }
 0x2db   : > { %5969 = vst [vmem:[#allocation3 + $0x10] sm:$0xf] %v5659_v34  ;;  %5972 = vst [vmem:[#allocation3 + $0x14] sm:$0x1] %v5971_v28  ;;  %v5988_v56 = vsel %vm16207_vm0, %v5701_v14, %v5987_v51  ;;  %v5412_v46 = vsel %vm5348_vm7, %v5316_v25, %v5380_v50  ;;  %v5278_v30 = vmul.f32 %v16119_v27, %v5169_v42  ;;  %v6910_v20 = vld [vmem:[#allocation3 + $0xc] sm:$0xf]  ;;  %v16258_v50 = vpop.f32.mrf.mxu0  ;;  %13007 = vmatpush3.bf16.msra.mxu1 %v13862_v3 }
 0x2dc   : > { %v6080_v40 = vld [vmem:[#allocation3 + $0xc] sm:$0xf]  ;;  %6114 = vst [vmem:[#allocation2 + $0x90] sm:$0xf] %v6082_v37  ;;  %v5702_v36 = vrot.slane %v16230_v39, 4  ;;  %v5684_v9 = vor.u32 %v5682_v19, %v16242_v10  ;;  %v12280_v43 = vpack.c.bf16 %v5412_v46, %v5412_v46  ;;  %v5314_v60 = vadd.f32 %v16142_v38, %v5275_v21 }
 0x2dd   : > { %5989 = vst [vmem:[#allocation3 + $0x30] sm:$0xf] %v5988_v56  ;;  %6942 = vst [vmem:[#allocation2 + $0xc] sm:$0xf] %v6910_v20  ;;  %v5319_v25 = vadd.f32 %v16142_v38, %v5280_v55  ;;  %v5317_v17 = vadd.f32 %v16142_v38, %v5278_v30  ;;  %v5281_v15 = vmul.f32 %v16119_v27, %v5180_v32  ;;  %v6913_v42 = vld [vmem:[#allocation3 + $0x1c] sm:$0xf] }
 0x2de   : > { %6112 = vst [vmem:[#allocation2 + $0x48] sm:$0xf] %v6080_v40  ;;  %v5172_v23 = vadd.f32 %v5171_v18, %v16076_v12  ;;  %v5981_v39 = vsel %vm16207_vm0, %v5684_v9, %v5980_v7  ;;  %v5704_v24 = vshrl.u32 %v12280_v43, 16  ;;  %v5707_v11 = vshll.u32 %v12280_v43, 16  ;;  %6945 = vst [vmem:[#allocation2 + $0x78] sm:$0xf] %v6913_v42 }
 0x2df   : > { %vm5346_vm9 = vcmp.ge.f32.partialorder %v5314_v60, 0.0  ;;  %v6083_v51 = vld [vmem:[#allocation3 + $0x1c] sm:$0xf]  ;;  %5982 = vst [vmem:[#allocation3 + $0x24] sm:$0xf] %v5981_v39  ;;  %vm5351_vm10 = vcmp.ge.f32.partialorder %v5319_v25, 0.0  ;;  %v5320_v61 = vadd.f32 %v16142_v38, %v5281_v15  ;;  %v16266_v49 = vadd.f32 %v16234_v29, %v16091_v8 }
 0x2e0   : > { %v5378_v14 = vmul.f32 0.001, %v5314_v60  ;;  %v5383_v19 = vmul.f32 0.001, %v5319_v25  ;;  %vm5349_vm11 = vcmp.ge.f32.partialorder %v5317_v17, 0.0  ;;  %v5706_v32 = vrot.slane %v5704_v24, 7 }
 0x2e1   : > { %6115 = vst [vmem:[#allocation2 + $0xb4] sm:$0xf] %v6083_v51  ;;  %v5991_v12 = vld [vmem:[#allocation3 + $0x38] sm:$0x1]  ;;  %v5381_v18 = vmul.f32 0.001, %v5317_v17  ;;  %v5279_v34 = vmul.f32 %v16119_v27, %v5172_v23  ;;  %v5185_v15 = vadd.f32 %v5184_v45, %v16094_v4 }
 0x2e2   : > { %v5685_v28 = vrot.slane %v16242_v10, 4  ;;  %v5410_v21 = vsel %vm5346_vm9, %v5314_v60, %v5378_v14  ;;  %v5415_v37 = vsel %vm5351_vm10, %v5319_v25, %v5383_v19  ;;  %v7743_v56 = vld [vmem:[#allocation3 + $0x18] sm:$0xf]  ;;  %v7744_v7 = vld [vmem:[#allocation3 + $0x1c] sm:$0xf]  ;;  %v5709_v46 = vor.u32 %v5707_v11, %v5706_v32  ;;  %v16270_v60 = vpop.f32.mrf.mxu0 }
 0x2e3   : > { %v5711_v55 = vrot.slane %v5706_v32, 4  ;;  %v12278_v30 = vpack.c.bf16 %v5410_v21, %v5410_v21  ;;  %v12283_v20 = vpack.c.bf16 %v5415_v37, %v5415_v37  ;;  %v6911_v40 = vld [vmem:[#allocation3 + $0x10] sm:$0xf]  ;;  %7775 = vst [vmem:[#allocation2 + $0x18] sm:$0xf] %v7743_v56  ;;  %v5413_v9 = vsel %vm5349_vm11, %v5317_v17, %v5381_v18 }
 0x2e4   : > { %7776 = vst [vmem:[#allocation2 + $0x3c] sm:$0xf] %v7744_v7  ;;  %vm5352_vm12 = vcmp.ge.f32.partialorder %v5320_v61, 0.0  ;;  %v5384_v10 = vmul.f32 0.001, %v5320_v61  ;;  %v5318_v43 = vadd.f32 %v16142_v38, %v5279_v34  ;;  %v5710_v8 = vsel %vm16217_vm3, %v5702_v36, %v5709_v46  ;;  %v16277_v4 = vpop.f32.mrf.mxu0 }
 0x2e5   : > { %6943 = vst [vmem:[#allocation2 + $0x30] sm:$0xf] %v6911_v40  ;;  %v5992_v29 = vsel %vm15812_vm8, %v5711_v55, %v5991_v12  ;;  %v5687_v25 = vshrl.u32 %v12278_v30, 16  ;;  %v6081_v23 = vld [vmem:[#allocation3 + $0x10] sm:$0xf]  ;;  %v5690_v17 = vshll.u32 %v12278_v30, 16  ;;  %v12281_v39 = vpack.c.bf16 %v5413_v9, %v5413_v9 }
 0x2e6   : > { %5990 = vst [vmem:[#allocation3 + $0x34] sm:$0xf] %v5710_v8  ;;  %5993 = vst [vmem:[#allocation3 + $0x38] sm:$0x1] %v5992_v29  ;;  %v5730_v42 = vshrl.u32 %v12283_v20, 16  ;;  %v5416_v24 = vsel %vm5352_vm12, %v5320_v61, %v5384_v10  ;;  %vm5350_vm13 = vcmp.ge.f32.partialorder %v5318_v43, 0.0 }
 0x2e7   : > { %6113 = vst [vmem:[#allocation2 + $0x6c] sm:$0xf] %v6081_v23  ;;  %v6916_v11 = vld [vmem:[#allocation3 + $0x30] sm:$0xf]  ;;  %v5689_v51 = vrot.slane %v5687_v25, 7  ;;  %v12284_v14 = vpack.c.bf16 %v5416_v24, %v5416_v24  ;;  %v5733_v32 = vshll.u32 %v12283_v20, 16  ;;  %v16292_v24 = vpop.f32.mrf.mxu0 }
 0x2e8   : > { %v5984_v3 = vld [vmem:[#allocation3 + $0x2c] sm:$0x1]  ;;  %v5382_v36 = vmul.f32 0.001, %v5318_v43  ;;  %6948 = vst [vmem:[#allocation2 + $0xe4] sm:$0xf] %v6916_v11 }
 0x2e9   : > { %v5732_v19 = vrot.slane %v5730_v42, 7  ;;  %v5713_v12 = vshrl.u32 %v12281_v39, 16  ;;  %v5716_v18 = vshll.u32 %v12281_v39, 16  ;;  %v6914_v45 = vld [vmem:[#allocation3 + $0x24] sm:$0xf]  ;;  %v5692_v34 = vor.u32 %v5690_v17, %v5689_v51 }
 0x2ea   : > { %v5694_v21 = vrot.slane %v5689_v51, 4  ;;  %v6001_v37 = vld [vmem:[#allocation3 + $0x48] sm:$0xf]  ;;  %v5738_v56 = vshrl.u32 %v12284_v14, 16  ;;  %v5741_v61 = vshll.u32 %v12284_v14, 16  ;;  %v5414_v40 = vsel %vm5350_vm13, %v5318_v43, %v5382_v36  ;;  %v13872_v51 = vld [vmem:[#allocation7 + $0x160] sm:$0xff]  }
 0x2eb   : > { %6946 = vst [vmem:[#allocation2 + $0x9c] sm:$0xf] %v6914_v45  ;;  %v5735_v7 = vor.u32 %v5733_v32, %v5732_v19  ;;  %v5736_v46 = vrot.slane %v5732_v19, 4  ;;  %v16279_v55 = vrot.slane %v5713_v12, 7  ;;  %v5994_v30 = vld [vmem:[#allocation3 + $0x3c] sm:$0xf]  ;;  %v5693_v20 = vsel %vm16217_vm3, %v5685_v28, %v5692_v34  ;;  %13008 = vmatprep.subr.bf16.mxu1 %v13872_v51 }
 0x2ec   : > { %v6084_v9 = vld [vmem:[#allocation3 + $0x24] sm:$0xf]  ;;  %v5985_v10 = vsel %vm15812_vm8, %v5694_v21, %v5984_v3  ;;  %v5740_v8 = vrot.slane %v5738_v56, 7  ;;  %v12282_v29 = vpack.c.bf16 %v5414_v40, %v5414_v40  ;;  %v13824_v25 = vld [vmem:[#allocation2 + $0x8] ss:$36 sps:$4 sm:$0xff]   ;;  %v5284_v28 = vmul.f32 %v16119_v27, %v16266_v49  ;;  %v13876_v12 = vld [vmem:[#allocation7 + $0x120] sm:$0xff]  }
 0x2ed   : > { %v13826_v23 = vld [vmem:[#allocation2 + $0xc] ss:$36 sps:$4 sm:$0xff]   ;;  %6116 = vst [vmem:[#allocation2 + $0xd8] sm:$0xf] %v6084_v9  ;;  %5983 = vst [vmem:[#allocation3 + $0x28] sm:$0xf] %v5693_v20  ;;  %v6002_v17 = vsel %vm16207_vm0, %v5735_v7, %v6001_v37  ;;  %v5718_v42 = vor.u32 %v5716_v18, %v16279_v55  ;;  %v5282_v49 = vmul.f32 %v16119_v27, %v5185_v15  ;;  %13009 = vmatpush3.bf16.msra.mxu1 %v13876_v12 }
 0x2ee   : > { %5986 = vst [vmem:[#allocation3 + $0x2c] sm:$0x1] %v5985_v10  ;;  %v5719_v43 = vrot.slane %v16279_v55, 4  ;;  %v6005_v39 = vld [vmem:[#allocation3 + $0x50] sm:$0x1]  ;;  %v5743_v3 = vor.u32 %v5741_v61, %v5740_v8  ;;  %v5745_v14 = vrot.slane %v5740_v8, 4  ;;  %10240 = vmatprep.mubr.bf16.mxu0 %v13826_v23  ;;  %v5323_v45 = vadd.f32 %v16142_v38, %v5284_v28 }
 0x2ef   : > { %v6086_v11 = vld [vmem:[#allocation3 + $0x30] sm:$0xf]  ;;  %6003 = vst [vmem:[#allocation3 + $0x48] sm:$0xf] %v6002_v17  ;;  %v5721_v36 = vshrl.u32 %v12282_v29, 16  ;;  %v5724_v19 = vshll.u32 %v12282_v29, 16  ;;  %v5995_v18 = vsel %vm16207_vm0, %v5718_v42, %v5994_v30  ;;  %v5196_v34 = vadd.f32 %v16258_v50, %v16097_v5  ;;  %10241 = vmatmul.mubr.bf16.vlgmr.msra.gmra.mxu0 %v13824_v25  ;;  %v16308_v30 = vpop.f32.mrf.mxu0 }
 0x2f0   : > { %v6917_v32 = vld [vmem:[#allocation3 + $0x34] sm:$0xf]  ;;  %6118 = vst [vmem:[#allocation2 + $0x120] sm:$0xf] %v6086_v11  ;;  %5996 = vst [vmem:[#allocation3 + $0x3c] sm:$0xf] %v5995_v18  ;;  %v5744_v37 = vsel %vm16217_vm3, %v5736_v46, %v5743_v3  ;;  %v6006_v56 = vsel %vm15812_vm8, %v5745_v14, %v6005_v39  ;;  %v5188_v7 = vadd.f32 %v16270_v60, %v16100_v58 }
 0x2f1   : > { %6949 = vst [vmem:[#allocation2 + $0x108] sm:$0xf] %v6917_v32  ;;  %v6087_v21 = vld [vmem:[#allocation3 + $0x34] sm:$0xf]  ;;  %v5723_v61 = vrot.slane %v5721_v36, 7  ;;  %vm5355_vm14 = vcmp.ge.f32.partialorder %v5323_v45, 0.0  ;;  %v5321_v50 = vadd.f32 %v16142_v38, %v5282_v49  ;;  %v5285_v55 = vmul.f32 %v16119_v27, %v5196_v34 }
 0x2f2   : > { %6119 = vst [vmem:[#allocation2 + $0x144] sm:$0xf] %v6087_v21  ;;  %6004 = vst [vmem:[#allocation3 + $0x4c] sm:$0xf] %v5744_v37  ;;  %v5998_v15 = vld [vmem:[#allocation3 + $0x44] sm:$0x1]  ;;  %v5283_v9 = vmul.f32 %v16119_v27, %v5188_v7  ;;  %v5209_v58 = vadd.f32 %v16277_v4, %v16147_v22  ;;  %v16319_v22 = vpop.f32.mrf.mxu0  ;;  %v16323_v4 = vadd.f32 %v16194_v59, %v16039_v31 }
 0x2f3   : > { %6007 = vst [vmem:[#allocation3 + $0x50] sm:$0x1] %v6006_v56  ;;  %v5387_v5 = vmul.f32 0.001, %v5323_v45  ;;  %v5726_v46 = vor.u32 %v5724_v19, %v5723_v61  ;;  %v5728_v40 = vrot.slane %v5723_v61, 4  ;;  %vm5353_vm15 = vcmp.ge.f32.partialorder %v5321_v50, 0.0 }
 0x2f4   : > { %v5385_v20 = vmul.f32 0.001, %v5321_v50  ;;  %v5324_v10 = vadd.f32 %v16142_v38, %v5285_v55  ;;  %v5322_v23 = vadd.f32 %v16142_v38, %v5283_v9  ;;  %v6915_v17 = vld [vmem:[#allocation3 + $0x28] sm:$0xf]  ;;  %v16331_v51 = vadd.f32 %v16199_v16, %v16067_v41  ;;  %v6008_v12 = vld [vmem:[#allocation3 + $0x54] sm:$0xf]  ;;  %v16340_v49 = vpop.f32.mrf.mxu0 }
 0x2f5   : > { %v5419_v60 = vsel %vm5355_vm14, %v5323_v45, %v5387_v5  ;;  %v5727_v8 = vsel %vm16217_vm3, %v5719_v43, %v5726_v46  ;;  %v5999_v29 = vsel %vm15812_vm8, %v5728_v40, %v5998_v15  ;;  %6947 = vst [vmem:[#allocation2 + $0xc0] sm:$0xf] %v6915_v17  ;;  %v16327_v43 = vadd.f32 %v16184_v63, %v16004_v26  ;;  %v6085_v19 = vld [vmem:[#allocation3 + $0x28] sm:$0xf]  ;;  %v6015_v63 = vld [vmem:[#allocation3 + $0x60] sm:$0xf] }
 0x2f6   : > { %v12287_v25 = vpack.c.bf16 %v5419_v60, %v5419_v60  ;;  %5997 = vst [vmem:[#allocation3 + $0x40] sm:$0xf] %v5727_v8  ;;  %6000 = vst [vmem:[#allocation3 + $0x44] sm:$0x1] %v5999_v29  ;;  %v5417_v42 = vsel %vm5353_vm15, %v5321_v50, %v5385_v20  ;;  %vm5356_vm1 = vcmp.ge.f32.partialorder %v5324_v10, 0.0  ;;  %vm5354_vm2 = vcmp.ge.f32.partialorder %v5322_v23, 0.0  ;;  %v5216_v29 = vpop.f32.mrf.mxu0 }
 0x2f7   : > { %v12285_v28 = vpack.c.bf16 %v5417_v42, %v5417_v42  ;;  %v5388_v11 = vmul.f32 0.001, %v5324_v10  ;;  %v5386_v14 = vmul.f32 0.001, %v5322_v23  ;;  %v5288_v36 = vmul.f32 %v16119_v27, %v5209_v58  ;;  %6117 = vst [vmem:[#allocation2 + $0xfc] sm:$0xf] %v6085_v19 }
 0x2f8   : > { %v5764_v39 = vshrl.u32 %v12287_v25, 16  ;;  %v5767_v3 = vshll.u32 %v12287_v25, 16  ;;  %v5201_v16 = vadd.f32 %v16292_v24, %v16126_v33  ;;  %v6918_v34 = vld [vmem:[#allocation3 + $0x3c] sm:$0xf]  ;;  %v6920_v7 = vld [vmem:[#allocation3 + $0x48] sm:$0xf] }
 0x2f9   : > { %v5747_v31 = vshrl.u32 %v12285_v28, 16  ;;  %v5750_v59 = vshll.u32 %v12285_v28, 16  ;;  %v5420_v26 = vsel %vm5356_vm1, %v5324_v10, %v5388_v11  ;;  %v5418_v45 = vsel %vm5354_vm2, %v5322_v23, %v5386_v14  ;;  %6950 = vst [vmem:[#allocation2 + $0x12c] sm:$0xf] %v6918_v34  ;;  %v6921_v15 = vld [vmem:[#allocation3 + $0x4c] sm:$0xf] }
 0x2fa   : > { %v16334_v32 = vrot.slane %v5764_v39, 7  ;;  %v12288_v18 = vpack.c.bf16 %v5420_v26, %v5420_v26  ;;  %v5327_v41 = vadd.f32 %v16142_v38, %v5288_v36  ;;  %v12286_v61 = vpack.c.bf16 %v5418_v45, %v5418_v45  ;;  %6952 = vst [vmem:[#allocation2 + $0x174] sm:$0xf] %v6920_v7  ;;  %6953 = vst [vmem:[#allocation2 + $0x198] sm:$0xf] %v6921_v15  ;;  %v13886_v46 = vld [vmem:[#allocation7 + $0x158] sm:$0xff]  }
 0x2fb   : > { %v5749_v56 = vrot.slane %v5747_v31, 7  ;;  %v5286_v8 = vmul.f32 %v16119_v27, %v5201_v16  ;;  %v6088_v25 = vld [vmem:[#allocation3 + $0x3c] sm:$0xf]  ;;  %13010 = vmatprep.subr.bf16.mxu1 %v13886_v46  ;;  %v6019_v17 = vld [vmem:[#allocation3 + $0x68] sm:$0x1]  ;;  %v5212_v28 = vadd.f32 %v16308_v30, %v16150_v0  ;;  %v5204_v31 = vadd.f32 %v16319_v22, %v16129_v47  ;;  %v13892_v0 = vld [vmem:[#allocation7 + $0x1b8] sm:$0xff]   ;;  %v13323_v16 = vpop.f32.mrf.mxu0 }
 0x2fc   : > { %v5769_v21 = vor.u32 %v5767_v3, %v16334_v32  ;;  %v5770_v37 = vrot.slane %v16334_v32, 4  ;;  %v5772_v5 = vshrl.u32 %v12288_v18, 16  ;;  %v5775_v50 = vshll.u32 %v12288_v18, 16  ;;  %6120 = vst [vmem:[#allocation2 + $0x168] sm:$0xf] %v6088_v25  ;;  %v13887_v3 = vld [vmem:[#allocation7 + $0x1f8] sm:$0xff]  }
 0x2fd   : > { %vm5359_vm6 = vcmp.ge.f32.partialorder %v5327_v41, 0.0  ;;  %v5391_v55 = vmul.f32 0.001, %v5327_v41  ;;  %v5752_v24 = vor.u32 %v5750_v59, %v5749_v56  ;;  %v5753_v40 = vrot.slane %v5749_v56, 4  ;;  %v6919_v58 = vld [vmem:[#allocation3 + $0x40] sm:$0xf]  ;;  %13114 = vmatprep.subr.bf16.mxu0 %v13887_v3 }
 0x2fe   : > { %v6016_v33 = vsel %vm16207_vm0, %v5769_v21, %v6015_v63  ;;  %v5755_v9 = vshrl.u32 %v12286_v61, 16  ;;  %v5774_v60 = vrot.slane %v5772_v5, 7  ;;  %v5758_v20 = vshll.u32 %v12286_v61, 16  ;;  %6951 = vst [vmem:[#allocation2 + $0x150] sm:$0xf] %v6919_v58  ;;  %v13891_v59 = vld [vmem:[#allocation7 + $0x118] sm:$0xff]   ;;  %13115 = vmatpush3.bf16.msra.mxu0 %v13892_v0 }
 0x2ff   : > { %6017 = vst [vmem:[#allocation3 + $0x60] sm:$0xf] %v6016_v33  ;;  %v5423_v10 = vsel %vm5359_vm6, %v5327_v41, %v5391_v55  ;;  %v6009_v23 = vsel %vm16207_vm0, %v5752_v24, %v6008_v12  ;;  %v6089_v11 = vld [vmem:[#allocation3 + $0x40] sm:$0xf]  ;;  %v6012_v19 = vld [vmem:[#allocation3 + $0x5c] sm:$0x1]  ;;  %v5325_v32 = vadd.f32 %v16142_v38, %v5286_v8  ;;  %13011 = vmatpush3.bf16.msra.mxu1 %v13891_v59 }
 0x300   : > { %v5757_v42 = vrot.slane %v5755_v9, 7  ;;  %v12291_v39 = vpack.c.bf16 %v5423_v10, %v5423_v10  ;;  %6010 = vst [vmem:[#allocation3 + $0x54] sm:$0xf] %v6009_v23  ;;  %v5777_v14 = vor.u32 %v5775_v50, %v5774_v60  ;;  %v5779_v36 = vrot.slane %v5774_v60, 4  ;;  %6121 = vst [vmem:[#allocation2 + $0x18c] sm:$0xf] %v6089_v11 }
 0x301   : > { %vm5357_vm7 = vcmp.ge.f32.partialorder %v5325_v32, 0.0  ;;  %v5389_v41 = vmul.f32 0.001, %v5325_v32  ;;  %v5289_v21 = vmul.f32 %v16119_v27, %v5212_v28  ;;  %v6029_v56 = vld [vmem:[#allocation3 + $0x78] sm:$0xf]  ;;  %v5287_v7 = vmul.f32 %v16119_v27, %v5204_v31 }
 0x302   : > { %v5760_v26 = vor.u32 %v5758_v20, %v5757_v42  ;;  %v5762_v63 = vrot.slane %v5757_v42, 4  ;;  %v5798_v12 = vshrl.u32 %v12291_v39, 16  ;;  %v5801_v18 = vshll.u32 %v12291_v39, 16  ;;  %v6091_v50 = vld [vmem:[#allocation3 + $0x4c] sm:$0xf] }
 0x303   : > { %v5778_v30 = vsel %vm16217_vm3, %v5770_v37, %v5777_v14  ;;  %v6020_v45 = vsel %vm15812_vm8, %v5779_v36, %v6019_v17  ;;  %v6090_v37 = vld [vmem:[#allocation3 + $0x48] sm:$0xf]  ;;  %v5421_v61 = vsel %vm5357_vm7, %v5325_v32, %v5389_v41  ;;  %v5225_v15 = vadd.f32 %v16340_v49, %v16155_v52  ;;  %6123 = vst [vmem:[#allocation2 + $0x1d4] sm:$0xf] %v6091_v50  ;;  %v6652_v44 = vld [vmem:[#allocation3 + $0x38] sm:$0x1] }
 0x304   : > { %6018 = vst [vmem:[#allocation3 + $0x64] sm:$0xf] %v5778_v30  ;;  %6021 = vst [vmem:[#allocation3 + $0x68] sm:$0x1] %v6020_v45  ;;  %v5761_v47 = vsel %vm16217_vm3, %v5753_v40, %v5760_v26  ;;  %v6013_v22 = vsel %vm15812_vm8, %v5762_v63, %v6012_v19  ;;  %v16362_v34 = vrot.slane %v5798_v12, 7  ;;  %v5217_v5 = vadd.f32 %v5216_v29, %v16158_v57  ;;  %v5219_v57 = vpop.f32.mrf.mxu0  ;;  %v13902_v30 = vld [vmem:[#allocation7 + $0x150] sm:$0xff]  }
 0x305   : > { %6011 = vst [vmem:[#allocation3 + $0x58] sm:$0xf] %v5761_v47  ;;  %6014 = vst [vmem:[#allocation3 + $0x5c] sm:$0x1] %v6013_v22  ;;  %v12289_v33 = vpack.c.bf16 %v5421_v61, %v5421_v61  ;;  %v5328_v24 = vadd.f32 %v16142_v38, %v5289_v21  ;;  %v5326_v9 = vadd.f32 %v16142_v38, %v5287_v7  ;;  %13012 = vmatprep.subr.bf16.mxu1 %v13902_v30  ;;  %v6656_v53 = vld [vmem:[#allocation3 + $0x48] sm:$0xe] }
 0x306   : > { %6122 = vst [vmem:[#allocation2 + $0x1b0] sm:$0xf] %v6090_v37  ;;  %v5803_v55 = vor.u32 %v5801_v18, %v16362_v34  ;;  %v5804_v46 = vrot.slane %v16362_v34, 4  ;;  %v6924_v40 = vld [vmem:[#allocation3 + $0x60] sm:$0xf]  ;;  %v5292_v58 = vmul.f32 %v16119_v27, %v5225_v15  ;;  %v5290_v60 = vmul.f32 %v16119_v27, %v5217_v5  ;;  %v13326_v22 = vpop.f32.mrf.mxu0  ;;  %v13903_v37 = vld [vmem:[#allocation7 + $0x1f0] sm:$0xff]  }
 0x307   : > { %v5228_v52 = vadd.f32 %v13323_v16, %v16166_v6  ;;  %6956 = vst [vmem:[#allocation2 + $0x204] sm:$0xf] %v6924_v40  ;;  %v6094_v49 = vld [vmem:[#allocation3 + $0x60] sm:$0xf]  ;;  %v5781_v10 = vshrl.u32 %v12289_v33, 16  ;;  %v5784_v8 = vshll.u32 %v12289_v33, 16  ;;  %v5220_v11 = vadd.f32 %v5219_v57, %v16161_v54  ;;  %13116 = vmatprep.subr.bf16.mxu0 %v13903_v37 }
 0x308   : > { %v6030_v20 = vsel %vm16207_vm0, %v5803_v55, %v6029_v56  ;;  %vm5360_vm9 = vcmp.ge.f32.partialorder %v5328_v24, 0.0  ;;  %v6922_v29 = vld [vmem:[#allocation3 + $0x54] sm:$0xf]  ;;  %6126 = vst [vmem:[#allocation2 + $0x240] sm:$0xf] %v6094_v49  ;;  %vm5358_vm10 = vcmp.ge.f32.partialorder %v5326_v9, 0.0  ;;  %v5331_v17 = vadd.f32 %v16142_v38, %v5292_v58 }
 0x309   : > { %6031 = vst [vmem:[#allocation3 + $0x78] sm:$0xf] %v6030_v20  ;;  %v5392_v25 = vmul.f32 0.001, %v5328_v24  ;;  %v5390_v23 = vmul.f32 0.001, %v5326_v9  ;;  %v5329_v39 = vadd.f32 %v16142_v38, %v5290_v60  ;;  %v5293_v28 = vmul.f32 %v16119_v27, %v5228_v52 }
 0x30a   : > { %6954 = vst [vmem:[#allocation2 + $0x1bc] sm:$0xf] %v6922_v29  ;;  %v16379_v42 = vrot.slane %v5781_v10, 7  ;;  %v6022_v6 = vld [vmem:[#allocation3 + $0x6c] sm:$0xf]  ;;  %vm5363_vm11 = vcmp.ge.f32.partialorder %v5331_v17, 0.0  ;;  %v5241_v58 = vadd.f32 %v13326_v22, %v16169_v2 }
 0x30b   : > { %v6092_v3 = vld [vmem:[#allocation3 + $0x54] sm:$0xf]  ;;  %v5424_v14 = vsel %vm5360_vm9, %v5328_v24, %v5392_v25  ;;  %v5422_v36 = vsel %vm5358_vm10, %v5326_v9, %v5390_v23  ;;  %v5395_v19 = vmul.f32 0.001, %v5331_v17  ;;  %v6925_v32 = vld [vmem:[#allocation3 + $0x64] sm:$0xf]  ;;  %v5332_v54 = vadd.f32 %v16142_v38, %v5293_v28 }
 0x30c   : > { %6124 = vst [vmem:[#allocation2 + $0x1f8] sm:$0xf] %v6092_v3  ;;  %v5786_v31 = vor.u32 %v5784_v8, %v16379_v42  ;;  %v5787_v59 = vrot.slane %v16379_v42, 4  ;;  %v12292_v26 = vpack.c.bf16 %v5424_v14, %v5424_v14  ;;  %v12290_v63 = vpack.c.bf16 %v5422_v36, %v5422_v36  ;;  %v6923_v12 = vld [vmem:[#allocation3 + $0x58] sm:$0xf]  ;;  %v13907_v42 = vld [vmem:[#allocation7 + $0x110] sm:$0xff]  }
 0x30d   : > { %6957 = vst [vmem:[#allocation2 + $0x228] sm:$0xf] %v6925_v32  ;;  %v5427_v18 = vsel %vm5363_vm11, %v5331_v17, %v5395_v19  ;;  %vm5361_vm12 = vcmp.ge.f32.partialorder %v5329_v39, 0.0  ;;  %v5393_v0 = vmul.f32 0.001, %v5329_v39  ;;  %vm5364_vm13 = vcmp.ge.f32.partialorder %v5332_v54, 0.0  ;;  %v5232_v19 = vpop.f32.mrf.mxu0  ;;  %13013 = vmatpush3.bf16.msra.mxu1 %v13907_v42 }
 0x30e   : > { %6955 = vst [vmem:[#allocation2 + $0x1e0] sm:$0xf] %v6923_v12  ;;  %v6023_v45 = vsel %vm16207_vm0, %v5786_v31, %v6022_v6  ;;  %v5806_v41 = vshrl.u32 %v12292_v26, 16  ;;  %v5809_v16 = vshll.u32 %v12292_v26, 16  ;;  %v5789_v47 = vshrl.u32 %v12290_v63, 16  ;;  %v13908_v32 = vld [vmem:[#allocation7 + $0x1b0] sm:$0xff]  }
 0x30f   : > { %v6093_v21 = vld [vmem:[#allocation3 + $0x58] sm:$0xf]  ;;  %6024 = vst [vmem:[#allocation3 + $0x6c] sm:$0xf] %v6023_v45  ;;  %v5792_v56 = vshll.u32 %v12290_v63, 16  ;;  %v12295_v61 = vpack.c.bf16 %v5427_v18, %v5427_v18  ;;  %v5425_v7 = vsel %vm5361_vm12, %v5329_v39, %v5393_v0  ;;  %v5291_v9 = vmul.f32 %v16119_v27, %v5220_v11  ;;  %13117 = vmatpush3.bf16.msra.mxu0 %v13908_v32 }
 0x310   : > { %6125 = vst [vmem:[#allocation2 + $0x21c] sm:$0xf] %v6093_v21  ;;  %v5808_v15 = vrot.slane %v5806_v41, 7  ;;  %v5791_v38 = vrot.slane %v5789_v47, 7  ;;  %v12293_v5 = vpack.c.bf16 %v5425_v7, %v5425_v7  ;;  %v5396_v50 = vmul.f32 0.001, %v5332_v54 }
 0x311   : > { %v6033_v55 = vld [vmem:[#allocation3 + $0x80] sm:$0x1]  ;;  %v6026_v33 = vld [vmem:[#allocation3 + $0x74] sm:$0x1]  ;;  %v5832_v24 = vshrl.u32 %v12295_v61, 16  ;;  %v5835_v40 = vshll.u32 %v12295_v61, 16 }
 0x312   : > { %v5811_v60 = vor.u32 %v5809_v16, %v5808_v15  ;;  %v5813_v52 = vrot.slane %v5808_v15, 4  ;;  %v5794_v57 = vor.u32 %v5792_v56, %v5791_v38  ;;  %v5796_v49 = vrot.slane %v5791_v38, 4  ;;  %v6641_v20 = vld [vmem:[#allocation3 + $0xc] sm:$0xe]  ;;  %v6095_v10 = vld [vmem:[#allocation3 + $0x64] sm:$0xf] }
 0x313   : > { %v16391_v8 = vrot.slane %v5832_v24, 7  ;;  %v5815_v29 = vshrl.u32 %v12293_v5, 16  ;;  %v5818_v25 = vshll.u32 %v12293_v5, 16  ;;  %v5428_v23 = vsel %vm5364_vm13, %v5332_v54, %v5396_v50  ;;  %v6642_v17 = vld [vmem:[#allocation3 + $0x10] sm:$0xf]  ;;  %v13327_v50 = vpop.f32.mrf.mxu0 }
 0x314   : > { %6127 = vst [vmem:[#allocation2 + $0x264] sm:$0xf] %v6095_v10  ;;  %v5812_v27 = vsel %vm16217_vm3, %v5804_v46, %v5811_v60  ;;  %v6034_v2 = vsel %vm15812_vm8, %v5813_v52, %v6033_v55  ;;  %v5795_v6 = vsel %vm16217_vm3, %v5787_v59, %v5794_v57  ;;  %v6027_v39 = vsel %vm15812_vm8, %v5796_v49, %v6026_v33  ;;  %v6043_v28 = vld [vmem:[#allocation3 + $0x90] sm:$0xf]  ;;  %v6928_v11 = vld [vmem:[#allocation3 + $0x78] sm:$0xf] }
 0x315   : > { %v6098_v3 = vld [vmem:[#allocation3 + $0x78] sm:$0xf]  ;;  %6032 = vst [vmem:[#allocation3 + $0x7c] sm:$0xf] %v5812_v27  ;;  %6035 = vst [vmem:[#allocation3 + $0x80] sm:$0x1] %v6034_v2  ;;  %v5837_v34 = vor.u32 %v5835_v40, %v16391_v8  ;;  %v12296_v36 = vpack.c.bf16 %v5428_v23, %v5428_v23  ;;  %v5233_v57 = vadd.f32 %v5232_v19, %v16172_v1 }
 0x316   : > { %6025 = vst [vmem:[#allocation3 + $0x70] sm:$0xf] %v5795_v6  ;;  %6028 = vst [vmem:[#allocation3 + $0x74] sm:$0x1] %v6027_v39  ;;  %v5838_v46 = vrot.slane %v16391_v8, 4  ;;  %v16406_v14 = vrot.slane %v5815_v29, 7  ;;  %v5244_v10 = vadd.f32 %v13327_v50, %v16175_v13 }
 0x317   : > { %6960 = vst [vmem:[#allocation2 + $0x294] sm:$0xf] %v6928_v11  ;;  %6130 = vst [vmem:[#allocation2 + $0x2d0] sm:$0xf] %v6098_v3  ;;  %v6036_v31 = vld [vmem:[#allocation3 + $0x84] sm:$0xf]  ;;  %v6044_v30 = vsel %vm16207_vm0, %v5837_v34, %v6043_v28 }
 0x318   : > { %v16411_v59 = vld [vmem:[%s17860_s4] ss:$0 sm:$0xff]  ;;  %v12001_v18 = vrot.slane %v6641_v20, 9  ;;  %v6743_v0 = vrot.slane %v6642_v17, 5  ;;  %v6926_v54 = vld [vmem:[#allocation3 + $0x6c] sm:$0xf]  ;;  %v5820_v45 = vor.u32 %v5818_v25, %v16406_v14 }
 0x319   : > { %v5330_v26 = vadd.f32 %v16411_v59, %v5291_v9  ;;  %v16417_v63 = vld [vmem:[%s17859_s3] ss:$0 sm:$0xff]  ;;  %v5821_v41 = vrot.slane %v16406_v14, 4  ;;  %v5840_v16 = vshrl.u32 %v12296_v36, 16  ;;  %v6643_v47 = vld [vmem:[#allocation3 + $0x14] sm:$0x1] }
 0x31a   : > { %v5296_v12 = vmul.f32 %v16417_v63, %v5241_v58  ;;  %6958 = vst [vmem:[#allocation2 + $0x24c] sm:$0xf] %v6926_v54  ;;  %v6096_v22 = vld [vmem:[#allocation3 + $0x6c] sm:$0xf]  ;;  %6045 = vst [vmem:[#allocation3 + $0x90] sm:$0xf] %v6044_v30  ;;  %v6037_v61 = vsel %vm16207_vm0, %v5820_v45, %v6036_v31  ;;  %v6744_v38 = vsel %vm14577_vm5, %v12001_v18, %v6743_v0 }
 0x31b   : > { %v5843_v21 = vshll.u32 %v12296_v36, 16  ;;  %vm5362_vm14 = vcmp.ge.f32.partialorder %v5330_v26, 0.0  ;;  %v5394_v37 = vmul.f32 0.001, %v5330_v26  ;;  %6128 = vst [vmem:[#allocation2 + $0x288] sm:$0xf] %v6096_v22  ;;  %v5294_v13 = vmul.f32 %v16417_v63, %v5233_v57 }
 0x31c   : > { %v5335_v56 = vadd.f32 %v16411_v59, %v5296_v12  ;;  %v5842_v7 = vrot.slane %v5840_v16, 7  ;;  %v6745_v5 = vrot.slane %v6743_v0, 4  ;;  %v6145_v55 = vld [vmem:[#allocation3 + $0xc] sm:$0xf]  ;;  %6038 = vst [vmem:[#allocation3 + $0x84] sm:$0xf] %v6037_v61  ;;  %v5297_v6 = vmul.f32 %v16417_v63, %v5244_v10 }
 0x31d   : > { %v6047_v33 = vld [vmem:[#allocation3 + $0x98] sm:$0x1]  ;;  %v5426_v24 = vsel %vm5362_vm14, %v5330_v26, %v5394_v37  ;;  %v6746_v9 = vrot.slane %v6643_v47, 5  ;;  %6880 = vst [vmem:[#allocation2 + $0x50] sm:$0xf] %v6744_v38  ;;  %v6215_v29 = vshrl.u32 %v6145_v55, 16  ;;  %v5333_v26 = vadd.f32 %v16411_v59, %v5294_v13  ;;  %v5235_v47 = vpop.f32.mrf.mxu0 }
 0x31e   : > { %vm5367_vm15 = vcmp.ge.f32.partialorder %v5335_v56, 0.0  ;;  %v5399_v40 = vmul.f32 0.001, %v5335_v56  ;;  %v5845_v58 = vor.u32 %v5843_v21, %v5842_v7  ;;  %v5847_v60 = vrot.slane %v5842_v7, 4  ;;  %v16433_v8 = vld [vmem:[#allocation3 + $0x10] sm:$0xf] }
 0x31f   : > { %v12294_v52 = vpack.c.bf16 %v5426_v24, %v5426_v24  ;;  %v6747_v20 = vsel %vm14577_vm5, %v6745_v5, %v6746_v9  ;;  %v6927_v25 = vld [vmem:[#allocation3 + $0x70] sm:$0xf]  ;;  %v6929_v1 = vld [vmem:[#allocation3 + $0x7c] sm:$0xf]  ;;  %v6217_v39 = vrot.slane %v6215_v29, 4  ;;  %v13918_v11 = vld [vmem:[#allocation7 + $0x148] sm:$0xff]   ;;  %v5336_v12 = vadd.f32 %v16411_v59, %v5297_v6  ;;  %v16460_v10 = vpop.f32.mrf.mxu0 }
 0x320   : > { %v5431_v49 = vsel %vm5367_vm15, %v5335_v56, %v5399_v40  ;;  %v5846_v23 = vsel %vm16217_vm3, %v5838_v46, %v5845_v58  ;;  %v6048_v17 = vsel %vm15812_vm8, %v5847_v60, %v6047_v33  ;;  %6881 = vst [vmem:[#allocation2 + $0x74] sm:$0xf] %v6747_v20  ;;  %6959 = vst [vmem:[#allocation2 + $0x270] sm:$0xf] %v6927_v25  ;;  %v6097_v28 = vld [vmem:[#allocation3 + $0x70] sm:$0xf]  ;;  %13014 = vmatprep.subr.bf16.mxu1 %v13918_v11 }
 0x321   : > { %v5823_v42 = vshrl.u32 %v12294_v52, 16  ;;  %v5826_v27 = vshll.u32 %v12294_v52, 16  ;;  %6046 = vst [vmem:[#allocation3 + $0x94] sm:$0xf] %v5846_v23  ;;  %6049 = vst [vmem:[#allocation3 + $0x98] sm:$0x1] %v6048_v17  ;;  %v12299_v2 = vpack.c.bf16 %v5431_v49, %v5431_v49  ;;  %v5236_v58 = vadd.f32 %v5235_v47, %v16178_v62 }
 0x322   : > { %6961 = vst [vmem:[#allocation2 + $0x2b8] sm:$0xf] %v6929_v1  ;;  %v6218_v34 = vshll.u32 %v6145_v55, 16  ;;  %v6224_v46 = vshll.u32 %v16433_v8, 16  ;;  %v6228_v36 = vshrl.u32 %v16433_v8, 16  ;;  %vm5365_vm1 = vcmp.ge.f32.partialorder %v5333_v26, 0.0 }
 0x323   : > { %v5825_v3 = vrot.slane %v5823_v42, 7  ;;  %6129 = vst [vmem:[#allocation2 + $0x2ac] sm:$0xf] %v6097_v28  ;;  %v6040_v19 = vld [vmem:[#allocation3 + $0x8c] sm:$0x1]  ;;  %v5866_v32 = vshrl.u32 %v12299_v2, 16 }
 0x324   : > { %v5869_v31 = vshll.u32 %v12299_v2, 16  ;;  %v6057_v54 = vld [vmem:[#allocation3 + $0xa8] sm:$0xf]  ;;  %v6220_v30 = vrot.slane %v6218_v34, 5  ;;  %v6226_v45 = vrot.slane %v6224_v46, 5  ;;  %vm5368_vm2 = vcmp.ge.f32.partialorder %v5336_v12, 0.0 }
 0x325   : > { %v5828_v18 = vor.u32 %v5826_v27, %v5825_v3  ;;  %v5830_v0 = vrot.slane %v5825_v3, 4  ;;  %v16445_v16 = vld [vmem:[#allocation3 + $0x18] sm:$0xe]  ;;  %v6930_v22 = vld [vmem:[#allocation3 + $0x84] sm:$0xf]  ;;  %v16447_v21 = vrot.slane %v5866_v32, 7 }
 0x326   : > { %v5397_v37 = vmul.f32 0.001, %v5333_v26  ;;  %6962 = vst [vmem:[#allocation2 + $0x2dc] sm:$0xf] %v6930_v22  ;;  %v13919_v56 = vld [vmem:[#allocation7 + $0x1e8] sm:$0xff]   ;;  %v6221_v50 = vor.u32 %v6220_v30, %v6217_v39  ;;  %v6230_v49 = vrot.slane %v6228_v36, 4 }
 0x327   : > { %v5829_v61 = vsel %vm16217_vm3, %v5821_v41, %v5828_v18  ;;  %v6041_v7 = vsel %vm15812_vm8, %v5830_v0, %v6040_v19  ;;  %v5400_v38 = vmul.f32 0.001, %v5336_v12  ;;  %v6147_v5 = vld [vmem:[#allocation3 + $0x14] sm:$0x1]  ;;  %v6099_v55 = vld [vmem:[#allocation3 + $0x7c] sm:$0xf]  ;;  %v5871_v33 = vor.u32 %v5869_v31, %v16447_v21  ;;  %13118 = vmatprep.subr.bf16.mxu0 %v13919_v56 }
 0x328   : > { %6039 = vst [vmem:[#allocation3 + $0x88] sm:$0xf] %v5829_v61  ;;  %6042 = vst [vmem:[#allocation3 + $0x8c] sm:$0x1] %v6041_v7  ;;  %v5872_v24 = vrot.slane %v16447_v21, 4  ;;  %v5429_v9 = vsel %vm5365_vm1, %v5333_v26, %v5397_v37  ;;  %v6222_v57 = vrot.slane %v6221_v50, 4  ;;  %v6231_v13 = vor.u32 %v6230_v49, %v6226_v45  ;;  %v5248_v26 = vpop.f32.mrf.mxu0 }
 0x329   : > { %v13831_v40 = vld [vmem:[#allocation2 + $0x54] ss:$36 sps:$4 sm:$0xff]   ;;  %v6645_v14 = vld [vmem:[#allocation3 + $0x1c] sm:$0xf]  ;;  %6131 = vst [vmem:[#allocation2 + $0x2f4] sm:$0xf] %v6099_v55  ;;  %v12297_v60 = vpack.c.bf16 %v5429_v9, %v5429_v9  ;;  %v5432_v52 = vsel %vm5368_vm2, %v5336_v12, %v5400_v38  ;;  %v6058_v8 = vsel %vm16207_vm0, %v5871_v33, %v6057_v54  ;;  %v5295_v31 = vmul.f32 %v16417_v63, %v5236_v58 }
 0x32a   : > { %v13829_v41 = vld [vmem:[#allocation2 + $0x50] ss:$36 sps:$4 sm:$0xff]   ;;  %v6646_v20 = vld [vmem:[#allocation3 + $0x20] sm:$0x1]  ;;  %10248 = vmatprep.mubr.bf16.mxu0 %v13831_v40  ;;  %v12300_v29 = vpack.c.bf16 %v5432_v52, %v5432_v52  ;;  %v6234_v25 = vshll.u32 %v6147_v5, 16  ;;  %v12002_v23 = vrot.slane %v16445_v16, 9  ;;  %v6227_v2 = vsel %vm14566_vm4, %v6222_v57, %v6226_v45 }
 0x32b   : > { %v6932_v62 = vld [vmem:[#allocation3 + $0x90] sm:$0xf]  ;;  %v6933_v17 = vld [vmem:[#allocation3 + $0x94] sm:$0xf]  ;;  %6059 = vst [vmem:[#allocation3 + $0xa8] sm:$0xf] %v6058_v8  ;;  %10249 = vmatmul.mubr.bf16.gmra.mxu0 %v13829_v41  ;;  %v5334_v56 = vadd.f32 %v16411_v59, %v5295_v31 }
 0x32c   : > { %v5849_v42 = vshrl.u32 %v12297_v60, 16  ;;  %v5852_v27 = vshll.u32 %v12297_v60, 16  ;;  %v6148_v6 = vld [vmem:[#allocation3 + $0x18] sm:$0xf]  ;;  %6964 = vst [vmem:[#allocation2 + $0x324] sm:$0xf] %v6932_v62  ;;  %v13331_v60 = vpop.f32.mrf.mxu0  ;;  %v5257_v62 = vadd.f32 %v16460_v10, %v16323_v4 }
 0x32d   : > { %6965 = vst [vmem:[#allocation2 + $0x348] sm:$0xf] %v6933_v17  ;;  %v6100_v39 = vld [vmem:[#allocation3 + $0x84] sm:$0xf]  ;;  %v5874_v28 = vshrl.u32 %v12300_v29, 16  ;;  %v5877_v11 = vshll.u32 %v12300_v29, 16 }
 0x32e   : > { %v6236_v3 = vrot.slane %v6234_v25, 5  ;;  %6608 = vst [vmem:[#allocation2 + $0x4c] sm:$0xf] %v6227_v2  ;;  %v6750_v34 = vrot.slane %v6645_v14, 5  ;;  %6132 = vst [vmem:[#allocation2 + $0x318] sm:$0xf] %v6100_v39  ;;  %v5249_v2 = vadd.f32 %v5248_v26, %v16188_v48  ;;  %v5300_v39 = vmul.f32 %v16417_v63, %v5257_v62 }
 0x32f   : > { %v16467_v46 = vrot.slane %v5849_v42, 7  ;;  %v6050_v36 = vld [vmem:[#allocation3 + $0x9c] sm:$0xf]  ;;  %v6232_v19 = vrot.slane %v6231_v13, 4  ;;  %v6753_v32 = vrot.slane %v6646_v20, 5  ;;  %v13923_v12 = vld [vmem:[#allocation7 + $0x108] sm:$0xff]  }
 0x330   : > { %v5876_v18 = vrot.slane %v5874_v28, 7  ;;  %v6061_v0 = vld [vmem:[#allocation3 + $0xb0] sm:$0x1]  ;;  %v6751_v54 = vsel %vm14577_vm5, %v12002_v23, %v6750_v34  ;;  %v6752_v30 = vrot.slane %v6750_v34, 4  ;;  %v6239_v45 = vshrl.u32 %v6148_v6, 16  ;;  %v13924_v16 = vld [vmem:[#allocation7 + $0x1a8] sm:$0xff]   ;;  %13015 = vmatpush3.bf16.msra.mxu1 %v13923_v12 }
 0x331   : > { %v5854_v47 = vor.u32 %v5852_v27, %v16467_v46  ;;  %v5855_v22 = vrot.slane %v16467_v46, 4  ;;  %v6237_v37 = vsel %vm14566_vm4, %v6232_v19, %v6236_v3  ;;  %6882 = vst [vmem:[#allocation2 + $0x98] sm:$0xf] %v6751_v54  ;;  %v6149_v61 = vld [vmem:[#allocation3 + $0x1c] sm:$0xf]  ;;  %13119 = vmatpush3.bf16.msra.mxu0 %v13924_v16  ;;  %vm5366_vm6 = vcmp.ge.f32.partialorder %v5334_v56, 0.0 }
 0x332   : > { %v6931_v7 = vld [vmem:[#allocation3 + $0x88] sm:$0xf]  ;;  %v13931_v38 = vld [vmem:[#allocation7 + $0x1e0] sm:$0xff]   ;;  %v5879_v5 = vor.u32 %v5877_v11, %v5876_v18  ;;  %v5881_v50 = vrot.slane %v5876_v18, 4  ;;  %6609 = vst [vmem:[#allocation2 + $0x70] sm:$0xf] %v6237_v37  ;;  %v6754_v55 = vsel %vm14577_vm5, %v6752_v30, %v6753_v32  ;;  %v5260_v28 = vadd.f32 %v13331_v60, %v16331_v51  ;;  %v5251_v11 = vpop.f32.mrf.mxu0 }
 0x333   : > { %v6150_v33 = vld [vmem:[#allocation3 + $0x20] sm:$0x1]  ;;  %v6241_v40 = vrot.slane %v6239_v45, 4  ;;  %6963 = vst [vmem:[#allocation2 + $0x300] sm:$0xf] %v6931_v7  ;;  %v6051_v14 = vsel %vm16207_vm0, %v5854_v47, %v6050_v36  ;;  %v6242_v41 = vshll.u32 %v6148_v6, 16  ;;  %13120 = vmatprep.subr.bf16.mxu0 %v13931_v38  ;;  %v5298_v19 = vmul.f32 %v16417_v63, %v5249_v2 }
 0x334   : > { %v6101_v9 = vld [vmem:[#allocation3 + $0x88] sm:$0xf]  ;;  %6883 = vst [vmem:[#allocation2 + $0xbc] sm:$0xf] %v6754_v55  ;;  %v5398_v58 = vmul.f32 0.001, %v5334_v56  ;;  %v5880_v52 = vsel %vm16217_vm3, %v5872_v24, %v5879_v5  ;;  %v6062_v57 = vsel %vm15812_vm8, %v5881_v50, %v6061_v0  ;;  %v5339_v0 = vadd.f32 %v16411_v59, %v5300_v39 }
 0x335   : > { %6133 = vst [vmem:[#allocation2 + $0x33c] sm:$0xf] %v6101_v9  ;;  %6052 = vst [vmem:[#allocation3 + $0x9c] sm:$0xf] %v6051_v14  ;;  %v6248_v49 = vshll.u32 %v6149_v61, 16  ;;  %v6252_v20 = vshrl.u32 %v6149_v61, 16  ;;  %v5301_v51 = vmul.f32 %v16417_v63, %v5260_v28  ;;  %v5337_v16 = vadd.f32 %v16411_v59, %v5298_v19 }
 0x336   : > { %v6102_v8 = vld [vmem:[#allocation3 + $0x90] sm:$0xf]  ;;  %6060 = vst [vmem:[#allocation3 + $0xac] sm:$0xf] %v5880_v52  ;;  %6063 = vst [vmem:[#allocation3 + $0xb0] sm:$0x1] %v6062_v57  ;;  %v5430_v29 = vsel %vm5366_vm6, %v5334_v56, %v5398_v58  ;;  %v5252_v37 = vadd.f32 %v5251_v11, %v16327_v43 }
 0x337   : > { %v6244_v25 = vrot.slane %v6242_v41, 5  ;;  %v6258_v23 = vshll.u32 %v6150_v33, 16  ;;  %v6103_v17 = vld [vmem:[#allocation3 + $0x94] sm:$0xf]  ;;  %6134 = vst [vmem:[#allocation2 + $0x360] sm:$0xf] %v6102_v8  ;;  %v12298_v42 = vpack.c.bf16 %v5430_v29, %v5430_v29  ;;  %v5340_v9 = vadd.f32 %v16411_v59, %v5301_v51 }
 0x338   : > { %v13932_v21 = vld [vmem:[#allocation7 + $0x1a0] sm:$0xff]   ;;  %v6250_v27 = vrot.slane %v6248_v49, 5  ;;  %v6254_v24 = vrot.slane %v6252_v20, 4  ;;  %6135 = vst [vmem:[#allocation2 + $0x384] sm:$0xf] %v6103_v17  ;;  %v13933_v34 = vld [vmem:[#allocation7 + $0x1d8] sm:$0xff]  }
 0x339   : > { %v6245_v13 = vor.u32 %v6244_v25, %v6241_v40  ;;  %v6260_v6 = vrot.slane %v6258_v23, 5  ;;  %v6936_v3 = vld [vmem:[#allocation3 + $0xa8] sm:$0xf]  ;;  %13121 = vmatpush3.bf16.msra.mxu0 %v13932_v21  ;;  %v5857_v4 = vshrl.u32 %v12298_v42, 16  ;;  %v5860_v10 = vshll.u32 %v12298_v42, 16  ;;  %v13937_v48 = vld [vmem:[#allocation7 + $0x140] sm:$0xff]  }
 0x33a   : > { %v6255_v36 = vor.u32 %v6254_v24, %v6250_v27  ;;  %v16493_v32 = vld [vmem:[#allocation3 + $0x24] sm:$0xe]  ;;  %6968 = vst [vmem:[#allocation2 + $0x3b4] sm:$0xf] %v6936_v3  ;;  %v13832_v31 = vld [vmem:[#allocation2 + $0x48] ss:$36 sps:$4 sm:$0xff]   ;;  %13122 = vmatprep.subr.bf16.mxu0 %v13933_v34  ;;  %13016 = vmatprep.subr.bf16.mxu1 %v13937_v48  ;;  %v5299_v42 = vmul.f32 %v16417_v63, %v5252_v37 }
 0x33b   : > { %v13834_v26 = vld [vmem:[#allocation2 + $0x4c] ss:$36 sps:$4 sm:$0xff]   ;;  %v6054_v12 = vld [vmem:[#allocation3 + $0xa4] sm:$0x1]  ;;  %v6246_v18 = vrot.slane %v6245_v13, 4  ;;  %v5859_v45 = vrot.slane %v5857_v4, 7 }
 0x33c   : > { %v13835_v54 = vld [vmem:[#allocation2 + $0x98] ss:$36 sps:$4 sm:$0xff]   ;;  %v6648_v47 = vld [vmem:[#allocation3 + $0x28] sm:$0xf]  ;;  %10087 = vmatprep.mubr.bf16.mxu1 %v13834_v26  ;;  %v6256_v61 = vrot.slane %v6255_v36, 4  ;;  %vm5371_vm7 = vcmp.ge.f32.partialorder %v5339_v0, 0.0 }
 0x33d   : > { %v13837_v30 = vld [vmem:[#allocation2 + $0x9c] ss:$36 sps:$4 sm:$0xff]   ;;  %v6251_v56 = vsel %vm14566_vm4, %v6246_v18, %v6250_v27  ;;  %v5403_v7 = vmul.f32 0.001, %v5339_v0  ;;  %10088 = vmatmul.mubr.bf16.gmra.mxu1 %v13832_v31  ;;  %v5862_v5 = vor.u32 %v5860_v10, %v5859_v45  ;;  %v5864_v50 = vrot.slane %v5859_v45, 4  ;;  %v13938_v60 = vld [vmem:[#allocation7 + $0x198] sm:$0xff]  }
 0x33e   : > { %v6934_v38 = vld [vmem:[#allocation3 + $0x9c] sm:$0xf]  ;;  %10256 = vmatprep.mubr.bf16.mxu0 %v13837_v30  ;;  %6610 = vst [vmem:[#allocation2 + $0x94] sm:$0xf] %v6251_v56  ;;  %vm5369_vm9 = vcmp.ge.f32.partialorder %v5337_v16, 0.0  ;;  %v6261_v43 = vsel %vm14566_vm4, %v6256_v61, %v6260_v6  ;;  %v12003_v14 = vrot.slane %v16493_v32, 9  ;;  %13123 = vmatpush3.bf16.msra.mxu0 %v13938_v60  ;;  %v5338_v10 = vadd.f32 %v16411_v59, %v5299_v42 }
 0x33f   : > { %v5401_v55 = vmul.f32 0.001, %v5337_v16  ;;  %v16501_v33 = vld [vmem:[#allocation3 + $0x2c] sm:$0x1]  ;;  %6966 = vst [vmem:[#allocation2 + $0x36c] sm:$0xf] %v6934_v38  ;;  %v5435_v40 = vsel %vm5371_vm7, %v5339_v0, %v5403_v7  ;;  %10257 = vmatmul.mubr.bf16.gmra.mxu0 %v13835_v54  ;;  %v5863_v52 = vsel %vm16217_vm3, %v5855_v22, %v5862_v5  ;;  %v6055_v57 = vsel %vm15812_vm8, %v5864_v50, %v6054_v12 }
 0x340   : > { %v6937_v58 = vld [vmem:[#allocation3 + $0xac] sm:$0xf]  ;;  %v6104_v41 = vld [vmem:[#allocation3 + $0x9c] sm:$0xf]  ;;  %6611 = vst [vmem:[#allocation2 + $0xb8] sm:$0xf] %v6261_v43  ;;  %v12303_v49 = vpack.c.bf16 %v5435_v40, %v5435_v40 }
 0x341   : > { %v5433_v20 = vsel %vm5369_vm9, %v5337_v16, %v5401_v55  ;;  %v16514_v8 = vld [vmem:[#allocation3 + $0x24] sm:$0xf]  ;;  %v16516_v29 = vld [vmem:[#allocation3 + $0x28] sm:$0xf]  ;;  %6969 = vst [vmem:[#allocation2 + $0x3d8] sm:$0xf] %v6937_v58 }
 0x342   : > { %6136 = vst [vmem:[#allocation2 + $0x3a8] sm:$0xf] %v6104_v41  ;;  %6053 = vst [vmem:[#allocation3 + $0xa0] sm:$0xf] %v5863_v52  ;;  %v12301_v25 = vpack.c.bf16 %v5433_v20, %v5433_v20  ;;  %vm5372_vm10 = vcmp.ge.f32.partialorder %v5340_v9, 0.0  ;;  %v6757_v23 = vrot.slane %v6648_v47, 5 }
 0x343   : > { %6056 = vst [vmem:[#allocation3 + $0xa4] sm:$0x1] %v6055_v57  ;;  %v5404_v46 = vmul.f32 0.001, %v5340_v9  ;;  %v6106_v22 = vld [vmem:[#allocation3 + $0xa8] sm:$0xf] }
 0x344   : > { %v5900_v62 = vshrl.u32 %v12303_v49, 16  ;;  %v5903_v17 = vshll.u32 %v12303_v49, 16  ;;  %v6760_v21 = vrot.slane %v16501_v33, 5  ;;  %v6107_v27 = vld [vmem:[#allocation3 + $0xac] sm:$0xf]  ;;  %v13942_v24 = vld [vmem:[#allocation7 + $0x100] sm:$0xff]   ;;  %v6758_v28 = vsel %vm14577_vm5, %v12003_v14, %v6757_v23 }
 0x345   : > { %6138 = vst [vmem:[#allocation2 + $0x3f0] sm:$0xf] %v6106_v22  ;;  %v6071_v2 = vld [vmem:[#allocation3 + $0xc0] sm:$0xf]  ;;  %v5883_v13 = vshrl.u32 %v12301_v25, 16  ;;  %v5886_v6 = vshll.u32 %v12301_v25, 16  ;;  %v5436_v39 = vsel %vm5372_vm10, %v5340_v9, %v5404_v46  ;;  %13017 = vmatpush3.bf16.msra.mxu1 %v13942_v24 }
 0x346   : > { %6139 = vst [vmem:[#allocation2 + $0x414] sm:$0xf] %v6107_v27  ;;  %v16522_v11 = vrot.slane %v5900_v62, 7  ;;  %v6064_v3 = vld [vmem:[#allocation3 + $0xb4] sm:$0xf]  ;;  %v12304_v34 = vpack.c.bf16 %v5436_v39, %v5436_v39  ;;  %v6759_v4 = vrot.slane %v6757_v23, 4 }
 0x347   : > { %6884 = vst [vmem:[#allocation2 + $0xe0] sm:$0xf] %v6758_v28  ;;  %v13943_v63 = vld [vmem:[#allocation7 + $0x1d0] sm:$0xff]   ;;  %v16525_v19 = vrot.slane %v5883_v13, 7  ;;  %v6263_v32 = vshrl.u32 %v16514_v8, 16  ;;  %v6266_v48 = vshll.u32 %v16514_v8, 16 }
 0x348   : > { %v13944_v36 = vld [vmem:[#allocation7 + $0x190] sm:$0xff]   ;;  %v6272_v31 = vshll.u32 %v16516_v29, 16  ;;  %v13945_v26 = vld [vmem:[#allocation7 + $0x1c8] sm:$0xff]   ;;  %v5905_v12 = vor.u32 %v5903_v17, %v16522_v11  ;;  %v5906_v18 = vrot.slane %v16522_v11, 4  ;;  %v5908_v0 = vshrl.u32 %v12304_v34, 16  ;;  %13124 = vmatprep.subr.bf16.mxu0 %v13943_v63  ;;  %v13953_v45 = vld [vmem:[#allocation7 + $0x1c0] sm:$0xff]  }
 0x349   : > { %v5911_v51 = vshll.u32 %v12304_v34, 16  ;;  %v6153_v54 = vld [vmem:[#allocation3 + $0x2c] sm:$0x1]  ;;  %v6650_v59 = vld [vmem:[#allocation3 + $0x30] sm:$0xe]  ;;  %v13946_v30 = vld [vmem:[#allocation7 + $0x188] sm:$0xff]   ;;  %v5888_v37 = vor.u32 %v5886_v6, %v16525_v19  ;;  %v6761_v7 = vsel %vm14577_vm5, %v6759_v4, %v6760_v21  ;;  %13125 = vmatpush3.bf16.msra.mxu0 %v13944_v36 }
 0x34a   : > { %v13838_v16 = vld [vmem:[#allocation2 + $0x90] ss:$36 sps:$4 sm:$0xff]   ;;  %v5889_v56 = vrot.slane %v16525_v19, 4  ;;  %v6075_v61 = vld [vmem:[#allocation3 + $0xc8] sm:$0x1]  ;;  %v6072_v38 = vsel %vm16207_vm0, %v5905_v12, %v6071_v2  ;;  %v5910_v5 = vrot.slane %v5908_v0, 7  ;;  %13126 = vmatprep.subr.bf16.mxu0 %v13945_v26 }
 0x34b   : > { %v13840_v47 = vld [vmem:[#allocation2 + $0x94] ss:$36 sps:$4 sm:$0xff]   ;;  %6885 = vst [vmem:[#allocation2 + $0x104] sm:$0xf] %v6761_v7  ;;  %vm5370_vm11 = vcmp.ge.f32.partialorder %v5338_v10, 0.0  ;;  %v6065_v33 = vsel %vm16207_vm0, %v5888_v37, %v6064_v3  ;;  %v6265_v43 = vrot.slane %v6263_v32, 4 }
 0x34c   : > { %v5402_v50 = vmul.f32 0.001, %v5338_v10  ;;  %v6935_v55 = vld [vmem:[#allocation3 + $0xa0] sm:$0xf]  ;;  %10095 = vmatprep.mubr.bf16.mxu1 %v13840_v47  ;;  %6073 = vst [vmem:[#allocation3 + $0xc0] sm:$0xf] %v6072_v38  ;;  %v5913_v41 = vor.u32 %v5911_v51, %v5910_v5 }
 0x34d   : > { %v6268_v40 = vrot.slane %v6266_v48, 5  ;;  %v6274_v9 = vrot.slane %v6272_v31, 5  ;;  %v6651_v14 = vld [vmem:[#allocation3 + $0x34] sm:$0xf]  ;;  %6967 = vst [vmem:[#allocation2 + $0x390] sm:$0xf] %v6935_v55  ;;  %10096 = vmatmul.mubr.bf16.gmra.mxu1 %v13838_v16  ;;  %13127 = vmatpush3.bf16.msra.mxu0 %v13946_v30 }
 0x34e   : > { %v13958_v58 = vld [vmem:[#allocation7 + $0x238] sm:$0xff]   ;;  %6066 = vst [vmem:[#allocation3 + $0xb4] sm:$0xf] %v6065_v33  ;;  %v5915_v60 = vrot.slane %v5910_v5, 4  ;;  %v5434_v52 = vsel %vm5370_vm11, %v5338_v10, %v5402_v50  ;;  %v6276_v57 = vshrl.u32 %v16516_v29, 16  ;;  %v6282_v25 = vshll.u32 %v6153_v54, 16  ;;  %13128 = vmatprep.subr.bf16.mxu0 %v13953_v45 }
 0x34f   : > { %v6105_v49 = vld [vmem:[#allocation3 + $0xa0] sm:$0xf]  ;;  %v12302_v20 = vpack.c.bf16 %v5434_v52, %v5434_v52  ;;  %v6269_v8 = vor.u32 %v6268_v40, %v6265_v43  ;;  %v12004_v46 = vrot.slane %v6650_v59, 9  ;;  %v13954_v23 = vld [vmem:[#allocation7 + $0x180] sm:$0xff]   ;;  %13332 = vmatprep.subr.bf16.mxu1 %v13958_v58  ;;  %v5914_v22 = vsel %vm16217_vm3, %v5906_v18, %v5913_v41  ;;  %v6154_v42 = vld [vmem:[#allocation3 + $0x30] sm:$0xf] }
 0x350   : > { %6137 = vst [vmem:[#allocation2 + $0x3cc] sm:$0xf] %v6105_v49  ;;  %v6076_v62 = vsel %vm15812_vm8, %v5915_v60, %v6075_v61  ;;  %v6278_v17 = vrot.slane %v6276_v57, 4  ;;  %v6764_v21 = vrot.slane %v6651_v14, 5  ;;  %v7745_v29 = vld [vmem:[#allocation3 + $0x24] sm:$0xf] }
 0x351   : > { %6074 = vst [vmem:[#allocation3 + $0xc4] sm:$0xf] %v5914_v22  ;;  %6077 = vst [vmem:[#allocation3 + $0xc8] sm:$0x1] %v6076_v62  ;;  %v5891_v27 = vshrl.u32 %v12302_v20, 16  ;;  %v5894_v24 = vshll.u32 %v12302_v20, 16  ;;  %13129 = vmatpush3.bf16.msra.mxu0 %v13954_v23 }
 0x352   : > { %v6270_v2 = vrot.slane %v6269_v8, 4  ;;  %v6284_v13 = vrot.slane %v6282_v25, 5  ;;  %v7746_v6 = vld [vmem:[#allocation3 + $0x28] sm:$0xf]  ;;  %7777 = vst [vmem:[#allocation2 + $0x60] sm:$0xf] %v7745_v29  ;;  %v6279_v28 = vor.u32 %v6278_v17, %v6274_v9  ;;  %v6765_v11 = vsel %vm14577_vm5, %v12004_v46, %v6764_v21 }
 0x353   : > { %v6068_v39 = vld [vmem:[#allocation3 + $0xbc] sm:$0x1]  ;;  %v6766_v3 = vrot.slane %v6764_v21, 4  ;;  %v6767_v34 = vrot.slane %v6652_v44, 5  ;;  %v6155_v4 = vld [vmem:[#allocation3 + $0x34] sm:$0xf] }
 0x354   : > { %v6156_v10 = vld [vmem:[#allocation3 + $0x38] sm:$0x1]  ;;  %7778 = vst [vmem:[#allocation2 + $0x84] sm:$0xf] %v7746_v6  ;;  %v13841_v63 = vld [vmem:[#allocation2 + $0xe0] ss:$36 sps:$4 sm:$0xff]   ;;  %v6275_v48 = vsel %vm14566_vm4, %v6270_v2, %v6274_v9 }
 0x355   : > { %v13843_v36 = vld [vmem:[#allocation2 + $0xe4] ss:$36 sps:$4 sm:$0xff]   ;;  %v5893_v32 = vrot.slane %v5891_v27, 7  ;;  %6886 = vst [vmem:[#allocation2 + $0x128] sm:$0xf] %v6765_v11  ;;  %v6280_v12 = vrot.slane %v6279_v28, 4  ;;  %v6768_v18 = vsel %vm14577_vm5, %v6766_v3, %v6767_v34 }
 0x356   : > { %v6653_v31 = vld [vmem:[#allocation3 + $0x3c] sm:$0xe]  ;;  %v6654_v26 = vld [vmem:[#allocation3 + $0x40] sm:$0xf]  ;;  %6612 = vst [vmem:[#allocation2 + $0xdc] sm:$0xf] %v6275_v48  ;;  %10264 = vmatprep.mubr.bf16.mxu0 %v13843_v36 }
 0x357   : > { %v6287_v0 = vshrl.u32 %v6154_v42, 16  ;;  %v6290_v51 = vshll.u32 %v6154_v42, 16  ;;  %v6655_v54 = vld [vmem:[#allocation3 + $0x44] sm:$0x1]  ;;  %v6940_v59 = vld [vmem:[#allocation3 + $0xc0] sm:$0xf]  ;;  %v5896_v30 = vor.u32 %v5894_v24, %v5893_v32  ;;  %v6285_v61 = vsel %vm14566_vm4, %v6280_v12, %v6284_v13  ;;  %10265 = vmatmul.mubr.bf16.gmra.mxu0 %v13841_v63 }
 0x358   : > { %v5898_v45 = vrot.slane %v5893_v32, 4  ;;  %6887 = vst [vmem:[#allocation2 + $0x14c] sm:$0xf] %v6768_v18  ;;  %v6296_v16 = vshll.u32 %v6155_v4, 16  ;;  %v6300_v47 = vshrl.u32 %v6155_v4, 16  ;;  %v6306_v5 = vshll.u32 %v6156_v10, 16 }
 0x359   : > { %v6938_v37 = vld [vmem:[#allocation3 + $0xb4] sm:$0xf]  ;;  %6972 = vst [vmem:[#allocation2 + $0x444] sm:$0xf] %v6940_v59  ;;  %v6289_v7 = vrot.slane %v6287_v0, 4  ;;  %v6292_v38 = vrot.slane %v6290_v51, 5  ;;  %v5897_v55 = vsel %vm16217_vm3, %v5889_v56, %v5896_v30 }
 0x35a   : > { %v6157_v50 = vld [vmem:[#allocation3 + $0x3c] sm:$0xf]  ;;  %6970 = vst [vmem:[#allocation2 + $0x3fc] sm:$0xf] %v6938_v37  ;;  %v6069_v33 = vsel %vm15812_vm8, %v5898_v45, %v6068_v39  ;;  %6613 = vst [vmem:[#allocation2 + $0x100] sm:$0xf] %v6285_v61 }
 0x35b   : > { %v6298_v43 = vrot.slane %v6296_v16, 5  ;;  %v6302_v40 = vrot.slane %v6300_v47, 4  ;;  %v6158_v9 = vld [vmem:[#allocation3 + $0x40] sm:$0xf]  ;;  %v6108_v14 = vld [vmem:[#allocation3 + $0xb4] sm:$0xf]  ;;  %v6293_v58 = vor.u32 %v6292_v38, %v6289_v7 }
 0x35c   : > { %6067 = vst [vmem:[#allocation3 + $0xb8] sm:$0xf] %v5897_v55  ;;  %6070 = vst [vmem:[#allocation3 + $0xbc] sm:$0x1] %v6069_v33  ;;  %v6308_v41 = vrot.slane %v6306_v5, 5  ;;  %v12005_v60 = vrot.slane %v6653_v31, 9 }
 0x35d   : > { %v6771_v52 = vrot.slane %v6654_v26, 5  ;;  %v6159_v57 = vld [vmem:[#allocation3 + $0x44] sm:$0x1]  ;;  %6140 = vst [vmem:[#allocation2 + $0x438] sm:$0xf] %v6108_v14  ;;  %v6303_v19 = vor.u32 %v6302_v40, %v6298_v43  ;;  %v6774_v35 = vrot.slane %v6655_v54, 5 }
 0x35e   : > { %v6941_v49 = vld [vmem:[#allocation3 + $0xc4] sm:$0xf]  ;;  %v6311_v56 = vshrl.u32 %v6157_v50, 16  ;;  %v6314_v20 = vshll.u32 %v6157_v50, 16  ;;  %v6294_v8 = vrot.slane %v6293_v58, 4  ;;  %v6320_v46 = vshll.u32 %v6158_v9, 16 }
 0x35f   : > { %6973 = vst [vmem:[#allocation2 + $0x468] sm:$0xf] %v6941_v49  ;;  %v6772_v25 = vsel %vm14577_vm5, %v12005_v60, %v6771_v52  ;;  %v6773_v44 = vrot.slane %v6771_v52, 4  ;;  %v6657_v23 = vld [vmem:[#allocation3 + $0x4c] sm:$0xf]  ;;  %v6304_v22 = vrot.slane %v6303_v19, 4 }
 0x360   : > { %6888 = vst [vmem:[#allocation2 + $0x170] sm:$0xf] %v6772_v25  ;;  %v6313_v62 = vrot.slane %v6311_v56, 4  ;;  %v6316_v17 = vrot.slane %v6314_v20, 5  ;;  %v6324_v21 = vshrl.u32 %v6158_v9, 16  ;;  %v6299_v27 = vsel %vm14566_vm4, %v6294_v8, %v6298_v43 }
 0x361   : > { %v6658_v42 = vld [vmem:[#allocation3 + $0x50] sm:$0x1]  ;;  %v6775_v24 = vsel %vm14577_vm5, %v6773_v44, %v6774_v35  ;;  %v6322_v2 = vrot.slane %v6320_v46, 5  ;;  %v6160_v13 = vld [vmem:[#allocation3 + $0x48] sm:$0xf]  ;;  %v6309_v39 = vsel %vm14566_vm4, %v6304_v22, %v6308_v41  ;;  %v6330_v3 = vshll.u32 %v6159_v57, 16 }
 0x362   : > { %v13851_v29 = vld [vmem:[#allocation2 + $0x12c] ss:$36 sps:$4 sm:$0xff]   ;;  %6614 = vst [vmem:[#allocation2 + $0x124] sm:$0xf] %v6299_v27  ;;  %6889 = vst [vmem:[#allocation2 + $0x194] sm:$0xf] %v6775_v24  ;;  %v6317_v28 = vor.u32 %v6316_v17, %v6313_v62 }
 0x363   : > { %v13849_v6 = vld [vmem:[#allocation2 + $0x128] ss:$36 sps:$4 sm:$0xff]   ;;  %v6326_v11 = vrot.slane %v6324_v21, 4  ;;  %v13845_v4 = vld [vmem:[#allocation2 + $0xd8] ss:$36 sps:$4 sm:$0xff]   ;;  %10272 = vmatprep.mubr.bf16.mxu0 %v13851_v29  ;;  %v12006_v63 = vrot.slane %v6656_v53, 9 }
 0x364   : > { %v6161_v34 = vld [vmem:[#allocation3 + $0x4c] sm:$0xf]  ;;  %v13847_v10 = vld [vmem:[#allocation2 + $0xdc] ss:$36 sps:$4 sm:$0xff]   ;;  %6615 = vst [vmem:[#allocation2 + $0x148] sm:$0xf] %v6309_v39  ;;  %10273 = vmatmul.mubr.bf16.gmra.mxu0 %v13849_v6 }
 0x365   : > { %v6162_v36 = vld [vmem:[#allocation3 + $0x50] sm:$0x1]  ;;  %v6318_v32 = vrot.slane %v6317_v28, 4  ;;  %v6327_v48 = vor.u32 %v6326_v11, %v6322_v2  ;;  %v6332_v31 = vrot.slane %v6330_v3, 5  ;;  %v6778_v26 = vrot.slane %v6657_v23, 5  ;;  %10103 = vmatprep.mubr.bf16.mxu1 %v13847_v10 }
 0x366   : > { %v6939_v12 = vld [vmem:[#allocation3 + $0xb8] sm:$0xf]  ;;  %v6781_v18 = vrot.slane %v6658_v42, 5  ;;  %v6335_v0 = vshrl.u32 %v6160_v13, 16  ;;  %v6338_v51 = vshll.u32 %v6160_v13, 16  ;;  %v6344_v54 = vshll.u32 %v6161_v34, 16  ;;  %10104 = vmatmul.mubr.bf16.gmra.mxu1 %v13845_v4 }
 0x367   : > { %v6659_v59 = vld [vmem:[#allocation3 + $0x54] sm:$0xe]  ;;  %6971 = vst [vmem:[#allocation2 + $0x420] sm:$0xf] %v6939_v12  ;;  %v6323_v30 = vsel %vm14566_vm4, %v6318_v32, %v6322_v2  ;;  %v6328_v45 = vrot.slane %v6327_v48, 4  ;;  %v6779_v16 = vsel %vm14577_vm5, %v12006_v63, %v6778_v26  ;;  %v6780_v47 = vrot.slane %v6778_v26, 4 }
 0x368   : > { %v6660_v37 = vld [vmem:[#allocation3 + $0x58] sm:$0xf]  ;;  %6616 = vst [vmem:[#allocation2 + $0x16c] sm:$0xf] %v6323_v30  ;;  %6890 = vst [vmem:[#allocation2 + $0x1b8] sm:$0xf] %v6779_v16 }
 0x369   : > { %v6109_v61 = vld [vmem:[#allocation3 + $0xb8] sm:$0xf]  ;;  %v6337_v7 = vrot.slane %v6335_v0, 4  ;;  %v6340_v38 = vrot.slane %v6338_v51, 5  ;;  %v6346_v5 = vrot.slane %v6344_v54, 5  ;;  %v6348_v50 = vshrl.u32 %v6161_v34, 16 }
 0x36a   : > { %v6661_v55 = vld [vmem:[#allocation3 + $0x5c] sm:$0x1]  ;;  %6141 = vst [vmem:[#allocation2 + $0x45c] sm:$0xf] %v6109_v61  ;;  %v6333_v33 = vsel %vm14566_vm4, %v6328_v45, %v6332_v31  ;;  %v6782_v43 = vsel %vm14577_vm5, %v6780_v47, %v6781_v18  ;;  %v6354_v40 = vshll.u32 %v6162_v36, 16  ;;  %v12007_v60 = vrot.slane %v6659_v59, 9 }
 0x36b   : > { %v6163_v9 = vld [vmem:[#allocation3 + $0x54] sm:$0xf]  ;;  %v6164_v14 = vld [vmem:[#allocation3 + $0x58] sm:$0xf]  ;;  %6617 = vst [vmem:[#allocation2 + $0x190] sm:$0xf] %v6333_v33  ;;  %v6341_v58 = vor.u32 %v6340_v38, %v6337_v7 }
 0x36c   : > { %6891 = vst [vmem:[#allocation2 + $0x1dc] sm:$0xf] %v6782_v43  ;;  %v6350_v41 = vrot.slane %v6348_v50, 4  ;;  %v6785_v52 = vrot.slane %v6660_v37, 5  ;;  %v13854_v57 = vld [vmem:[#allocation2 + $0x124] ss:$36 sps:$4 sm:$0xff]  }
 0x36d   : > { %v6356_v49 = vrot.slane %v6354_v40, 5  ;;  %v6165_v19 = vld [vmem:[#allocation3 + $0x5c] sm:$0x1]  ;;  %v13855_v35 = vld [vmem:[#allocation2 + $0x170] ss:$36 sps:$4 sm:$0xff]   ;;  %v6342_v20 = vrot.slane %v6341_v58, 4  ;;  %10111 = vmatprep.mubr.bf16.mxu1 %v13854_v57 }
 0x36e   : > { %v13857_v56 = vld [vmem:[#allocation2 + $0x174] ss:$36 sps:$4 sm:$0xff]   ;;  %v6351_v53 = vor.u32 %v6350_v41, %v6346_v5  ;;  %v6786_v8 = vsel %vm14577_vm5, %v12007_v60, %v6785_v52  ;;  %v6787_v25 = vrot.slane %v6785_v52, 4  ;;  %v6662_v44 = vld [vmem:[#allocation3 + $0x60] sm:$0xe]  ;;  %v6788_v22 = vrot.slane %v6661_v55, 5 }
 0x36f   : > { %v6663_v46 = vld [vmem:[#allocation3 + $0x64] sm:$0xf]  ;;  %6892 = vst [vmem:[#allocation2 + $0x200] sm:$0xf] %v6786_v8  ;;  %v6359_v62 = vshrl.u32 %v6163_v9, 16  ;;  %v6362_v17 = vshll.u32 %v6163_v9, 16  ;;  %10280 = vmatprep.mubr.bf16.mxu0 %v13857_v56  ;;  %v6347_v42 = vsel %vm14566_vm4, %v6342_v20, %v6346_v5 }
 0x370   : > { %v13852_v23 = vld [vmem:[#allocation2 + $0x120] ss:$36 sps:$4 sm:$0xff]   ;;  %v6368_v21 = vshll.u32 %v6164_v14, 16  ;;  %v6352_v29 = vrot.slane %v6351_v53, 4  ;;  %v6372_v27 = vshrl.u32 %v6164_v14, 16  ;;  %v6378_v24 = vshll.u32 %v6165_v19, 16  ;;  %10281 = vmatmul.mubr.bf16.gmra.mxu0 %v13855_v35 }
 0x371   : > { %v6664_v2 = vld [vmem:[#allocation3 + $0x68] sm:$0x1]  ;;  %v6166_v13 = vld [vmem:[#allocation3 + $0x60] sm:$0xf]  ;;  %10112 = vmatmul.mubr.bf16.gmra.mxu1 %v13852_v23  ;;  %6618 = vst [vmem:[#allocation2 + $0x1b4] sm:$0xf] %v6347_v42  ;;  %v6789_v6 = vsel %vm14577_vm5, %v6787_v25, %v6788_v22 }
 0x372   : > { %v6361_v39 = vrot.slane %v6359_v62, 4  ;;  %v6364_v28 = vrot.slane %v6362_v17, 5  ;;  %v6370_v11 = vrot.slane %v6368_v21, 5  ;;  %v6167_v3 = vld [vmem:[#allocation3 + $0x64] sm:$0xf]  ;;  %v6357_v34 = vsel %vm14566_vm4, %v6352_v29, %v6356_v49 }
 0x373   : > { %6893 = vst [vmem:[#allocation2 + $0x224] sm:$0xf] %v6789_v6  ;;  %v6374_v4 = vrot.slane %v6372_v27, 4  ;;  %v6168_v10 = vld [vmem:[#allocation3 + $0x68] sm:$0x1]  ;;  %v12008_v48 = vrot.slane %v6662_v44, 9 }
 0x374   : > { %v7747_v63 = vld [vmem:[#allocation3 + $0x30] sm:$0xf]  ;;  %6619 = vst [vmem:[#allocation2 + $0x1d8] sm:$0xf] %v6357_v34  ;;  %v6365_v32 = vor.u32 %v6364_v28, %v6361_v39  ;;  %v6792_v31 = vrot.slane %v6663_v46, 5  ;;  %v6380_v18 = vrot.slane %v6378_v24, 5 }
 0x375   : > { %v13861_v36 = vld [vmem:[#allocation2 + $0x16c] ss:$36 sps:$4 sm:$0xff]   ;;  %7779 = vst [vmem:[#allocation2 + $0xa8] sm:$0xf] %v7747_v63  ;;  %v13865_v26 = vld [vmem:[#allocation2 + $0x1bc] ss:$36 sps:$4 sm:$0xff]   ;;  %v6375_v12 = vor.u32 %v6374_v4, %v6370_v11 }
 0x376   : > { %v6795_v0 = vrot.slane %v6664_v2, 5  ;;  %10119 = vmatprep.mubr.bf16.mxu1 %v13861_v36  ;;  %v6366_v51 = vrot.slane %v6365_v32, 4  ;;  %v6793_v54 = vsel %vm14577_vm5, %v12008_v48, %v6792_v31  ;;  %v6794_v59 = vrot.slane %v6792_v31, 4  ;;  %v6665_v45 = vld [vmem:[#allocation3 + $0x6c] sm:$0xe]  ;;  %10288 = vmatprep.mubr.bf16.mxu0 %v13865_v26 }
 0x377   : > { %v6383_v30 = vshrl.u32 %v6166_v13, 16  ;;  %v7748_v16 = vld [vmem:[#allocation3 + $0x34] sm:$0xf]  ;;  %v6376_v47 = vrot.slane %v6375_v12, 4  ;;  %6894 = vst [vmem:[#allocation2 + $0x248] sm:$0xf] %v6793_v54 }
 0x378   : > { %v6386_v37 = vshll.u32 %v6166_v13, 16  ;;  %v6392_v61 = vshll.u32 %v6167_v3, 16  ;;  %v6396_v7 = vshrl.u32 %v6167_v3, 16  ;;  %v6666_v38 = vld [vmem:[#allocation3 + $0x70] sm:$0xf]  ;;  %v6371_v33 = vsel %vm14566_vm4, %v6366_v51, %v6370_v11 }
 0x379   : > { %v6169_v5 = vld [vmem:[#allocation3 + $0x6c] sm:$0xf]  ;;  %7780 = vst [vmem:[#allocation2 + $0xcc] sm:$0xf] %v7748_v16  ;;  %v13863_v55 = vld [vmem:[#allocation2 + $0x1b8] ss:$36 sps:$4 sm:$0xff]   ;;  %v6796_v43 = vsel %vm14577_vm5, %v6794_v59, %v6795_v0  ;;  %v6381_v14 = vsel %vm14566_vm4, %v6376_v47, %v6380_v18 }
 0x37a   : > { %v13859_v50 = vld [vmem:[#allocation2 + $0x168] ss:$36 sps:$4 sm:$0xff]   ;;  %v6385_v40 = vrot.slane %v6383_v30, 4  ;;  %v6402_v9 = vshll.u32 %v6168_v10, 16  ;;  %6620 = vst [vmem:[#allocation2 + $0x1fc] sm:$0xf] %v6371_v33  ;;  %10289 = vmatmul.mubr.bf16.gmra.mxu0 %v13863_v55 }
 0x37b   : > { %6895 = vst [vmem:[#allocation2 + $0x26c] sm:$0xf] %v6796_v43  ;;  %v6388_v58 = vrot.slane %v6386_v37, 5  ;;  %v6394_v41 = vrot.slane %v6392_v61, 5  ;;  %v6398_v60 = vrot.slane %v6396_v7, 4  ;;  %10120 = vmatmul.mubr.bf16.gmra.mxu1 %v13859_v50  ;;  %v12009_v53 = vrot.slane %v6665_v45, 9 }
 0x37c   : > { %v6667_v52 = vld [vmem:[#allocation3 + $0x74] sm:$0x1]  ;;  %v13871_v57 = vld [vmem:[#allocation2 + $0x204] ss:$36 sps:$4 sm:$0xff]   ;;  %6621 = vst [vmem:[#allocation2 + $0x220] sm:$0xf] %v6381_v14 }
 0x37d   : > { %v6170_v49 = vld [vmem:[#allocation3 + $0x70] sm:$0xf]  ;;  %v13868_v19 = vld [vmem:[#allocation2 + $0x1b4] ss:$36 sps:$4 sm:$0xff]   ;;  %v6389_v35 = vor.u32 %v6388_v58, %v6385_v40  ;;  %v6399_v56 = vor.u32 %v6398_v60, %v6394_v41  ;;  %v6404_v20 = vrot.slane %v6402_v9, 5  ;;  %10296 = vmatprep.mubr.bf16.mxu0 %v13871_v57  ;;  %v6799_v8 = vrot.slane %v6666_v38, 5 }
 0x37e   : > { %v6802_v25 = vrot.slane %v6667_v52, 5  ;;  %v6171_v44 = vld [vmem:[#allocation3 + $0x74] sm:$0x1]  ;;  %v6407_v46 = vshrl.u32 %v6169_v5, 16  ;;  %v6410_v23 = vshll.u32 %v6169_v5, 16  ;;  %10127 = vmatprep.mubr.bf16.mxu1 %v13868_v19  ;;  %v6416_v21 = vshll.u32 %v6170_v49, 16 }
 0x37f   : > { %v6668_v22 = vld [vmem:[#allocation3 + $0x78] sm:$0xe]  ;;  %v6390_v62 = vrot.slane %v6389_v35, 4  ;;  %v6400_v17 = vrot.slane %v6399_v56, 4  ;;  %v6420_v42 = vshrl.u32 %v6170_v49, 16  ;;  %v6800_v24 = vsel %vm14577_vm5, %v12009_v53, %v6799_v8 }
 0x380   : > { %v6669_v29 = vld [vmem:[#allocation3 + $0x7c] sm:$0xf]  ;;  %v6172_v27 = vld [vmem:[#allocation3 + $0x78] sm:$0xf]  ;;  %v6801_v2 = vrot.slane %v6799_v8, 4  ;;  %v6409_v13 = vrot.slane %v6407_v46, 4 }
 0x381   : > { %v6412_v6 = vrot.slane %v6410_v23, 5  ;;  %v6670_v39 = vld [vmem:[#allocation3 + $0x80] sm:$0x1]  ;;  %v6395_v11 = vsel %vm14566_vm4, %v6390_v62, %v6394_v41  ;;  %v6405_v3 = vsel %vm14566_vm4, %v6400_v17, %v6404_v20  ;;  %6896 = vst [vmem:[#allocation2 + $0x290] sm:$0xf] %v6800_v24  ;;  %v6418_v34 = vrot.slane %v6416_v21, 5 }
 0x382   : > { %v13869_v28 = vld [vmem:[#allocation2 + $0x200] ss:$36 sps:$4 sm:$0xff]   ;;  %v6422_v4 = vrot.slane %v6420_v42, 4  ;;  %v6173_v10 = vld [vmem:[#allocation3 + $0x7c] sm:$0xf]  ;;  %v6803_v36 = vsel %vm14577_vm5, %v6801_v2, %v6802_v25  ;;  %v6426_v48 = vshll.u32 %v6171_v44, 16 }
 0x383   : > { %v13866_v63 = vld [vmem:[#allocation2 + $0x1b0] ss:$36 sps:$4 sm:$0xff]   ;;  %6622 = vst [vmem:[#allocation2 + $0x244] sm:$0xf] %v6395_v11  ;;  %6623 = vst [vmem:[#allocation2 + $0x268] sm:$0xf] %v6405_v3  ;;  %v6413_v32 = vor.u32 %v6412_v6, %v6409_v13  ;;  %10297 = vmatmul.mubr.bf16.gmra.mxu0 %v13869_v28 }
 0x384   : > { %v6174_v31 = vld [vmem:[#allocation3 + $0x80] sm:$0x1]  ;;  %6897 = vst [vmem:[#allocation2 + $0x2b4] sm:$0xf] %v6803_v36  ;;  %v6423_v12 = vor.u32 %v6422_v4, %v6418_v34  ;;  %v12010_v18 = vrot.slane %v6668_v22, 9  ;;  %v6806_v0 = vrot.slane %v6669_v29, 5  ;;  %10128 = vmatmul.mubr.bf16.gmra.mxu1 %v13866_v63 }
 0x385   : > { %v13875_v26 = vld [vmem:[#allocation2 + $0x1fc] ss:$36 sps:$4 sm:$0xff]   ;;  %v6671_v51 = vld [vmem:[#allocation3 + $0x84] sm:$0xe]  ;;  %v6672_v54 = vld [vmem:[#allocation3 + $0x88] sm:$0xf] }
 0x386   : > { %v13879_v59 = vld [vmem:[#allocation2 + $0x24c] ss:$36 sps:$4 sm:$0xff]   ;;  %v6414_v30 = vrot.slane %v6413_v32, 4  ;;  %v6428_v45 = vrot.slane %v6426_v48, 5  ;;  %v6809_v16 = vrot.slane %v6670_v39, 5  ;;  %v6431_v47 = vshrl.u32 %v6172_v27, 16  ;;  %10135 = vmatprep.mubr.bf16.mxu1 %v13875_v26 }
 0x387   : > { %v6424_v37 = vrot.slane %v6423_v12, 4  ;;  %v6807_v61 = vsel %vm14577_vm5, %v12010_v18, %v6806_v0  ;;  %v6808_v7 = vrot.slane %v6806_v0, 4  ;;  %v6434_v38 = vshll.u32 %v6172_v27, 16  ;;  %v6673_v5 = vld [vmem:[#allocation3 + $0x8c] sm:$0x1]  ;;  %10304 = vmatprep.mubr.bf16.mxu0 %v13879_v59 }
 0x388   : > { %v6419_v50 = vsel %vm14566_vm4, %v6414_v30, %v6418_v34  ;;  %6898 = vst [vmem:[#allocation2 + $0x2d8] sm:$0xf] %v6807_v61  ;;  %v6433_v55 = vrot.slane %v6431_v47, 4  ;;  %v6440_v33 = vshll.u32 %v6173_v10, 16  ;;  %v6444_v43 = vshrl.u32 %v6173_v10, 16 }
 0x389   : > { %v6175_v40 = vld [vmem:[#allocation3 + $0x84] sm:$0xf]  ;;  %v6176_v9 = vld [vmem:[#allocation3 + $0x88] sm:$0xf]  ;;  %v7749_v14 = vld [vmem:[#allocation3 + $0x3c] sm:$0xf]  ;;  %v6429_v58 = vsel %vm14566_vm4, %v6424_v37, %v6428_v45  ;;  %v6810_v41 = vsel %vm14577_vm5, %v6808_v7, %v6809_v16 }
 0x38a   : > { %6624 = vst [vmem:[#allocation2 + $0x28c] sm:$0xf] %v6419_v50  ;;  %v6436_v60 = vrot.slane %v6434_v38, 5  ;;  %v6450_v52 = vshll.u32 %v6174_v31, 16  ;;  %v6177_v57 = vld [vmem:[#allocation3 + $0x8c] sm:$0x1] }
 0x38b   : > { %v7750_v49 = vld [vmem:[#allocation3 + $0x40] sm:$0xf]  ;;  %7781 = vst [vmem:[#allocation2 + $0xf0] sm:$0xf] %v7749_v14  ;;  %v13877_v19 = vld [vmem:[#allocation2 + $0x248] ss:$36 sps:$4 sm:$0xff]  }
 0x38c   : > { %6625 = vst [vmem:[#allocation2 + $0x2b0] sm:$0xf] %v6429_v58  ;;  %6899 = vst [vmem:[#allocation2 + $0x2fc] sm:$0xf] %v6810_v41  ;;  %v6442_v35 = vrot.slane %v6440_v33, 5  ;;  %v6446_v56 = vrot.slane %v6444_v43, 4  ;;  %v6437_v25 = vor.u32 %v6436_v60, %v6433_v55  ;;  %10305 = vmatmul.mubr.bf16.gmra.mxu0 %v13877_v19 }
 0x38d   : > { %v12011_v20 = vrot.slane %v6671_v51, 9  ;;  %v6813_v53 = vrot.slane %v6672_v54, 5  ;;  %7782 = vst [vmem:[#allocation2 + $0x114] sm:$0xf] %v7750_v49  ;;  %v13873_v8 = vld [vmem:[#allocation2 + $0x1f8] ss:$36 sps:$4 sm:$0xff]  }
 0x38e   : > { %v6452_v44 = vrot.slane %v6450_v52, 5  ;;  %v13882_v46 = vld [vmem:[#allocation2 + $0x244] ss:$36 sps:$4 sm:$0xff]   ;;  %v6447_v23 = vor.u32 %v6446_v56, %v6442_v35  ;;  %v6816_v17 = vrot.slane %v6673_v5, 5  ;;  %v6674_v21 = vld [vmem:[#allocation3 + $0x90] sm:$0xe]  ;;  %10136 = vmatmul.mubr.bf16.gmra.mxu1 %v13873_v8 }
 0x38f   : > { %v6814_v22 = vsel %vm14577_vm5, %v12011_v20, %v6813_v53  ;;  %v6815_v62 = vrot.slane %v6813_v53, 4  ;;  %v13885_v42 = vld [vmem:[#allocation2 + $0x294] ss:$36 sps:$4 sm:$0xff]   ;;  %v6438_v29 = vrot.slane %v6437_v25, 4  ;;  %v6455_v27 = vshrl.u32 %v6175_v40, 16  ;;  %10143 = vmatprep.mubr.bf16.mxu1 %v13882_v46 }
 0x390   : > { %6900 = vst [vmem:[#allocation2 + $0x320] sm:$0xf] %v6814_v22  ;;  %v6458_v24 = vshll.u32 %v6175_v40, 16  ;;  %v6464_v2 = vshll.u32 %v6176_v9, 16  ;;  %v6448_v13 = vrot.slane %v6447_v23, 4  ;;  %v6468_v39 = vshrl.u32 %v6176_v9, 16  ;;  %10312 = vmatprep.mubr.bf16.mxu0 %v13885_v42 }
 0x391   : > { %v6817_v6 = vsel %vm14577_vm5, %v6815_v62, %v6816_v17  ;;  %v6474_v28 = vshll.u32 %v6177_v57, 16  ;;  %v6675_v11 = vld [vmem:[#allocation3 + $0x94] sm:$0xf]  ;;  %v6443_v3 = vsel %vm14566_vm4, %v6438_v29, %v6442_v35  ;;  %v6457_v34 = vrot.slane %v6455_v27, 4  ;;  %v6676_v63 = vld [vmem:[#allocation3 + $0x98] sm:$0x1] }
 0x392   : > { %6901 = vst [vmem:[#allocation2 + $0x344] sm:$0xf] %v6817_v6  ;;  %v6460_v4 = vrot.slane %v6458_v24, 5  ;;  %v6466_v10 = vrot.slane %v6464_v2, 5  ;;  %v6453_v36 = vsel %vm14566_vm4, %v6448_v13, %v6452_v44  ;;  %6626 = vst [vmem:[#allocation2 + $0x2d4] sm:$0xf] %v6443_v3 }
 0x393   : > { %v6470_v32 = vrot.slane %v6468_v39, 4  ;;  %v6178_v48 = vld [vmem:[#allocation3 + $0x90] sm:$0xf]  ;;  %v6179_v31 = vld [vmem:[#allocation3 + $0x94] sm:$0xf]  ;;  %v12012_v12 = vrot.slane %v6674_v21, 9  ;;  %v12794_v21 = vpop.f32.mrf.mxu1 }
 0x394   : > { %6627 = vst [vmem:[#allocation2 + $0x2f8] sm:$0xf] %v6453_v36  ;;  %v6461_v26 = vor.u32 %v6460_v4, %v6457_v34  ;;  %v6820_v18 = vrot.slane %v6675_v11, 5  ;;  %v6180_v0 = vld [vmem:[#allocation3 + $0x98] sm:$0x1]  ;;  %v6476_v59 = vrot.slane %v6474_v28, 5 }
 0x395   : > { %v13880_v51 = vld [vmem:[#allocation2 + $0x240] ss:$36 sps:$4 sm:$0xff]   ;;  %v6471_v54 = vor.u32 %v6470_v32, %v6466_v10  ;;  %v6823_v30 = vrot.slane %v6676_v63, 5  ;;  %v13883_v45 = vld [vmem:[#allocation2 + $0x290] ss:$36 sps:$4 sm:$0xff]   ;;  %v6479_v61 = vshrl.u32 %v6178_v48, 16 }
 0x396   : > { %v6462_v16 = vrot.slane %v6461_v26, 4  ;;  %v6821_v47 = vsel %vm14577_vm5, %v12012_v12, %v6820_v18  ;;  %v6822_v37 = vrot.slane %v6820_v18, 4  ;;  %v6677_v7 = vld [vmem:[#allocation3 + $0x9c] sm:$0xe]  ;;  %v6678_v38 = vld [vmem:[#allocation3 + $0xa0] sm:$0xf]  ;;  %10144 = vmatmul.mubr.bf16.gmra.mxu1 %v13880_v51  ;;  %10313 = vmatmul.mubr.bf16.gmra.mxu0 %v13883_v45 }
 0x397   : > { %v6472_v5 = vrot.slane %v6471_v54, 4  ;;  %6902 = vst [vmem:[#allocation2 + $0x368] sm:$0xf] %v6821_v47  ;;  %v6482_v50 = vshll.u32 %v6178_v48, 16  ;;  %v6488_v55 = vshll.u32 %v6179_v31, 16  ;;  %v6492_v33 = vshrl.u32 %v6179_v31, 16 }
 0x398   : > { %v13890_v43 = vld [vmem:[#allocation2 + $0x28c] ss:$36 sps:$4 sm:$0xff]   ;;  %v13895_v40 = vld [vmem:[#allocation2 + $0x2dc] ss:$36 sps:$4 sm:$0xff]   ;;  %v6467_v9 = vsel %vm14566_vm4, %v6462_v16, %v6466_v10  ;;  %v6824_v14 = vsel %vm14577_vm5, %v6822_v37, %v6823_v30  ;;  %v6481_v58 = vrot.slane %v6479_v61, 4  ;;  %v6498_v41 = vshll.u32 %v6180_v0, 16 }
 0x399   : > { %v6477_v60 = vsel %vm14566_vm4, %v6472_v5, %v6476_v59  ;;  %6628 = vst [vmem:[#allocation2 + $0x31c] sm:$0xf] %v6467_v9  ;;  %6903 = vst [vmem:[#allocation2 + $0x38c] sm:$0xf] %v6824_v14  ;;  %v6484_v52 = vrot.slane %v6482_v50, 5  ;;  %10151 = vmatprep.mubr.bf16.mxu1 %v13890_v43  ;;  %10320 = vmatprep.mubr.bf16.mxu0 %v13895_v40  ;;  %v6490_v19 = vrot.slane %v6488_v55, 5  ;;  %v12795_v59 = vpop.f32.mrf.mxu1 }
 0x39a   : > { %v6679_v57 = vld [vmem:[#allocation3 + $0xa4] sm:$0x1]  ;;  %v6181_v49 = vld [vmem:[#allocation3 + $0x9c] sm:$0xf]  ;;  %6629 = vst [vmem:[#allocation2 + $0x340] sm:$0xf] %v6477_v60  ;;  %v16632_v16 = vadd.f32 %v12795_v59, %v12794_v21 }
 0x39b   : > { %v6494_v35 = vrot.slane %v6492_v33, 4  ;;  %v6182_v56 = vld [vmem:[#allocation3 + $0xa0] sm:$0xf]  ;;  %v6485_v20 = vor.u32 %v6484_v52, %v6481_v58  ;;  %v6500_v53 = vrot.slane %v6498_v41, 5  ;;  %v12013_v8 = vrot.slane %v6677_v7, 9 }
 0x39c   : > { %v6827_v25 = vrot.slane %v6678_v38, 5  ;;  %v6830_v46 = vrot.slane %v6679_v57, 5  ;;  %v6183_v23 = vld [vmem:[#allocation3 + $0xa4] sm:$0x1]  ;;  %v6503_v22 = vshrl.u32 %v6181_v49, 16  ;;  %v6506_v62 = vshll.u32 %v6181_v49, 16 }
 0x39d   : > { %v6495_v44 = vor.u32 %v6494_v35, %v6490_v19  ;;  %v6680_v17 = vld [vmem:[#allocation3 + $0xa8] sm:$0xe]  ;;  %v13893_v29 = vld [vmem:[#allocation2 + $0x2d8] ss:$36 sps:$4 sm:$0xff]   ;;  %v6486_v27 = vrot.slane %v6485_v20, 4  ;;  %v6512_v13 = vshll.u32 %v6182_v56, 16 }
 0x39e   : > { %v13888_v42 = vld [vmem:[#allocation2 + $0x288] ss:$36 sps:$4 sm:$0xff]   ;;  %v6828_v24 = vsel %vm14577_vm5, %v12013_v8, %v6827_v25  ;;  %v6829_v2 = vrot.slane %v6827_v25, 4  ;;  %v6682_v39 = vld [vmem:[#allocation3 + $0xb0] sm:$0x1]  ;;  %v6505_v3 = vrot.slane %v6503_v22, 4  ;;  %10321 = vmatmul.mubr.bf16.gmra.mxu0 %v13893_v29 }
 0x39f   : > { %v6681_v6 = vld [vmem:[#allocation3 + $0xac] sm:$0xf]  ;;  %v13901_v28 = vld [vmem:[#allocation2 + $0x324] ss:$36 sps:$4 sm:$0xff]   ;;  %v6496_v11 = vrot.slane %v6495_v44, 4  ;;  %v6508_v34 = vrot.slane %v6506_v62, 5  ;;  %v6491_v36 = vsel %vm14566_vm4, %v6486_v27, %v6490_v19  ;;  %10152 = vmatmul.mubr.bf16.gmra.mxu1 %v13888_v42 }
 0x3a0   : > { %6904 = vst [vmem:[#allocation2 + $0x3b0] sm:$0xf] %v6828_v24  ;;  %v6516_v4 = vshrl.u32 %v6182_v56, 16  ;;  %v6184_v10 = vld [vmem:[#allocation3 + $0xa8] sm:$0xf]  ;;  %v6831_v32 = vsel %vm14577_vm5, %v6829_v2, %v6830_v46  ;;  %v6514_v48 = vrot.slane %v6512_v13, 5  ;;  %10328 = vmatprep.mubr.bf16.mxu0 %v13901_v28 }
 0x3a1   : > { %v6185_v63 = vld [vmem:[#allocation3 + $0xac] sm:$0xf]  ;;  %v6522_v31 = vshll.u32 %v6183_v23, 16  ;;  %v7751_v26 = vld [vmem:[#allocation3 + $0x48] sm:$0xf]  ;;  %v6501_v0 = vsel %vm14566_vm4, %v6496_v11, %v6500_v53  ;;  %v6509_v51 = vor.u32 %v6508_v34, %v6505_v3  ;;  %v12014_v45 = vrot.slane %v6680_v17, 9 }
 0x3a2   : > { %v7752_v12 = vld [vmem:[#allocation3 + $0x4c] sm:$0xf]  ;;  %v13898_v18 = vld [vmem:[#allocation2 + $0x2d4] ss:$36 sps:$4 sm:$0xff]   ;;  %6630 = vst [vmem:[#allocation2 + $0x364] sm:$0xf] %v6491_v36 }
 0x3a3   : > { %6905 = vst [vmem:[#allocation2 + $0x3d4] sm:$0xf] %v6831_v32  ;;  %v6518_v54 = vrot.slane %v6516_v4, 4  ;;  %7783 = vst [vmem:[#allocation2 + $0x138] sm:$0xf] %v7751_v26  ;;  %v6524_v30 = vrot.slane %v6522_v31, 5  ;;  %10159 = vmatprep.mubr.bf16.mxu1 %v13898_v18 }
 0x3a4   : > { %7784 = vst [vmem:[#allocation2 + $0x15c] sm:$0xf] %v7752_v12  ;;  %6631 = vst [vmem:[#allocation2 + $0x388] sm:$0xf] %v6501_v0  ;;  %v6510_v47 = vrot.slane %v6509_v51, 4  ;;  %v6834_v61 = vrot.slane %v6681_v6, 5 }
 0x3a5   : > { %v6519_v37 = vor.u32 %v6518_v54, %v6514_v48  ;;  %v6837_v7 = vrot.slane %v6682_v39, 5  ;;  %v6186_v38 = vld [vmem:[#allocation3 + $0xb0] sm:$0x1]  ;;  %v6527_v5 = vshrl.u32 %v6184_v10, 16  ;;  %v6530_v50 = vshll.u32 %v6184_v10, 16 }
 0x3a6   : > { %v6536_v55 = vshll.u32 %v6185_v63, 16  ;;  %v6540_v33 = vshrl.u32 %v6185_v63, 16  ;;  %v6683_v43 = vld [vmem:[#allocation3 + $0xb4] sm:$0xe]  ;;  %v6515_v40 = vsel %vm14566_vm4, %v6510_v47, %v6514_v48  ;;  %v6835_v14 = vsel %vm14577_vm5, %v12014_v45, %v6834_v61  ;;  %v6684_v41 = vld [vmem:[#allocation3 + $0xb8] sm:$0xf] }
 0x3a7   : > { %v6520_v9 = vrot.slane %v6519_v37, 4  ;;  %v6836_v58 = vrot.slane %v6834_v61, 4  ;;  %v6685_v60 = vld [vmem:[#allocation3 + $0xbc] sm:$0x1]  ;;  %6632 = vst [vmem:[#allocation2 + $0x3ac] sm:$0xf] %v6515_v40 }
 0x3a8   : > { %6906 = vst [vmem:[#allocation2 + $0x3f8] sm:$0xf] %v6835_v14  ;;  %v6529_v52 = vrot.slane %v6527_v5, 4  ;;  %v6532_v57 = vrot.slane %v6530_v50, 5  ;;  %v6538_v49 = vrot.slane %v6536_v55, 5  ;;  %v6542_v19 = vrot.slane %v6540_v33, 4 }
 0x3a9   : > { %v6187_v35 = vld [vmem:[#allocation3 + $0xb4] sm:$0xf]  ;;  %v6188_v56 = vld [vmem:[#allocation3 + $0xb8] sm:$0xf]  ;;  %v13899_v53 = vld [vmem:[#allocation2 + $0x320] ss:$36 sps:$4 sm:$0xff]   ;;  %v6525_v8 = vsel %vm14566_vm4, %v6520_v9, %v6524_v30  ;;  %v6838_v25 = vsel %vm14577_vm5, %v6836_v58, %v6837_v7 }
 0x3aa   : > { %v13896_v20 = vld [vmem:[#allocation2 + $0x2d0] ss:$36 sps:$4 sm:$0xff]   ;;  %v6546_v44 = vshll.u32 %v6186_v38, 16  ;;  %v6189_v46 = vld [vmem:[#allocation3 + $0xbc] sm:$0x1]  ;;  %v6533_v22 = vor.u32 %v6532_v57, %v6529_v52  ;;  %v6543_v62 = vor.u32 %v6542_v19, %v6538_v49  ;;  %v12015_v17 = vrot.slane %v6683_v43, 9  ;;  %10329 = vmatmul.mubr.bf16.gmra.mxu0 %v13899_v53 }
 0x3ab   : > { %v13906_v23 = vld [vmem:[#allocation2 + $0x31c] ss:$36 sps:$4 sm:$0xff]   ;;  %6633 = vst [vmem:[#allocation2 + $0x3d0] sm:$0xf] %v6525_v8  ;;  %6907 = vst [vmem:[#allocation2 + $0x41c] sm:$0xf] %v6838_v25  ;;  %10160 = vmatmul.mubr.bf16.gmra.mxu1 %v13896_v20 }
 0x3ac   : > { %v6841_v21 = vrot.slane %v6684_v41, 5  ;;  %v13911_v42 = vld [vmem:[#allocation2 + $0x36c] ss:$36 sps:$4 sm:$0xff]   ;;  %v6548_v29 = vrot.slane %v6546_v44, 5  ;;  %v6844_v27 = vrot.slane %v6685_v60, 5  ;;  %v6534_v24 = vrot.slane %v6533_v22, 4  ;;  %10167 = vmatprep.mubr.bf16.mxu1 %v13906_v23 }
 0x3ad   : > { %v6544_v2 = vrot.slane %v6543_v62, 4  ;;  %v7807_v39 = vld [vmem:[#allocation3 + $0x18] sm:$0xf]  ;;  %10336 = vmatprep.mubr.bf16.mxu0 %v13911_v42  ;;  %v6551_v28 = vshrl.u32 %v6187_v35, 16  ;;  %v6554_v11 = vshll.u32 %v6187_v35, 16  ;;  %v6560_v3 = vshll.u32 %v6188_v56, 16 }
 0x3ae   : > { %v6842_v13 = vsel %vm14577_vm5, %v12015_v17, %v6841_v21  ;;  %v6843_v6 = vrot.slane %v6841_v21, 4  ;;  %v6564_v34 = vshrl.u32 %v6188_v56, 16  ;;  %v7808_v4 = vld [vmem:[#allocation3 + $0x1c] sm:$0xf]  ;;  %v6539_v10 = vsel %vm14566_vm4, %v6534_v24, %v6538_v49  ;;  %v7809_v18 = vld [vmem:[#allocation3 + $0x20] sm:$0x1] }
 0x3af   : > { %6908 = vst [vmem:[#allocation2 + $0x440] sm:$0xf] %v6842_v13  ;;  %v6549_v63 = vsel %vm14566_vm4, %v6544_v2, %v6548_v29  ;;  %v6570_v32 = vshll.u32 %v6189_v46, 16  ;;  %6634 = vst [vmem:[#allocation2 + $0x3f4] sm:$0xf] %v6539_v10  ;;  %v6553_v48 = vrot.slane %v6551_v28, 4 }
 0x3b0   : > { %v6845_v36 = vsel %vm14577_vm5, %v6843_v6, %v6844_v27  ;;  %6635 = vst [vmem:[#allocation2 + $0x418] sm:$0xf] %v6549_v63  ;;  %v6556_v31 = vrot.slane %v6554_v11, 5  ;;  %v6562_v26 = vrot.slane %v6560_v3, 5  ;;  %v6566_v12 = vrot.slane %v6564_v34, 4 }
 0x3b1   : > { %6909 = vst [vmem:[#allocation2 + $0x464] sm:$0xf] %v6845_v36  ;;  %v6974_v0 = vld [vmem:[#allocation3 + $0xc] sm:$0xf]  ;;  %v7856_v54 = vshrl.u32 %v7807_v39, 16  ;;  %v7859_v59 = vshll.u32 %v7807_v39, 16 }
 0x3b2   : > { %v13909_v51 = vld [vmem:[#allocation2 + $0x368] ss:$36 sps:$4 sm:$0xff]   ;;  %v7865_v30 = vshll.u32 %v7808_v4, 16  ;;  %v6975_v45 = vld [vmem:[#allocation3 + $0x10] sm:$0xf]  ;;  %v6557_v61 = vor.u32 %v6556_v31, %v6553_v48  ;;  %v6567_v7 = vor.u32 %v6566_v12, %v6562_v26  ;;  %v7869_v38 = vshrl.u32 %v7808_v4, 16 }
 0x3b3   : > { %v13904_v47 = vld [vmem:[#allocation2 + $0x318] ss:$36 sps:$4 sm:$0xff]   ;;  %v13914_v37 = vld [vmem:[#allocation2 + $0x364] ss:$36 sps:$4 sm:$0xff]   ;;  %v6572_v50 = vrot.slane %v6570_v32, 5  ;;  %v7858_v55 = vrot.slane %v7856_v54, 4  ;;  %10337 = vmatmul.mubr.bf16.gmra.mxu0 %v13909_v51 }
 0x3b4   : > { %v13917_v5 = vld [vmem:[#allocation2 + $0x3b4] ss:$36 sps:$4 sm:$0xff]   ;;  %v6558_v33 = vrot.slane %v6557_v61, 4  ;;  %v6568_v43 = vrot.slane %v6567_v7, 4  ;;  %v7861_v40 = vrot.slane %v7859_v59, 5  ;;  %v7867_v9 = vrot.slane %v7865_v30, 5  ;;  %10168 = vmatmul.mubr.bf16.gmra.mxu1 %v13904_v47 }
 0x3b5   : > { %v7753_v14 = vld [vmem:[#allocation3 + $0x54] sm:$0xf]  ;;  %v7871_v58 = vrot.slane %v7869_v38, 4  ;;  %v7875_v41 = vshll.u32 %v7809_v18, 16  ;;  %v7023_v52 = vshrl.u32 %v6974_v0, 16  ;;  %v7026_v57 = vshll.u32 %v6974_v0, 16  ;;  %10175 = vmatprep.mubr.bf16.mxu1 %v13914_v37  ;;  %10344 = vmatprep.mubr.bf16.mxu0 %v13917_v5 }
 0x3b6   : > { %v6976_v60 = vld [vmem:[#allocation3 + $0x14] sm:$0x1]  ;;  %v7470_v49 = vld [vmem:[#allocation3 + $0xc] sm:$0xe]  ;;  %7785 = vst [vmem:[#allocation2 + $0x180] sm:$0xf] %v7753_v14  ;;  %v6563_v35 = vsel %vm14566_vm4, %v6558_v33, %v6562_v26  ;;  %v6573_v56 = vsel %vm14566_vm4, %v6568_v43, %v6572_v50  ;;  %v7862_v20 = vor.u32 %v7861_v40, %v7858_v55 }
 0x3b7   : > { %v16650_v19 = vld [vmem:[#allocation3 + $0x24] sm:$0xe]  ;;  %v7032_v53 = vshll.u32 %v6975_v45, 16  ;;  %v7471_v8 = vld [vmem:[#allocation3 + $0x10] sm:$0xf]  ;;  %v7872_v44 = vor.u32 %v7871_v58, %v7867_v9  ;;  %v7025_v46 = vrot.slane %v7023_v52, 4 }
 0x3b8   : > { %v7754_v25 = vld [vmem:[#allocation3 + $0x58] sm:$0xf]  ;;  %6636 = vst [vmem:[#allocation2 + $0x43c] sm:$0xf] %v6563_v35  ;;  %6637 = vst [vmem:[#allocation2 + $0x460] sm:$0xf] %v6573_v56 }
 0x3b9   : > { %v7472_v23 = vld [vmem:[#allocation3 + $0x14] sm:$0x1]  ;;  %7786 = vst [vmem:[#allocation2 + $0x1a4] sm:$0xf] %v7754_v25  ;;  %v7863_v22 = vrot.slane %v7862_v20, 4  ;;  %v7877_v62 = vrot.slane %v7875_v41, 5 }
 0x3ba   : > { %v7810_v17 = vld [vmem:[#allocation3 + $0x24] sm:$0xf]  ;;  %v7873_v21 = vrot.slane %v7872_v44, 4  ;;  %v7028_v42 = vrot.slane %v7026_v57, 5  ;;  %v7034_v29 = vrot.slane %v7032_v53, 5  ;;  %v7036_v27 = vshrl.u32 %v6975_v45, 16 }
 0x3bb   : > { %v7811_v24 = vld [vmem:[#allocation3 + $0x28] sm:$0xf]  ;;  %v13915_v2 = vld [vmem:[#allocation2 + $0x3b0] ss:$36 sps:$4 sm:$0xff]   ;;  %v7868_v13 = vsel %vm14566_vm4, %v7863_v22, %v7867_v9  ;;  %v7042_v6 = vshll.u32 %v6976_v60, 16  ;;  %v12016_v39 = vrot.slane %v7470_v49, 9 }
 0x3bc   : > { %v7568_v28 = vrot.slane %v7471_v8, 5  ;;  %v12033_v11 = vrot.slane %v16650_v19, 9  ;;  %v13912_v3 = vld [vmem:[#allocation2 + $0x360] ss:$36 sps:$4 sm:$0xff]   ;;  %v13922_v34 = vld [vmem:[#allocation2 + $0x3ac] ss:$36 sps:$4 sm:$0xff]   ;;  %v7878_v4 = vsel %vm14566_vm4, %v7873_v21, %v7877_v62  ;;  %v7029_v10 = vor.u32 %v7028_v42, %v7025_v46  ;;  %10345 = vmatmul.mubr.bf16.gmra.mxu0 %v13915_v2 }
 0x3bd   : > { %8271 = vst [vmem:[#allocation2 + $0x1c] sm:$0xf] %v7868_v13  ;;  %v7038_v63 = vrot.slane %v7036_v27, 4  ;;  %v7812_v36 = vld [vmem:[#allocation3 + $0x2c] sm:$0x1]  ;;  %v7571_v12 = vrot.slane %v7472_v23, 5  ;;  %10176 = vmatmul.mubr.bf16.gmra.mxu1 %v13912_v3 }
 0x3be   : > { %v6977_v32 = vld [vmem:[#allocation3 + $0x18] sm:$0xf]  ;;  %v13927_v48 = vld [vmem:[#allocation2 + $0x3fc] ss:$36 sps:$4 sm:$0xff]   ;;  %8272 = vst [vmem:[#allocation2 + $0x40] sm:$0xf] %v7878_v4  ;;  %v7569_v31 = vsel %vm14577_vm5, %v12016_v39, %v7568_v28  ;;  %10183 = vmatprep.mubr.bf16.mxu1 %v13922_v34 }
 0x3bf   : > { %v7570_v26 = vrot.slane %v7568_v28, 4  ;;  %v7880_v18 = vshrl.u32 %v7810_v17, 16  ;;  %v16663_v0 = vld [vmem:[#allocation3 + $0x28] sm:$0xf]  ;;  %v7030_v51 = vrot.slane %v7029_v10, 4  ;;  %v7039_v54 = vor.u32 %v7038_v63, %v7034_v29  ;;  %10352 = vmatprep.mubr.bf16.mxu0 %v13927_v48 }
 0x3c0   : > { %7710 = vst [vmem:[#allocation2 + $0x14] sm:$0xf] %v7569_v31  ;;  %v7883_v59 = vshll.u32 %v7810_v17, 16  ;;  %v7889_v30 = vshll.u32 %v7811_v24, 16  ;;  %v6978_v45 = vld [vmem:[#allocation3 + $0x1c] sm:$0xf] }
 0x3c1   : > { %v7044_v47 = vrot.slane %v7042_v6, 5  ;;  %v7572_v37 = vsel %vm14577_vm5, %v7570_v26, %v7571_v12  ;;  %v7882_v61 = vrot.slane %v7880_v18, 4  ;;  %v7893_v7 = vshrl.u32 %v7811_v24, 16  ;;  %v16667_v38 = vld [vmem:[#allocation3 + $0x2c] sm:$0x1] }
 0x3c2   : > { %v7035_v5 = vsel %vm14566_vm4, %v7030_v51, %v7034_v29  ;;  %v7040_v50 = vrot.slane %v7039_v54, 4  ;;  %7711 = vst [vmem:[#allocation2 + $0x38] sm:$0xf] %v7572_v37  ;;  %v7885_v55 = vrot.slane %v7883_v59, 5  ;;  %v7891_v33 = vrot.slane %v7889_v30, 5 }
 0x3c3   : > { %7438 = vst [vmem:[#allocation2 + $0x10] sm:$0xf] %v7035_v5  ;;  %v7895_v43 = vrot.slane %v7893_v7, 4  ;;  %v7899_v40 = vshll.u32 %v7812_v36, 16  ;;  %v6979_v9 = vld [vmem:[#allocation3 + $0x20] sm:$0x1] }
 0x3c4   : > { %v7047_v14 = vshrl.u32 %v6977_v32, 16  ;;  %v7050_v58 = vshll.u32 %v6977_v32, 16  ;;  %v7473_v41 = vld [vmem:[#allocation3 + $0x18] sm:$0xe]  ;;  %v7474_v60 = vld [vmem:[#allocation3 + $0x1c] sm:$0xf]  ;;  %v7045_v49 = vsel %vm14566_vm4, %v7040_v50, %v7044_v47  ;;  %v7886_v35 = vor.u32 %v7885_v55, %v7882_v61 }
 0x3c5   : > { %v13920_v52 = vld [vmem:[#allocation2 + $0x3a8] ss:$36 sps:$4 sm:$0xff]   ;;  %v13925_v57 = vld [vmem:[#allocation2 + $0x3f8] ss:$36 sps:$4 sm:$0xff]   ;;  %v7056_v56 = vshll.u32 %v6978_v45, 16  ;;  %v7060_v20 = vshrl.u32 %v6978_v45, 16  ;;  %v7896_v44 = vor.u32 %v7895_v43, %v7891_v33 }
 0x3c6   : > { %v7475_v53 = vld [vmem:[#allocation3 + $0x20] sm:$0x1]  ;;  %v8408_v8 = vrot.slane %v16663_v0, 5  ;;  %v13930_v25 = vld [vmem:[#allocation2 + $0x3f4] ss:$36 sps:$4 sm:$0xff]   ;;  %v7049_v46 = vrot.slane %v7047_v14, 4  ;;  %10184 = vmatmul.mubr.bf16.gmra.mxu1 %v13920_v52  ;;  %10353 = vmatmul.mubr.bf16.gmra.mxu0 %v13925_v57 }
 0x3c7   : > { %7439 = vst [vmem:[#allocation2 + $0x34] sm:$0xf] %v7045_v49  ;;  %v7052_v23 = vrot.slane %v7050_v58, 5  ;;  %v7813_v22 = vld [vmem:[#allocation3 + $0x30] sm:$0xf]  ;;  %v8411_v17 = vrot.slane %v16667_v38, 5  ;;  %10191 = vmatprep.mubr.bf16.mxu1 %v13930_v25 }
 0x3c8   : > { %v7755_v62 = vld [vmem:[#allocation3 + $0x60] sm:$0xf]  ;;  %v13936_v21 = vld [vmem:[#allocation2 + $0x444] ss:$36 sps:$4 sm:$0xff]   ;;  %v7887_v42 = vrot.slane %v7886_v35, 4  ;;  %v7901_v29 = vrot.slane %v7899_v40, 5 }
 0x3c9   : > { %7787 = vst [vmem:[#allocation2 + $0x1c8] sm:$0xf] %v7755_v62  ;;  %v7897_v27 = vrot.slane %v7896_v44, 4  ;;  %v7053_v24 = vor.u32 %v7052_v23, %v7049_v46  ;;  %v7058_v2 = vrot.slane %v7056_v56, 5  ;;  %v7062_v13 = vrot.slane %v7060_v20, 4  ;;  %10360 = vmatprep.mubr.bf16.mxu0 %v13936_v21  ;;  %v12797_v23 = vpop.f32.mrf.mxu1  ;;  %v14036_v0 = vld [vmem:[#allocation7 + $0x208] sm:$0xff]  }
 0x3ca   : > { %v7756_v6 = vld [vmem:[#allocation3 + $0x64] sm:$0xf]  ;;  %v7892_v39 = vsel %vm14566_vm4, %v7887_v42, %v7891_v33  ;;  %v7066_v28 = vshll.u32 %v6979_v9, 16  ;;  %v12017_v3 = vrot.slane %v7473_v41, 9  ;;  %v7575_v34 = vrot.slane %v7474_v60, 5 }
 0x3cb   : > { %v7814_v4 = vld [vmem:[#allocation3 + $0x34] sm:$0xf]  ;;  %7788 = vst [vmem:[#allocation2 + $0x1ec] sm:$0xf] %v7756_v6  ;;  %v7902_v10 = vsel %vm14566_vm4, %v7897_v27, %v7901_v29  ;;  %8273 = vst [vmem:[#allocation2 + $0x64] sm:$0xf] %v7892_v39  ;;  %v7063_v36 = vor.u32 %v7062_v13, %v7058_v2 }
 0x3cc   : > { %v7054_v63 = vrot.slane %v7053_v24, 4  ;;  %v7578_v32 = vrot.slane %v7475_v53, 5  ;;  %v7815_v48 = vld [vmem:[#allocation3 + $0x38] sm:$0x1]  ;;  %8274 = vst [vmem:[#allocation2 + $0x88] sm:$0xf] %v7902_v10  ;;  %v7576_v26 = vsel %vm14577_vm5, %v12017_v3, %v7575_v34 }
 0x3cd   : > { %v7068_v31 = vrot.slane %v7066_v28, 5  ;;  %v7577_v12 = vrot.slane %v7575_v34, 4  ;;  %v7904_v18 = vshrl.u32 %v7813_v22, 16  ;;  %v6980_v51 = vld [vmem:[#allocation3 + $0x24] sm:$0xf]  ;;  %v7064_v59 = vrot.slane %v7063_v36, 4 }
 0x3ce   : > { %v7059_v54 = vsel %vm14566_vm4, %v7054_v63, %v7058_v2  ;;  %7712 = vst [vmem:[#allocation2 + $0x5c] sm:$0xf] %v7576_v26  ;;  %v7907_v30 = vshll.u32 %v7813_v22, 16  ;;  %v7913_v45 = vshll.u32 %v7814_v4, 16  ;;  %v6981_v47 = vld [vmem:[#allocation3 + $0x28] sm:$0xf] }
 0x3cf   : > { %v13928_v37 = vld [vmem:[#allocation2 + $0x3f0] ss:$36 sps:$4 sm:$0xff]   ;;  %7440 = vst [vmem:[#allocation2 + $0x58] sm:$0xf] %v7059_v54  ;;  %v7579_v61 = vsel %vm14577_vm5, %v7577_v12, %v7578_v32  ;;  %v7906_v7 = vrot.slane %v7904_v18, 4  ;;  %v7069_v55 = vsel %vm14566_vm4, %v7064_v59, %v7068_v31  ;;  %v7917_v40 = vshrl.u32 %v7814_v4, 16  ;;  %v16691_v12 = vpop.f32.mrf.mxu0  ;;  %v12798_v18 = vpop.f32.mrf.mxu1 }
 0x3d0   : > { %v6982_v5 = vld [vmem:[#allocation3 + $0x2c] sm:$0x1]  ;;  %v13934_v50 = vld [vmem:[#allocation2 + $0x440] ss:$36 sps:$4 sm:$0xff]   ;;  %7713 = vst [vmem:[#allocation2 + $0x80] sm:$0xf] %v7579_v61  ;;  %10192 = vmatmul.mubr.bf16.gmra.mxu1 %v13928_v37 }
 0x3d1   : > { %v7909_v33 = vrot.slane %v7907_v30, 5  ;;  %v7915_v43 = vrot.slane %v7913_v45, 5  ;;  %v13941_v9 = vld [vmem:[#allocation2 + $0x43c] ss:$36 sps:$4 sm:$0xff]   ;;  %7441 = vst [vmem:[#allocation2 + $0x7c] sm:$0xf] %v7069_v55  ;;  %10361 = vmatmul.mubr.bf16.gmra.mxu0 %v13934_v50  ;;  %v12907_v50 = vpop.f32.mrf.mxu0 }
 0x3d2   : > { %v7923_v14 = vshll.u32 %v7815_v48, 16  ;;  %v7071_v58 = vshrl.u32 %v6980_v51, 16  ;;  %v7074_v41 = vshll.u32 %v6980_v51, 16  ;;  %v7080_v60 = vshll.u32 %v6981_v47, 16  ;;  %v7476_v52 = vld [vmem:[#allocation3 + $0x24] sm:$0xe]  ;;  %10199 = vmatprep.mubr.bf16.mxu1 %v13941_v9 }
 0x3d3   : > { %v13949_v57 = vld [vmem:[#allocation2 + $0x1c] ss:$36 sps:$4 sm:$0xff]   ;;  %v7910_v49 = vor.u32 %v7909_v33, %v7906_v7  ;;  %v7919_v35 = vrot.slane %v7917_v40, 4  ;;  %v7084_v56 = vshrl.u32 %v6981_v47, 16  ;;  %v7090_v20 = vshll.u32 %v6982_v5, 16 }
 0x3d4   : > { %v7073_v53 = vrot.slane %v7071_v58, 4  ;;  %v7076_v25 = vrot.slane %v7074_v41, 5  ;;  %v7082_v44 = vrot.slane %v7080_v60, 5  ;;  %v7477_v46 = vld [vmem:[#allocation3 + $0x28] sm:$0xf]  ;;  %10562 = vmatprep.mubr.bf16.mxu0 %v13949_v57  ;;  %v7925_v29 = vrot.slane %v7923_v14, 5 }
 0x3d5   : > { %v7911_v22 = vrot.slane %v7910_v49, 4  ;;  %v7920_v62 = vor.u32 %v7919_v35, %v7915_v43  ;;  %v7478_v21 = vld [vmem:[#allocation3 + $0x2c] sm:$0x1]  ;;  %v7816_v42 = vld [vmem:[#allocation3 + $0x3c] sm:$0xf]  ;;  %v7086_v24 = vrot.slane %v7084_v56, 4  ;;  %v16701_v14 = vadd.f32 %v12798_v18, %v12797_v23  ;;  %v12909_v35 = vpop.f32.mrf.mxu0 }
 0x3d6   : > { %v7077_v27 = vor.u32 %v7076_v25, %v7073_v53  ;;  %v7092_v2 = vrot.slane %v7090_v20, 5  ;;  %v7817_v13 = vld [vmem:[#allocation3 + $0x40] sm:$0xf]  ;;  %v12018_v28 = vrot.slane %v7476_v52, 9  ;;  %v7582_v3 = vrot.slane %v7477_v46, 5  ;;  %v13971_v18 = vld [vmem:[#allocation7 + $0x230] sm:$0xff]  }
 0x3d7   : > { %v7916_v6 = vsel %vm14566_vm4, %v7911_v22, %v7915_v43  ;;  %v7921_v39 = vrot.slane %v7920_v62, 4  ;;  %v6983_v34 = vld [vmem:[#allocation3 + $0x30] sm:$0xf]  ;;  %v7757_v4 = vld [vmem:[#allocation3 + $0x6c] sm:$0xf]  ;;  %v7087_v63 = vor.u32 %v7086_v24, %v7082_v44  ;;  %v7928_v32 = vshrl.u32 %v7816_v42, 16 }
 0x3d8   : > { %8275 = vst [vmem:[#allocation2 + $0xac] sm:$0xf] %v7916_v6  ;;  %v7078_v10 = vrot.slane %v7077_v27, 4  ;;  %v16689_v36 = vld [vmem:[#allocation3 + $0x44] sm:$0x1]  ;;  %v7931_v48 = vshll.u32 %v7816_v42, 16  ;;  %v7583_v59 = vsel %vm14577_vm5, %v12018_v28, %v7582_v3  ;;  %v12910_v42 = vpop.f32.mrf.mxu0 }
 0x3d9   : > { %v6984_v31 = vld [vmem:[#allocation3 + $0x34] sm:$0xf]  ;;  %v7758_v26 = vld [vmem:[#allocation3 + $0x70] sm:$0xf]  ;;  %7789 = vst [vmem:[#allocation2 + $0x210] sm:$0xf] %v7757_v4  ;;  %v7926_v54 = vsel %vm14566_vm4, %v7921_v39, %v7925_v29 }
 0x3da   : > { %v13939_v51 = vld [vmem:[#allocation2 + $0x438] ss:$36 sps:$4 sm:$0xff]   ;;  %v7584_v30 = vrot.slane %v7582_v3, 4  ;;  %v7585_v45 = vrot.slane %v7478_v21, 5  ;;  %7790 = vst [vmem:[#allocation2 + $0x234] sm:$0xf] %v7758_v26  ;;  %v7083_v37 = vsel %vm14566_vm4, %v7078_v10, %v7082_v44  ;;  %v12911_v26 = vadd.f32 %v12910_v42, %v12909_v35 }
 0x3db   : > { %v13947_v47 = vld [vmem:[#allocation2 + $0x18] ss:$36 sps:$4 sm:$0xff]   ;;  %8276 = vst [vmem:[#allocation2 + $0xd0] sm:$0xf] %v7926_v54  ;;  %v7088_v61 = vrot.slane %v7087_v63, 4  ;;  %v7930_v7 = vrot.slane %v7928_v32, 4  ;;  %10200 = vmatmul.mubr.bf16.gmra.mxu1 %v13939_v51 }
 0x3dc   : > { %7714 = vst [vmem:[#allocation2 + $0xa4] sm:$0xf] %v7583_v59  ;;  %v7933_v5 = vrot.slane %v7931_v48, 5  ;;  %v13952_v55 = vld [vmem:[#allocation2 + $0x14] ss:$36 sps:$4 sm:$0xff]   ;;  %v7586_v43 = vsel %vm14577_vm5, %v7584_v30, %v7585_v45  ;;  %v7937_v40 = vshll.u32 %v7817_v13, 16  ;;  %10563 = vmatmul.mubr.bf16.vlgmr.msra.gmra.mxu0 %v13947_v47 }
 0x3dd   : > { %v13957_v33 = vld [vmem:[#allocation2 + $0x64] ss:$36 sps:$4 sm:$0xff]   ;;  %7442 = vst [vmem:[#allocation2 + $0xa0] sm:$0xf] %v7083_v37  ;;  %v7941_v9 = vshrl.u32 %v7817_v13, 16  ;;  %v7093_v58 = vsel %vm14566_vm4, %v7088_v61, %v7092_v2  ;;  %v7095_v52 = vshrl.u32 %v6983_v34, 16  ;;  %10401 = vmatprep.mubr.bf16.mxu1 %v13952_v55 }
 0x3de   : > { %7715 = vst [vmem:[#allocation2 + $0xc8] sm:$0xf] %v7586_v43  ;;  %v7934_v41 = vor.u32 %v7933_v5, %v7930_v7  ;;  %v6985_v60 = vld [vmem:[#allocation3 + $0x38] sm:$0x1]  ;;  %v7098_v57 = vshll.u32 %v6983_v34, 16  ;;  %10570 = vmatprep.mubr.bf16.mxu0 %v13957_v33  ;;  %v7939_v56 = vrot.slane %v7937_v40, 5  ;;  %v16719_v40 = vadd.f32 %v12911_v26, %v16701_v14 }
 0x3df   : > { %v7479_v49 = vld [vmem:[#allocation3 + $0x30] sm:$0xe]  ;;  %7443 = vst [vmem:[#allocation2 + $0xc4] sm:$0xf] %v7093_v58  ;;  %v7943_v20 = vrot.slane %v7941_v9, 4  ;;  %v7947_v53 = vshll.u32 %v16689_v36, 16 }
 0x3e0   : > { %v7104_v25 = vshll.u32 %v6984_v31, 16  ;;  %v7480_v44 = vld [vmem:[#allocation3 + $0x34] sm:$0xf]  ;;  %v7935_v46 = vrot.slane %v7934_v41, 4  ;;  %v7097_v23 = vrot.slane %v7095_v52, 4  ;;  %v7100_v22 = vrot.slane %v7098_v57, 5 }
 0x3e1   : > { %v7108_v62 = vshrl.u32 %v6984_v31, 16  ;;  %v7481_v21 = vld [vmem:[#allocation3 + $0x38] sm:$0x1]  ;;  %v7944_v29 = vor.u32 %v7943_v20, %v7939_v56  ;;  %v7114_v24 = vshll.u32 %v6985_v60, 16  ;;  %v12019_v2 = vrot.slane %v7479_v49, 9  ;;  %v14075_v9 = vld [vmem:[#allocation7 + $0x238] sm:$0xff]  }
 0x3e2   : > { %v7106_v27 = vrot.slane %v7104_v25, 5  ;;  %v7819_v13 = vld [vmem:[#allocation3 + $0x48] sm:$0xf]  ;;  %v13950_v6 = vld [vmem:[#allocation2 + $0x10] ss:$36 sps:$4 sm:$0xff]   ;;  %v7940_v28 = vsel %vm14566_vm4, %v7935_v46, %v7939_v56  ;;  %v7101_v3 = vor.u32 %v7100_v22, %v7097_v23  ;;  %v7589_v4 = vrot.slane %v7480_v44, 5 }
 0x3e3   : > { %v13955_v39 = vld [vmem:[#allocation2 + $0x60] ss:$36 sps:$4 sm:$0xff]   ;;  %v7110_v34 = vrot.slane %v7108_v62, 4  ;;  %v7820_v10 = vld [vmem:[#allocation3 + $0x4c] sm:$0xf]  ;;  %v7945_v36 = vrot.slane %v7944_v29, 4  ;;  %v12908_v31 = vadd.f32 %v12907_v50, %v16691_v12  ;;  %10402 = vmatmul.mubr.bf16.vlgmr.msra.gmra.mxu1 %v13950_v6 }
 0x3e4   : > { %v13961_v63 = vld [vmem:[#allocation2 + $0x5c] ss:$36 sps:$4 sm:$0xff]   ;;  %v7949_v32 = vrot.slane %v7947_v53, 5  ;;  %8277 = vst [vmem:[#allocation2 + $0xf4] sm:$0xf] %v7940_v28  ;;  %v7102_v51 = vrot.slane %v7101_v3, 4  ;;  %v7590_v30 = vsel %vm14577_vm5, %v12019_v2, %v7589_v4  ;;  %10571 = vmatmul.mubr.bf16.gmra.mxu0 %v13955_v39  ;;  %13333 = vmatpush3.bf16.msra.mxu1 %v14075_v9 }
 0x3e5   : > { %v6986_v48 = vld [vmem:[#allocation3 + $0x3c] sm:$0xf]  ;;  %v7111_v54 = vor.u32 %v7110_v34, %v7106_v27  ;;  %v7116_v59 = vrot.slane %v7114_v24, 5  ;;  %v7759_v45 = vld [vmem:[#allocation3 + $0x78] sm:$0xf]  ;;  %v7591_v37 = vrot.slane %v7589_v4, 4  ;;  %v16716_v43 = vadd.f32 %v12908_v31, %v16632_v16  ;;  %10409 = vmatprep.mubr.bf16.mxu1 %v13961_v63  ;;  %13334 = vmatprep.subr.bf16.mxu1 %v13971_v18 }
 0x3e6   : > { %v7950_v47 = vsel %vm14566_vm4, %v7945_v36, %v7949_v32  ;;  %v7592_v61 = vrot.slane %v7481_v21, 5  ;;  %7716 = vst [vmem:[#allocation2 + $0xec] sm:$0xf] %v7590_v30  ;;  %v7952_v7 = vshrl.u32 %v7819_v13, 16  ;;  %v7760_v5 = vld [vmem:[#allocation3 + $0x7c] sm:$0xf]  ;;  %v7107_v50 = vsel %vm14566_vm4, %v7102_v51, %v7106_v27 }
 0x3e7   : > { %7791 = vst [vmem:[#allocation2 + $0x258] sm:$0xf] %v7759_v45  ;;  %v13964_v12 = vld [vmem:[#allocation2 + $0xac] ss:$36 sps:$4 sm:$0xff]   ;;  %8278 = vst [vmem:[#allocation2 + $0x118] sm:$0xf] %v7950_v47 }
 0x3e8   : > { %v7112_v55 = vrot.slane %v7111_v54, 4  ;;  %v6987_v33 = vld [vmem:[#allocation3 + $0x40] sm:$0xf]  ;;  %7792 = vst [vmem:[#allocation2 + $0x27c] sm:$0xf] %v7760_v5  ;;  %v7593_v58 = vsel %vm14577_vm5, %v7591_v37, %v7592_v61  ;;  %v7954_v60 = vrot.slane %v7952_v7, 4  ;;  %10578 = vmatprep.mubr.bf16.mxu0 %v13964_v12  ;;  %13335 = vmatpush3.bf16.msra.mxu1 %v13971_v18 }
 0x3e9   : > { %7444 = vst [vmem:[#allocation2 + $0xe8] sm:$0xf] %v7107_v50  ;;  %v7821_v41 = vld [vmem:[#allocation3 + $0x50] sm:$0x1]  ;;  %v7955_v52 = vshll.u32 %v7819_v13, 16  ;;  %v7961_v57 = vshll.u32 %v7820_v10, 16 }
 0x3ea   : > { %v13984_v49 = vld [vmem:[#allocation7 + $0x228] sm:$0xff]   ;;  %v7117_v16 = vsel %vm14566_vm4, %v7112_v55, %v7116_v59  ;;  %7717 = vst [vmem:[#allocation2 + $0x110] sm:$0xf] %v7593_v58  ;;  %v7965_v14 = vshrl.u32 %v7820_v10, 16  ;;  %v7119_v56 = vshrl.u32 %v6986_v48, 16  ;;  %v7122_v44 = vshll.u32 %v6986_v48, 16 }
 0x3eb   : > { %v6988_v35 = vld [vmem:[#allocation3 + $0x44] sm:$0x1]  ;;  %v7482_v20 = vld [vmem:[#allocation3 + $0x3c] sm:$0xe]  ;;  %7445 = vst [vmem:[#allocation2 + $0x10c] sm:$0xf] %v7117_v16  ;;  %13336 = vmatprep.subr.bf16.mxu1 %v13984_v49 }
 0x3ec   : > { %v7957_v53 = vrot.slane %v7955_v52, 5  ;;  %v7963_v25 = vrot.slane %v7961_v57, 5  ;;  %v7128_v46 = vshll.u32 %v6987_v33, 16  ;;  %v7483_v23 = vld [vmem:[#allocation3 + $0x40] sm:$0xf]  ;;  %v7967_v22 = vrot.slane %v7965_v14, 4  ;;  %13337 = vmatpush3.bf16.msra.mxu1 %v13984_v49 }
 0x3ed   : > { %v7971_v62 = vshll.u32 %v7821_v41, 16  ;;  %v7121_v21 = vrot.slane %v7119_v56, 4  ;;  %v7132_v42 = vshrl.u32 %v6987_v33, 16  ;;  %v7484_v29 = vld [vmem:[#allocation3 + $0x44] sm:$0x1]  ;;  %v7124_v2 = vrot.slane %v7122_v44, 5 }
 0x3ee   : > { %v13959_v27 = vld [vmem:[#allocation2 + $0x58] ss:$36 sps:$4 sm:$0xff]   ;;  %v7958_v24 = vor.u32 %v7957_v53, %v7954_v60  ;;  %v7130_v13 = vrot.slane %v7128_v46, 5  ;;  %v7138_v6 = vshll.u32 %v6988_v35, 16  ;;  %v13962_v39 = vld [vmem:[#allocation2 + $0xa8] ss:$36 sps:$4 sm:$0xff]   ;;  %v7968_v28 = vor.u32 %v7967_v22, %v7963_v25 }
 0x3ef   : > { %v7134_v3 = vrot.slane %v7132_v42, 4  ;;  %v12020_v34 = vrot.slane %v7482_v20, 9  ;;  %v7596_v4 = vrot.slane %v7483_v23, 5  ;;  %v7822_v10 = vld [vmem:[#allocation3 + $0x54] sm:$0xf]  ;;  %v13997_v63 = vld [vmem:[#allocation7 + $0x220] sm:$0xff]   ;;  %v7125_v31 = vor.u32 %v7124_v2, %v7121_v21  ;;  %10410 = vmatmul.mubr.bf16.gmra.mxu1 %v13959_v27  ;;  %10579 = vmatmul.mubr.bf16.gmra.mxu0 %v13962_v39 }
 0x3f0   : > { %v13967_v36 = vld [vmem:[#allocation2 + $0xa4] ss:$36 sps:$4 sm:$0xff]   ;;  %v13970_v32 = vld [vmem:[#allocation2 + $0xf4] ss:$36 sps:$4 sm:$0xff]   ;;  %v7959_v48 = vrot.slane %v7958_v24, 4  ;;  %v7969_v26 = vrot.slane %v7968_v28, 4  ;;  %13338 = vmatprep.subr.bf16.mxu1 %v13997_v63 }
 0x3f1   : > { %v7973_v18 = vrot.slane %v7971_v62, 5  ;;  %v7135_v51 = vor.u32 %v7134_v3, %v7130_v13  ;;  %v7597_v54 = vsel %vm14577_vm5, %v12020_v34, %v7596_v4  ;;  %v7823_v59 = vld [vmem:[#allocation3 + $0x58] sm:$0xf]  ;;  %10417 = vmatprep.mubr.bf16.mxu1 %v13967_v36  ;;  %10586 = vmatprep.mubr.bf16.mxu0 %v13970_v32  ;;  %v7126_v45 = vrot.slane %v7125_v31, 4  ;;  %v7824_v61 = vld [vmem:[#allocation3 + $0x5c] sm:$0x1] }
 0x3f2   : > { %v7964_v30 = vsel %vm14566_vm4, %v7959_v48, %v7963_v25  ;;  %v7598_v47 = vrot.slane %v7596_v4, 4  ;;  %v7599_v37 = vrot.slane %v7484_v29, 5  ;;  %7718 = vst [vmem:[#allocation2 + $0x134] sm:$0xf] %v7597_v54  ;;  %v7140_v12 = vrot.slane %v7138_v6, 5  ;;  %v14010_v55 = vld [vmem:[#allocation7 + $0x218] sm:$0xff]   ;;  %13339 = vmatpush3.bf16.msra.mxu1 %v13997_v63 }
 0x3f3   : > { %v7974_v7 = vsel %vm14566_vm4, %v7969_v26, %v7973_v18  ;;  %8279 = vst [vmem:[#allocation2 + $0x13c] sm:$0xf] %v7964_v30  ;;  %v7136_v5 = vrot.slane %v7135_v51, 4  ;;  %v6989_v50 = vld [vmem:[#allocation3 + $0x48] sm:$0xf]  ;;  %v7131_v33 = vsel %vm14566_vm4, %v7126_v45, %v7130_v13  ;;  %v7976_v58 = vshrl.u32 %v7822_v10, 16  ;;  %13340 = vmatprep.subr.bf16.mxu1 %v14010_v55 }
 0x3f4   : > { %8280 = vst [vmem:[#allocation2 + $0x160] sm:$0xf] %v7974_v7  ;;  %v7600_v9 = vsel %vm14577_vm5, %v7598_v47, %v7599_v37  ;;  %v7979_v41 = vshll.u32 %v7822_v10, 16  ;;  %v6990_v60 = vld [vmem:[#allocation3 + $0x4c] sm:$0xf]  ;;  %v7985_v49 = vshll.u32 %v7823_v59, 16  ;;  %v8409_v30 = vsel %vm14577_vm5, %v12033_v11, %v8408_v8 }
 0x3f5   : > { %v16735_v52 = vld [vmem:[#allocation3 + $0x50] sm:$0x1]  ;;  %v13965_v57 = vld [vmem:[#allocation2 + $0xa0] ss:$36 sps:$4 sm:$0xff]   ;;  %v7141_v16 = vsel %vm14566_vm4, %v7136_v5, %v7140_v12  ;;  %7446 = vst [vmem:[#allocation2 + $0x130] sm:$0xf] %v7131_v33 }
 0x3f6   : > { %7719 = vst [vmem:[#allocation2 + $0x158] sm:$0xf] %v7600_v9  ;;  %v7989_v14 = vshrl.u32 %v7823_v59, 16  ;;  %v7995_v35 = vshll.u32 %v7824_v61, 16  ;;  %v7486_v56 = vld [vmem:[#allocation3 + $0x4c] sm:$0xf]  ;;  %13341 = vmatpush3.bf16.msra.mxu1 %v14010_v55 }
 0x3f7   : > { %v7761_v20 = vld [vmem:[#allocation3 + $0x84] sm:$0xf]  ;;  %7447 = vst [vmem:[#allocation2 + $0x154] sm:$0xf] %v7141_v16  ;;  %v7978_v53 = vrot.slane %v7976_v58, 4  ;;  %v7981_v25 = vrot.slane %v7979_v41, 5  ;;  %10418 = vmatmul.mubr.bf16.gmra.mxu1 %v13965_v57 }
 0x3f8   : > { %v7143_v44 = vshrl.u32 %v6989_v50, 16  ;;  %v7146_v46 = vshll.u32 %v6989_v50, 16  ;;  %v7485_v23 = vld [vmem:[#allocation3 + $0x48] sm:$0xe]  ;;  %7793 = vst [vmem:[#allocation2 + $0x2a0] sm:$0xf] %v7761_v20 }
 0x3f9   : > { %v7762_v22 = vld [vmem:[#allocation3 + $0x88] sm:$0xf]  ;;  %v8410_v62 = vrot.slane %v8408_v8, 4  ;;  %v13968_v21 = vld [vmem:[#allocation2 + $0xf0] ss:$36 sps:$4 sm:$0xff]   ;;  %v7987_v42 = vrot.slane %v7985_v49, 5  ;;  %v7982_v2 = vor.u32 %v7981_v25, %v7978_v53 }
 0x3fa   : > { %v7991_v29 = vrot.slane %v7989_v14, 4  ;;  %v7152_v27 = vshll.u32 %v6990_v60, 16  ;;  %7794 = vst [vmem:[#allocation2 + $0x2c4] sm:$0xf] %v7762_v22  ;;  %v13974_v24 = vld [vmem:[#allocation2 + $0xec] ss:$36 sps:$4 sm:$0xff]   ;;  %10587 = vmatmul.mubr.bf16.gmra.mxu0 %v13968_v21 }
 0x3fb   : > { %v7145_v13 = vrot.slane %v7143_v44, 4  ;;  %v7148_v6 = vrot.slane %v7146_v46, 5  ;;  %v7156_v39 = vshrl.u32 %v6990_v60, 16  ;;  %v14023_v28 = vld [vmem:[#allocation7 + $0x210] sm:$0xff]   ;;  %v7997_v34 = vrot.slane %v7995_v35, 5  ;;  %10425 = vmatprep.mubr.bf16.mxu1 %v13974_v24  ;;  %v14046_v25 = vld [vmem:[#allocation7 + $0x200] sm:$0xff]  }
 0x3fc   : > { %v7992_v3 = vor.u32 %v7991_v29, %v7987_v42  ;;  %v7154_v4 = vrot.slane %v7152_v27, 5  ;;  %v7162_v10 = vshll.u32 %v16735_v52, 16  ;;  %v7487_v36 = vld [vmem:[#allocation3 + $0x50] sm:$0x1]  ;;  %v7825_v32 = vld [vmem:[#allocation3 + $0x60] sm:$0xf]  ;;  %v8412_v45 = vsel %vm14577_vm5, %v8410_v62, %v8411_v17  ;;  %13342 = vmatprep.subr.bf16.mxu1 %v14023_v28 }
 0x3fd   : > { %v7983_v48 = vrot.slane %v7982_v2, 4  ;;  %v7149_v63 = vor.u32 %v7148_v6, %v7145_v13  ;;  %v7158_v31 = vrot.slane %v7156_v39, 4  ;;  %v7603_v26 = vrot.slane %v7486_v56, 5  ;;  %v7826_v18 = vld [vmem:[#allocation3 + $0x64] sm:$0xf]  ;;  %13343 = vmatpush3.bf16.msra.mxu1 %v14023_v28 }
 0x3fe   : > { %v13977_v51 = vld [vmem:[#allocation2 + $0x13c] ss:$36 sps:$4 sm:$0xff]   ;;  %v7993_v54 = vrot.slane %v7992_v3, 4  ;;  %v12021_v59 = vrot.slane %v7485_v23, 9  ;;  %v16754_v7 = vld [vmem:[#allocation3 + $0x68] sm:$0x1]  ;;  %13344 = vmatprep.subr.bf16.mxu1 %v14036_v0 }
 0x3ff   : > { %v7988_v47 = vsel %vm14566_vm4, %v7983_v48, %v7987_v42  ;;  %v7150_v37 = vrot.slane %v7149_v63, 4  ;;  %v7159_v61 = vor.u32 %v7158_v31, %v7154_v4  ;;  %v6992_v5 = vld [vmem:[#allocation3 + $0x54] sm:$0xf]  ;;  %8545 = vst [vmem:[#allocation2 + $0x68] sm:$0xf] %v8409_v30  ;;  %10594 = vmatprep.mubr.bf16.mxu0 %v13977_v51  ;;  %v7164_v11 = vrot.slane %v7162_v10, 5 }
 0x400   : > { %8546 = vst [vmem:[#allocation2 + $0x8c] sm:$0xf] %v8412_v45  ;;  %v7998_v19 = vsel %vm14566_vm4, %v7993_v54, %v7997_v34  ;;  %8281 = vst [vmem:[#allocation2 + $0x184] sm:$0xf] %v7988_v47  ;;  %v7604_v38 = vsel %vm14577_vm5, %v12021_v59, %v7603_v26  ;;  %v7605_v8 = vrot.slane %v7603_v26, 4  ;;  %v7606_v33 = vrot.slane %v7487_v36, 5 }
 0x401   : > { %v6993_v17 = vld [vmem:[#allocation3 + $0x58] sm:$0xf]  ;;  %v13972_v12 = vld [vmem:[#allocation2 + $0xe8] ss:$36 sps:$4 sm:$0xff]   ;;  %8282 = vst [vmem:[#allocation2 + $0x1a8] sm:$0xf] %v7998_v19  ;;  %v7155_v50 = vsel %vm14566_vm4, %v7150_v37, %v7154_v4  ;;  %13345 = vmatpush3.bf16.msra.mxu1 %v14036_v0 }
 0x402   : > { %v7160_v55 = vrot.slane %v7159_v61, 4  ;;  %7720 = vst [vmem:[#allocation2 + $0x17c] sm:$0xf] %v7604_v38  ;;  %v8000_v9 = vshrl.u32 %v7825_v32, 16  ;;  %v16762_v58 = vld [vmem:[#allocation3 + $0x5c] sm:$0x1]  ;;  %v7607_v35 = vsel %vm14577_vm5, %v7605_v8, %v7606_v33  ;;  %10426 = vmatmul.mubr.bf16.gmra.mxu1 %v13972_v12  ;;  %13346 = vmatprep.subr.bf16.mxu1 %v14046_v25 }
 0x403   : > { %v13975_v41 = vld [vmem:[#allocation2 + $0x138] ss:$36 sps:$4 sm:$0xff]   ;;  %7448 = vst [vmem:[#allocation2 + $0x178] sm:$0xf] %v7155_v50  ;;  %v8003_v60 = vshll.u32 %v7825_v32, 16  ;;  %v8009_v52 = vshll.u32 %v7826_v18, 16 }
 0x404   : > { %v8013_v57 = vshrl.u32 %v7826_v18, 16  ;;  %v7489_v16 = vld [vmem:[#allocation3 + $0x58] sm:$0xf]  ;;  %v7165_v14 = vsel %vm14566_vm4, %v7160_v55, %v7164_v11  ;;  %v8002_v56 = vrot.slane %v8000_v9, 4  ;;  %v7167_v20 = vshrl.u32 %v6992_v5, 16  ;;  %10595 = vmatmul.mubr.bf16.gmra.mxu0 %v13975_v41 }
 0x405   : > { %v13980_v49 = vld [vmem:[#allocation2 + $0x134] ss:$36 sps:$4 sm:$0xff]   ;;  %7449 = vst [vmem:[#allocation2 + $0x19c] sm:$0xf] %v7165_v14  ;;  %7721 = vst [vmem:[#allocation2 + $0x1a0] sm:$0xf] %v7607_v35  ;;  %13347 = vmatpush3.bf16.msra.mxu1 %v14046_v25 }
 0x406   : > { %v7488_v53 = vld [vmem:[#allocation3 + $0x54] sm:$0xe]  ;;  %v8005_v44 = vrot.slane %v8003_v60, 5  ;;  %v8011_v46 = vrot.slane %v8009_v52, 5  ;;  %v8015_v23 = vrot.slane %v8013_v57, 4  ;;  %v8019_v22 = vshll.u32 %v16754_v7, 16  ;;  %10433 = vmatprep.mubr.bf16.mxu1 %v13980_v49 }
 0x407   : > { %v7763_v62 = vld [vmem:[#allocation3 + $0x90] sm:$0xf]  ;;  %v7169_v21 = vrot.slane %v7167_v20, 4  ;;  %v7170_v42 = vshll.u32 %v6992_v5, 16  ;;  %v7176_v29 = vshll.u32 %v6993_v17, 16  ;;  %v7180_v27 = vshrl.u32 %v6993_v17, 16 }
 0x408   : > { %v7764_v24 = vld [vmem:[#allocation3 + $0x94] sm:$0xf]  ;;  %7795 = vst [vmem:[#allocation2 + $0x2e8] sm:$0xf] %v7763_v62  ;;  %v8006_v2 = vor.u32 %v8005_v44, %v8002_v56  ;;  %v8016_v13 = vor.u32 %v8015_v23, %v8011_v46  ;;  %v7186_v6 = vshll.u32 %v16762_v58, 16  ;;  %v7610_v4 = vrot.slane %v7489_v16, 5 }
 0x409   : > { %v7490_v39 = vld [vmem:[#allocation3 + $0x5c] sm:$0x1]  ;;  %7796 = vst [vmem:[#allocation2 + $0x30c] sm:$0xf] %v7764_v24  ;;  %v7172_v28 = vrot.slane %v7170_v42, 5  ;;  %v7178_v3 = vrot.slane %v7176_v29, 5 }
 0x40a   : > { %v7182_v34 = vrot.slane %v7180_v27, 4  ;;  %v7828_v10 = vld [vmem:[#allocation3 + $0x6c] sm:$0xf]  ;;  %v13983_v36 = vld [vmem:[#allocation2 + $0x184] ss:$36 sps:$4 sm:$0xff]   ;;  %v8007_v32 = vrot.slane %v8006_v2, 4 }
 0x40b   : > { %v12022_v48 = vrot.slane %v7488_v53, 9  ;;  %v7829_v63 = vld [vmem:[#allocation3 + $0x70] sm:$0xf]  ;;  %v8017_v31 = vrot.slane %v8016_v13, 4  ;;  %v8021_v26 = vrot.slane %v8019_v22, 5  ;;  %v7173_v18 = vor.u32 %v7172_v28, %v7169_v21  ;;  %10602 = vmatprep.mubr.bf16.mxu0 %v13983_v36 }
 0x40c   : > { %v7183_v51 = vor.u32 %v7182_v34, %v7178_v3  ;;  %v6995_v54 = vld [vmem:[#allocation3 + $0x60] sm:$0xf]  ;;  %v13978_v59 = vld [vmem:[#allocation2 + $0x130] ss:$36 sps:$4 sm:$0xff]   ;;  %v8012_v45 = vsel %vm14566_vm4, %v8007_v32, %v8011_v46  ;;  %v7612_v37 = vrot.slane %v7610_v4, 4  ;;  %v7613_v61 = vrot.slane %v7490_v39, 5 }
 0x40d   : > { %v13981_v30 = vld [vmem:[#allocation2 + $0x180] ss:$36 sps:$4 sm:$0xff]   ;;  %v7611_v47 = vsel %vm14577_vm5, %v12022_v48, %v7610_v4  ;;  %v8022_v5 = vsel %vm14566_vm4, %v8017_v31, %v8021_v26  ;;  %8283 = vst [vmem:[#allocation2 + $0x1cc] sm:$0xf] %v8012_v45  ;;  %v7174_v0 = vrot.slane %v7173_v18, 4  ;;  %v7188_v19 = vrot.slane %v7186_v6, 5  ;;  %10434 = vmatmul.mubr.bf16.gmra.mxu1 %v13978_v59 }
 0x40e   : > { %v13987_v7 = vld [vmem:[#allocation2 + $0x17c] ss:$36 sps:$4 sm:$0xff]   ;;  %7722 = vst [vmem:[#allocation2 + $0x1c4] sm:$0xf] %v7611_v47  ;;  %10603 = vmatmul.mubr.bf16.gmra.mxu0 %v13981_v30  ;;  %8284 = vst [vmem:[#allocation2 + $0x1f0] sm:$0xf] %v8022_v5  ;;  %v7614_v38 = vsel %vm14577_vm5, %v7612_v37, %v7613_v61  ;;  %v12912_v61 = vpop.f32.mrf.mxu0 }
 0x40f   : > { %v7184_v11 = vrot.slane %v7183_v51, 4  ;;  %v7830_v8 = vld [vmem:[#allocation3 + $0x74] sm:$0x1]  ;;  %v8024_v17 = vshrl.u32 %v7828_v10, 16  ;;  %v8027_v12 = vshll.u32 %v7828_v10, 16  ;;  %10441 = vmatprep.mubr.bf16.mxu1 %v13987_v7  ;;  %v7179_v50 = vsel %vm14566_vm4, %v7174_v0, %v7178_v3 }
 0x410   : > { %7723 = vst [vmem:[#allocation2 + $0x1e8] sm:$0xf] %v7614_v38  ;;  %v8033_v55 = vshll.u32 %v7829_v63, 16  ;;  %v8037_v33 = vshrl.u32 %v7829_v63, 16  ;;  %v6996_v9 = vld [vmem:[#allocation3 + $0x64] sm:$0xf] }
 0x411   : > { %v6997_v58 = vld [vmem:[#allocation3 + $0x68] sm:$0x1]  ;;  %v7189_v41 = vsel %vm14566_vm4, %v7184_v11, %v7188_v19  ;;  %7450 = vst [vmem:[#allocation2 + $0x1c0] sm:$0xf] %v7179_v50  ;;  %v8026_v60 = vrot.slane %v8024_v17, 4  ;;  %v8029_v52 = vrot.slane %v8027_v12, 5 }
 0x412   : > { %v7191_v57 = vshrl.u32 %v6995_v54, 16  ;;  %v7491_v16 = vld [vmem:[#allocation3 + $0x60] sm:$0xe]  ;;  %7451 = vst [vmem:[#allocation2 + $0x1e4] sm:$0xf] %v7189_v41  ;;  %v8035_v49 = vrot.slane %v8033_v55, 5 }
 0x413   : > { %v8039_v14 = vrot.slane %v8037_v33, 4  ;;  %v8043_v35 = vshll.u32 %v7830_v8, 16  ;;  %v7194_v56 = vshll.u32 %v6995_v54, 16  ;;  %v7492_v20 = vld [vmem:[#allocation3 + $0x64] sm:$0xf]  ;;  %v8030_v25 = vor.u32 %v8029_v52, %v8026_v60 }
 0x414   : > { %v13985_v53 = vld [vmem:[#allocation2 + $0x178] ss:$36 sps:$4 sm:$0xff]   ;;  %v7193_v44 = vrot.slane %v7191_v57, 4  ;;  %v7200_v46 = vshll.u32 %v6996_v9, 16  ;;  %v7204_v23 = vshrl.u32 %v6996_v9, 16  ;;  %v7210_v29 = vshll.u32 %v6997_v58, 16 }
 0x415   : > { %v7493_v22 = vld [vmem:[#allocation3 + $0x68] sm:$0x1]  ;;  %v7765_v62 = vld [vmem:[#allocation3 + $0x9c] sm:$0xf]  ;;  %v8040_v21 = vor.u32 %v8039_v14, %v8035_v49  ;;  %v7196_v42 = vrot.slane %v7194_v56, 5  ;;  %v12023_v27 = vrot.slane %v7491_v16, 9  ;;  %10442 = vmatmul.mubr.bf16.gmra.mxu1 %v13985_v53 }
 0x416   : > { %v7766_v24 = vld [vmem:[#allocation3 + $0xa0] sm:$0xf]  ;;  %7797 = vst [vmem:[#allocation2 + $0x330] sm:$0xf] %v7765_v62  ;;  %v8031_v2 = vrot.slane %v8030_v25, 4  ;;  %v7202_v13 = vrot.slane %v7200_v46, 5 }
 0x417   : > { %v7206_v6 = vrot.slane %v7204_v23, 4  ;;  %v7617_v39 = vrot.slane %v7492_v20, 5  ;;  %v7831_v28 = vld [vmem:[#allocation3 + $0x78] sm:$0xf]  ;;  %7798 = vst [vmem:[#allocation2 + $0x354] sm:$0xf] %v7766_v24  ;;  %v7197_v10 = vor.u32 %v7196_v42, %v7193_v44 }
 0x418   : > { %v13990_v3 = vld [vmem:[#allocation2 + $0x1cc] ss:$36 sps:$4 sm:$0xff]   ;;  %v8041_v34 = vrot.slane %v8040_v21, 4  ;;  %v8045_v4 = vrot.slane %v8043_v35, 5  ;;  %v8036_v32 = vsel %vm14566_vm4, %v8031_v2, %v8035_v49  ;;  %v7832_v31 = vld [vmem:[#allocation3 + $0x7c] sm:$0xf]  ;;  %v12913_v35 = vpop.f32.mrf.mxu0 }
 0x419   : > { %v13988_v36 = vld [vmem:[#allocation2 + $0x1c8] ss:$36 sps:$4 sm:$0xff]   ;;  %v7207_v48 = vor.u32 %v7206_v6, %v7202_v13  ;;  %v7618_v63 = vsel %vm14577_vm5, %v12023_v27, %v7617_v39  ;;  %v7833_v26 = vld [vmem:[#allocation3 + $0x80] sm:$0x1]  ;;  %10610 = vmatprep.mubr.bf16.mxu0 %v13990_v3  ;;  %8285 = vst [vmem:[#allocation2 + $0x214] sm:$0xf] %v8036_v32 }
 0x41a   : > { %v8046_v18 = vsel %vm14566_vm4, %v8041_v34, %v8045_v4  ;;  %v7198_v51 = vrot.slane %v7197_v10, 4  ;;  %v7619_v54 = vrot.slane %v7617_v39, 4  ;;  %v7620_v59 = vrot.slane %v7493_v22, 5  ;;  %7724 = vst [vmem:[#allocation2 + $0x20c] sm:$0xf] %v7618_v63  ;;  %10611 = vmatmul.mubr.bf16.gmra.mxu0 %v13988_v36  ;;  %v12915_v34 = vpop.f32.mrf.mxu0 }
 0x41b   : > { %v6998_v30 = vld [vmem:[#allocation3 + $0x6c] sm:$0xf]  ;;  %v13993_v45 = vld [vmem:[#allocation2 + $0x1c4] ss:$36 sps:$4 sm:$0xff]   ;;  %8286 = vst [vmem:[#allocation2 + $0x238] sm:$0xf] %v8046_v18 }
 0x41c   : > { %v7208_v47 = vrot.slane %v7207_v48, 4  ;;  %v7212_v37 = vrot.slane %v7210_v29, 5  ;;  %v7203_v7 = vsel %vm14566_vm4, %v7198_v51, %v7202_v13  ;;  %v7621_v5 = vsel %vm14577_vm5, %v7619_v54, %v7620_v59  ;;  %v6999_v11 = vld [vmem:[#allocation3 + $0x70] sm:$0xf]  ;;  %10449 = vmatprep.mubr.bf16.mxu1 %v13993_v45  ;;  %v16794_v50 = vld [vmem:[#allocation3 + $0x74] sm:$0x1] }
 0x41d   : > { %v8048_v0 = vshrl.u32 %v7831_v28, 16  ;;  %v8051_v19 = vshll.u32 %v7831_v28, 16  ;;  %7452 = vst [vmem:[#allocation2 + $0x208] sm:$0xf] %v7203_v7  ;;  %7725 = vst [vmem:[#allocation2 + $0x230] sm:$0xf] %v7621_v5  ;;  %v16797_v13 = vadd.f32 %v12913_v35, %v12912_v61  ;;  %v12800_v35 = vpop.f32.mrf.mxu1 }
 0x41e   : > { %v7213_v38 = vsel %vm14566_vm4, %v7208_v47, %v7212_v37  ;;  %v8057_v8 = vshll.u32 %v7832_v31, 16  ;;  %v8061_v17 = vshrl.u32 %v7832_v31, 16  ;;  %v8067_v12 = vshll.u32 %v7833_v26, 16  ;;  %v7494_v41 = vld [vmem:[#allocation3 + $0x6c] sm:$0xe] }
 0x41f   : > { %7453 = vst [vmem:[#allocation2 + $0x22c] sm:$0xf] %v7213_v38  ;;  %v8050_v55 = vrot.slane %v8048_v0, 4  ;;  %v8053_v33 = vrot.slane %v8051_v19, 5  ;;  %v7215_v9 = vshrl.u32 %v6998_v30, 16  ;;  %v7218_v58 = vshll.u32 %v6998_v30, 16  ;;  %v12916_v38 = vpop.f32.mrf.mxu0 }
 0x420   : > { %v7495_v60 = vld [vmem:[#allocation3 + $0x70] sm:$0xf]  ;;  %v13991_v52 = vld [vmem:[#allocation2 + $0x1c0] ss:$36 sps:$4 sm:$0xff]   ;;  %v8059_v57 = vrot.slane %v8057_v8, 5  ;;  %v8063_v16 = vrot.slane %v8061_v17, 4 }
 0x421   : > { %v7224_v49 = vshll.u32 %v6999_v11, 16  ;;  %v7496_v14 = vld [vmem:[#allocation3 + $0x74] sm:$0x1]  ;;  %v8054_v56 = vor.u32 %v8053_v33, %v8050_v55  ;;  %v7217_v20 = vrot.slane %v7215_v9, 4  ;;  %v7220_v53 = vrot.slane %v7218_v58, 5  ;;  %10450 = vmatmul.mubr.bf16.gmra.mxu1 %v13991_v52 }
 0x422   : > { %v7228_v25 = vshrl.u32 %v6999_v11, 16  ;;  %v7834_v44 = vld [vmem:[#allocation3 + $0x84] sm:$0xf]  ;;  %v8064_v46 = vor.u32 %v8063_v16, %v8059_v57  ;;  %v8069_v23 = vrot.slane %v8067_v12, 5  ;;  %v7234_v62 = vshll.u32 %v16794_v50, 16 }
 0x423   : > { %v7226_v22 = vrot.slane %v7224_v49, 5  ;;  %v7835_v21 = vld [vmem:[#allocation3 + $0x88] sm:$0xf]  ;;  %v13994_v29 = vld [vmem:[#allocation2 + $0x210] ss:$36 sps:$4 sm:$0xff]   ;;  %v8055_v24 = vrot.slane %v8054_v56, 4  ;;  %v7221_v2 = vor.u32 %v7220_v53, %v7217_v20 }
 0x424   : > { %v7767_v42 = vld [vmem:[#allocation3 + $0xa8] sm:$0xf]  ;;  %v13996_v27 = vld [vmem:[#allocation2 + $0x214] ss:$36 sps:$4 sm:$0xff]   ;;  %v8065_v6 = vrot.slane %v8064_v46, 4  ;;  %v7230_v39 = vrot.slane %v7228_v25, 4  ;;  %v16811_v46 = vadd.f32 %v12916_v38, %v12915_v34 }
 0x425   : > { %7799 = vst [vmem:[#allocation2 + $0x378] sm:$0xf] %v7767_v42  ;;  %v12024_v28 = vrot.slane %v7494_v41, 9  ;;  %v7624_v3 = vrot.slane %v7495_v60, 5  ;;  %v7768_v4 = vld [vmem:[#allocation3 + $0xac] sm:$0xf]  ;;  %10618 = vmatprep.mubr.bf16.mxu0 %v13996_v27  ;;  %v8060_v10 = vsel %vm14566_vm4, %v8055_v24, %v8059_v57  ;;  %v12801_v27 = vpop.f32.mrf.mxu1 }
 0x426   : > { %v7222_v36 = vrot.slane %v7221_v2, 4  ;;  %v7627_v32 = vrot.slane %v7496_v14, 5  ;;  %v7836_v48 = vld [vmem:[#allocation3 + $0x8c] sm:$0x1]  ;;  %v8072_v63 = vshrl.u32 %v7834_v44, 16  ;;  %10619 = vmatmul.mubr.bf16.gmra.mxu0 %v13994_v29  ;;  %v8070_v26 = vsel %vm14566_vm4, %v8065_v6, %v8069_v23  ;;  %v16813_v23 = vpop.f32.mrf.mxu0 }
 0x427   : > { %7800 = vst [vmem:[#allocation2 + $0x39c] sm:$0xf] %v7768_v4  ;;  %v14000_v31 = vld [vmem:[#allocation2 + $0x20c] ss:$36 sps:$4 sm:$0xff]   ;;  %8287 = vst [vmem:[#allocation2 + $0x25c] sm:$0xf] %v8060_v10  ;;  %v7231_v18 = vor.u32 %v7230_v39, %v7226_v22  ;;  %v7625_v51 = vsel %vm14577_vm5, %v12024_v28, %v7624_v3  ;;  %v12802_v28 = vadd.f32 %v12801_v27, %v12800_v35 }
 0x428   : > { %v7626_v54 = vrot.slane %v7624_v3, 4  ;;  %v7001_v59 = vld [vmem:[#allocation3 + $0x78] sm:$0xf]  ;;  %8288 = vst [vmem:[#allocation2 + $0x280] sm:$0xf] %v8070_v26  ;;  %v7227_v30 = vsel %vm14566_vm4, %v7222_v36, %v7226_v22  ;;  %v8074_v45 = vrot.slane %v8072_v63, 4  ;;  %10457 = vmatprep.mubr.bf16.mxu1 %v14000_v31  ;;  %v12803_v63 = vpop.f32.mrf.mxu1 }
 0x429   : > { %7726 = vst [vmem:[#allocation2 + $0x254] sm:$0xf] %v7625_v51  ;;  %v8075_v47 = vshll.u32 %v7834_v44, 16  ;;  %v8081_v37 = vshll.u32 %v7835_v21, 16  ;;  %v7002_v61 = vld [vmem:[#allocation3 + $0x7c] sm:$0xf] }
 0x42a   : > { %v13998_v7 = vld [vmem:[#allocation2 + $0x208] ss:$36 sps:$4 sm:$0xff]   ;;  %v7232_v5 = vrot.slane %v7231_v18, 4  ;;  %v7236_v0 = vrot.slane %v7234_v62, 5  ;;  %7454 = vst [vmem:[#allocation2 + $0x250] sm:$0xf] %v7227_v30  ;;  %v7628_v19 = vsel %vm14577_vm5, %v7626_v54, %v7627_v32  ;;  %v12919_v54 = vpop.f32.mrf.mxu0 }
 0x42b   : > { %v8085_v11 = vshrl.u32 %v7835_v21, 16  ;;  %7727 = vst [vmem:[#allocation2 + $0x278] sm:$0xf] %v7628_v19  ;;  %v8077_v8 = vrot.slane %v8075_v47, 5  ;;  %v8083_v17 = vrot.slane %v8081_v37, 5  ;;  %v7239_v50 = vshrl.u32 %v7001_v59, 16  ;;  %10458 = vmatmul.mubr.bf16.gmra.mxu1 %v13998_v7 }
 0x42c   : > { %v7003_v12 = vld [vmem:[#allocation3 + $0x80] sm:$0x1]  ;;  %v7242_v55 = vshll.u32 %v7001_v59, 16  ;;  %v7237_v33 = vsel %vm14566_vm4, %v7232_v5, %v7236_v0  ;;  %v8091_v58 = vshll.u32 %v7836_v48, 16  ;;  %v7248_v41 = vshll.u32 %v7002_v61, 16  ;;  %v12804_v5 = vpop.f32.mrf.mxu1 }
 0x42d   : > { %v8087_v9 = vrot.slane %v8085_v11, 4  ;;  %v7498_v60 = vld [vmem:[#allocation3 + $0x7c] sm:$0xf]  ;;  %7455 = vst [vmem:[#allocation2 + $0x274] sm:$0xf] %v7237_v33  ;;  %v8078_v52 = vor.u32 %v8077_v8, %v8074_v45  ;;  %v7241_v57 = vrot.slane %v7239_v50, 4  ;;  %v16826_v8 = vadd.f32 %v16797_v13, %v12802_v28 }
 0x42e   : > { %v7244_v16 = vrot.slane %v7242_v55, 5  ;;  %v7252_v49 = vshrl.u32 %v7002_v61, 16  ;;  %v7497_v14 = vld [vmem:[#allocation3 + $0x78] sm:$0xe]  ;;  %v7250_v20 = vrot.slane %v7248_v41, 5  ;;  %v7258_v53 = vshll.u32 %v7003_v12, 16  ;;  %v12806_v27 = vpop.f32.mrf.mxu1 }
 0x42f   : > { %v8088_v56 = vor.u32 %v8087_v9, %v8083_v17  ;;  %v7499_v25 = vld [vmem:[#allocation3 + $0x80] sm:$0x1]  ;;  %v7837_v44 = vld [vmem:[#allocation3 + $0x90] sm:$0xf]  ;;  %v8079_v22 = vrot.slane %v8078_v52, 4  ;;  %v7631_v42 = vrot.slane %v7498_v60, 5 }
 0x430   : > { %v7245_v62 = vor.u32 %v7244_v16, %v7241_v57  ;;  %v7254_v21 = vrot.slane %v7252_v49, 4  ;;  %v7838_v29 = vld [vmem:[#allocation3 + $0x94] sm:$0xf]  ;;  %v14003_v24 = vld [vmem:[#allocation2 + $0x25c] ss:$36 sps:$4 sm:$0xff]   ;;  %v8093_v6 = vrot.slane %v8091_v58, 5  ;;  %v12921_v16 = vpop.f32.mrf.mxu0 }
 0x431   : > { %v8089_v2 = vrot.slane %v8088_v56, 4  ;;  %v12025_v39 = vrot.slane %v7497_v14, 9  ;;  %v14001_v3 = vld [vmem:[#allocation2 + $0x258] ss:$36 sps:$4 sm:$0xff]   ;;  %v8084_v4 = vsel %vm14566_vm4, %v8079_v22, %v8083_v17  ;;  %v7260_v36 = vrot.slane %v7258_v53, 5  ;;  %10626 = vmatprep.mubr.bf16.mxu0 %v14003_v24 }
 0x432   : > { %v7246_v10 = vrot.slane %v7245_v62, 4  ;;  %v7255_v34 = vor.u32 %v7254_v21, %v7250_v20  ;;  %v7839_v32 = vld [vmem:[#allocation3 + $0x98] sm:$0x1]  ;;  %v7004_v48 = vld [vmem:[#allocation3 + $0x84] sm:$0xf]  ;;  %v7633_v18 = vrot.slane %v7631_v42, 4  ;;  %10627 = vmatmul.mubr.bf16.gmra.mxu0 %v14001_v3  ;;  %v12805_v17 = vadd.f32 %v12804_v5, %v12803_v63 }
 0x433   : > { %v8094_v31 = vsel %vm14566_vm4, %v8089_v2, %v8093_v6  ;;  %8289 = vst [vmem:[#allocation2 + $0x2a4] sm:$0xf] %v8084_v4  ;;  %v7632_v26 = vsel %vm14577_vm5, %v12025_v39, %v7631_v42  ;;  %v7634_v51 = vrot.slane %v7499_v25, 5  ;;  %v7769_v59 = vld [vmem:[#allocation3 + $0xb4] sm:$0xf]  ;;  %v8096_v37 = vshrl.u32 %v7837_v44, 16 }
 0x434   : > { %v7770_v30 = vld [vmem:[#allocation3 + $0xb8] sm:$0xf]  ;;  %8290 = vst [vmem:[#allocation2 + $0x2c8] sm:$0xf] %v8094_v31  ;;  %v7251_v45 = vsel %vm14566_vm4, %v7246_v10, %v7250_v20  ;;  %v7256_v47 = vrot.slane %v7255_v34, 4  ;;  %v8099_v61 = vshll.u32 %v7837_v44, 16  ;;  %v16831_v28 = vadd.f32 %v16811_v46, %v12805_v17  ;;  %v12922_v10 = vpop.f32.mrf.mxu0 }
 0x435   : > { %7728 = vst [vmem:[#allocation2 + $0x29c] sm:$0xf] %v7632_v26  ;;  %v7005_v7 = vld [vmem:[#allocation3 + $0x88] sm:$0xf]  ;;  %7801 = vst [vmem:[#allocation2 + $0x3c0] sm:$0xf] %v7769_v59  ;;  %v7635_v19 = vsel %vm14577_vm5, %v7633_v18, %v7634_v51  ;;  %v16834_v4 = vadd.f32 %v12919_v54, %v16813_v23  ;;  %v12807_v26 = vpop.f32.mrf.mxu1 }
 0x436   : > { %7802 = vst [vmem:[#allocation2 + $0x3e4] sm:$0xf] %v7770_v30  ;;  %v14006_v0 = vld [vmem:[#allocation2 + $0x254] ss:$36 sps:$4 sm:$0xff]   ;;  %7456 = vst [vmem:[#allocation2 + $0x298] sm:$0xf] %v7251_v45  ;;  %v7261_v50 = vsel %vm14566_vm4, %v7256_v47, %v7260_v36 }
 0x437   : > { %v8105_v11 = vshll.u32 %v7838_v29, 16  ;;  %v7006_v38 = vld [vmem:[#allocation3 + $0x8c] sm:$0x1]  ;;  %v14004_v12 = vld [vmem:[#allocation2 + $0x250] ss:$36 sps:$4 sm:$0xff]   ;;  %v8098_v55 = vrot.slane %v8096_v37, 4  ;;  %10465 = vmatprep.mubr.bf16.mxu1 %v14006_v0  ;;  %v12808_v37 = vadd.f32 %v12807_v26, %v12806_v27  ;;  %v12809_v17 = vpop.f32.mrf.mxu1 }
 0x438   : > { %7729 = vst [vmem:[#allocation2 + $0x2c0] sm:$0xf] %v7635_v19  ;;  %v8101_v33 = vrot.slane %v8099_v61, 5  ;;  %v8109_v9 = vshrl.u32 %v7838_v29, 16  ;;  %7457 = vst [vmem:[#allocation2 + $0x2bc] sm:$0xf] %v7261_v50  ;;  %10466 = vmatmul.mubr.bf16.gmra.mxu1 %v14004_v12  ;;  %v16840_v61 = vadd.f32 %v12922_v10, %v12921_v16 }
 0x439   : > { %v8107_v58 = vrot.slane %v8105_v11, 5  ;;  %v8115_v41 = vshll.u32 %v7839_v32, 16  ;;  %v7263_v60 = vshrl.u32 %v7004_v48, 16  ;;  %v7266_v52 = vshll.u32 %v7004_v48, 16  ;;  %v7500_v57 = vld [vmem:[#allocation3 + $0x84] sm:$0xe] }
 0x43a   : > { %v8102_v13 = vor.u32 %v8101_v33, %v8098_v55  ;;  %v8111_v49 = vrot.slane %v8109_v9, 4  ;;  %v7272_v14 = vshll.u32 %v7005_v7, 16  ;;  %v7276_v35 = vshrl.u32 %v7005_v7, 16  ;;  %v7501_v56 = vld [vmem:[#allocation3 + $0x88] sm:$0xf] }
 0x43b   : > { %v8117_v20 = vrot.slane %v8115_v41, 5  ;;  %v7265_v53 = vrot.slane %v7263_v60, 4  ;;  %v7268_v25 = vrot.slane %v7266_v52, 5  ;;  %v7282_v44 = vshll.u32 %v7006_v38, 16  ;;  %v7502_v22 = vld [vmem:[#allocation3 + $0x8c] sm:$0x1] }
 0x43c   : > { %v8103_v62 = vrot.slane %v8102_v13, 4  ;;  %v8112_v21 = vor.u32 %v8111_v49, %v8107_v58  ;;  %v7274_v42 = vrot.slane %v7272_v14, 5  ;;  %v7278_v29 = vrot.slane %v7276_v35, 4  ;;  %v7840_v24 = vld [vmem:[#allocation3 + $0x9c] sm:$0xf] }
 0x43d   : > { %v14009_v2 = vld [vmem:[#allocation2 + $0x2a4] ss:$36 sps:$4 sm:$0xff]   ;;  %v7269_v6 = vor.u32 %v7268_v25, %v7265_v53  ;;  %v7284_v39 = vrot.slane %v7282_v44, 5  ;;  %v7841_v3 = vld [vmem:[#allocation3 + $0xa0] sm:$0xf]  ;;  %v12026_v63 = vrot.slane %v7500_v57, 9 }
 0x43e   : > { %v14007_v34 = vld [vmem:[#allocation2 + $0x2a0] ss:$36 sps:$4 sm:$0xff]   ;;  %v8108_v36 = vsel %vm14566_vm4, %v8103_v62, %v8107_v58  ;;  %v8113_v32 = vrot.slane %v8112_v21, 4  ;;  %v7279_v48 = vor.u32 %v7278_v29, %v7274_v42  ;;  %10634 = vmatprep.mubr.bf16.mxu0 %v14009_v2  ;;  %v7638_v51 = vrot.slane %v7501_v56, 5  ;;  %v7007_v30 = vld [vmem:[#allocation3 + $0x90] sm:$0xf]  ;;  %v12810_v62 = vpop.f32.mrf.mxu1 }
 0x43f   : > { %v7842_v31 = vld [vmem:[#allocation3 + $0xa4] sm:$0x1]  ;;  %8291 = vst [vmem:[#allocation2 + $0x2ec] sm:$0xf] %v8108_v36  ;;  %v7270_v18 = vrot.slane %v7269_v6, 4  ;;  %v7641_v46 = vrot.slane %v7502_v22, 5  ;;  %10635 = vmatmul.mubr.bf16.gmra.mxu0 %v14007_v34 }
 0x440   : > { %v8120_v59 = vshrl.u32 %v7840_v24, 16  ;;  %v14013_v45 = vld [vmem:[#allocation2 + $0x29c] ss:$36 sps:$4 sm:$0xff]   ;;  %v8118_v23 = vsel %vm14566_vm4, %v8113_v32, %v8117_v20  ;;  %v7280_v54 = vrot.slane %v7279_v48, 4  ;;  %v7008_v47 = vld [vmem:[#allocation3 + $0x94] sm:$0xf]  ;;  %v7639_v0 = vsel %vm14577_vm5, %v12026_v63, %v7638_v51  ;;  %v12924_v20 = vpop.f32.mrf.mxu0 }
 0x441   : > { %v14011_v7 = vld [vmem:[#allocation2 + $0x298] ss:$36 sps:$4 sm:$0xff]   ;;  %8292 = vst [vmem:[#allocation2 + $0x310] sm:$0xf] %v8118_v23  ;;  %v7275_v5 = vsel %vm14566_vm4, %v7270_v18, %v7274_v42  ;;  %v7640_v19 = vrot.slane %v7638_v51, 4  ;;  %10473 = vmatprep.mubr.bf16.mxu1 %v14013_v45  ;;  %v8123_v55 = vshll.u32 %v7840_v24, 16  ;;  %v16851_v63 = vadd.f32 %v16834_v4, %v12808_v37 }
 0x442   : > { %v8122_v11 = vrot.slane %v8120_v59, 4  ;;  %v7009_v38 = vld [vmem:[#allocation3 + $0x98] sm:$0x1]  ;;  %v7771_v12 = vld [vmem:[#allocation3 + $0xc0] sm:$0xf]  ;;  %v7285_v50 = vsel %vm14566_vm4, %v7280_v54, %v7284_v39  ;;  %v8129_v33 = vshll.u32 %v7841_v3, 16  ;;  %10474 = vmatmul.mubr.bf16.gmra.mxu1 %v14011_v7  ;;  %v12925_v2 = vpop.f32.mrf.mxu0 }
 0x443   : > { %7458 = vst [vmem:[#allocation2 + $0x2e0] sm:$0xf] %v7275_v5  ;;  %7730 = vst [vmem:[#allocation2 + $0x2e4] sm:$0xf] %v7639_v0  ;;  %v8133_v9 = vshrl.u32 %v7841_v3, 16  ;;  %v7642_v41 = vsel %vm14577_vm5, %v7640_v19, %v7641_v46  ;;  %v8139_v60 = vshll.u32 %v7842_v31, 16  ;;  %v12811_v31 = vadd.f32 %v12810_v62, %v12809_v17 }
 0x444   : > { %v7772_v58 = vld [vmem:[#allocation3 + $0xc4] sm:$0xf]  ;;  %7803 = vst [vmem:[#allocation2 + $0x408] sm:$0xf] %v7771_v12  ;;  %7459 = vst [vmem:[#allocation2 + $0x304] sm:$0xf] %v7285_v50  ;;  %v16853_v18 = vadd.f32 %v12925_v2, %v12924_v20  ;;  %v16855_v51 = vpop.f32.mrf.mxu0 }
 0x445   : > { %v7287_v52 = vshrl.u32 %v7007_v30, 16  ;;  %v7290_v57 = vshll.u32 %v7007_v30, 16  ;;  %v7503_v16 = vld [vmem:[#allocation3 + $0x90] sm:$0xe]  ;;  %7804 = vst [vmem:[#allocation2 + $0x42c] sm:$0xf] %v7772_v58  ;;  %v16866_v12 = vadd.f32 %v16840_v61, %v12811_v31 }
 0x446   : > { %7731 = vst [vmem:[#allocation2 + $0x308] sm:$0xf] %v7642_v41  ;;  %v8125_v13 = vrot.slane %v8123_v55, 5  ;;  %v8131_v49 = vrot.slane %v8129_v33, 5  ;;  %v8135_v14 = vrot.slane %v8133_v9, 4  ;;  %v7296_v35 = vshll.u32 %v7008_v47, 16  ;;  %v12928_v0 = vpop.f32.mrf.mxu0 }
 0x447   : > { %v7504_v56 = vld [vmem:[#allocation3 + $0x94] sm:$0xf]  ;;  %v8141_v53 = vrot.slane %v8139_v60, 5  ;;  %v7289_v25 = vrot.slane %v7287_v52, 4  ;;  %v7292_v44 = vrot.slane %v7290_v57, 5  ;;  %v7300_v22 = vshrl.u32 %v7008_v47, 16 }
 0x448   : > { %v8126_v21 = vor.u32 %v8125_v13, %v8122_v11  ;;  %v8136_v42 = vor.u32 %v8135_v14, %v8131_v49  ;;  %v7298_v29 = vrot.slane %v7296_v35, 5  ;;  %v7306_v27 = vshll.u32 %v7009_v38, 16  ;;  %v7505_v24 = vld [vmem:[#allocation3 + $0x98] sm:$0x1]  ;;  %v7843_v34 = vld [vmem:[#allocation3 + $0xa8] sm:$0xf]  ;;  %v12930_v13 = vpop.f32.mrf.mxu0 }
 0x449   : > { %v7293_v6 = vor.u32 %v7292_v44, %v7289_v25  ;;  %v7302_v39 = vrot.slane %v7300_v22, 4  ;;  %v12027_v3 = vrot.slane %v7503_v16, 9  ;;  %v7645_v10 = vrot.slane %v7504_v56, 5  ;;  %v7844_v36 = vld [vmem:[#allocation3 + $0xac] sm:$0xf] }
 0x44a   : > { %v14016_v32 = vld [vmem:[#allocation2 + $0x2ec] ss:$36 sps:$4 sm:$0xff]   ;;  %v8127_v48 = vrot.slane %v8126_v21, 4  ;;  %v8137_v59 = vrot.slane %v8136_v42, 4  ;;  %v7308_v23 = vrot.slane %v7306_v27, 5  ;;  %v7648_v37 = vrot.slane %v7505_v24, 5  ;;  %v12931_v21 = vpop.f32.mrf.mxu0 }
 0x44b   : > { %v7845_v26 = vld [vmem:[#allocation3 + $0xb0] sm:$0x1]  ;;  %v14014_v46 = vld [vmem:[#allocation2 + $0x2e8] ss:$36 sps:$4 sm:$0xff]   ;;  %v7294_v30 = vrot.slane %v7293_v6, 4  ;;  %v7303_v45 = vor.u32 %v7302_v39, %v7298_v29  ;;  %10642 = vmatprep.mubr.bf16.mxu0 %v14016_v32  ;;  %v7646_v47 = vsel %vm14577_vm5, %v12027_v3, %v7645_v10  ;;  %v7647_v4 = vrot.slane %v7645_v10, 4 }
 0x44c   : > { %v8132_v54 = vsel %vm14566_vm4, %v8127_v48, %v8131_v49  ;;  %v7010_v7 = vld [vmem:[#allocation3 + $0x9c] sm:$0xf]  ;;  %v7011_v5 = vld [vmem:[#allocation3 + $0xa0] sm:$0xf]  ;;  %10643 = vmatmul.mubr.bf16.gmra.mxu0 %v14014_v46  ;;  %v8142_v11 = vsel %vm14566_vm4, %v8137_v59, %v8141_v53  ;;  %7732 = vst [vmem:[#allocation2 + $0x32c] sm:$0xf] %v7646_v47  ;;  %v12812_v53 = vpop.f32.mrf.mxu1  ;;  %v16872_v32 = vpop.f32.mrf.mxu0 }
 0x44d   : > { %v14019_v19 = vld [vmem:[#allocation2 + $0x2e4] ss:$36 sps:$4 sm:$0xff]   ;;  %8293 = vst [vmem:[#allocation2 + $0x334] sm:$0xf] %v8132_v54  ;;  %v7299_v38 = vsel %vm14566_vm4, %v7294_v30, %v7298_v29  ;;  %v7304_v17 = vrot.slane %v7303_v45, 4  ;;  %v7649_v33 = vsel %vm14577_vm5, %v7647_v4, %v7648_v37  ;;  %v8144_v9 = vshrl.u32 %v7843_v34, 16 }
 0x44e   : > { %v7012_v50 = vld [vmem:[#allocation3 + $0xa4] sm:$0x1]  ;;  %8294 = vst [vmem:[#allocation2 + $0x358] sm:$0xf] %v8142_v11  ;;  %7460 = vst [vmem:[#allocation2 + $0x328] sm:$0xf] %v7299_v38  ;;  %10481 = vmatprep.mubr.bf16.mxu1 %v14019_v19  ;;  %v12929_v4 = vadd.f32 %v12928_v0, %v16855_v51 }
 0x44f   : > { %v14017_v55 = vld [vmem:[#allocation2 + $0x2e0] ss:$36 sps:$4 sm:$0xff]   ;;  %v8147_v58 = vshll.u32 %v7843_v34, 16  ;;  %v8153_v41 = vshll.u32 %v7844_v36, 16  ;;  %v7309_v60 = vsel %vm14566_vm4, %v7304_v17, %v7308_v23  ;;  %7733 = vst [vmem:[#allocation2 + $0x350] sm:$0xf] %v7649_v33  ;;  %v12813_v34 = vpop.f32.mrf.mxu1 }
 0x450   : > { %v8157_v52 = vshrl.u32 %v7844_v36, 16  ;;  %v8163_v57 = vshll.u32 %v7845_v26, 16  ;;  %v7311_v16 = vshrl.u32 %v7010_v7, 16  ;;  %v7506_v61 = vld [vmem:[#allocation3 + $0x9c] sm:$0xe]  ;;  %10482 = vmatmul.mubr.bf16.gmra.mxu1 %v14017_v55  ;;  %v8146_v49 = vrot.slane %v8144_v9, 4 }
 0x451   : > { %7461 = vst [vmem:[#allocation2 + $0x34c] sm:$0xf] %v7309_v60  ;;  %v8149_v14 = vrot.slane %v8147_v58, 5  ;;  %v8155_v35 = vrot.slane %v8153_v41, 5  ;;  %v7314_v56 = vshll.u32 %v7010_v7, 16  ;;  %v7320_v62 = vshll.u32 %v7011_v5, 16  ;;  %v12815_v47 = vpop.f32.mrf.mxu1  ;;  %v16877_v7 = vpop.f32.mrf.mxu0 }
 0x452   : > { %v7507_v20 = vld [vmem:[#allocation3 + $0xa0] sm:$0xf]  ;;  %v8159_v25 = vrot.slane %v8157_v52, 4  ;;  %v8165_v44 = vrot.slane %v8163_v57, 5  ;;  %v7313_v22 = vrot.slane %v7311_v16, 4  ;;  %v7324_v27 = vshrl.u32 %v7011_v5, 16 }
 0x453   : > { %v8150_v42 = vor.u32 %v8149_v14, %v8146_v49  ;;  %v7316_v29 = vrot.slane %v7314_v56, 5  ;;  %v7330_v24 = vshll.u32 %v7012_v50, 16  ;;  %v7508_v2 = vld [vmem:[#allocation3 + $0xa4] sm:$0x1]  ;;  %v7322_v39 = vrot.slane %v7320_v62, 5  ;;  %v12816_v0 = vpop.f32.mrf.mxu1 }
 0x454   : > { %v8160_v6 = vor.u32 %v8159_v25, %v8155_v35  ;;  %v12028_v3 = vrot.slane %v7506_v61, 9  ;;  %v7652_v10 = vrot.slane %v7507_v20, 5  ;;  %v7846_v36 = vld [vmem:[#allocation3 + $0xb4] sm:$0xf]  ;;  %v7326_v26 = vrot.slane %v7324_v27, 4  ;;  %v12936_v20 = vpop.f32.mrf.mxu0 }
 0x455   : > { %v8151_v48 = vrot.slane %v8150_v42, 4  ;;  %v7317_v31 = vor.u32 %v7316_v29, %v7313_v22  ;;  %v7332_v46 = vrot.slane %v7330_v24, 5  ;;  %v7847_v59 = vld [vmem:[#allocation3 + $0xb8] sm:$0xf]  ;;  %v12814_v54 = vadd.f32 %v12813_v34, %v12812_v53  ;;  %v7848_v37 = vld [vmem:[#allocation3 + $0xbc] sm:$0x1]  ;;  %v12818_v49 = vpop.f32.mrf.mxu1 }
 0x456   : > { %v14022_v30 = vld [vmem:[#allocation2 + $0x334] ss:$36 sps:$4 sm:$0xff]   ;;  %v8161_v45 = vrot.slane %v8160_v6, 4  ;;  %v7653_v23 = vsel %vm14577_vm5, %v12028_v3, %v7652_v10  ;;  %v7327_v38 = vor.u32 %v7326_v26, %v7322_v39  ;;  %v7654_v17 = vrot.slane %v7652_v10, 4  ;;  %v14026_v50 = vld [vmem:[#allocation2 + $0x32c] ss:$36 sps:$4 sm:$0xff]  }
 0x457   : > { %v14020_v5 = vld [vmem:[#allocation2 + $0x330] ss:$36 sps:$4 sm:$0xff]   ;;  %v8156_v19 = vsel %vm14566_vm4, %v8151_v48, %v8155_v35  ;;  %v7318_v11 = vrot.slane %v7317_v31, 4  ;;  %7734 = vst [vmem:[#allocation2 + $0x374] sm:$0xf] %v7653_v23  ;;  %10650 = vmatprep.mubr.bf16.mxu0 %v14022_v30  ;;  %v7655_v33 = vrot.slane %v7508_v2, 5  ;;  %v16884_v51 = vadd.f32 %v16853_v18, %v12814_v54  ;;  %10489 = vmatprep.mubr.bf16.mxu1 %v14026_v50  ;;  %v12819_v24 = vpop.f32.mrf.mxu1  ;;  %v12937_v2 = vpop.f32.mrf.mxu0 }
 0x458   : > { %v8166_v55 = vsel %vm14566_vm4, %v8161_v45, %v8165_v44  ;;  %8295 = vst [vmem:[#allocation2 + $0x37c] sm:$0xf] %v8156_v19  ;;  %v16886_v9 = vadd.f32 %v12931_v21, %v12930_v13  ;;  %v7013_v58 = vld [vmem:[#allocation3 + $0xa8] sm:$0xf]  ;;  %10651 = vmatmul.mubr.bf16.gmra.mxu0 %v14020_v5  ;;  %v7328_v52 = vrot.slane %v7327_v38, 4  ;;  %v12817_v57 = vadd.f32 %v12816_v0, %v12815_v47 }
 0x459   : > { %v14024_v41 = vld [vmem:[#allocation2 + $0x328] ss:$36 sps:$4 sm:$0xff]   ;;  %8296 = vst [vmem:[#allocation2 + $0x3a0] sm:$0xf] %v8166_v55  ;;  %v7323_v60 = vsel %vm14566_vm4, %v7318_v11, %v7322_v39  ;;  %v8168_v16 = vshrl.u32 %v7846_v36, 16  ;;  %v7656_v18 = vsel %vm14577_vm5, %v7654_v17, %v7655_v33  ;;  %v8171_v14 = vshll.u32 %v7846_v36, 16  ;;  %v12939_v30 = vpop.f32.mrf.mxu0 }
 0x45a   : > { %v7014_v61 = vld [vmem:[#allocation3 + $0xac] sm:$0xf]  ;;  %7462 = vst [vmem:[#allocation2 + $0x370] sm:$0xf] %v7323_v60  ;;  %v8177_v13 = vshll.u32 %v7847_v59, 16  ;;  %v8181_v35 = vshrl.u32 %v7847_v59, 16  ;;  %10490 = vmatmul.mubr.bf16.gmra.mxu1 %v14024_v41  ;;  %v7333_v53 = vsel %vm14566_vm4, %v7328_v52, %v7332_v46  ;;  %v16894_v25 = vadd.f32 %v12929_v4, %v12817_v57  ;;  %v12821_v59 = vpop.f32.mrf.mxu1 }
 0x45b   : > { %v7015_v56 = vld [vmem:[#allocation3 + $0xb0] sm:$0x1]  ;;  %7735 = vst [vmem:[#allocation2 + $0x398] sm:$0xf] %v7656_v18  ;;  %v8170_v44 = vrot.slane %v8168_v16, 4  ;;  %v8187_v22 = vshll.u32 %v7848_v37, 16  ;;  %v12820_v5 = vadd.f32 %v12819_v24, %v12818_v49  ;;  %v12935_v19 = vadd.f32 %v16877_v7, %v16872_v32  ;;  %v12940_v50 = vpop.f32.mrf.mxu0 }
 0x45c   : > { %v7509_v62 = vld [vmem:[#allocation3 + $0xa8] sm:$0xe]  ;;  %7463 = vst [vmem:[#allocation2 + $0x394] sm:$0xf] %v7333_v53  ;;  %v8173_v21 = vrot.slane %v8171_v14, 5  ;;  %v8179_v42 = vrot.slane %v8177_v13, 5  ;;  %v12822_v11 = vpop.f32.mrf.mxu1  ;;  %v16898_v17 = vadd.f32 %v12937_v2, %v12936_v20  ;;  %v16911_v20 = vadd.f32 %v12940_v50, %v12939_v30 }
 0x45d   : > { %v8183_v29 = vrot.slane %v8181_v35, 4  ;;  %v7335_v27 = vshrl.u32 %v7013_v58, 16  ;;  %v8189_v6 = vrot.slane %v8187_v22, 5  ;;  %v7338_v39 = vshll.u32 %v7013_v58, 16  ;;  %v7510_v26 = vld [vmem:[#allocation3 + $0xac] sm:$0xf]  ;;  %v16907_v18 = vpop.f32.mrf.mxu0 }
 0x45e   : > { %v7344_v3 = vshll.u32 %v7014_v61, 16  ;;  %v7348_v10 = vshrl.u32 %v7014_v61, 16  ;;  %v8174_v34 = vor.u32 %v8173_v21, %v8170_v44  ;;  %v7354_v31 = vshll.u32 %v7015_v56, 16  ;;  %v7511_v46 = vld [vmem:[#allocation3 + $0xb0] sm:$0x1]  ;;  %v16905_v32 = vpop.f32.mrf.mxu1 }
 0x45f   : > { %v8184_v36 = vor.u32 %v8183_v29, %v8179_v42  ;;  %v7337_v48 = vrot.slane %v7335_v27, 4  ;;  %v7340_v45 = vrot.slane %v7338_v39, 5  ;;  %v12029_v47 = vrot.slane %v7509_v62, 9  ;;  %v7849_v38 = vld [vmem:[#allocation3 + $0xc0] sm:$0xf] }
 0x460   : > { %v7346_v23 = vrot.slane %v7344_v3, 5  ;;  %v7350_v54 = vrot.slane %v7348_v10, 4  ;;  %v14029_v4 = vld [vmem:[#allocation2 + $0x37c] ss:$36 sps:$4 sm:$0xff]   ;;  %v8175_v37 = vrot.slane %v8174_v34, 4  ;;  %v7356_v41 = vrot.slane %v7354_v31, 5  ;;  %v12825_v21 = vpop.f32.mrf.mxu1 }
 0x461   : > { %v14027_v55 = vld [vmem:[#allocation2 + $0x378] ss:$36 sps:$4 sm:$0xff]   ;;  %v8185_v33 = vrot.slane %v8184_v36, 4  ;;  %v7341_v0 = vor.u32 %v7340_v45, %v7337_v48  ;;  %10658 = vmatprep.mubr.bf16.mxu0 %v14029_v4  ;;  %v7659_v52 = vrot.slane %v7510_v26, 5  ;;  %v7662_v57 = vrot.slane %v7511_v46, 5 }
 0x462   : > { %v7351_v58 = vor.u32 %v7350_v54, %v7346_v23  ;;  %v8180_v60 = vsel %vm14566_vm4, %v8175_v37, %v8179_v42  ;;  %v16903_v16 = vadd.f32 %v16886_v9, %v12820_v5  ;;  %v7850_v7 = vld [vmem:[#allocation3 + $0xc4] sm:$0xf]  ;;  %v7851_v61 = vld [vmem:[#allocation3 + $0xc8] sm:$0x1]  ;;  %v14032_v49 = vld [vmem:[#allocation2 + $0x374] ss:$36 sps:$4 sm:$0xff]   ;;  %10659 = vmatmul.mubr.bf16.gmra.mxu0 %v14027_v55  ;;  %v12823_v35 = vadd.f32 %v12822_v11, %v12821_v59  ;;  %v12943_v42 = vpop.f32.mrf.mxu0  ;;  %v12827_v48 = vpop.f32.mrf.mxu1 }
 0x463   : > { %v8190_v14 = vsel %vm14566_vm4, %v8185_v33, %v8189_v6  ;;  %8297 = vst [vmem:[#allocation2 + $0x3c4] sm:$0xf] %v8180_v60  ;;  %v7342_v13 = vrot.slane %v7341_v0, 4  ;;  %v7016_v56 = vld [vmem:[#allocation3 + $0xb4] sm:$0xf]  ;;  %v7660_v44 = vsel %vm14577_vm5, %v12029_v47, %v7659_v52  ;;  %v7661_v22 = vrot.slane %v7659_v52, 4  ;;  %10497 = vmatprep.mubr.bf16.mxu1 %v14032_v49 }
 0x464   : > { %v14030_v53 = vld [vmem:[#allocation2 + $0x370] ss:$36 sps:$4 sm:$0xff]   ;;  %8298 = vst [vmem:[#allocation2 + $0x3e8] sm:$0xf] %v8190_v14  ;;  %v7352_v9 = vrot.slane %v7351_v58, 4  ;;  %v8192_v62 = vshrl.u32 %v7849_v38, 16  ;;  %v16917_v27 = vadd.f32 %v12935_v19, %v12823_v35  ;;  %v16923_v31 = vpop.f32.mrf.mxu0  ;;  %v12828_v5 = vpop.f32.mrf.mxu1  ;;  %v12826_v14 = vadd.f32 %v12825_v21, %v16905_v32 }
 0x465   : > { %v7347_v29 = vsel %vm14566_vm4, %v7342_v13, %v7346_v23  ;;  %7736 = vst [vmem:[#allocation2 + $0x3bc] sm:$0xf] %v7660_v44  ;;  %v8195_v24 = vshll.u32 %v7849_v38, 16  ;;  %v8201_v2 = vshll.u32 %v7850_v7, 16  ;;  %v7017_v6 = vld [vmem:[#allocation3 + $0xb8] sm:$0xf]  ;;  %10498 = vmatmul.mubr.bf16.gmra.mxu1 %v14030_v53  ;;  %v7663_v3 = vsel %vm14577_vm5, %v7661_v22, %v7662_v57 }
 0x466   : > { %v7357_v39 = vsel %vm14566_vm4, %v7352_v9, %v7356_v41  ;;  %7464 = vst [vmem:[#allocation2 + $0x3b8] sm:$0xf] %v7347_v29  ;;  %v8194_v10 = vrot.slane %v8192_v62, 4  ;;  %v8205_v34 = vshrl.u32 %v7850_v7, 16  ;;  %v7018_v36 = vld [vmem:[#allocation3 + $0xbc] sm:$0x1]  ;;  %v16925_v19 = vpop.f32.mrf.mxu0  ;;  %v16927_v52 = vpop.f32.mrf.mxu1  ;;  %v12829_v13 = vadd.f32 %v12828_v5, %v12827_v48 }
 0x467   : > { %7465 = vst [vmem:[#allocation2 + $0x3dc] sm:$0xf] %v7357_v39  ;;  %7737 = vst [vmem:[#allocation2 + $0x3e0] sm:$0xf] %v7663_v3  ;;  %v8197_v26 = vrot.slane %v8195_v24, 5  ;;  %v8203_v46 = vrot.slane %v8201_v2, 5  ;;  %v16933_v35 = vadd.f32 %v12943_v42, %v16907_v18 }
 0x468   : > { %v8211_v59 = vshll.u32 %v7851_v61, 16  ;;  %v7359_v30 = vshrl.u32 %v7016_v56, 16  ;;  %v8207_v45 = vrot.slane %v8205_v34, 4  ;;  %v7362_v23 = vshll.u32 %v7016_v56, 16  ;;  %v7512_v4 = vld [vmem:[#allocation3 + $0xb4] sm:$0xe]  ;;  %v16929_v7 = vpop.f32.mrf.mxu0  ;;  %v12831_v24 = vpop.f32.mrf.mxu1 }
 0x469   : > { %v7368_v54 = vshll.u32 %v7017_v6, 16  ;;  %v7372_v47 = vshrl.u32 %v7017_v6, 16  ;;  %v7513_v37 = vld [vmem:[#allocation3 + $0xb8] sm:$0xf]  ;;  %v8198_v11 = vor.u32 %v8197_v26, %v8194_v10  ;;  %v7378_v55 = vshll.u32 %v7018_v36, 16 }
 0x46a   : > { %v8213_v38 = vrot.slane %v8211_v59, 5  ;;  %v7361_v50 = vrot.slane %v7359_v30, 4  ;;  %v7514_v33 = vld [vmem:[#allocation3 + $0xbc] sm:$0x1]  ;;  %v8208_v0 = vor.u32 %v8207_v45, %v8203_v46  ;;  %v7364_v58 = vrot.slane %v7362_v23, 5  ;;  %v16935_v2 = vpop.f32.mrf.mxu0  ;;  %v12833_v26 = vpop.f32.mrf.mxu1 }
 0x46b   : > { %v7370_v41 = vrot.slane %v7368_v54, 5  ;;  %v7374_v60 = vrot.slane %v7372_v47, 4  ;;  %v7019_v57 = vld [vmem:[#allocation3 + $0xc0] sm:$0xf]  ;;  %v14035_v61 = vld [vmem:[#allocation2 + $0x3c4] ss:$36 sps:$4 sm:$0xff]   ;;  %v16942_v34 = vadd.f32 %v16898_v17, %v12826_v14  ;;  %v16945_v36 = vadd.f32 %v16911_v20, %v12829_v13 }
 0x46c   : > { %v8199_v49 = vrot.slane %v8198_v11, 4  ;;  %v7020_v56 = vld [vmem:[#allocation3 + $0xc4] sm:$0xf]  ;;  %v8209_v9 = vrot.slane %v8208_v0, 4  ;;  %v7365_v44 = vor.u32 %v7364_v58, %v7361_v50  ;;  %v7380_v62 = vrot.slane %v7378_v55, 5  ;;  %10666 = vmatprep.mubr.bf16.mxu0 %v14035_v61  ;;  %v12834_v5 = vpop.f32.mrf.mxu1 }
 0x46d   : > { %v14033_v53 = vld [vmem:[#allocation2 + $0x3c0] ss:$36 sps:$4 sm:$0xff]   ;;  %v7375_v22 = vor.u32 %v7374_v60, %v7370_v41  ;;  %v7021_v29 = vld [vmem:[#allocation3 + $0xc8] sm:$0x1]  ;;  %v12030_v39 = vrot.slane %v7512_v4, 9  ;;  %v7666_v32 = vrot.slane %v7513_v37, 5 }
 0x46e   : > { %v8204_v6 = vsel %vm14566_vm4, %v8199_v49, %v8203_v46  ;;  %v7669_v21 = vrot.slane %v7514_v33, 5  ;;  %v7515_v3 = vld [vmem:[#allocation3 + $0xc0] sm:$0xe]  ;;  %10667 = vmatmul.mubr.bf16.gmra.mxu0 %v14033_v53  ;;  %v8214_v42 = vsel %vm14566_vm4, %v8209_v9, %v8213_v38  ;;  %v7366_v10 = vrot.slane %v7365_v44, 4  ;;  %v7516_v48 = vld [vmem:[#allocation3 + $0xc4] sm:$0xf]  ;;  %v12951_v46 = vpop.f32.mrf.mxu0 }
 0x46f   : > { %v14039_v18 = vld [vmem:[#allocation2 + $0x3bc] ss:$36 sps:$4 sm:$0xff]   ;;  %8299 = vst [vmem:[#allocation2 + $0x40c] sm:$0xf] %v8204_v6  ;;  %8300 = vst [vmem:[#allocation2 + $0x430] sm:$0xf] %v8214_v42  ;;  %v7667_v45 = vsel %vm14577_vm5, %v12030_v39, %v7666_v32  ;;  %v12947_v44 = vadd.f32 %v16925_v19, %v16923_v31 }
 0x470   : > { %v14037_v59 = vld [vmem:[#allocation2 + $0x3b8] ss:$36 sps:$4 sm:$0xff]   ;;  %v7376_v30 = vrot.slane %v7375_v22, 4  ;;  %v7668_v23 = vrot.slane %v7666_v32, 4  ;;  %v7383_v54 = vshrl.u32 %v7019_v57, 16  ;;  %10505 = vmatprep.mubr.bf16.mxu1 %v14039_v18  ;;  %v7371_v47 = vsel %vm14566_vm4, %v7366_v10, %v7370_v41  ;;  %v12952_v11 = vpop.f32.mrf.mxu0 }
 0x471   : > { %7738 = vst [vmem:[#allocation2 + $0x404] sm:$0xf] %v7667_v45  ;;  %v7386_v17 = vshll.u32 %v7019_v57, 16  ;;  %v7392_v4 = vshll.u32 %v7020_v56, 16  ;;  %v7396_v20 = vshrl.u32 %v7020_v56, 16  ;;  %10506 = vmatmul.mubr.bf16.gmra.mxu1 %v14037_v59  ;;  %v7402_v33 = vshll.u32 %v7021_v29, 16  ;;  %v12836_v57 = vpop.f32.mrf.mxu1 }
 0x472   : > { %v7517_v37 = vld [vmem:[#allocation3 + $0xc8] sm:$0x1]  ;;  %v7381_v38 = vsel %vm14566_vm4, %v7376_v30, %v7380_v62  ;;  %7466 = vst [vmem:[#allocation2 + $0x400] sm:$0xf] %v7371_v47  ;;  %v7670_v50 = vsel %vm14577_vm5, %v7668_v23, %v7669_v21  ;;  %v7385_v55 = vrot.slane %v7383_v54, 4  ;;  %v12031_v60 = vrot.slane %v7515_v3, 9  ;;  %v12954_v61 = vpop.f32.mrf.mxu0 }
 0x473   : > { %7467 = vst [vmem:[#allocation2 + $0x424] sm:$0xf] %v7381_v38  ;;  %7739 = vst [vmem:[#allocation2 + $0x428] sm:$0xf] %v7670_v50  ;;  %v7388_v0 = vrot.slane %v7386_v17, 5  ;;  %v7394_v58 = vrot.slane %v7392_v4, 5  ;;  %v12832_v56 = vadd.f32 %v12831_v24, %v16927_v52  ;;  %v12835_v22 = vadd.f32 %v12834_v5, %v12833_v26  ;;  %v12837_v32 = vpop.f32.mrf.mxu1 }
 0x474   : > { %v7398_v41 = vrot.slane %v7396_v20, 4  ;;  %v7404_v49 = vrot.slane %v7402_v33, 5  ;;  %v7673_v14 = vrot.slane %v7516_v48, 5  ;;  %v7676_v13 = vrot.slane %v7517_v37, 5  ;;  %v14052_v62 = vld [vmem:[#allocation2 + $0x454] ss:$36 sps:$4 sm:$0xff]   ;;  %v12955_v21 = vpop.f32.mrf.mxu0 }
 0x475   : > { %v7389_v53 = vor.u32 %v7388_v0, %v7385_v55  ;;  %v8303_v29 = vld [vmem:[#allocation3 + $0x18] sm:$0xe]  ;;  %v8304_v6 = vld [vmem:[#allocation3 + $0x1c] sm:$0xf]  ;;  %v8305_v39 = vld [vmem:[#allocation3 + $0x20] sm:$0x1]  ;;  %v16961_v42 = vadd.f32 %v16933_v35, %v12832_v56  ;;  %v12950_v52 = vadd.f32 %v16935_v2, %v16929_v7  ;;  %v16967_v26 = vadd.f32 %v12947_v44, %v12835_v22  ;;  %v12839_v30 = vpop.f32.mrf.mxu1 }
 0x476   : > { %v7399_v9 = vor.u32 %v7398_v41, %v7394_v58  ;;  %v7674_v3 = vsel %vm14577_vm5, %v12031_v60, %v7673_v14  ;;  %v7675_v18 = vrot.slane %v7673_v14, 4  ;;  %v8309_v24 = vld [vmem:[#allocation3 + $0x30] sm:$0xe]  ;;  %v8310_v10 = vld [vmem:[#allocation3 + $0x34] sm:$0xf]  ;;  %v12838_v59 = vadd.f32 %v12837_v32, %v12836_v57  ;;  %v12957_v23 = vpop.f32.mrf.mxu0 }
 0x477   : > { %v16965_v31 = vld [vmem:[#allocation3 + $0x38] sm:$0x1]  ;;  %v14042_v19 = vld [vmem:[#allocation2 + $0x40c] ss:$36 sps:$4 sm:$0xff]   ;;  %v7390_v48 = vrot.slane %v7389_v53, 4  ;;  %v12953_v45 = vadd.f32 %v12952_v11, %v12951_v46  ;;  %v12032_v2 = vrot.slane %v8303_v29, 9  ;;  %v12840_v38 = vpop.f32.mrf.mxu1  ;;  %v12956_v46 = vadd.f32 %v12955_v21, %v12954_v61 }
 0x478   : > { %7740 = vst [vmem:[#allocation2 + $0x44c] sm:$0xf] %v7674_v3  ;;  %v8312_v54 = vld [vmem:[#allocation3 + $0x3c] sm:$0xe]  ;;  %v8313_v47 = vld [vmem:[#allocation3 + $0x40] sm:$0xf]  ;;  %v7677_v7 = vsel %vm14577_vm5, %v7675_v18, %v7676_v13  ;;  %10674 = vmatprep.mubr.bf16.mxu0 %v14042_v19  ;;  %v16973_v5 = vadd.f32 %v12950_v52, %v12838_v59  ;;  %v12958_v11 = vpop.f32.mrf.mxu0  ;;  %v12841_v60 = vadd.f32 %v12840_v38, %v12839_v30 }
 0x479   : > { %v14040_v35 = vld [vmem:[#allocation2 + $0x408] ss:$36 sps:$4 sm:$0xff]   ;;  %v7400_v17 = vrot.slane %v7399_v9, 4  ;;  %v8401_v4 = vrot.slane %v8304_v6, 5  ;;  %v7395_v20 = vsel %vm14566_vm4, %v7390_v48, %v7394_v58  ;;  %7741 = vst [vmem:[#allocation2 + $0x470] sm:$0xf] %v7677_v7  ;;  %v12842_v56 = vpop.f32.mrf.mxu1 }
 0x47a   : > { %v8404_v37 = vrot.slane %v8305_v39, 5  ;;  %v8314_v50 = vld [vmem:[#allocation3 + $0x44] sm:$0x1]  ;;  %v16975_v55 = vld [vmem:[#allocation3 + $0x48] sm:$0xe]  ;;  %10675 = vmatmul.mubr.bf16.gmra.mxu0 %v14040_v35  ;;  %v12034_v53 = vrot.slane %v8309_v24, 9  ;;  %v12960_v44 = vpop.f32.mrf.mxu0  ;;  %v16990_v6 = vadd.f32 %v12953_v45, %v12841_v60 }
 0x47b   : > { %v14045_v33 = vld [vmem:[#allocation2 + $0x404] ss:$36 sps:$4 sm:$0xff]   ;;  %v7405_v0 = vsel %vm14566_vm4, %v7400_v17, %v7404_v49  ;;  %7468 = vst [vmem:[#allocation2 + $0x448] sm:$0xf] %v7395_v20  ;;  %v8402_v41 = vsel %vm14577_vm5, %v12032_v2, %v8401_v4  ;;  %v8403_v58 = vrot.slane %v8401_v4, 4  ;;  %10682 = vmatprep.mubr.bf16.mxu0 %v14052_v62  ;;  %v8415_v9 = vrot.slane %v8310_v10, 5  ;;  %v12843_v52 = vpop.f32.mrf.mxu1 }
 0x47c   : > { %v8316_v57 = vld [vmem:[#allocation3 + $0x4c] sm:$0xf]  ;;  %v16981_v14 = vld [vmem:[#allocation3 + $0x50] sm:$0x1]  ;;  %v16983_v13 = vld [vmem:[#allocation3 + $0x54] sm:$0xe]  ;;  %v16986_v49 = vadd.f32 %v12958_v11, %v12957_v23  ;;  %10513 = vmatprep.mubr.bf16.mxu1 %v14045_v33  ;;  %v12961_v10 = vpop.f32.mrf.mxu0  ;;  %v12844_v48 = vadd.f32 %v12843_v52, %v12842_v56 }
 0x47d   : > { %v14043_v61 = vld [vmem:[#allocation2 + $0x400] ss:$36 sps:$4 sm:$0xff]   ;;  %7469 = vst [vmem:[#allocation2 + $0x46c] sm:$0xf] %v7405_v0  ;;  %8543 = vst [vmem:[#allocation2 + $0x20] sm:$0xf] %v8402_v41  ;;  %v8405_v29 = vsel %vm14577_vm5, %v8403_v58, %v8404_v37  ;;  %v8416_v3 = vsel %vm14577_vm5, %v12034_v53, %v8415_v9  ;;  %v16999_v45 = vadd.f32 %v12961_v10, %v12960_v44  ;;  %v12845_v35 = vpop.f32.mrf.mxu1 }
 0x47e   : > { %v8418_v1 = vrot.slane %v16965_v31, 5  ;;  %v14050_v22 = vld [vmem:[#allocation2 + $0x450] ss:$36 sps:$4 sm:$0xff]   ;;  %v12035_v39 = vrot.slane %v8312_v54, 9  ;;  %v8422_v32 = vrot.slane %v8313_v47, 5  ;;  %10514 = vmatmul.mubr.bf16.gmra.mxu1 %v14043_v61  ;;  %v8417_v18 = vrot.slane %v8415_v9, 4  ;;  %v12963_v2 = vpop.f32.mrf.mxu0 }
 0x47f   : > { %v8319_v21 = vld [vmem:[#allocation3 + $0x58] sm:$0xf]  ;;  %v16992_v62 = vld [vmem:[#allocation3 + $0x5c] sm:$0x1]  ;;  %8544 = vst [vmem:[#allocation2 + $0x44] sm:$0xf] %v8405_v29  ;;  %v17005_v38 = vadd.f32 %v12956_v46, %v12844_v48  ;;  %v12846_v41 = vpop.f32.mrf.mxu1 }
 0x480   : > { %v8425_v24 = vrot.slane %v8314_v50, 5  ;;  %v12036_v31 = vrot.slane %v16975_v55, 9  ;;  %v8321_v19 = vld [vmem:[#allocation3 + $0x60] sm:$0xe]  ;;  %8547 = vst [vmem:[#allocation2 + $0xb0] sm:$0xf] %v8416_v3  ;;  %v8423_v59 = vsel %vm14577_vm5, %v12035_v39, %v8422_v32  ;;  %v8419_v47 = vsel %vm14577_vm5, %v8417_v18, %v8418_v1 }
 0x481   : > { %v8424_v30 = vrot.slane %v8422_v32, 4  ;;  %v8322_v23 = vld [vmem:[#allocation3 + $0x64] sm:$0xf]  ;;  %v8323_v54 = vld [vmem:[#allocation3 + $0x68] sm:$0x1]  ;;  %v8429_v17 = vrot.slane %v8316_v57, 5  ;;  %v12964_v57 = vpop.f32.mrf.mxu0  ;;  %v12847_v56 = vadd.f32 %v12846_v41, %v12845_v35  ;;  %v12848_v39 = vpop.f32.mrf.mxu1 }
 0x482   : > { %8549 = vst [vmem:[#allocation2 + $0xf8] sm:$0xf] %v8423_v59  ;;  %v8432_v7 = vrot.slane %v16981_v14, 5  ;;  %v12037_v4 = vrot.slane %v16983_v13, 9  ;;  %v8324_v20 = vld [vmem:[#allocation3 + $0x6c] sm:$0xe]  ;;  %10683 = vmatmul.mubr.bf16.gmra.mxu0 %v14050_v22  ;;  %v17014_v53 = vadd.f32 %v12964_v57, %v12963_v2 }
 0x483   : > { %v8325_v37 = vld [vmem:[#allocation3 + $0x70] sm:$0xf]  ;;  %8548 = vst [vmem:[#allocation2 + $0xd4] sm:$0xf] %v8419_v47  ;;  %v8426_v11 = vsel %vm14577_vm5, %v8424_v30, %v8425_v24  ;;  %v8436_v50 = vrot.slane %v8319_v21, 5  ;;  %v8439_v55 = vrot.slane %v16992_v62, 5  ;;  %v8430_v58 = vsel %vm14577_vm5, %v12036_v31, %v8429_v17  ;;  %v12966_v21 = vpop.f32.mrf.mxu0 }
 0x484   : > { %v17010_v33 = vld [vmem:[#allocation3 + $0x74] sm:$0x1]  ;;  %v8327_v0 = vld [vmem:[#allocation3 + $0x78] sm:$0xe]  ;;  %8550 = vst [vmem:[#allocation2 + $0x11c] sm:$0xf] %v8426_v11  ;;  %v17023_v10 = vadd.f32 %v16986_v49, %v12847_v56 }
 0x485   : > { %v8431_v60 = vrot.slane %v8429_v17, 4  ;;  %v12038_v14 = vrot.slane %v8321_v19, 9  ;;  %v8443_v13 = vrot.slane %v8322_v23, 5  ;;  %v8328_v46 = vld [vmem:[#allocation3 + $0x7c] sm:$0xf]  ;;  %v8437_v9 = vsel %vm14577_vm5, %v12037_v4, %v8436_v50  ;;  %v12849_v23 = vpop.f32.mrf.mxu1 }
 0x486   : > { %v14049_v61 = vld [vmem:[#allocation2 + $0x44c] ss:$36 sps:$4 sm:$0xff]   ;;  %8551 = vst [vmem:[#allocation2 + $0x140] sm:$0xf] %v8430_v58  ;;  %v8438_v1 = vrot.slane %v8436_v50, 4  ;;  %v8446_v3 = vrot.slane %v8323_v54, 5  ;;  %v12967_v54 = vpop.f32.mrf.mxu0 }
 0x487   : > { %v8329_v44 = vld [vmem:[#allocation3 + $0x80] sm:$0x1]  ;;  %v14047_v29 = vld [vmem:[#allocation2 + $0x448] ss:$36 sps:$4 sm:$0xff]   ;;  %v8433_v32 = vsel %vm14577_vm5, %v8431_v60, %v8432_v7  ;;  %8553 = vst [vmem:[#allocation2 + $0x188] sm:$0xf] %v8437_v9  ;;  %v8444_v62 = vsel %vm14577_vm5, %v12038_v14, %v8443_v13  ;;  %10521 = vmatprep.mubr.bf16.mxu1 %v14049_v61  ;;  %v12850_v7 = vadd.f32 %v12849_v23, %v12848_v39  ;;  %v12851_v11 = vpop.f32.mrf.mxu1 }
 0x488   : > { %v8445_v22 = vrot.slane %v8443_v13, 4  ;;  %v8330_v18 = vld [vmem:[#allocation3 + $0x84] sm:$0xe]  ;;  %v8331_v52 = vld [vmem:[#allocation3 + $0x88] sm:$0xf]  ;;  %v8440_v31 = vsel %vm14577_vm5, %v8438_v1, %v8439_v55  ;;  %v12039_v19 = vrot.slane %v8324_v20, 9  ;;  %10522 = vmatmul.mubr.bf16.gmra.mxu1 %v14047_v29  ;;  %v17030_v2 = vadd.f32 %v12967_v54, %v12966_v21  ;;  %v12969_v50 = vpop.f32.mrf.mxu0 }
 0x489   : > { %v14053_v24 = vld [vmem:[#allocation2 + $0x20] ss:$36 sps:$4 sm:$0xff]   ;;  %8552 = vst [vmem:[#allocation2 + $0x164] sm:$0xf] %v8433_v32  ;;  %8555 = vst [vmem:[#allocation2 + $0x1d0] sm:$0xf] %v8444_v62  ;;  %v17037_v58 = vadd.f32 %v16999_v45, %v12850_v7  ;;  %v12852_v56 = vpop.f32.mrf.mxu1 }
 0x48a   : > { %v8450_v48 = vrot.slane %v8325_v37, 5  ;;  %v8332_v59 = vld [vmem:[#allocation3 + $0x8c] sm:$0x1]  ;;  %v8333_v30 = vld [vmem:[#allocation3 + $0x90] sm:$0xe]  ;;  %v8447_v47 = vsel %vm14577_vm5, %v8445_v22, %v8446_v3  ;;  %v8453_v35 = vrot.slane %v17010_v33, 5  ;;  %13348 = vmatprep.mubr.bf16.mxu1 %v14053_v24  ;;  %v12970_v9 = vpop.f32.mrf.mxu0  ;;  %v12853_v32 = vadd.f32 %v12852_v56, %v12851_v11 }
 0x48b   : > { %8554 = vst [vmem:[#allocation2 + $0x1ac] sm:$0xf] %v8440_v31  ;;  %v12040_v49 = vrot.slane %v8327_v0, 9  ;;  %v8457_v17 = vrot.slane %v8328_v46, 5  ;;  %8556 = vst [vmem:[#allocation2 + $0x1f4] sm:$0xf] %v8447_v47  ;;  %v17043_v21 = vadd.f32 %v12970_v9, %v12969_v50 }
 0x48c   : > { %v8451_v4 = vsel %vm14577_vm5, %v12039_v19, %v8450_v48  ;;  %v8452_v20 = vrot.slane %v8450_v48, 4  ;;  %v8334_v37 = vld [vmem:[#allocation3 + $0x94] sm:$0xf]  ;;  %v8460_v33 = vrot.slane %v8329_v44, 5  ;;  %v8335_v0 = vld [vmem:[#allocation3 + $0x98] sm:$0x1]  ;;  %v12972_v24 = vpop.f32.mrf.mxu0 }
 0x48d   : > { %8557 = vst [vmem:[#allocation2 + $0x218] sm:$0xf] %v8451_v4  ;;  %v8458_v55 = vsel %vm14577_vm5, %v12040_v49, %v8457_v17  ;;  %v8459_v41 = vrot.slane %v8457_v17, 4  ;;  %v12041_v57 = vrot.slane %v8330_v18, 9  ;;  %v8464_v14 = vrot.slane %v8331_v52, 5  ;;  %v12854_v52 = vpop.f32.mrf.mxu1 }
 0x48e   : > { %v8454_v60 = vsel %vm14577_vm5, %v8452_v20, %v8453_v35  ;;  %8559 = vst [vmem:[#allocation2 + $0x260] sm:$0xf] %v8458_v55  ;;  %v8336_v13 = vld [vmem:[#allocation3 + $0x9c] sm:$0xe]  ;;  %v8337_v46 = vld [vmem:[#allocation3 + $0xa0] sm:$0xf]  ;;  %v12973_v17 = vpop.f32.mrf.mxu0 }
 0x48f   : > { %v14054_v61 = vld [vmem:[#allocation2 + $0x68] ss:$36 sps:$4 sm:$0xff]   ;;  %8558 = vst [vmem:[#allocation2 + $0x23c] sm:$0xf] %v8454_v60  ;;  %v8461_v1 = vsel %vm14577_vm5, %v8459_v41, %v8460_v33  ;;  %v8467_v44 = vrot.slane %v8332_v59, 5  ;;  %v12042_v29 = vrot.slane %v8333_v30, 9  ;;  %v8465_v62 = vsel %vm14577_vm5, %v12041_v57, %v8464_v14  ;;  %v12855_v49 = vpop.f32.mrf.mxu1 }
 0x490   : > { %v8471_v39 = vrot.slane %v8334_v37, 5  ;;  %v8338_v45 = vld [vmem:[#allocation3 + $0xa4] sm:$0x1]  ;;  %8560 = vst [vmem:[#allocation2 + $0x284] sm:$0xf] %v8461_v1  ;;  %v8466_v22 = vrot.slane %v8464_v14, 4  ;;  %v17050_v30 = vadd.f32 %v17014_v53, %v12853_v32  ;;  %13349 = vmatmul.mubr.bf16.vlgmr.msra.gmra.mxu1 %v14054_v61  ;;  %v12856_v37 = vadd.f32 %v12855_v49, %v12854_v52  ;;  %v12975_v33 = vpop.f32.mrf.mxu0 }
 0x491   : > { %v8339_v3 = vld [vmem:[#allocation3 + $0xa8] sm:$0xe]  ;;  %v8340_v18 = vld [vmem:[#allocation3 + $0xac] sm:$0xf]  ;;  %8561 = vst [vmem:[#allocation2 + $0x2a8] sm:$0xf] %v8465_v62  ;;  %v12974_v11 = vadd.f32 %v12973_v17, %v12972_v24  ;;  %v12857_v41 = vpop.f32.mrf.mxu1 }
 0x492   : > { %v8472_v31 = vsel %vm14577_vm5, %v12042_v29, %v8471_v39  ;;  %v8341_v19 = vld [vmem:[#allocation3 + $0xb0] sm:$0x1]  ;;  %v8342_v48 = vld [vmem:[#allocation3 + $0xb4] sm:$0xe]  ;;  %v8468_v23 = vsel %vm14577_vm5, %v8466_v22, %v8467_v44  ;;  %v8473_v54 = vrot.slane %v8471_v39, 4  ;;  %v8474_v47 = vrot.slane %v8335_v0, 5  ;;  %v12976_v1 = vpop.f32.mrf.mxu0 }
 0x493   : > { %v14055_v59 = vld [vmem:[#allocation2 + $0xb0] ss:$36 sps:$4 sm:$0xff]   ;;  %8563 = vst [vmem:[#allocation2 + $0x2f0] sm:$0xf] %v8472_v31  ;;  %v8343_v35 = vld [vmem:[#allocation3 + $0xb8] sm:$0xf]  ;;  %v12858_v9 = vpop.f32.mrf.mxu1  ;;  %v12977_v62 = vadd.f32 %v12976_v1, %v12975_v33 }
 0x494   : > { %8562 = vst [vmem:[#allocation2 + $0x2cc] sm:$0xf] %v8468_v23  ;;  %v12043_v7 = vrot.slane %v8336_v13, 9  ;;  %v8478_v4 = vrot.slane %v8337_v46, 5  ;;  %v8344_v20 = vld [vmem:[#allocation3 + $0xbc] sm:$0x1]  ;;  %13352 = vmatprep.mubr.bf16.mxu1 %v14055_v59  ;;  %v8475_v53 = vsel %vm14577_vm5, %v8473_v54, %v8474_v47  ;;  %v17059_v13 = vadd.f32 %v17030_v2, %v12856_v37  ;;  %v12978_v24 = vpop.f32.mrf.mxu0 }
 0x495   : > { %v8481_v50 = vrot.slane %v8338_v45, 5  ;;  %v8345_v55 = vld [vmem:[#allocation3 + $0xc0] sm:$0xe]  ;;  %8564 = vst [vmem:[#allocation2 + $0x314] sm:$0xf] %v8475_v53  ;;  %v12044_v57 = vrot.slane %v8339_v3, 9  ;;  %v12859_v32 = vadd.f32 %v12858_v9, %v12857_v41  ;;  %v12860_v52 = vpop.f32.mrf.mxu1 }
 0x496   : > { %v8479_v0 = vsel %vm14577_vm5, %v12043_v7, %v8478_v4  ;;  %v8480_v60 = vrot.slane %v8478_v4, 4  ;;  %v8485_v14 = vrot.slane %v8340_v18, 5  ;;  %v8488_v46 = vrot.slane %v8341_v19, 5  ;;  %v8346_v56 = vld [vmem:[#allocation3 + $0xc4] sm:$0xf] }
 0x497   : > { %8565 = vst [vmem:[#allocation2 + $0x338] sm:$0xf] %v8479_v0  ;;  %v12045_v61 = vrot.slane %v8342_v48, 9  ;;  %v8492_v45 = vrot.slane %v8343_v35, 5  ;;  %v8495_v2 = vrot.slane %v8344_v20, 5  ;;  %v12046_v3 = vrot.slane %v8345_v55, 9  ;;  %v12861_v47 = vpop.f32.mrf.mxu1  ;;  %v12979_v35 = vpop.f32.mrf.mxu0 }
 0x498   : > { %v8482_v44 = vsel %vm14577_vm5, %v8480_v60, %v8481_v50  ;;  %v8486_v29 = vsel %vm14577_vm5, %v12044_v57, %v8485_v14  ;;  %v8487_v39 = vrot.slane %v8485_v14, 4  ;;  %v8347_v22 = vld [vmem:[#allocation3 + $0xc8] sm:$0x1]  ;;  %v14056_v18 = vld [vmem:[#allocation2 + $0xf8] ss:$36 sps:$4 sm:$0xff]   ;;  %v8499_v59 = vrot.slane %v8346_v56, 5 }
 0x499   : > { %8566 = vst [vmem:[#allocation2 + $0x35c] sm:$0xf] %v8482_v44  ;;  %8567 = vst [vmem:[#allocation2 + $0x380] sm:$0xf] %v8486_v29  ;;  %v8493_v19 = vsel %vm14577_vm5, %v12045_v61, %v8492_v45  ;;  %v8494_v48 = vrot.slane %v8492_v45, 4  ;;  %v17070_v54 = vadd.f32 %v17043_v21, %v12859_v32  ;;  %13353 = vmatmul.mubr.bf16.gmra.mxu1 %v14056_v18  ;;  %v8502_v4 = vrot.slane %v8347_v22, 5  ;;  %v12863_v21 = vpop.f32.mrf.mxu1  ;;  %v12981_v53 = vpop.f32.mrf.mxu0 }
 0x49a   : > { %v8489_v31 = vsel %vm14577_vm5, %v8487_v39, %v8488_v46  ;;  %v14057_v23 = vld [vmem:[#allocation2 + $0x140] ss:$36 sps:$4 sm:$0xff]   ;;  %8569 = vst [vmem:[#allocation2 + $0x3c8] sm:$0xf] %v8493_v19  ;;  %v8500_v17 = vsel %vm14577_vm5, %v12046_v3, %v8499_v59  ;;  %v8501_v7 = vrot.slane %v8499_v59, 4  ;;  %v12862_v20 = vadd.f32 %v12861_v47, %v12860_v52 }
 0x49b   : > { %8568 = vst [vmem:[#allocation2 + $0x3a4] sm:$0xf] %v8489_v31  ;;  %v8496_v49 = vsel %vm14577_vm5, %v8494_v48, %v8495_v2  ;;  %13356 = vmatprep.mubr.bf16.mxu1 %v14057_v23  ;;  %v12980_v37 = vadd.f32 %v12979_v35, %v12978_v24  ;;  %8571 = vst [vmem:[#allocation2 + $0x410] sm:$0xf] %v8500_v17  ;;  %v12864_v41 = vpop.f32.mrf.mxu1  ;;  %v12982_v33 = vpop.f32.mrf.mxu0  ;;  %v14058_v57 = vld [vmem:[#allocation2 + $0x188] ss:$36 sps:$4 sm:$0xff]  }
 0x49c   : > { %8570 = vst [vmem:[#allocation2 + $0x3ec] sm:$0xf] %v8496_v49  ;;  %v8503_v50 = vsel %vm14577_vm5, %v8501_v7, %v8502_v4  ;;  %v17078_v55 = vadd.f32 %v12974_v11, %v12862_v20  ;;  %v12865_v0 = vadd.f32 %v12864_v41, %v12863_v21  ;;  %v12983_v60 = vadd.f32 %v12982_v33, %v12981_v53  ;;  %v14059_v61 = vld [vmem:[#allocation2 + $0x1d0] ss:$36 sps:$4 sm:$0xff]   ;;  %v14060_v18 = vld [vmem:[#allocation2 + $0x218] ss:$36 sps:$4 sm:$0xff]  }
 0x49d   : > { %8572 = vst [vmem:[#allocation2 + $0x434] sm:$0xf] %v8503_v50  ;;  %v12866_v14 = vpop.f32.mrf.mxu1  ;;  %v12984_v46 = vpop.f32.mrf.mxu0  ;;  %v17883_v39 = vmov 0.0   ;;  %v14061_v31 = vld [vmem:[#allocation2 + $0x260] ss:$36 sps:$4 sm:$0xff]   ;;  %vm14235_vm4 = vmmov 0  }
 0x49e   : > { %v17080_v56 = vadd.f32 %v12977_v62, %v12865_v0  ;;  %13380 = vmatprep.subr.mxu0 %v17883_v39  ;;  %13415 = vmatprep.subr.mxu1 %v17883_v39  ;;  %v10984_v62 = vld [vmem:[%s17864_s8 + $0x78] sm:$0xff]  ;;  %v14062_v21 = vld [vmem:[#allocation2 + $0x2a8] ss:$36 sps:$4 sm:$0xff]   ;;  %v14063_v41 = vld [vmem:[#allocation2 + $0x2f0] ss:$36 sps:$4 sm:$0xff]  }
 0x49f   : > { %v12867_v9 = vpop.f32.mrf.mxu1  ;;  %v12985_v1 = vpop.f32.mrf.mxu0  ;;  %13381 = vmatpush3.msra.mxu0 %v10984_v62  ;;  %v10983_v0 = vld [vmem:[%s17864_s8 + $0x70] sm:$0xff] }
 0x4a0   : > { %v12868_v44 = vadd.f32 %v12867_v9, %v12866_v14  ;;  %v12986_v15 = vadd.f32 %v12985_v1, %v12984_v46  ;;  %13382 = vmatprep.subr.mxu0 %v17883_v39 }
 0x4a1   : > { %13357 = vmatmul.mubr.bf16.gmra.mxu1 %v14058_v57  ;;  %v12869_v29 = vpop.f32.mrf.mxu1  ;;  %v12987_v11 = vpop.f32.mrf.mxu0  ;;  %13383 = vmatpush3.msra.mxu0 %v10983_v0 }
 0x4a2   : > { %13360 = vmatprep.mubr.bf16.mxu1 %v14059_v61  ;;  %v17084_v45 = vadd.f32 %v12980_v37, %v12868_v44  ;;  %13384 = vmatprep.subr.mxu0 %v17883_v39 }
 0x4a3   : > { %v12870_v32 = vpop.f32.mrf.mxu1  ;;  %v12988_v2 = vpop.f32.mrf.mxu0 }
 0x4a4   : > { %v12871_v22 = vadd.f32 %v12870_v32, %v12869_v29  ;;  %v12989_v3 = vadd.f32 %v12988_v2, %v12987_v11  ;;  %v14064_v32 = vld [vmem:[#allocation2 + $0x338] ss:$36 sps:$4 sm:$0xff]  }
 0x4a5   : > { %v12872_v52 = vpop.f32.mrf.mxu1  ;;  %v12990_v24 = vpop.f32.mrf.mxu0 }
 0x4a6   : > { %v17090_v19 = vadd.f32 %v12983_v60, %v12871_v22  ;;  %v14065_v22 = vld [vmem:[#allocation2 + $0x380] ss:$36 sps:$4 sm:$0xff]  }
 0x4a7   : > { %v12873_v48 = vpop.f32.mrf.mxu1  ;;  %v12991_v59 = vpop.f32.mrf.mxu0 }
 0x4a8   : > { %v12874_v23 = vadd.f32 %v12873_v48, %v12872_v52  ;;  %v12992_v47 = vadd.f32 %v12991_v59, %v12990_v24 }
 0x4a9   : > { %13361 = vmatmul.mubr.bf16.gmra.mxu1 %v14060_v18  ;;  %v12875_v35 = vpop.f32.mrf.mxu1  ;;  %v12993_v49 = vpop.f32.mrf.mxu0 }
 0x4aa   : > { %13364 = vmatprep.mubr.bf16.mxu1 %v14061_v31  ;;  %v17092_v17 = vadd.f32 %v12986_v15, %v12874_v23  ;;  %v10982_v23 = vld [vmem:[%s17864_s8 + $0x68] sm:$0xff] }
 0x4ab   : > { %v12876_v7 = vpop.f32.mrf.mxu1  ;;  %v12994_v4 = vpop.f32.mrf.mxu0  ;;  %13385 = vmatpush3.msra.mxu0 %v10982_v23 }
 0x4ac   : > { %v12877_v20 = vadd.f32 %v12876_v7, %v12875_v35  ;;  %v12995_v37 = vadd.f32 %v12994_v4, %v12993_v49  ;;  %13386 = vmatprep.subr.mxu0 %v17883_v39  ;;  %v14066_v4 = vld [vmem:[#allocation2 + $0x3c8] ss:$36 sps:$4 sm:$0xff]  }
 0x4ad   : > { %v12878_v53 = vpop.f32.mrf.mxu1  ;;  %v12996_v50 = vpop.f32.mrf.mxu0 }
 0x4ae   : > { %v17094_v33 = vadd.f32 %v12989_v3, %v12877_v20 }
 0x4af   : > { %v12879_v60 = vpop.f32.mrf.mxu1  ;;  %v12997_v57 = vpop.f32.mrf.mxu0 }
 0x4b0   : > { %v12880_v14 = vadd.f32 %v12879_v60, %v12878_v53  ;;  %v12998_v46 = vadd.f32 %v12997_v57, %v12996_v50 }
 0x4b1   : > { %13365 = vmatmul.mubr.bf16.gmra.mxu1 %v14062_v21  ;;  %v12881_v61 = vpop.f32.mrf.mxu1  ;;  %v12999_v9 = vpop.f32.mrf.mxu0  ;;  %v14067_v21 = vld [vmem:[#allocation2 + $0x410] ss:$36 sps:$4 sm:$0xff]  }
 0x4b2   : > { %13368 = vmatprep.mubr.bf16.mxu1 %v14063_v41  ;;  %v17100_v1 = vadd.f32 %v12992_v47, %v12880_v14 }
 0x4b3   : > { %v12882_v44 = vpop.f32.mrf.mxu1  ;;  %v13000_v15 = vpop.f32.mrf.mxu0 }
 0x4b4   : > { %v12883_v29 = vadd.f32 %v12882_v44, %v12881_v61  ;;  %v13001_v11 = vadd.f32 %v13000_v15, %v12999_v9  ;;  %v10981_v15 = vld [vmem:[%s17864_s8 + $0x60] sm:$0xff] }
 0x4b5   : > { %v12884_v2 = vpop.f32.mrf.mxu1  ;;  %v13130_v62 = vpop.f32.mrf.mxu0  ;;  %13387 = vmatpush3.msra.mxu0 %v10981_v15 }
 0x4b6   : > { %v17102_v3 = vadd.f32 %v12995_v37, %v12883_v29  ;;  %13388 = vmatprep.subr.mxu0 %v17883_v39 }
 0x4b7   : > { %v12885_v18 = vpop.f32.mrf.mxu1  ;;  %v13131_v52 = vpop.f32.mrf.mxu0 }
 0x4b8   : > { %v12886_v24 = vadd.f32 %v12885_v18, %v12884_v2  ;;  %v13132_v31 = vadd.f32 %v13131_v52, %v13130_v62 }
 0x4b9   : > { %13369 = vmatmul.mubr.bf16.gmra.mxu1 %v14064_v32  ;;  %v12887_v48 = vpop.f32.mrf.mxu1  ;;  %v17104_v59 = vpop.f32.mrf.mxu0 }
 0x4ba   : > { %13372 = vmatprep.mubr.bf16.mxu1 %v14065_v22  ;;  %v17109_v47 = vadd.f32 %v12998_v46, %v12886_v24  ;;  %v14068_v46 = vld [vmem:[#allocation2 + $0x458] ss:$36 sps:$4 sm:$0xff]  }
 0x4bb   : > { %v12888_v35 = vpop.f32.mrf.mxu1  ;;  %v17111_v49 = vpop.f32.mrf.mxu0 }
 0x4bc   : > { %v12889_v7 = vadd.f32 %v12888_v35, %v12887_v48 }
 0x4bd   : > { %v13018_v20 = vpop.f32.mrf.mxu1  ;;  %v17114_v37 = vpop.f32.mrf.mxu0 }
 0x4be   : > { %v17116_v53 = vadd.f32 %v13001_v11, %v12889_v7 }
 0x4bf   : > { %v13019_v50 = vpop.f32.mrf.mxu1  ;;  %v17118_v41 = vpop.f32.mrf.mxu0 }
 0x4c0   : > { %v13020_v0 = vadd.f32 %v13019_v50, %v13018_v20 }
 0x4c1   : > { %13373 = vmatmul.mubr.bf16.gmra.mxu1 %v14066_v4  ;;  %v13021_v60 = vpop.f32.mrf.mxu1  ;;  %v17120_v57 = vpop.f32.mrf.mxu0 }
 0x4c2   : > { %13376 = vmatprep.mubr.bf16.mxu1 %v14067_v21  ;;  %v10404_v14 = vadd.f32 %v13020_v0, %v16716_v43 }
 0x4c3   : > { %v13022_v61 = vpop.f32.mrf.mxu1  ;;  %v17123_v9 = vpop.f32.mrf.mxu0 }
 0x4c4   : > { %v13023_v44 = vadd.f32 %v13022_v61, %v13021_v60  ;;  %v17161_v15 = vadd.f32 %v13132_v31, %v10404_v14 }
 0x4c5   : > { %v13024_v29 = vpop.f32.mrf.mxu1  ;;  %v17128_v11 = vpop.f32.mrf.mxu0 }
 0x4c6   : > { %v17131_v32 = vadd.f32 %v13023_v44, %v16719_v40  ;;  %v10980_v40 = vld [vmem:[%s17864_s8 + $0x58] sm:$0xff] }
 0x4c7   : > { %v13025_v43 = vpop.f32.mrf.mxu1  ;;  %v17134_v2 = vpop.f32.mrf.mxu0  ;;  %13389 = vmatpush3.msra.mxu0 %v10980_v40 }
 0x4c8   : > { %v13026_v62 = vadd.f32 %v13025_v43, %v13024_v29  ;;  %13390 = vmatprep.subr.mxu0 %v17883_v39 }
 0x4c9   : > { %13377 = vmatmul.mubr.bf16.gmra.mxu1 %v14068_v46  ;;  %v13027_v22 = vpop.f32.mrf.mxu1  ;;  %v17136_v18 = vpop.f32.mrf.mxu0 }
 0x4ca   : > { %v17139_v52 = vadd.f32 %v13026_v62, %v16826_v8  ;;  %v10979_v62 = vld [vmem:[%s17864_s8 + $0x50] sm:$0xff] }
 0x4cb   : > { %v13028_v24 = vpop.f32.mrf.mxu1  ;;  %v17141_v48 = vpop.f32.mrf.mxu0  ;;  %13391 = vmatpush3.msra.mxu0 %v10979_v62 }
 0x4cc   : > { %v13029_v23 = vadd.f32 %v13028_v24, %v13027_v22  ;;  %13392 = vmatprep.subr.mxu0 %v17883_v39 }
 0x4cd   : > { %v13030_v35 = vpop.f32.mrf.mxu1  ;;  %v17146_v7 = vpop.f32.mrf.mxu0 }
 0x4ce   : > { %v17149_v4 = vadd.f32 %v13029_v23, %v16831_v28 }
 0x4cf   : > { %v13031_v20 = vpop.f32.mrf.mxu1  ;;  %v17152_v8 = vpop.f32.mrf.mxu0 }
 0x4d0   : > { %v13032_v21 = vadd.f32 %v13031_v20, %v13030_v35 }
 0x4d1   : > { %v13033_v50 = vpop.f32.mrf.mxu1  ;;  %v17154_v0 = vpop.f32.mrf.mxu0 }
 0x4d2   : > { %v17157_v60 = vadd.f32 %v13032_v21, %v16851_v63 }
 0x4d3   : > { %v13034_v46 = vpop.f32.mrf.mxu1  ;;  %v17159_v61 = vpop.f32.mrf.mxu0 }
 0x4d4   : > { %v13035_v44 = vadd.f32 %v13034_v46, %v13033_v50 }
 0x4d5   : > { %v13036_v28 = vpop.f32.mrf.mxu1  ;;  %v17163_v29 = vpop.f32.mrf.mxu0 }
 0x4d6   : > { %v17166_v43 = vadd.f32 %v13035_v44, %v16866_v12 }
 0x4d7   : > { %v13037_v22 = vpop.f32.mrf.mxu1  ;;  %v17171_v24 = vpop.f32.mrf.mxu0 }
 0x4d8   : > { %v13038_v63 = vadd.f32 %v13037_v22, %v13036_v28 }
 0x4d9   : > { %v13039_v23 = vpop.f32.mrf.mxu1  ;;  %v17174_v31 = vpop.f32.mrf.mxu0 }
 0x4da   : > { %v17177_v14 = vadd.f32 %v13038_v63, %v16884_v51  ;;  %v10978_v63 = vld [vmem:[%s17864_s8 + $0x48] sm:$0xff] }
 0x4db   : > { %v13040_v40 = vpop.f32.mrf.mxu1  ;;  %v17179_v12 = vpop.f32.mrf.mxu0  ;;  %13393 = vmatpush3.msra.mxu0 %v10978_v63 }
 0x4dc   : > { %18002 = vst [vmem:[#allocation35_spill] sm:$0xff] %v17179_v12  ;;  %v13041_v35 = vadd.f32 %v13040_v40, %v13039_v23  ;;  %13394 = vmatprep.subr.mxu0 %v17883_v39 }
 0x4dd   : > { %v13042_v20 = vpop.f32.mrf.mxu1  ;;  %v17181_v21 = vpop.f32.mrf.mxu0 }
 0x4de   : > { %v17184_v50 = vadd.f32 %v13041_v35, %v16894_v25 }
 0x4df   : > { %v13043_v46 = vpop.f32.mrf.mxu1  ;;  %v17186_v44 = vpop.f32.mrf.mxu0 }
 0x4e0   : > { %v13044_v28 = vadd.f32 %v13043_v46, %v13042_v20 }
 0x4e1   : > { %v13045_v62 = vpop.f32.mrf.mxu1  ;;  %v17191_v51 = vpop.f32.mrf.mxu0 }
 0x4e2   : > { %v17189_v22 = vadd.f32 %v13044_v28, %v16903_v16  ;;  %18003 = vst [vmem:[#allocation36_spill] sm:$0xff] %v17191_v51 }
 0x4e3   : > { %v13046_v23 = vpop.f32.mrf.mxu1  ;;  %v17200_v20 = vpop.f32.mrf.mxu0 }
 0x4e4   : > { %v13047_v40 = vadd.f32 %v13046_v23, %v13045_v62  ;;  %v10977_v62 = vld [vmem:[%s17864_s8 + $0x40] sm:$0xff] }
 0x4e5   : > { %v13048_v25 = vpop.f32.mrf.mxu1  ;;  %v17205_v12 = vpop.f32.mrf.mxu0  ;;  %13395 = vmatpush3.msra.mxu0 %v10977_v62 }
 0x4e6   : > { %v17198_v35 = vadd.f32 %v13047_v40, %v16917_v27  ;;  %18005 = vst [vmem:[#allocation25_spill] sm:$0xff] %v17205_v12  ;;  %13396 = vmatprep.subr.mxu0 %v17883_v39 }
 0x4e7   : > { %v13049_v46 = vpop.f32.mrf.mxu1 }
 0x4e8   : > { %18004 = vst [vmem:[#allocation22_spill] sm:$0xff] %v17198_v35  ;;  %v13050_v16 = vadd.f32 %v13049_v46, %v13048_v25  ;;  %v17214_v25 = vpop.f32.mrf.mxu0 }
 0x4e9   : > { %v13051_v28 = vpop.f32.mrf.mxu1 }
 0x4ea   : > { %v17203_v51 = vadd.f32 %v13050_v16, %v16942_v34  ;;  %v17219_v35 = vpop.f32.mrf.mxu0 }
 0x4eb   : > { %v13052_v63 = vpop.f32.mrf.mxu1  ;;  %18007 = vst [vmem:[#allocation24_spill] sm:$0xff] %v17219_v35 }
 0x4ec   : > { %v13053_v23 = vadd.f32 %v13052_v63, %v13051_v28  ;;  %v10976_v28 = vld [vmem:[%s17864_s8 + $0x38] sm:$0xff] }
 0x4ed   : > { %v13054_v27 = vpop.f32.mrf.mxu1  ;;  %13397 = vmatpush3.msra.mxu0 %v10976_v28 }
 0x4ee   : > { %v17212_v40 = vadd.f32 %v13053_v23, %v16945_v36  ;;  %13398 = vmatprep.subr.mxu0 %v17883_v39  ;;  %v17225_v23 = vpop.f32.mrf.mxu0 }
 0x4ef   : > { %v13055_v46 = vpop.f32.mrf.mxu1  ;;  %18008 = vst [vmem:[#allocation21_spill] sm:$0xff] %v17225_v23 }
 0x4f0   : > { %v13056_v34 = vadd.f32 %v13055_v46, %v13054_v27 }
 0x4f1   : > { %v13057_v16 = vpop.f32.mrf.mxu1 }
 0x4f2   : > { %v17217_v12 = vadd.f32 %v13056_v34, %v16961_v42 }
 0x4f3   : > { %v13058_v62 = vpop.f32.mrf.mxu1 }
 0x4f4   : > { %18006 = vst [vmem:[#allocation23_spill] sm:$0xff] %v17217_v12  ;;  %v13059_v63 = vadd.f32 %v13058_v62, %v13057_v16  ;;  %v17230_v12 = vpop.f32.mrf.mxu0  ;;  %v10975_v16 = vld [vmem:[%s17864_s8 + $0x30] sm:$0xff] }
 0x4f5   : > { %v13060_v36 = vpop.f32.mrf.mxu1  ;;  %13399 = vmatpush3.msra.mxu0 %v10975_v16 }
 0x4f6   : > { %v17228_v27 = vadd.f32 %v13059_v63, %v16967_v26  ;;  %13400 = vmatprep.subr.mxu0 %v17883_v39  ;;  %v17239_v23 = vpop.f32.mrf.mxu0 }
 0x4f7   : > { %v13061_v46 = vpop.f32.mrf.mxu1 }
 0x4f8   : > { %18009 = vst [vmem:[#allocation26_spill] sm:$0xff] %v17228_v27  ;;  %v13062_v42 = vadd.f32 %v13061_v46, %v13060_v36  ;;  %v17244_v36 = vpop.f32.mrf.mxu0 }
 0x4f9   : > { %v13063_v34 = vpop.f32.mrf.mxu1 }
 0x4fa   : > { %v17233_v35 = vadd.f32 %v13062_v42, %v16973_v5  ;;  %v10974_v5 = vld [vmem:[%s17864_s8 + $0x28] sm:$0xff]  ;;  %v17253_v16 = vpop.f32.mrf.mxu0 }
 0x4fb   : > { %v13064_v28 = vpop.f32.mrf.mxu1  ;;  %13401 = vmatpush3.msra.mxu0 %v10974_v5 }
 0x4fc   : > { %18010 = vst [vmem:[#allocation27_spill] sm:$0xff] %v17233_v35  ;;  %v13065_v62 = vadd.f32 %v13064_v28, %v13063_v34  ;;  %13402 = vmatprep.subr.mxu0 %v17883_v39  ;;  %v17258_v35 = vpop.f32.mrf.mxu0 }
 0x4fd   : > { %v13066_v63 = vpop.f32.mrf.mxu1 }
 0x4fe   : > { %v17242_v26 = vadd.f32 %v13065_v62, %v16990_v6 }
 0x4ff   : > { %v13067_v46 = vpop.f32.mrf.mxu1 }
 0x500   : > { %18011 = vst [vmem:[#allocation28_spill] sm:$0xff] %v17242_v26  ;;  %v13068_v42 = vadd.f32 %v13067_v46, %v13066_v63  ;;  %v10973_v63 = vld [vmem:[%s17864_s8 + $0x20] sm:$0xff] }
 0x501   : > { %v13069_v27 = vpop.f32.mrf.mxu1  ;;  %13403 = vmatpush3.msra.mxu0 %v10973_v63  ;;  %v10972_v63 = vld [vmem:[%s17864_s8 + $0x18] sm:$0xff] }
 0x502   : > { %v17251_v34 = vadd.f32 %v13068_v42, %v17005_v38  ;;  %13404 = vmatprep.subr.mxu0 %v17883_v39  ;;  %v17264_v42 = vpop.f32.mrf.mxu0 }
 0x503   : > { %v13070_v6 = vpop.f32.mrf.mxu1  ;;  %18014 = vst [vmem:[#allocation29_spill] sm:$0xff] %v17264_v42  ;;  %13405 = vmatpush3.msra.mxu0 %v10972_v63 }
 0x504   : > { %18012 = vst [vmem:[#allocation39_spill] sm:$0xff] %v17251_v34  ;;  %v13071_v28 = vadd.f32 %v13070_v6, %v13069_v27  ;;  %13406 = vmatprep.subr.mxu0 %v17883_v39 }
 0x505   : > { %v13072_v26 = vpop.f32.mrf.mxu1 }
 0x506   : > { %v17256_v62 = vadd.f32 %v13071_v28, %v17023_v10  ;;  %v17269_v28 = vpop.f32.mrf.mxu0 }
 0x507   : > { %v13073_v46 = vpop.f32.mrf.mxu1  ;;  %18016 = vst [vmem:[#allocation33_spill] sm:$0xff] %v17269_v28 }
 0x508   : > { %18013 = vst [vmem:[#allocation40_spill] sm:$0xff] %v17256_v62  ;;  %v13074_v5 = vadd.f32 %v13073_v46, %v13072_v26  ;;  %v17278_v46 = vpop.f32.mrf.mxu0 }
 0x509   : > { %v13075_v38 = vpop.f32.mrf.mxu1  ;;  %18018 = vst [vmem:[#allocation34_spill] sm:$0xff] %v17278_v46 }
 0x50a   : > { %v17267_v27 = vadd.f32 %v13074_v5, %v17037_v58 }
 0x50b   : > { %v13076_v10 = vpop.f32.mrf.mxu1 }
 0x50c   : > { %18015 = vst [vmem:[#allocation30_spill] sm:$0xff] %v17267_v27  ;;  %v13077_v6 = vadd.f32 %v13076_v10, %v13075_v38  ;;  %v17283_v10 = vpop.f32.mrf.mxu0 }
 0x50e   : > { %v17272_v62 = vadd.f32 %v13077_v6, %v17050_v30  ;;  %v17288_v27 = vpop.f32.mrf.mxu0 }
 0x510   : > { %18017 = vst [vmem:[#allocation31_spill] sm:$0xff] %v17272_v62  ;;  %v13078_v26 = vpop.f32.mrf.mxu1  ;;  %v17290_v42 = vpop.f32.mrf.mxu0 }
 0x512   : > { %v13079_v34 = vpop.f32.mrf.mxu1 }
 0x513   : > { %v13080_v58 = vadd.f32 %v13079_v34, %v13078_v26 }
 0x514   : > { %v13081_v5 = vpop.f32.mrf.mxu1 }
 0x515   : > { %v17281_v38 = vadd.f32 %v13080_v58, %v17059_v13  ;;  %v17295_v58 = vpop.f32.mrf.mxu0 }
 0x516   : > { %v13082_v30 = vpop.f32.mrf.mxu1 }
 0x517   : > { %18019 = vst [vmem:[#allocation32_spill] sm:$0xff] %v17281_v38  ;;  %v13083_v6 = vadd.f32 %v13082_v30, %v13081_v5  ;;  %v10970_v5 = vld [vmem:[%s17864_s8 + $0x8] sm:$0xff]  ;;  %v18023_v30 = vmov 0.0  }
 0x518   : > { %13412 = vmatprep.mubr.msk.f32.mxu0 %vm14235_vm4, %v18023_v30  ;;  %13447 = vmatprep.mubr.msk.f32.mxu1 %vm14235_vm4, %v18023_v30 }
 0x519   : > { %v17286_v62 = vadd.f32 %v13083_v6, %v17070_v54  ;;  %v10971_v54 = vld [vmem:[%s17864_s8 + $0x10] sm:$0xff] }
 0x51a   : > { %v13084_v63 = vpop.f32.mrf.mxu1  ;;  %13407 = vmatpush3.msra.mxu0 %v10971_v54  ;;  %v11069_v54 = vld [vmem:[#allocation9 + $0x60] sm:$0xff] }
 0x51b   : > { %18020 = vst [vmem:[#allocation42_spill] sm:$0xff] %v17286_v62  ;;  %13408 = vmatprep.subr.mxu0 %v18023_v30 }
 0x51c   : > { %v13085_v28 = vpop.f32.mrf.mxu1  ;;  %13409 = vmatpush3.msra.mxu0 %v10970_v5 }
 0x51d   : > { %v13086_v39 = vadd.f32 %v13085_v28, %v13084_v63  ;;  %v17312_v63 = vpop.f32.mrf.mxu0  ;;  %13410 = vmatprep.subr.mxu0 %v18023_v30 }
 0x51e   : > { %v13087_v46 = vpop.f32.mrf.mxu1 }
 0x51f   : > { %v17293_v34 = vadd.f32 %v13086_v39, %v17078_v55  ;;  %v10969_v55 = vld [vmem:[%s17864_s8] sm:$0xff]  ;;  %v11072_v39 = vld [vmem:[#allocation9 + $0x78] sm:$0xff] }
 0x520   : > { %v13088_v13 = vpop.f32.mrf.mxu1  ;;  %13416 = vmatpush3.msra.mxu1 %v11072_v39  ;;  %13411 = vmatpush3.msra.mxu0 %v10969_v55  ;;  %v11068_v39 = vld [vmem:[#allocation9 + $0x58] sm:$0xff]  ;;  %v11067_v55 = vld [vmem:[#allocation9 + $0x50] sm:$0xff] }
 0x521   : > { %18021 = vst [vmem:[#allocation43_spill] sm:$0xff] %v17293_v34  ;;  %v13089_v26 = vadd.f32 %v13088_v13, %v13087_v46  ;;  %v11071_v46 = vld [vmem:[#allocation9 + $0x70] sm:$0xff]  ;;  %13417 = vmatprep.subr.mxu1 %v18023_v30 }
 0x522   : > { %13418 = vmatpush3.msra.mxu1 %v11071_v46 }
 0x523   : > { %v17304_v28 = vadd.f32 %v13089_v26, %v17080_v56  ;;  %v11070_v56 = vld [vmem:[#allocation9 + $0x68] sm:$0xff]  ;;  %13419 = vmatprep.subr.mxu1 %v18023_v30 }
 0x524   : > { %13420 = vmatpush3.msra.mxu1 %v11070_v56  ;;  %v11066_v56 = vld [vmem:[#allocation9 + $0x48] sm:$0xff] }
 0x525   : > { %18022 = vst [vmem:[#allocation44_spill] sm:$0xff] %v17304_v28  ;;  %v13090_v6 = vpop.f32.mrf.mxu1  ;;  %v17317_v28 = vpop.f32.mrf.mxu0  ;;  %13421 = vmatprep.subr.mxu1 %v18023_v30 }
 0x526   : > { %13422 = vmatpush3.msra.mxu1 %v11069_v54 }
 0x527   : > { %v13091_v13 = vpop.f32.mrf.mxu1  ;;  %13423 = vmatprep.subr.mxu1 %v18023_v30  ;;  %v17324_v46 = vpop.f32.mrf.mxu0 }
 0x528   : > { %v13092_v26 = vadd.f32 %v13091_v13, %v13090_v6  ;;  %13424 = vmatpush3.msra.mxu1 %v11068_v39  ;;  %v11065_v13 = vld [vmem:[#allocation9 + $0x40] sm:$0xff] }
 0x529   : > { %v13093_v62 = vpop.f32.mrf.mxu1  ;;  %13425 = vmatprep.subr.mxu1 %v18023_v30 }
 0x52a   : > { %v17320_v5 = vadd.f32 %v13092_v26, %v17084_v45  ;;  %13426 = vmatpush3.msra.mxu1 %v11067_v55  ;;  %v17331_v26 = vpop.f32.mrf.mxu0 }
 0x52b   : > { %v13094_v34 = vpop.f32.mrf.mxu1  ;;  %13427 = vmatprep.subr.mxu1 %v18023_v30  ;;  %18026 = vst [vmem:[#allocation37_spill] sm:$0xff] %v17331_v26 }
 0x52c   : > { %18024 = vst [vmem:[#allocation49_spill] sm:$0xff] %v17320_v5  ;;  %v13095_v38 = vadd.f32 %v13094_v34, %v13093_v62  ;;  %13428 = vmatpush3.msra.mxu1 %v11066_v56  ;;  %v11064_v34 = vld [vmem:[#allocation9 + $0x38] sm:$0xff]  ;;  %v17338_v55 = vpop.f32.mrf.mxu0  ;;  %v11062_v56 = vld [vmem:[#allocation9 + $0x28] sm:$0xff] }
 0x52d   : > { %13429 = vmatprep.subr.mxu1 %v18023_v30 }
 0x52e   : > { %v17327_v6 = vadd.f32 %v13095_v38, %v17090_v19  ;;  %13430 = vmatpush3.msra.mxu1 %v11065_v13  ;;  %v11063_v19 = vld [vmem:[#allocation9 + $0x30] sm:$0xff] }
 0x52f   : > { %13431 = vmatprep.subr.mxu1 %v18023_v30 }
 0x530   : > { %18025 = vst [vmem:[#allocation50_spill] sm:$0xff] %v17327_v6  ;;  %13432 = vmatpush3.msra.mxu1 %v11064_v34 }
 0x531   : > { %v13096_v45 = vpop.f32.mrf.mxu1  ;;  %13433 = vmatprep.subr.mxu1 %v18023_v30 }
 0x532   : > { %13434 = vmatpush3.msra.mxu1 %v11063_v19 }
 0x533   : > { %v13097_v62 = vpop.f32.mrf.mxu1  ;;  %13435 = vmatprep.subr.mxu1 %v18023_v30 }
 0x534   : > { %v13098_v54 = vadd.f32 %v13097_v62, %v13096_v45  ;;  %v11061_v45 = vld [vmem:[#allocation9 + $0x20] sm:$0xff]  ;;  %13436 = vmatpush3.msra.mxu1 %v11062_v56  ;;  %v17345_v62 = vpop.f32.mrf.mxu0 }
 0x535   : > { %v13099_v39 = vpop.f32.mrf.mxu1  ;;  %13437 = vmatprep.subr.mxu1 %v18023_v30 }
 0x536   : > { %v17336_v38 = vadd.f32 %v13098_v54, %v17092_v17  ;;  %v11060_v17 = vld [vmem:[#allocation9 + $0x18] sm:$0xff]  ;;  %13438 = vmatpush3.msra.mxu1 %v11061_v45  ;;  %v11059_v54 = vld [vmem:[#allocation9 + $0x10] sm:$0xff] }
 0x537   : > { %v13100_v6 = vpop.f32.mrf.mxu1  ;;  %13439 = vmatprep.subr.mxu1 %v18023_v30 }
 0x538   : > { %18027 = vst [vmem:[#allocation38_spill] sm:$0xff] %v17336_v38  ;;  %v13101_v5 = vadd.f32 %v13100_v6, %v13099_v39  ;;  %13440 = vmatpush3.msra.mxu1 %v11060_v17  ;;  %v17349_v6 = vpop.f32.mrf.mxu0 }
 0x539   : > { %18029 = vst [vmem:[#allocation54_spill] sm:$0xff] %v17349_v6  ;;  %13441 = vmatprep.subr.mxu1 %v18023_v30 }
 0x53a   : > { %v17343_v13 = vadd.f32 %v13101_v5, %v17094_v33  ;;  %v11058_v33 = vld [vmem:[#allocation9 + $0x8] sm:$0xff]  ;;  %13442 = vmatpush3.msra.mxu1 %v11059_v54  ;;  %v17356_v45 = vpop.f32.mrf.mxu0 }
 0x53b   : > { %13443 = vmatprep.subr.mxu1 %v18023_v30  ;;  %18031 = vst [vmem:[#allocation58_spill] sm:$0xff] %v17356_v45 }
 0x53c   : > { %18028 = vst [vmem:[#allocation52_spill] sm:$0xff] %v17343_v13  ;;  %13444 = vmatpush3.msra.mxu1 %v11058_v33  ;;  %v17362_v6 = vpop.f32.mrf.mxu0 }
 0x53d   : > { %13445 = vmatprep.subr.mxu1 %v18023_v30  ;;  %v13138_v30 = vadd.f32 %v17118_v41, %v17114_v37  ;;  %v17387_v41 = vld [vmem:[%s17862_s6] ss:$0 sm:$0xff] }
 0x53e   : > { %v13102_v34 = vpop.f32.mrf.mxu1 }
 0x540   : > { %v13103_v38 = vpop.f32.mrf.mxu1 }
 0x541   : > { %v13104_v39 = vadd.f32 %v13103_v38, %v13102_v34 }
 0x542   : > { %v13105_v5 = vpop.f32.mrf.mxu1 }
 0x543   : > { %v17353_v19 = vadd.f32 %v13104_v39, %v17100_v1 }
 0x544   : > { %v13106_v56 = vpop.f32.mrf.mxu1 }
 0x545   : > { %18030 = vst [vmem:[#allocation56_spill] sm:$0xff] %v17353_v19  ;;  %v13107_v13 = vadd.f32 %v13106_v56, %v13105_v5  ;;  %v17367_v19 = vpop.f32.mrf.mxu0  ;;  %v13141_v56 = vadd.f32 %v17123_v9, %v17120_v57 }
 0x547   : > { %v17360_v38 = vadd.f32 %v13107_v13, %v17102_v3  ;;  %v13135_v13 = vadd.f32 %v17111_v49, %v17104_v59  ;;  %v10576_v37 = vadd.f32 %v13141_v56, %v17149_v4  ;;  %v13144_v49 = vadd.f32 %v17134_v2, %v17128_v11  ;;  %v17406_v2 = vld [vmem:[%s17863_s7] ss:$0 sm:$0xff] }
 0x548   : > { %v13108_v17 = vpop.f32.mrf.mxu1  ;;  %v13150_v4 = vadd.f32 %v17152_v8, %v17146_v7  ;;  %v13153_v11 = vadd.f32 %v17159_v61, %v17154_v0 }
 0x54a   : > { %v13109_v34 = vpop.f32.mrf.mxu1  ;;  %v10589_v7 = vadd.f32 %v13150_v4, %v17177_v14  ;;  %v10592_v0 = vadd.f32 %v13153_v11, %v17184_v50 }
 0x54b   : > { %v13110_v54 = vadd.f32 %v13109_v34, %v13108_v17  ;;  %v10573_v17 = vadd.f32 %v13138_v30, %v17139_v52  ;;  %v13147_v30 = vadd.f32 %v17141_v48, %v17136_v18 }
 0x54c   : > { %v13111_v26 = vpop.f32.mrf.mxu1 }
 0x54d   : > { %v17365_v1 = vadd.f32 %v13110_v54, %v17109_v47  ;;  %v17378_v47 = vpop.f32.mrf.mxu0  ;;  %v10584_v56 = vadd.f32 %v13147_v30, %v17166_v43 }
 0x54e   : > { %v13112_v39 = vpop.f32.mrf.mxu1 }
 0x54f   : > { %v13113_v33 = vadd.f32 %v13112_v39, %v13111_v26  ;;  %v17391_v57 = vpop.f32.mrf.mxu0 }
 0x550   : > { %v13350_v45 = vpop.f32.mrf.mxu1 }
 0x551   : > { %v17372_v5 = vadd.f32 %v13113_v33, %v17116_v53  ;;  %v10734_v54 = vadd.f32 %v13350_v45, %v10573_v17  ;;  %v10568_v53 = vadd.f32 %v13135_v13, %v17131_v32  ;;  %v10581_v33 = vadd.f32 %v13144_v49, %v17157_v60 }
 0x552   : > { %v10725_v3 = vpop.f32.mrf.mxu1 }
 0x553   : > { %v10726_v26 = vadd.f32 %v10725_v3, %v17161_v15  ;;  %v10861_v32 = vmul.f32 %v17387_v41, %v10734_v54  ;;  %v17409_v3 = vpop.f32.mrf.mxu0  ;;  %v13156_v54 = vadd.f32 %v17171_v24, %v17163_v29 }
 0x554   : > { %v13351_v34 = vpop.f32.mrf.mxu1 }
 0x555   : > { %v10859_v9 = vmul.f32 %v17387_v41, %v10726_v26  ;;  %v10737_v52 = vadd.f32 %v13351_v34, %v10576_v37  ;;  %v17421_v17 = vadd.f32 %v17406_v2, %v10861_v32  ;;  %v18032_v32 = vld [vmem:[#allocation35_spill] sm:$0xff] }
 0x556   : > { %v10728_v59 = vpop.f32.mrf.mxu1 }
 0x557   : > { %v10729_v15 = vadd.f32 %v10728_v59, %v10568_v53  ;;  %v17412_v13 = vadd.f32 %v17406_v2, %v10859_v9  ;;  %v10862_v60 = vmul.f32 %v17387_v41, %v10737_v52  ;;  %v17428_v53 = vpop.f32.mrf.mxu0  ;;  %v13162_v9 = vadd.f32 %v17186_v44, %v17181_v21 }
 0x559   : > { %v13354_v45 = vpop.f32.mrf.mxu1  ;;  %v10860_v39 = vmul.f32 %v17387_v41, %v10729_v15  ;;  %v17431_v50 = vadd.f32 %v17406_v2, %v10862_v60  ;;  %v10597_v15 = vadd.f32 %v13156_v54, %v17189_v22  ;;  %v10605_v21 = vadd.f32 %v13162_v9, %v17203_v51  ;;  %v17448_v11 = vpop.f32.mrf.mxu0 }
 0x55a   : > { %v10750_v26 = vadd.f32 %v13354_v45, %v10589_v7  ;;  %v13174_v9 = vadd.f32 %v17239_v23, %v17230_v12 }
 0x55b   : > { %v10741_v8 = vpop.f32.mrf.mxu1  ;;  %v17416_v18 = vadd.f32 %v17406_v2, %v10860_v39  ;;  %v13159_v39 = vadd.f32 %v18032_v32, %v17174_v31  ;;  %v18034_v31 = vld [vmem:[#allocation22_spill] sm:$0xff] }
 0x55c   : > { %v10742_v48 = vadd.f32 %v10741_v8, %v10581_v33  ;;  %v10865_v4 = vmul.f32 %v17387_v41, %v10750_v26  ;;  %v18033_v33 = vld [vmem:[#allocation36_spill] sm:$0xff]  ;;  %v18035_v26 = vld [vmem:[#allocation25_spill] sm:$0xff] }
 0x55d   : > { %v13355_v61 = vpop.f32.mrf.mxu1  ;;  %v10930_v14 = vadd.f32 %v17416_v18, %v17412_v13  ;;  %v13165_v30 = vadd.f32 %v17200_v20, %v18033_v33  ;;  %v18038_v33 = vld [vmem:[#allocation21_spill] sm:$0xff] }
 0x55e   : > { %v10863_v34 = vmul.f32 %v17387_v41, %v10742_v48  ;;  %v10753_v59 = vadd.f32 %v13355_v61, %v10592_v0  ;;  %v10600_v61 = vadd.f32 %v13159_v39, %v18034_v31  ;;  %v17458_v20 = vadd.f32 %v17406_v2, %v10865_v4  ;;  %v18037_v39 = vld [vmem:[#allocation24_spill] sm:$0xff] }
 0x55f   : > { %v10744_v37 = vpop.f32.mrf.mxu1  ;;  %v10931_v43 = vadd.f32 %v10930_v14, %v17421_v17  ;;  %v10608_v48 = vadd.f32 %v13165_v30, %v17212_v40  ;;  %v13171_v30 = vadd.f32 %v18038_v33, %v18037_v39  ;;  %v18040_v31 = vld [vmem:[#allocation28_spill] sm:$0xff] }
 0x560   : > { %v10745_v49 = vadd.f32 %v10744_v37, %v10584_v56  ;;  %v17439_v29 = vadd.f32 %v17406_v2, %v10863_v34  ;;  %v10866_v7 = vmul.f32 %v17387_v41, %v10753_v59  ;;  %v13168_v34 = vadd.f32 %v17214_v25, %v18035_v26  ;;  %v17464_v37 = vpop.f32.mrf.mxu0 }
 0x561   : > { %v13358_v52 = vpop.f32.mrf.mxu1  ;;  %v10932_v24 = vadd.f32 %v10931_v43, %v17431_v50 }
 0x562   : > { %v10864_v45 = vmul.f32 %v17387_v41, %v10745_v49  ;;  %v10766_v56 = vadd.f32 %v13358_v52, %v10605_v21  ;;  %v17467_v43 = vadd.f32 %v17406_v2, %v10866_v7  ;;  %v18036_v52 = vld [vmem:[#allocation23_spill] sm:$0xff]  ;;  %v13177_v21 = vadd.f32 %v17253_v16, %v17244_v36 }
 0x563   : > { %v10757_v44 = vpop.f32.mrf.mxu1  ;;  %v10933_v22 = vadd.f32 %v10932_v24, %v17439_v29  ;;  %v10613_v4 = vadd.f32 %v13168_v34, %v18036_v52 }
 0x564   : > { %v17453_v8 = vadd.f32 %v17406_v2, %v10864_v45  ;;  %v10758_v60 = vadd.f32 %v10757_v44, %v10597_v15  ;;  %v10869_v24 = vmul.f32 %v17387_v41, %v10766_v56  ;;  %v18039_v44 = vld [vmem:[#allocation27_spill] sm:$0xff]  ;;  %v18041_v56 = vld [vmem:[#allocation26_spill] sm:$0xff] }
 0x565   : > { %v13359_v0 = vpop.f32.mrf.mxu1  ;;  %v10621_v12 = vadd.f32 %v13174_v9, %v18039_v44  ;;  %v18044_v44 = vld [vmem:[#allocation33_spill] sm:$0xff] }
 0x566   : > { %v10934_v51 = vadd.f32 %v10933_v22, %v17453_v8  ;;  %v10867_v14 = vmul.f32 %v17387_v41, %v10758_v60  ;;  %v10769_v59 = vadd.f32 %v13359_v0, %v10608_v48  ;;  %v17484_v22 = vpop.f32.mrf.mxu0  ;;  %v17494_v36 = vadd.f32 %v17406_v2, %v10869_v24 }
 0x567   : > { %v10760_v54 = vpop.f32.mrf.mxu1  ;;  %v13186_v24 = vadd.f32 %v17288_v27, %v17283_v10 }
 0x568   : > { %v10935_v40 = vadd.f32 %v10934_v51, %v17458_v20  ;;  %v10761_v49 = vadd.f32 %v10760_v54, %v10600_v61  ;;  %v17475_v25 = vadd.f32 %v17406_v2, %v10867_v14  ;;  %v10870_v60 = vmul.f32 %v17387_v41, %v10769_v59  ;;  %v18042_v54 = vld [vmem:[#allocation29_spill] sm:$0xff] }
 0x569   : > { %v13362_v15 = vpop.f32.mrf.mxu1  ;;  %v10624_v61 = vadd.f32 %v13177_v21, %v18040_v31  ;;  %v10616_v14 = vadd.f32 %v13171_v30, %v18041_v56 }
 0x56a   : > { %v10936_v45 = vadd.f32 %v10935_v40, %v17467_v43  ;;  %v10868_v32 = vmul.f32 %v17387_v41, %v10761_v49  ;;  %v10782_v26 = vadd.f32 %v13362_v15, %v10621_v12  ;;  %v13180_v40 = vadd.f32 %v18042_v54, %v17258_v35  ;;  %v17500_v49 = vpop.f32.mrf.mxu0  ;;  %v18043_v15 = vld [vmem:[#allocation39_spill] sm:$0xff]  ;;  %v18045_v12 = vld [vmem:[#allocation34_spill] sm:$0xff] }
 0x56b   : > { %v10773_v23 = vpop.f32.mrf.mxu1  ;;  %v17503_v9 = vadd.f32 %v17406_v2, %v10870_v60  ;;  %v18046_v60 = vld [vmem:[#allocation30_spill] sm:$0xff] }
 0x56c   : > { %v10937_v7 = vadd.f32 %v10936_v45, %v17475_v25  ;;  %v17489_v48 = vadd.f32 %v17406_v2, %v10868_v32  ;;  %v10774_v0 = vadd.f32 %v10773_v23, %v10613_v4  ;;  %v10629_v39 = vadd.f32 %v13180_v40, %v18043_v15 }
 0x56d   : > { %v13363_v51 = vpop.f32.mrf.mxu1  ;;  %v10873_v33 = vmul.f32 %v17387_v41, %v10782_v26  ;;  %v13183_v23 = vadd.f32 %v18045_v12, %v18044_v44  ;;  %v10637_v27 = vadd.f32 %v13186_v24, %v18046_v60  ;;  %v18050_v60 = vld [vmem:[#allocation37_spill] sm:$0xff] }
 0x56e   : > { %v10938_v16 = vadd.f32 %v10937_v7, %v17489_v48  ;;  %v10871_v34 = vmul.f32 %v17387_v41, %v10774_v0  ;;  %v10785_v4 = vadd.f32 %v13363_v51, %v10624_v61  ;;  %v13189_v7 = vadd.f32 %v17295_v58, %v17290_v42  ;;  %v17520_v0 = vpop.f32.mrf.mxu0 }
 0x56f   : > { %v10776_v59 = vpop.f32.mrf.mxu1  ;;  %v17530_v42 = vadd.f32 %v17406_v2, %v10873_v33  ;;  %v13198_v33 = vadd.f32 %v17345_v62, %v17338_v55  ;;  %v18053_v55 = vld [vmem:[#allocation43_spill] sm:$0xff] }
 0x570   : > { %v10939_v52 = vadd.f32 %v10938_v16, %v17494_v36  ;;  %v10777_v45 = vadd.f32 %v10776_v59, %v10616_v14  ;;  %v17511_v35 = vadd.f32 %v17406_v2, %v10871_v34  ;;  %v10874_v61 = vmul.f32 %v17387_v41, %v10785_v4  ;;  %v18047_v14 = vld [vmem:[#allocation31_spill] sm:$0xff]  ;;  %v18048_v34 = vld [vmem:[#allocation40_spill] sm:$0xff] }
 0x571   : > { %v13366_v32 = vpop.f32.mrf.mxu1  ;;  %v10640_v16 = vadd.f32 %v13189_v7, %v18047_v14  ;;  %v10632_v54 = vadd.f32 %v13183_v23, %v18048_v34  ;;  %v10653_v62 = vadd.f32 %v13198_v33, %v18053_v55 }
 0x572   : > { %v10940_v30 = vadd.f32 %v10939_v52, %v17503_v9  ;;  %v10872_v21 = vmul.f32 %v17387_v41, %v10777_v45  ;;  %v10798_v40 = vadd.f32 %v13366_v32, %v10637_v27  ;;  %v13192_v52 = vadd.f32 %v17317_v28, %v17312_v63  ;;  %v17536_v45 = vpop.f32.mrf.mxu0  ;;  %v18049_v32 = vld [vmem:[#allocation32_spill] sm:$0xff] }
 0x573   : > { %v10789_v10 = vpop.f32.mrf.mxu1  ;;  %v17539_v24 = vadd.f32 %v17406_v2, %v10874_v61  ;;  %v13195_v27 = vadd.f32 %v18050_v60, %v17324_v46 }
 0x574   : > { %v10941_v31 = vadd.f32 %v10940_v30, %v17511_v35  ;;  %v17525_v51 = vadd.f32 %v17406_v2, %v10872_v21  ;;  %v10790_v56 = vadd.f32 %v10789_v10, %v10629_v39  ;;  %v10645_v44 = vadd.f32 %v13192_v52, %v18049_v32  ;;  %v13220_v12 = vpop.f32.mrf.mxu0  ;;  %v18051_v10 = vld [vmem:[#allocation54_spill] sm:$0xff] }
 0x575   : > { %v13367_v26 = vpop.f32.mrf.mxu1  ;;  %v10877_v23 = vmul.f32 %v17387_v41, %v10798_v40 }
 0x576   : > { %v10942_v58 = vadd.f32 %v10941_v31, %v17525_v51  ;;  %v10875_v59 = vmul.f32 %v17387_v41, %v10790_v56  ;;  %v10801_v39 = vadd.f32 %v13367_v26, %v10640_v16  ;;  %v18052_v31 = vld [vmem:[#allocation58_spill] sm:$0xff]  ;;  %v13221_v46 = vpop.f32.mrf.mxu0 }
 0x577   : > { %v10792_v4 = vpop.f32.mrf.mxu1  ;;  %v13201_v61 = vadd.f32 %v18052_v31, %v18051_v10  ;;  %v18056_v10 = vld [vmem:[#allocation49_spill] sm:$0xff] }
 0x578   : > { %v10943_v15 = vadd.f32 %v10942_v58, %v17530_v42  ;;  %v10793_v30 = vadd.f32 %v10792_v4, %v10632_v54  ;;  %v17547_v28 = vadd.f32 %v17406_v2, %v10875_v59  ;;  %v10878_v16 = vmul.f32 %v17387_v41, %v10801_v39  ;;  %v18054_v54 = vld [vmem:[#allocation44_spill] sm:$0xff]  ;;  %v18055_v59 = vld [vmem:[#allocation42_spill] sm:$0xff] }
 0x579   : > { %v13370_v21 = vpop.f32.mrf.mxu1  ;;  %v10656_v58 = vadd.f32 %v13201_v61, %v18054_v54  ;;  %v10648_v52 = vadd.f32 %v13195_v27, %v18055_v59  ;;  %v17564_v4 = vadd.f32 %v17406_v2, %v10877_v23  ;;  %v13204_v39 = vadd.f32 %v17367_v19, %v17362_v6 }
 0x57a   : > { %v10944_v63 = vadd.f32 %v10943_v15, %v17539_v24  ;;  %v10876_v7 = vmul.f32 %v17387_v41, %v10793_v30  ;;  %v10814_v30 = vadd.f32 %v13370_v21, %v10653_v62  ;;  %v13210_v23 = vadd.f32 %v17428_v53, %v17409_v3  ;;  %v13223_v21 = vpop.f32.mrf.mxu0  ;;  %v18057_v3 = vld [vmem:[#allocation38_spill] sm:$0xff] }
 0x57b   : > { %v10805_v56 = vpop.f32.mrf.mxu1  ;;  %v10661_v31 = vadd.f32 %v13204_v39, %v18056_v10  ;;  %v13207_v62 = vadd.f32 %v17391_v57, %v17378_v47  ;;  %v13216_v39 = vadd.f32 %v17500_v49, %v17484_v22 }
 0x57c   : > { %v10945_v14 = vadd.f32 %v10944_v63, %v17547_v28  ;;  %v17559_v26 = vadd.f32 %v17406_v2, %v10876_v7  ;;  %v10806_v34 = vadd.f32 %v10805_v56, %v10645_v44  ;;  %v17571_v44 = vadd.f32 %v17406_v2, %v10878_v16  ;;  %v13224_v47 = vpop.f32.mrf.mxu0 }
 0x57d   : > { %v13371_v40 = vpop.f32.mrf.mxu1  ;;  %v10881_v61 = vmul.f32 %v17387_v41, %v10814_v30  ;;  %v13213_v56 = vadd.f32 %v17464_v37, %v17448_v11  ;;  %v10669_v53 = vadd.f32 %v13210_v23, %v18057_v3 }
 0x57e   : > { %v10946_v15 = vadd.f32 %v10945_v14, %v17559_v26  ;;  %v10879_v33 = vmul.f32 %v17387_v41, %v10806_v34  ;;  %v10817_v7 = vadd.f32 %v13371_v40, %v10656_v58  ;;  %v18058_v40 = vld [vmem:[#allocation52_spill] sm:$0xff] }
 0x57f   : > { %v10808_v32 = vpop.f32.mrf.mxu1  ;;  %v10672_v59 = vadd.f32 %v13213_v56, %v18058_v40  ;;  %v17596_v57 = vadd.f32 %v17406_v2, %v10881_v61 }
 0x580   : > { %v10947_v63 = vadd.f32 %v10946_v15, %v17564_v4  ;;  %v10809_v60 = vadd.f32 %v10808_v32, %v10648_v52  ;;  %v17579_v55 = vadd.f32 %v17406_v2, %v10879_v33  ;;  %v10882_v34 = vmul.f32 %v17387_v41, %v10817_v7  ;;  %v18059_v15 = vld [vmem:[#allocation50_spill] sm:$0xff] }
 0x581   : > { %v13374_v27 = vpop.f32.mrf.mxu1  ;;  %v10664_v30 = vadd.f32 %v13207_v62, %v18059_v15  ;;  %v13222_v32 = vadd.f32 %v13221_v46, %v13220_v12  ;;  %v13219_v12 = vadd.f32 %v17536_v45, %v17520_v0 }
 0x582   : > { %v10948_v6 = vadd.f32 %v10947_v63, %v17571_v44  ;;  %v10880_v19 = vmul.f32 %v17387_v41, %v10809_v60  ;;  %v10830_v37 = vadd.f32 %v13374_v27, %v10669_v53  ;;  %v17603_v7 = vadd.f32 %v17406_v2, %v10882_v34 }
 0x583   : > { %v10821_v14 = vpop.f32.mrf.mxu1  ;;  %v10685_v46 = vadd.f32 %v13222_v32, %v17365_v1 }
 0x584   : > { %v10949_v16 = vadd.f32 %v10948_v6, %v17579_v55  ;;  %v17591_v54 = vadd.f32 %v17406_v2, %v10880_v19  ;;  %v10822_v58 = vadd.f32 %v10821_v14, %v10661_v31  ;;  %v13225_v31 = vadd.f32 %v13224_v47, %v13223_v21  ;;  %v18060_v6 = vld [vmem:[#allocation56_spill] sm:$0xff] }
 0x585   : > { %v13375_v52 = vpop.f32.mrf.mxu1  ;;  %v10677_v19 = vadd.f32 %v13216_v39, %v18060_v6  ;;  %v10885_v27 = vmul.f32 %v17387_v41, %v10830_v37 }
 0x586   : > { %v10950_v11 = vadd.f32 %v10949_v16, %v17591_v54  ;;  %v10883_v33 = vmul.f32 %v17387_v41, %v10822_v58  ;;  %v10833_v23 = vadd.f32 %v13375_v52, %v10672_v59  ;;  %v10688_v16 = vadd.f32 %v13225_v31, %v17372_v5 }
 0x587   : > { %v10824_v63 = vpop.f32.mrf.mxu1  ;;  %v10680_v58 = vadd.f32 %v13219_v12, %v17360_v38  ;;  %v17624_v40 = vadd.f32 %v17406_v2, %v10885_v27  ;;  %v11057_v12 = vld [vmem:[#allocation9] sm:$0xff] }
 0x588   : > { %v10951_v60 = vadd.f32 %v10950_v11, %v17596_v57  ;;  %v10825_v10 = vadd.f32 %v10824_v63, %v10664_v30  ;;  %v17609_v62 = vadd.f32 %v17406_v2, %v10883_v33  ;;  %v10886_v3 = vmul.f32 %v17387_v41, %v10833_v23  ;;  %13446 = vmatpush3.msra.mxu1 %v11057_v12 }
 0x589   : > { %v13378_v61 = vpop.f32.mrf.mxu1 }
 0x58a   : > { %v10952_v22 = vadd.f32 %v10951_v60, %v17603_v7  ;;  %v10884_v49 = vmul.f32 %v17387_v41, %v10825_v10  ;;  %v10846_v1 = vadd.f32 %v13378_v61, %v10685_v46  ;;  %v17629_v52 = vadd.f32 %v17406_v2, %v10886_v3  ;;  %v10985_v46 = vld [vmem:[%s17865_s9] sm:$0x1] }
 0x58b   : > { %v10837_v56 = vpop.f32.mrf.mxu1 }
 0x58c   : > { %v10953_v21 = vadd.f32 %v10952_v22, %v17609_v62  ;;  %v17619_v53 = vadd.f32 %v17406_v2, %v10884_v49  ;;  %v10838_v14 = vadd.f32 %v10837_v56, %v10677_v19  ;;  %v10889_v5 = vmul.f32 %v17387_v41, %v10846_v1 }
 0x58d   : > { %v13379_v34 = vpop.f32.mrf.mxu1 }
 0x58e   : > { %v10954_v0 = vadd.f32 %v10953_v21, %v17619_v53  ;;  %v10887_v45 = vmul.f32 %v17387_v41, %v10838_v14  ;;  %v10849_v30 = vadd.f32 %v13379_v34, %v10688_v16  ;;  %v17644_v63 = vadd.f32 %v17406_v2, %v10889_v5  ;;  %v11073_v14 = vld [vmem:[%s17867_s11] sm:$0x1] }
 0x58f   : > { %v10840_v59 = vpop.f32.mrf.mxu1 }
 0x590   : > { %v10955_v15 = vadd.f32 %v10954_v0, %v17624_v40  ;;  %v10841_v47 = vadd.f32 %v10840_v59, %v10680_v58  ;;  %v17634_v38 = vadd.f32 %v17406_v2, %v10887_v45  ;;  %v10890_v39 = vmul.f32 %v17387_v41, %v10849_v30 }
 0x591   : > { %v11182_v59 = vlaneseq }
 0x592   : > { %v10956_v11 = vadd.f32 %v10955_v15, %v17629_v52  ;;  %v10888_v37 = vmul.f32 %v17387_v41, %v10841_v47  ;;  %v17648_v23 = vadd.f32 %v17406_v2, %v10890_v39 }
 0x593   : > { %v11183_v15 = vshrl.u32 %v11182_v59, 7 }
 0x594   : > { %v10957_v33 = vadd.f32 %v10956_v11, %v17634_v38  ;;  %v17641_v32 = vadd.f32 %v17406_v2, %v10888_v37 }
 0x595   : > { %v11184_v30 = vsub.s32 0, %v11183_v15  ;;  %v11172_v15 = vld [vmem:[%s14443_s10 + $0xb0] sm:$0xff] }
 0x596   : > { %v10958_v60 = vadd.f32 %v10957_v33, %v17641_v32 }
 0x598   : > { %v10959_v10 = vadd.f32 %v10958_v60, %v17644_v63 }
 0x59a   : > { %v10960_v31 = vadd.f32 %v10959_v10, %v17648_v23 }
 0x59c   : > { %v10961_v61 = vrot.slane %v10960_v31, 4 }
 0x59e   : > { %v10962_v6 = vadd.f32 %v10961_v61, %v10960_v31 }
 0x5a0   : > { %v10963_v19 = vrot.slane %v10962_v6, 2 }
 0x5a2   : > { %v10964_v27 = vadd.f32 %v10963_v19, %v10962_v6  ;;  %v11152_v6 = vld [vmem:[%s14443_s10 + $0x10] sm:$0xff]  ;;  %v11151_v19 = vld [vmem:[%s14443_s10 + $0x8] sm:$0xff] }
 0x5a4   : > { %v10965_v41 = vrot.slane %v10964_v27, 1 }
 0x5a6   : > { %v10966_v22 = vadd.f32 %v10965_v41, %v10964_v27  ;;  %v11155_v41 = vld [vmem:[%s14443_s10 + $0x28] sm:$0xff] }
 0x5a8   : > { %v10968_v49 = vmul.f32 0.00390625, %v10966_v22 }
 0x5aa   : > { %13413 = vmatmul.mubr.f32.vlgmr.msra.gmra.mxu0 %v10968_v49 }
 0x66a   : > { %v11052_v2 = vpop.f32.mrf.mxu0 }
 0x66b   : > { %v11053_v56 = vadd.f32 %v11052_v2, %v10985_v46 }
 0x66c   : > { %v13414_v21 = vpop.f32.mrf.mxu0 }
 0x66d   : > { %v11056_v3 = vmax.f32 %v11053_v56, 0.0  ;;  %v11162_v21 = vld [vmem:[%s14443_s10 + $0x60] sm:$0xff] }
 0x66f   : > { %13448 = vmatmul.mubr.f32.vlgmr.msra.gmra.mxu1 %v11056_v3 }
 0x72f   : > { %v11140_v16 = vpop.f32.mrf.mxu1 }
 0x730   : > { %v11141_v34 = vadd.f32 %v11140_v16, %v11073_v14  ;;  %v11168_v16 = vld [vmem:[%s14443_s10 + $0x90] sm:$0xff] }
 0x731   : > { %v13449_v58 = vpop.f32.mrf.mxu1 }
 0x732   : > { %v12266_v0 = vmul.f32 -1.442695, %v11141_v34 }
 0x734   : > { %14069 = vpow2.f32 %v12266_v0  ;;  %v11167_v0 = vld [vmem:[%s14443_s10 + $0x88] sm:$0xff] }
 0x741   : > { %v14070_v1 = vpop.eup %14069 }
 0x742   : > { %v11147_v45 = vadd.f32 1.0, %v14070_v1 }
 0x744   : > { %14071 = vrcp.f32 %v11147_v45 }
 0x751   : > { %v14072_v47 = vpop.eup %14071 }
 0x752   : > { %v11185_v5 = vrot.slane %v14072_v47, %v11184_v30 }
 0x754   : > { %v11186_v11 = vmul.f32 %v11185_v5, %v17412_v13  ;;  %v11187_v37 = vmul.f32 %v11185_v5, %v17416_v18  ;;  %v11188_v33 = vmul.f32 %v11185_v5, %v17421_v17  ;;  %v11189_v39 = vmul.f32 %v11185_v5, %v17431_v50 }
 0x755   : > { %v11190_v60 = vmul.f32 %v11185_v5, %v17439_v29  ;;  %v11191_v10 = vmul.f32 %v11185_v5, %v17453_v8  ;;  %v11192_v31 = vmul.f32 %v11185_v5, %v17458_v20  ;;  %v11193_v61 = vmul.f32 %v11185_v5, %v17467_v43  ;;  %v11150_v29 = vld [vmem:[%s14443_s10] sm:$0xff]  ;;  %v11153_v8 = vld [vmem:[%s14443_s10 + $0x18] sm:$0xff] }
 0x756   : > { %v11194_v13 = vmul.f32 %v11185_v5, %v17475_v25  ;;  %v11195_v18 = vmul.f32 %v11185_v5, %v17489_v48  ;;  %v11196_v17 = vmul.f32 %v11185_v5, %v17494_v36  ;;  %v11197_v50 = vmul.f32 %v11185_v5, %v17503_v9  ;;  %v11156_v48 = vld [vmem:[%s14443_s10 + $0x30] sm:$0xff]  ;;  %v11154_v36 = vld [vmem:[%s14443_s10 + $0x20] sm:$0xff]  ;;  %v11157_v9 = vld [vmem:[%s14443_s10 + $0x38] sm:$0xff] }
 0x757   : > { %v11198_v20 = vmul.f32 %v11185_v5, %v17511_v35  ;;  %v11199_v43 = vmul.f32 %v11185_v5, %v17525_v51  ;;  %v11200_v27 = vmul.f32 %v11185_v5, %v17530_v42  ;;  %v11201_v25 = vmul.f32 %v11185_v5, %v17539_v24  ;;  %v11160_v51 = vld [vmem:[%s14443_s10 + $0x50] sm:$0xff]  ;;  %v11158_v42 = vld [vmem:[%s14443_s10 + $0x40] sm:$0xff]  ;;  %v11161_v24 = vld [vmem:[%s14443_s10 + $0x58] sm:$0xff] }
 0x758   : > { %v11202_v22 = vmul.f32 %v11185_v5, %v17547_v28  ;;  %v11203_v49 = vmul.f32 %v11185_v5, %v17559_v26  ;;  %v11204_v12 = vmul.f32 %v11185_v5, %v17564_v4  ;;  %v11205_v35 = vmul.f32 %v11185_v5, %v17571_v44  ;;  %v11159_v26 = vld [vmem:[%s14443_s10 + $0x48] sm:$0xff]  ;;  %v11164_v4 = vld [vmem:[%s14443_s10 + $0x70] sm:$0xff] }
 0x759   : > { %v11206_v46 = vmul.f32 %v11185_v5, %v17579_v55  ;;  %v11207_v2 = vmul.f32 %v11185_v5, %v17591_v54  ;;  %v11208_v56 = vmul.f32 %v11185_v5, %v17596_v57  ;;  %v11209_v28 = vmul.f32 %v11185_v5, %v17603_v7  ;;  %v11165_v54 = vld [vmem:[%s14443_s10 + $0x78] sm:$0xff]  ;;  %v11163_v57 = vld [vmem:[%s14443_s10 + $0x68] sm:$0xff] }
 0x75a   : > { %v11210_v44 = vmul.f32 %v11185_v5, %v17609_v62  ;;  %v11211_v3 = vmul.f32 %v11185_v5, %v17619_v53  ;;  %v11212_v14 = vmul.f32 %v11185_v5, %v17624_v40  ;;  %v11213_v55 = vmul.f32 %v11185_v5, %v17629_v52  ;;  %v11166_v53 = vld [vmem:[%s14443_s10 + $0x80] sm:$0xff]  ;;  %v11169_v40 = vld [vmem:[%s14443_s10 + $0x98] sm:$0xff] }
 0x75b   : > { %v11214_v7 = vmul.f32 %v11185_v5, %v17634_v38  ;;  %v11215_v34 = vmul.f32 %v11185_v5, %v17641_v32  ;;  %v11216_v58 = vmul.f32 %v11185_v5, %v17644_v63  ;;  %v11217_v62 = vmul.f32 %v11185_v5, %v17648_v23  ;;  %v11170_v38 = vld [vmem:[%s14443_s10 + $0xa0] sm:$0xff]  ;;  %v11173_v32 = vld [vmem:[%s14443_s10 + $0xb8] sm:$0xff]  ;;  %v11171_v5 = vld [vmem:[%s14443_s10 + $0xa8] sm:$0xff] }
 0x75c   : > { %v11218_v52 = vadd.f32 %v11186_v11, %v11150_v29  ;;  %v11219_v1 = vadd.f32 %v11187_v37, %v11151_v19  ;;  %v11220_v45 = vadd.f32 %v11188_v33, %v11152_v6  ;;  %v11221_v59 = vadd.f32 %v11189_v39, %v11153_v8  ;;  %v11176_v11 = vld [vmem:[%s14443_s10 + $0xd0] sm:$0xff]  ;;  %v11174_v29 = vld [vmem:[%s14443_s10 + $0xc0] sm:$0xff]  ;;  %v11177_v39 = vld [vmem:[%s14443_s10 + $0xd8] sm:$0xff] }
 0x75d   : > { %v11222_v30 = vadd.f32 %v11190_v60, %v11154_v36  ;;  %v11223_v63 = vadd.f32 %v11191_v10, %v11155_v41  ;;  %v11224_v47 = vadd.f32 %v11192_v31, %v11156_v48  ;;  %v11225_v23 = vadd.f32 %v11193_v61, %v11157_v9  ;;  %v11175_v8 = vld [vmem:[%s14443_s10 + $0xc8] sm:$0xff]  ;;  %v11180_v36 = vld [vmem:[%s14443_s10 + $0xf0] sm:$0xff]  ;;  %v11178_v48 = vld [vmem:[%s14443_s10 + $0xe0] sm:$0xff] }
 0x75e   : > { %v11226_v19 = vadd.f32 %v11194_v13, %v11158_v42  ;;  %v11227_v37 = vadd.f32 %v11195_v18, %v11159_v26  ;;  %v11228_v33 = vadd.f32 %v11196_v17, %v11160_v51  ;;  %v11229_v6 = vadd.f32 %v11197_v50, %v11161_v24  ;;  %v11181_v9 = vld [vmem:[%s14443_s10 + $0xf8] sm:$0xff]  ;;  %v11179_v61 = vld [vmem:[%s14443_s10 + $0xe8] sm:$0xff]  ;;  %s17756_s10 = scalar_lea.vmem [#allocation10], %s11441_s24  ;;  %s12305_s24 = sshll.u32 %s14325_s25, 12 }
 0x75f   : > { %v11230_v60 = vadd.f32 %v11198_v20, %v11162_v21  ;;  %v11231_v10 = vadd.f32 %v11199_v43, %v11163_v57  ;;  %v11232_v41 = vadd.f32 %v11200_v27, %v11164_v4  ;;  %v11233_v31 = vadd.f32 %v11201_v25, %v11165_v54  ;;  %s11328_s26 = sshll.u32 %s17756_s10, 4  ;;  %s17795_s30 = scalar_lea.hbm %s17868_s12, %s12305_s24  ;;  %s17797_s26 = int_to_ptr.vmem [resolvable:$true] %s11328_s26 }
 0x760   : > { %v17722_v13 = vadd.f32 %v11202_v22, %v11166_v53  ;;  %v17724_v42 = vadd.f32 %v11203_v49, %v11167_v0  ;;  %v17726_v18 = vadd.f32 %v11204_v12, %v11168_v16  ;;  %v17728_v26 = vadd.f32 %v11205_v35, %v11169_v40  ;;  %s14156_s27 = scalar_lea.vmem %s17797_s26, 4096  ;;  %p14163_p12 = scmp.lt.s32.totalorder %s17797_s26, %s14161_s5 }
 0x761   : > { %v17730_v17 = vadd.f32 %v11206_v46, %v11170_v38  ;;  %v17732_v50 = vadd.f32 %v11207_v2, %v11171_v5  ;;  %v17734_v51 = vadd.f32 %v11208_v56, %v11172_v15  ;;  %v17736_v20 = vadd.f32 %v11209_v28, %v11173_v32  ;;  %p14157_p10 = scmp.ne.s32.totalorder %s17797_s26, %s14156_s27  ;;  %p14164_p3 = scmp.lt.s32.totalorder %s14162_s23, %s14156_s27 }
 0x762   : > { %v17738_v43 = vadd.f32 %v11210_v44, %v11174_v29  ;;  %v17740_v27 = vadd.f32 %v11211_v3, %v11175_v8  ;;  %v17742_v25 = vadd.f32 %v11212_v14, %v11176_v11  ;;  %v17744_v22 = vadd.f32 %v11213_v55, %v11177_v39 }
 0x763   : > { %v17746_v49 = vadd.f32 %v11214_v7, %v11178_v48  ;;  %v17748_v12 = vadd.f32 %v11215_v34, %v11179_v61  ;;  %v17750_v35 = vadd.f32 %v11216_v58, %v11180_v36  ;;  %v17752_v24 = vadd.f32 %v11217_v62, %v11181_v9  ;;  %p14158_p2 = pnand %p14157_p10, %p18061_p1  ;;  %p14165_p9 = por %p14164_p3, %p14163_p12 }
 0x764   : > { %v11250_v46 = vmax.f32 %v11218_v52, 0.0  ;;  %v11251_v2 = vmax.f32 %v11219_v1, 0.0  ;;  %v11252_v56 = vmax.f32 %v11220_v45, 0.0  ;;  %v11253_v28 = vmax.f32 %v11221_v59, 0.0 }
 0x765   : > { %v11254_v4 = vmax.f32 %v11222_v30, 0.0  ;;  %v11255_v21 = vmax.f32 %v11223_v63, 0.0  ;;  %v11256_v44 = vmax.f32 %v11224_v47, 0.0  ;;  %v11257_v3 = vmax.f32 %v11225_v23, 0.0  ;;  %p14159_p6 = pneg %p14158_p2 }
 0x766   : > { %v11258_v14 = vmax.f32 %v11226_v19, 0.0  ;;  %v11259_v55 = vmax.f32 %v11227_v37, 0.0  ;;  %v11260_v54 = vmax.f32 %v11228_v33, 0.0  ;;  %v11261_v57 = vmax.f32 %v11229_v6, 0.0  ;;  %11282 = vst [vmem:[%s17756_s10] sm:$0xff] %v11250_v46  ;;  %11283 = vst [vmem:[%s17756_s10 + $0x8] sm:$0xff] %v11251_v2 }
 0x767   : > { %11284 = vst [vmem:[%s17756_s10 + $0x10] sm:$0xff] %v11252_v56  ;;  %11285 = vst [vmem:[%s17756_s10 + $0x18] sm:$0xff] %v11253_v28  ;;  %v11262_v16 = vmax.f32 %v11230_v60, 0.0  ;;  %v11263_v7 = vmax.f32 %v11231_v10, 0.0  ;;  %v11264_v34 = vmax.f32 %v11232_v41, 0.0  ;;  %v11265_v58 = vmax.f32 %v11233_v31, 0.0  ;;  %p14166_p13 = pnand %p14165_p9, %p14159_p6 }
 0x768   : > { %11286 = vst [vmem:[%s17756_s10 + $0x20] sm:$0xff] %v11254_v4  ;;  %11287 = vst [vmem:[%s17756_s10 + $0x28] sm:$0xff] %v11255_v21  ;;  %v11266_v62 = vmax.f32 %v17722_v13, 0.0  ;;  %v11267_v53 = vmax.f32 %v17724_v42, 0.0  ;;  %v11268_v40 = vmax.f32 %v17726_v18, 0.0  ;;  %v11269_v0 = vmax.f32 %v17728_v26, 0.0 }
 0x769   : > { %11288 = vst [vmem:[%s17756_s10 + $0x30] sm:$0xff] %v11256_v44  ;;  %11289 = vst [vmem:[%s17756_s10 + $0x38] sm:$0xff] %v11257_v3  ;;  %v11270_v52 = vmax.f32 %v17730_v17, 0.0  ;;  %v11271_v1 = vmax.f32 %v17732_v50, 0.0  ;;  %v11272_v45 = vmax.f32 %v17734_v51, 0.0  ;;  %v11273_v59 = vmax.f32 %v17736_v20, 0.0 }
 0x76a   : > { %11290 = vst [vmem:[%s17756_s10 + $0x40] sm:$0xff] %v11258_v14  ;;  %11291 = vst [vmem:[%s17756_s10 + $0x48] sm:$0xff] %v11259_v55  ;;  %v11274_v15 = vmax.f32 %v17738_v43, 0.0  ;;  %v11275_v38 = vmax.f32 %v17740_v27, 0.0  ;;  %v11276_v32 = vmax.f32 %v17742_v25, 0.0  ;;  %v11277_v30 = vmax.f32 %v17744_v22, 0.0 }
 0x76b   : > { %11292 = vst [vmem:[%s17756_s10 + $0x50] sm:$0xff] %v11260_v54  ;;  %11293 = vst [vmem:[%s17756_s10 + $0x58] sm:$0xff] %v11261_v57  ;;  %v11278_v63 = vmax.f32 %v17746_v49, 0.0  ;;  %v11279_v47 = vmax.f32 %v17748_v12, 0.0  ;;  %v11280_v23 = vmax.f32 %v17750_v35, 0.0  ;;  %v11281_v5 = vmax.f32 %v17752_v24, 0.0 }
 0x76c   : > { %11294 = vst [vmem:[%s17756_s10 + $0x60] sm:$0xff] %v11262_v16  ;;  %11295 = vst [vmem:[%s17756_s10 + $0x68] sm:$0xff] %v11263_v7 }
 0x76d   : > { %11296 = vst [vmem:[%s17756_s10 + $0x70] sm:$0xff] %v11264_v34  ;;  %11297 = vst [vmem:[%s17756_s10 + $0x78] sm:$0xff] %v11265_v58 }
 0x76e   : > { %11298 = vst [vmem:[%s17756_s10 + $0x80] sm:$0xff] %v11266_v62  ;;  %11299 = vst [vmem:[%s17756_s10 + $0x88] sm:$0xff] %v11267_v53 }
 0x76f   : > { %11300 = vst [vmem:[%s17756_s10 + $0x90] sm:$0xff] %v11268_v40  ;;  %11301 = vst [vmem:[%s17756_s10 + $0x98] sm:$0xff] %v11269_v0 }
 0x770   : > { %11302 = vst [vmem:[%s17756_s10 + $0xa0] sm:$0xff] %v11270_v52  ;;  %11303 = vst [vmem:[%s17756_s10 + $0xa8] sm:$0xff] %v11271_v1 }
 0x771   : > { %11304 = vst [vmem:[%s17756_s10 + $0xb0] sm:$0xff] %v11272_v45  ;;  %11305 = vst [vmem:[%s17756_s10 + $0xb8] sm:$0xff] %v11273_v59 }
 0x772   : > { %11306 = vst [vmem:[%s17756_s10 + $0xc0] sm:$0xff] %v11274_v15  ;;  %11307 = vst [vmem:[%s17756_s10 + $0xc8] sm:$0xff] %v11275_v38 }
 0x773   : > { %11308 = vst [vmem:[%s17756_s10 + $0xd0] sm:$0xff] %v11276_v32  ;;  %11309 = vst [vmem:[%s17756_s10 + $0xd8] sm:$0xff] %v11277_v30 }
 0x774   : > { %11310 = vst [vmem:[%s17756_s10 + $0xe0] sm:$0xff] %v11278_v63  ;;  %11311 = vst [vmem:[%s17756_s10 + $0xe8] sm:$0xff] %v11279_v47 }
 0x775   : > { %11312 = vst [vmem:[%s17756_s10 + $0xf0] sm:$0xff] %v11280_v23  ;;  %11313 = vst [vmem:[%s17756_s10 + $0xf8] sm:$0xff] %v11281_v5 }
 0x776   : > { %14169 = shalt.err (!%p14166_p13)
}
 0x777   : > { %s14170_s16 = scalar_lea.hbm %s17795_s30, 4096  ;;  %s14174_s29 = scalar_lea.hbm %s17868_s12, 8192 }
 0x778   : > { %p14171_p5 = scmp.ne.s32.totalorder %s17795_s30, %s14170_s16  ;;  %p14175_p8 = scmp.lt.s32.totalorder %s17795_s30, %s17868_s12 }
 0x779   : > { %p14176_p7 = scmp.lt.s32.totalorder %s14174_s29, %s14170_s16 }
 0x77a   : > { %p14172_p0 = pnand %p14171_p5, %p18061_p1 }
 0x77b   : > { %p14177_p11 = por %p14176_p7, %p14175_p8 }
 0x77c   : > { %p14173_p4 = pneg %p14172_p0 }
 0x77e   : > { %p14178_p10 = pnand %p14177_p11, %p14173_p4 }
 0x780   : > { %14181 = shalt.err (!%p14178_p10)
}
 0x781   : > { %s14237_s25 = smov 128   ;;  %s14238_s13 = smov 8  }
 0x782   : > { %13461 = dma.vmem_to_hbm [thread:$0]  (%p18061_p1), %s17797_s26, 4096, %s17795_s30, %s11315_s15, %s14237_s25, %s14237_s25, %s14238_s13  }
 0x783 PF: > { %s18062_s27 = sld [smem:[#allocation15_spill]]  ;;  %s11343_s20 = sand.u32 1, %s14212_s21  }
 0x784   : > { %p18063_p2 = scmp.ne.s32.totalorder %s17890_s28, 0  ;;  %s11344_s5 = scalar_lea.sflag [#allocation6], %s11343_s20 }
 0x789   : > { %p18064_p6 = scmp.ge.s32.totalorder %s18062_s27, 2 }
 0x78b   : > { %p13475_p12 = pnand %p18064_p6, %p18063_p2 }
 0x78d   : > { %p13476_p3 = pneg %p13475_p12 }
 0x78f   : > { %14207 = dma.done.wait (%p13476_p3), %s11344_s5, 4096  }
 0x790   : > { %14209 = vsyncadd (%p13476_p3), %s11344_s5, 4294963200  ;;  %s18065_s24 = sld [smem:[#allocation16_spill]]  ;;  %s18068_s21 = smov %s14216_s22 }
 0x791   : > { %s18066_s23 = sld [smem:[#allocation14_spill]] }
 0x792   : > { %s18067_s16 = sld [smem:[#allocation17_spill]] }
 0x796   : > { %p26_p9 = scmp.ge.s32.totalorder %s18065_s24, 4  }
 0x797   : > { %s18069_s22 = smov %s18066_s23 }
 0x798   : > { %s18070_s23 = smov %s18067_s16  ;;  %28 = sbr.rel (!%p26_p9) target bundleno = 9 (0x9), region = 129 }
 0x79d   :  { %11349 = vsyncpa [#allocation5], 1 }
 0x79e   :  { %11351 = vsyncpa [#allocation5 + $0x1], 1 }
 0x79f   :  { %11352 = vsyncpa [#allocation8], 1 }
 0x7a0   :  { %11353 = vsyncpa [#allocation6], 1 }
 0x7a1   :  { %11355 = vsyncpa [#allocation6 + $0x1], 1 }

</bundles_post_ra>
